<compile_context>
chip_gen: v7x
topology: tpu7x:2x2x1
jax: 0.10.0
libtpu: 0.0.40
codegen_flags: <defaults>
</compile_context>

<pallas_src>
import numpy as np
import jax
import jax.numpy as jnp
from jax.experimental import pallas as pl
from jax.experimental.pallas import tpu as pltpu


# ----------------------------- Pallas kernel -------------------------------

def _make_fc_g_kernel(has_scale):
    """Build the fused FC_G kernel.

    Ref order: x, then per layer (w, [scale], b), then out.
    Layers 1..n-1: Linear -> LeakyReLU(0.2); layer n: Linear -> tanh.
    Matmuls consume bf16 on the MXU; accumulation, dequant scale, bias,
    LeakyReLU and tanh stay in f32.
    """
    n_layers = len(has_scale)

    def kernel(*refs):
        x_ref, o_ref = refs[0], refs[-1]
        prefs = refs[1:-1]

        def leaky_relu(v, slope=0.2):
            return jnp.where(v > 0, v, slope * v)

        h = x_ref[...]                                   # bf16 activations
        idx = 0
        for li in range(n_layers):
            w_ref = prefs[idx]; idx += 1
            s_ref = None
            if has_scale[li]:
                s_ref = prefs[idx]; idx += 1
            b_ref = prefs[idx]; idx += 1

            w = w_ref[...]
            if w_ref.dtype != jnp.bfloat16:
                # int8 weights: integers in [-127,127] are exact in bf16, so a
                # plain cast keeps the dot on the bf16 MXU path everywhere.
                w = w.astype(jnp.bfloat16)
            acc = jnp.dot(h, w, preferred_element_type=jnp.float32)
            if s_ref is not None:
                acc = acc * s_ref[...]                   # per-out-channel dequant
            acc = acc + b_ref[...]                       # f32 bias (broadcast)
            if li + 1 < n_layers:
                h = leaky_relu(acc).astype(jnp.bfloat16)
            else:
                o_ref[...] = jnp.tanh(acc).astype(o_ref.dtype)

    return kernel


# ------------------------------ JAX wrapper ---------------------------------

def _round_up(x, m):
    return (x + m - 1) // m * m


def fc_g_forward(x, params, output_dim, *, max_tile_m=1024,
                 megacore_min_batch=512, out_dtype=jnp.bfloat16):
    """Fused FC_G forward.  Returns (B, *output_dim) in `out_dtype` (bf16 by
    default: tanh output lies in [-1,1], so bf16 is ample and halves the output
    HBM writeback)."""
    B, input_dim = x.shape
    out_features = int(np.prod(output_dim))
    assert max_tile_m % 16 == 0

    # --- batch tiling policy -------------------------------------------------
    # Minimal padding; force >= 2 tiles only when compute-bound so both v7x
    # TensorCores get work (weights use a constant index_map, so extra grid
    # steps never re-fetch them).
    n_tiles = int(pl.cdiv(B, max_tile_m))
    if B >= megacore_min_batch:
        n_tiles = max(n_tiles, 2)
    tm = _round_up(int(pl.cdiv(B, n_tiles)), 16)
    b_pad = n_tiles * tm

    x_bf16 = x.astype(jnp.bfloat16)
    if b_pad != B:
        x_bf16 = jnp.pad(x_bf16, ((0, b_pad - B), (0, 0)))

    row_map = lambda i: (i, 0)     # tiled on batch rows
    const_map = lambda i: (0, 0)   # weights/biases/scales: VMEM-resident

    # --- cost hint so XLA can overlap the weight DMA with neighbors ----------
    dims = [input_dim] + [int(w.shape[1]) for (w, _, _) in params]
    flops = 2 * b_pad * sum(dims[i] * dims[i + 1] for i in range(len(dims) - 1))
    param_bytes = 0
    for (w, s, b) in params:
        param_bytes += int(w.size) * w.dtype.itemsize + int(b.size) * b.dtype.itemsize
        if s is not None:
            param_bytes += int(s.size) * s.dtype.itemsize
    bytes_accessed = (param_bytes + int(x_bf16.size) * 2
                      + b_pad * out_features * jnp.dtype(out_dtype).itemsize)
    cost = pl.CostEstimate(flops=flops,
                           transcendentals=b_pad * out_features,
                           bytes_accessed=bytes_accessed)

    # --- VMEM limit: ~3/4 of physical (~48 MiB v7x, 64 MiB v5e/v6e) ----------
    try:
        phys_vmem = int(pltpu.get_tpu_info().vmem_capacity_bytes)
    except Exception:
        phys_vmem = 128 * 1024 * 1024
    vmem_limit = int(min(64 * 1024 * 1024, (phys_vmem * 3) // 4))

    kernel = _make_fc_g_kernel(tuple(s is not None for (_, s, _) in params))
    out_shape = jax.ShapeDtypeStruct((b_pad, out_features), out_dtype)
    out_spec = pl.BlockSpec((tm, out_features), row_map)

    def run(single_buffer_weights):
        def resident_spec(arr):
            if single_buffer_weights:
                # Constant index_map => fetched once; Buffered(1) drops the
                # useless second buffer (saves VMEM on v7x's 64 MiB).
                return pl.BlockSpec(arr.shape, const_map,
                                    pipeline_mode=pl.Buffered(1))
            return pl.BlockSpec(arr.shape, const_map)

        flat_args = [x_bf16]
        in_specs = [pl.BlockSpec((tm, input_dim), row_map)]
        for (w, s, b) in params:
            flat_args.append(w)
            in_specs.append(resident_spec(w))
            if s is not None:
                flat_args.append(s)
                in_specs.append(resident_spec(s))
            flat_args.append(b)
            in_specs.append(resident_spec(b))

        return pl.pallas_call(
            kernel,
            out_shape=out_shape,
            grid=(n_tiles,),
            in_specs=in_specs,
            out_specs=out_spec,
            compiler_params=pltpu.CompilerParams(
                dimension_semantics=("parallel",),   # megacore sharding on v7x
                vmem_limit_bytes=vmem_limit),
            cost_estimate=cost,
        )(*flat_args)

    try:
        out_flat = run(True)
    except Exception:
        # Older JAX without BlockSpec(pipeline_mode=...): same result, just
        # default double-buffered resident specs.
        out_flat = run(False)

    out_flat = out_flat[:B]
    # Glue: reshape to NCHW, same as torch's x.view(B, *output_dim).
    return out_flat.reshape((B,) + tuple(int(d) for d in output_dim))


# ------------------------------ parameters ----------------------------------

def init_fc_g_params(key, input_dim, output_dim, int8_layers=(2, 3)):
    """PyTorch-Linear-style init: U(-1/sqrt(fan_in), 1/sqrt(fan_in)).

    Returns (kernel_params, f32_params):
      kernel_params[i] = (W, scale_or_None, b), W transposed to
        (in_features, out_features); layers in `int8_layers` (the two large
        weights, ~90% of weight bytes) are int8 with per-output-channel f32
        scales, the rest bf16.  Biases f32.
      f32_params[i] = (W_f32, b_f32) full-precision masters (fidelity ref).
    """
    dims = [input_dim, 256, 512, 1024, int(np.prod(output_dim))]
    kernel_params, f32_params = [], []
    for i in range(4):
        fan_in, fan_out = dims[i], dims[i + 1]
        key, kw, kb = jax.random.split(key, 3)
        bound = 1.0 / np.sqrt(fan_in)
        w = jax.random.uniform(kw, (fan_in, fan_out), jnp.float32, -bound, bound)
        b = jax.random.uniform(kb, (1, fan_out), jnp.float32, -bound, bound)
        f32_params.append((w, b))
        if i in int8_layers:
            scale = jnp.max(jnp.abs(w), axis=0, keepdims=True) / 127.0  # (1, out)
            w_q = jnp.clip(jnp.round(w / scale), -127, 127).astype(jnp.int8)
            kernel_params.append((w_q, scale, b))
        else:
            kernel_params.append((w.astype(jnp.bfloat16), None, b))
    return kernel_params, f32_params


# ------------------------------ references ----------------------------------

def fc_g_reference(x, params, output_dim):
    """Pure-JAX reference with the kernel's recipe (bf16 activations,
    int8->bf16 weights + folded scales, f32 accumulation/epilogue)."""
    h = x.astype(jnp.bfloat16)
    n = len(params)
    for i, (w, s, b) in enumerate(params):
        acc = jnp.dot(h, w.astype(jnp.bfloat16), preferred_element_type=jnp.float32)
        if s is not None:
            acc = acc * s
        acc = acc + b
        if i + 1 < n:
            h = jnp.where(acc > 0, acc, 0.2 * acc).astype(jnp.bfloat16)
        else:
            h = jnp.tanh(acc)
    return h.reshape((x.shape[0],) + tuple(int(d) for d in output_dim))


def fc_g_reference_f32(x, f32_params, output_dim):
    """Full-f32 reference == original PyTorch FC_G semantics."""
    h = x.astype(jnp.float32)
    n = len(f32_params)
    for i, (w, b) in enumerate(f32_params):
        h = jnp.dot(h, w) + b
        if i + 1 < n:
            h = jnp.where(h > 0, h, 0.2 * h)
        else:
            h = jnp.tanh(h)
    return h.reshape((x.shape[0],) + tuple(int(d) for d in output_dim))


# --------------------------------- main --------------------------------------

if __name__ == "__main__":
    # Small shapes consistent with the module: noise dim 32, output (3,16,16).
    batch = 2
    input_dim = 32
    output_dim = np.array([3, 16, 16])

    key = jax.random.PRNGKey(0)
    key, kx = jax.random.split(key)
    x = jax.random.normal(kx, (batch, input_dim), jnp.float32)

    params, f32_params = init_fc_g_params(key, input_dim, output_dim)

    out = fc_g_forward(x, params, output_dim)
    out = jax.block_until_ready(out)
    assert out.shape == (batch, 3, 16, 16), out.shape
    out_f32 = out.astype(jnp.float32)

    # 1) Kernel vs same-recipe JAX reference (tight).
    ref_q = fc_g_reference(x, params, output_dim).astype(jnp.float32)
    assert jnp.allclose(out_f32, ref_q, atol=2e-2, rtol=2e-2), \
        "mismatch vs same-recipe JAX reference"

    # 2) Kernel vs full-f32 reference (original module semantics): verifies the
    #    int8/bf16 compression stays within tolerance of PyTorch FC_G.
    ref_f = fc_g_reference_f32(x, f32_params, output_dim)
    assert jnp.allclose(out_f32, ref_f, atol=5e-2, rtol=5e-2), \
        "mismatch vs f32 reference (quantization fidelity)"

    print("KERNEL_OK")
</pallas_src>

<mosaic_0001>
module attributes {stable_mosaic.version = 11 : i64} {
  func.func @kernel(%arg0: i32, %arg1: memref<16x32xbf16, #tpu.memory_space<vmem>>, %arg2: memref<32x256xbf16, #tpu.memory_space<vmem>>, %arg3: memref<1x256xf32, #tpu.memory_space<vmem>>, %arg4: memref<256x512xbf16, #tpu.memory_space<vmem>>, %arg5: memref<1x512xf32, #tpu.memory_space<vmem>>, %arg6: memref<512x1024xi8, #tpu.memory_space<vmem>>, %arg7: memref<1x1024xf32, #tpu.memory_space<vmem>>, %arg8: memref<1x1024xf32, #tpu.memory_space<vmem>>, %arg9: memref<1024x768xi8, #tpu.memory_space<vmem>>, %arg10: memref<1x768xf32, #tpu.memory_space<vmem>>, %arg11: memref<1x768xf32, #tpu.memory_space<vmem>>, %arg12: memref<16x768xbf16, #tpu.memory_space<vmem>>) attributes {dimension_semantics = [#tpu.dimension_semantics<parallel>], iteration_bounds = array<i64: 1>, scalar_prefetch = 0 : i64, scratch_operands = 0 : i64, tpu.core_type = #tpu.core_type<tc>, window_params = [{transform_indices = @transform_0, window_bounds = array<i64: 16, 32>}, {pipeline_mode = #tpu.pipeline_mode<synchronous>, transform_indices = @transform_1, window_bounds = array<i64: 32, 256>}, {pipeline_mode = #tpu.pipeline_mode<synchronous>, transform_indices = @transform_2, window_bounds = array<i64: 1, 256>}, {pipeline_mode = #tpu.pipeline_mode<synchronous>, transform_indices = @transform_3, window_bounds = array<i64: 256, 512>}, {pipeline_mode = #tpu.pipeline_mode<synchronous>, transform_indices = @transform_4, window_bounds = array<i64: 1, 512>}, {pipeline_mode = #tpu.pipeline_mode<synchronous>, transform_indices = @transform_5, window_bounds = array<i64: 512, 1024>}, {pipeline_mode = #tpu.pipeline_mode<synchronous>, transform_indices = @transform_6, window_bounds = array<i64: 1, 1024>}, {pipeline_mode = #tpu.pipeline_mode<synchronous>, transform_indices = @transform_7, window_bounds = array<i64: 1, 1024>}, {pipeline_mode = #tpu.pipeline_mode<synchronous>, transform_indices = @transform_8, window_bounds = array<i64: 1024, 768>}, {pipeline_mode = #tpu.pipeline_mode<synchronous>, transform_indices = @transform_9, window_bounds = array<i64: 1, 768>}, {pipeline_mode = #tpu.pipeline_mode<synchronous>, transform_indices = @transform_10, window_bounds = array<i64: 1, 768>}, {transform_indices = @transform_11, window_bounds = array<i64: 16, 768>}]} {
    %c0 = arith.constant 0 : index
    %c0_0 = arith.constant 0 : index
    %0 = vector.load %arg1[%c0, %c0_0] : memref<16x32xbf16, #tpu.memory_space<vmem>>, vector<16x32xbf16>
    %c0_1 = arith.constant 0 : index
    %c0_2 = arith.constant 0 : index
    %1 = vector.load %arg2[%c0_1, %c0_2] : memref<32x256xbf16, #tpu.memory_space<vmem>>, vector<32x256xbf16>
    %cst = arith.constant dense<0.000000e+00> : vector<16x256xf32>
    %2 = tpu.matmul %0, %1, %cst {dimension_numbers = #tpu.dot_dimension_numbers<[1], [0], [0], [1], [0, 0, 1, 1], [], []>} : vector<16x32xbf16>, vector<32x256xbf16>, vector<16x256xf32> -> vector<16x256xf32>
    %c0_3 = arith.constant 0 : index
    %c0_4 = arith.constant 0 : index
    %3 = vector.load %arg3[%c0_3, %c0_4] : memref<1x256xf32, #tpu.memory_space<vmem>>, vector<1x256xf32>
    %4 = vector.broadcast %3 : vector<1x256xf32> to vector<16x256xf32>
    %5 = arith.addf %2, %4 : vector<16x256xf32>
    %cst_5 = arith.constant 0.000000e+00 : f32
    %6 = vector.broadcast %cst_5 : f32 to vector<16x256xf32>
    %7 = arith.cmpf ogt, %5, %6 : vector<16x256xf32>
    %cst_6 = arith.constant 2.000000e-01 : f32
    %8 = vector.broadcast %cst_6 : f32 to vector<16x256xf32>
    %9 = arith.mulf %8, %5 : vector<16x256xf32>
    %10 = arith.select %7, %5, %9 : vector<16x256xi1>, vector<16x256xf32>
    %11 = arith.truncf %10 : vector<16x256xf32> to vector<16x256xbf16>
    %c0_7 = arith.constant 0 : index
    %c0_8 = arith.constant 0 : index
    %12 = vector.load %arg4[%c0_7, %c0_8] : memref<256x512xbf16, #tpu.memory_space<vmem>>, vector<256x512xbf16>
    %cst_9 = arith.constant dense<0.000000e+00> : vector<16x512xf32>
    %13 = tpu.matmul %11, %12, %cst_9 {dimension_numbers = #tpu.dot_dimension_numbers<[1], [0], [0], [1], [0, 0, 1, 1], [], []>} : vector<16x256xbf16>, vector<256x512xbf16>, vector<16x512xf32> -> vector<16x512xf32>
    %c0_10 = arith.constant 0 : index
    %c0_11 = arith.constant 0 : index
    %14 = vector.load %arg5[%c0_10, %c0_11] : memref<1x512xf32, #tpu.memory_space<vmem>>, vector<1x512xf32>
    %15 = vector.broadcast %14 : vector<1x512xf32> to vector<16x512xf32>
    %16 = arith.addf %13, %15 : vector<16x512xf32>
    %cst_12 = arith.constant 0.000000e+00 : f32
    %17 = vector.broadcast %cst_12 : f32 to vector<16x512xf32>
    %18 = arith.cmpf ogt, %16, %17 : vector<16x512xf32>
    %cst_13 = arith.constant 2.000000e-01 : f32
    %19 = vector.broadcast %cst_13 : f32 to vector<16x512xf32>
    %20 = arith.mulf %19, %16 : vector<16x512xf32>
    %21 = arith.select %18, %16, %20 : vector<16x512xi1>, vector<16x512xf32>
    %22 = arith.truncf %21 : vector<16x512xf32> to vector<16x512xbf16>
    %c0_14 = arith.constant 0 : index
    %c0_15 = arith.constant 0 : index
    %23 = vector.load %arg6[%c0_14, %c0_15] : memref<512x1024xi8, #tpu.memory_space<vmem>>, vector<512x1024xi8>
    %24 = arith.sitofp %23 : vector<512x1024xi8> to vector<512x1024xbf16>
    %cst_16 = arith.constant dense<0.000000e+00> : vector<16x1024xf32>
    %25 = tpu.matmul %22, %24, %cst_16 {dimension_numbers = #tpu.dot_dimension_numbers<[1], [0], [0], [1], [0, 0, 1, 1], [], []>} : vector<16x512xbf16>, vector<512x1024xbf16>, vector<16x1024xf32> -> vector<16x1024xf32>
    %c0_17 = arith.constant 0 : index
    %c0_18 = arith.constant 0 : index
    %26 = vector.load %arg7[%c0_17, %c0_18] : memref<1x1024xf32, #tpu.memory_space<vmem>>, vector<1x1024xf32>
    %27 = vector.broadcast %26 : vector<1x1024xf32> to vector<16x1024xf32>
    %28 = arith.mulf %25, %27 : vector<16x1024xf32>
    %c0_19 = arith.constant 0 : index
    %c0_20 = arith.constant 0 : index
    %29 = vector.load %arg8[%c0_19, %c0_20] : memref<1x1024xf32, #tpu.memory_space<vmem>>, vector<1x1024xf32>
    %30 = vector.broadcast %29 : vector<1x1024xf32> to vector<16x1024xf32>
    %31 = arith.addf %28, %30 : vector<16x1024xf32>
    %cst_21 = arith.constant 0.000000e+00 : f32
    %32 = vector.broadcast %cst_21 : f32 to vector<16x1024xf32>
    %33 = arith.cmpf ogt, %31, %32 : vector<16x1024xf32>
    %cst_22 = arith.constant 2.000000e-01 : f32
    %34 = vector.broadcast %cst_22 : f32 to vector<16x1024xf32>
    %35 = arith.mulf %34, %31 : vector<16x1024xf32>
    %36 = arith.select %33, %31, %35 : vector<16x1024xi1>, vector<16x1024xf32>
    %37 = arith.truncf %36 : vector<16x1024xf32> to vector<16x1024xbf16>
    %c0_23 = arith.constant 0 : index
    %c0_24 = arith.constant 0 : index
    %38 = vector.load %arg9[%c0_23, %c0_24] : memref<1024x768xi8, #tpu.memory_space<vmem>>, vector<1024x768xi8>
    %39 = arith.sitofp %38 : vector<1024x768xi8> to vector<1024x768xbf16>
    %cst_25 = arith.constant dense<0.000000e+00> : vector<16x768xf32>
    %40 = tpu.matmul %37, %39, %cst_25 {dimension_numbers = #tpu.dot_dimension_numbers<[1], [0], [0], [1], [0, 0, 1, 1], [], []>} : vector<16x1024xbf16>, vector<1024x768xbf16>, vector<16x768xf32> -> vector<16x768xf32>
    %c0_26 = arith.constant 0 : index
    %c0_27 = arith.constant 0 : index
    %41 = vector.load %arg10[%c0_26, %c0_27] : memref<1x768xf32, #tpu.memory_space<vmem>>, vector<1x768xf32>
    %42 = vector.broadcast %41 : vector<1x768xf32> to vector<16x768xf32>
    %43 = arith.mulf %40, %42 : vector<16x768xf32>
    %c0_28 = arith.constant 0 : index
    %c0_29 = arith.constant 0 : index
    %44 = vector.load %arg11[%c0_28, %c0_29] : memref<1x768xf32, #tpu.memory_space<vmem>>, vector<1x768xf32>
    %45 = vector.broadcast %44 : vector<1x768xf32> to vector<16x768xf32>
    %46 = arith.addf %43, %45 : vector<16x768xf32>
    %47 = math.tanh %46 : vector<16x768xf32>
    %48 = arith.truncf %47 : vector<16x768xf32> to vector<16x768xbf16>
    %c0_30 = arith.constant 0 : index
    %c0_31 = arith.constant 0 : index
    %49 = vector.load %arg12[%c0_30, %c0_31] : memref<16x768xbf16, #tpu.memory_space<vmem>>, vector<16x768xbf16>
    tpu.vector_store %arg12[%c0_30, %c0_31], %48 {strides = array<i32>} : memref<16x768xbf16, #tpu.memory_space<vmem>>, vector<16x768xbf16>,
    return
  }
  func.func @transform_0(%arg0: i32) -> (i32, i32) {
    %c0_i32 = arith.constant 0 : i32
    %c0_i32_0 = arith.constant 0 : i32
    return %arg0, %c0_i32 : i32, i32
  }
  func.func @transform_1(%arg0: i32) -> (i32, i32) {
    %c0_i32 = arith.constant 0 : i32
    %c0_i32_0 = arith.constant 0 : i32
    %c0_i32_1 = arith.constant 0 : i32
    return %c0_i32, %c0_i32_0 : i32, i32
  }
  func.func @transform_2(%arg0: i32) -> (i32, i32) {
    %c0_i32 = arith.constant 0 : i32
    %c0_i32_0 = arith.constant 0 : i32
    %c0_i32_1 = arith.constant 0 : i32
    return %c0_i32, %c0_i32_0 : i32, i32
  }
  func.func @transform_3(%arg0: i32) -> (i32, i32) {
    %c0_i32 = arith.constant 0 : i32
    %c0_i32_0 = arith.constant 0 : i32
    %c0_i32_1 = arith.constant 0 : i32
    return %c0_i32, %c0_i32_0 : i32, i32
  }
  func.func @transform_4(%arg0: i32) -> (i32, i32) {
    %c0_i32 = arith.constant 0 : i32
    %c0_i32_0 = arith.constant 0 : i32
    %c0_i32_1 = arith.constant 0 : i32
    return %c0_i32, %c0_i32_0 : i32, i32
  }
  func.func @transform_5(%arg0: i32) -> (i32, i32) {
    %c0_i32 = arith.constant 0 : i32
    %c0_i32_0 = arith.constant 0 : i32
    %c0_i32_1 = arith.constant 0 : i32
    return %c0_i32, %c0_i32_0 : i32, i32
  }
  func.func @transform_6(%arg0: i32) -> (i32, i32) {
    %c0_i32 = arith.constant 0 : i32
    %c0_i32_0 = arith.constant 0 : i32
    %c0_i32_1 = arith.constant 0 : i32
    return %c0_i32, %c0_i32_0 : i32, i32
  }
  func.func @transform_7(%arg0: i32) -> (i32, i32) {
    %c0_i32 = arith.constant 0 : i32
    %c0_i32_0 = arith.constant 0 : i32
    %c0_i32_1 = arith.constant 0 : i32
    return %c0_i32, %c0_i32_0 : i32, i32
  }
  func.func @transform_8(%arg0: i32) -> (i32, i32) {
    %c0_i32 = arith.constant 0 : i32
    %c0_i32_0 = arith.constant 0 : i32
    %c0_i32_1 = arith.constant 0 : i32
    return %c0_i32, %c0_i32_0 : i32, i32
  }
  func.func @transform_9(%arg0: i32) -> (i32, i32) {
    %c0_i32 = arith.constant 0 : i32
    %c0_i32_0 = arith.constant 0 : i32
    %c0_i32_1 = arith.constant 0 : i32
    return %c0_i32, %c0_i32_0 : i32, i32
  }
  func.func @transform_10(%arg0: i32) -> (i32, i32) {
    %c0_i32 = arith.constant 0 : i32
    %c0_i32_0 = arith.constant 0 : i32
    %c0_i32_1 = arith.constant 0 : i32
    return %c0_i32, %c0_i32_0 : i32, i32
  }
  func.func @transform_11(%arg0: i32) -> (i32, i32) {
    %c0_i32 = arith.constant 0 : i32
    %c0_i32_0 = arith.constant 0 : i32
    return %arg0, %c0_i32 : i32, i32
  }
}

module attributes {stable_mosaic.version = 11 : i64} {
  func.func @kernel(%arg0: i32, %arg1: memref<16x32xbf16, #tpu.memory_space<vmem>>, %arg2: memref<32x256xbf16, #tpu.memory_space<vmem>>, %arg3: memref<1x256xf32, #tpu.memory_space<vmem>>, %arg4: memref<256x512xbf16, #tpu.memory_space<vmem>>, %arg5: memref<1x512xf32, #tpu.memory_space<vmem>>, %arg6: memref<512x1024xi8, #tpu.memory_space<vmem>>, %arg7: memref<1x1024xf32, #tpu.memory_space<vmem>>, %arg8: memref<1x1024xf32, #tpu.memory_space<vmem>>, %arg9: memref<1024x768xi8, #tpu.memory_space<vmem>>, %arg10: memref<1x768xf32, #tpu.memory_space<vmem>>, %arg11: memref<1x768xf32, #tpu.memory_space<vmem>>, %arg12: memref<16x768xbf16, #tpu.memory_space<vmem>>) attributes {dimension_semantics = [#tpu.dimension_semantics<parallel>], iteration_bounds = array<i64: 1>, scalar_prefetch = 0 : i64, scratch_operands = 0 : i64, tpu.core_type = #tpu.core_type<tc>, window_params = [{transform_indices = @transform_0, window_bounds = array<i64: 16, 32>}, {pipeline_mode = #tpu.pipeline_mode<synchronous>, transform_indices = @transform_1, window_bounds = array<i64: 32, 256>}, {pipeline_mode = #tpu.pipeline_mode<synchronous>, transform_indices = @transform_2, window_bounds = array<i64: 1, 256>}, {pipeline_mode = #tpu.pipeline_mode<synchronous>, transform_indices = @transform_3, window_bounds = array<i64: 256, 512>}, {pipeline_mode = #tpu.pipeline_mode<synchronous>, transform_indices = @transform_4, window_bounds = array<i64: 1, 512>}, {pipeline_mode = #tpu.pipeline_mode<synchronous>, transform_indices = @transform_5, window_bounds = array<i64: 512, 1024>}, {pipeline_mode = #tpu.pipeline_mode<synchronous>, transform_indices = @transform_6, window_bounds = array<i64: 1, 1024>}, {pipeline_mode = #tpu.pipeline_mode<synchronous>, transform_indices = @transform_7, window_bounds = array<i64: 1, 1024>}, {pipeline_mode = #tpu.pipeline_mode<synchronous>, transform_indices = @transform_8, window_bounds = array<i64: 1024, 768>}, {pipeline_mode = #tpu.pipeline_mode<synchronous>, transform_indices = @transform_9, window_bounds = array<i64: 1, 768>}, {pipeline_mode = #tpu.pipeline_mode<synchronous>, transform_indices = @transform_10, window_bounds = array<i64: 1, 768>}, {transform_indices = @transform_11, window_bounds = array<i64: 16, 768>}]} {
    %c0 = arith.constant 0 : index
    %c0_0 = arith.constant 0 : index
    %0 = vector.load %arg1[%c0, %c0_0] : memref<16x32xbf16, #tpu.memory_space<vmem>>, vector<16x32xbf16>
    %c0_1 = arith.constant 0 : index
    %c0_2 = arith.constant 0 : index
    %1 = vector.load %arg2[%c0_1, %c0_2] : memref<32x256xbf16, #tpu.memory_space<vmem>>, vector<32x256xbf16>
    %cst = arith.constant dense<0.000000e+00> : vector<16x256xf32>
    %2 = tpu.matmul %0, %1, %cst {dimension_numbers = #tpu.dot_dimension_numbers<[1], [0], [0], [1], [0, 0, 1, 1], [], []>} : vector<16x32xbf16>, vector<32x256xbf16>, vector<16x256xf32> -> vector<16x256xf32>
    %c0_3 = arith.constant 0 : index
    %c0_4 = arith.constant 0 : index
    %3 = vector.load %arg3[%c0_3, %c0_4] : memref<1x256xf32, #tpu.memory_space<vmem>>, vector<1x256xf32>
    %4 = vector.broadcast %3 : vector<1x256xf32> to vector<16x256xf32>
    %5 = arith.addf %2, %4 : vector<16x256xf32>
    %cst_5 = arith.constant 0.000000e+00 : f32
    %6 = vector.broadcast %cst_5 : f32 to vector<16x256xf32>
    %7 = arith.cmpf ogt, %5, %6 : vector<16x256xf32>
    %cst_6 = arith.constant 2.000000e-01 : f32
    %8 = vector.broadcast %cst_6 : f32 to vector<16x256xf32>
    %9 = arith.mulf %8, %5 : vector<16x256xf32>
    %10 = arith.select %7, %5, %9 : vector<16x256xi1>, vector<16x256xf32>
    %11 = arith.truncf %10 : vector<16x256xf32> to vector<16x256xbf16>
    %c0_7 = arith.constant 0 : index
    %c0_8 = arith.constant 0 : index
    %12 = vector.load %arg4[%c0_7, %c0_8] : memref<256x512xbf16, #tpu.memory_space<vmem>>, vector<256x512xbf16>
    %cst_9 = arith.constant dense<0.000000e+00> : vector<16x512xf32>
    %13 = tpu.matmul %11, %12, %cst_9 {dimension_numbers = #tpu.dot_dimension_numbers<[1], [0], [0], [1], [0, 0, 1, 1], [], []>} : vector<16x256xbf16>, vector<256x512xbf16>, vector<16x512xf32> -> vector<16x512xf32>
    %c0_10 = arith.constant 0 : index
    %c0_11 = arith.constant 0 : index
    %14 = vector.load %arg5[%c0_10, %c0_11] : memref<1x512xf32, #tpu.memory_space<vmem>>, vector<1x512xf32>
    %15 = vector.broadcast %14 : vector<1x512xf32> to vector<16x512xf32>
    %16 = arith.addf %13, %15 : vector<16x512xf32>
    %cst_12 = arith.constant 0.000000e+00 : f32
    %17 = vector.broadcast %cst_12 : f32 to vector<16x512xf32>
    %18 = arith.cmpf ogt, %16, %17 : vector<16x512xf32>
    %cst_13 = arith.constant 2.000000e-01 : f32
    %19 = vector.broadcast %cst_13 : f32 to vector<16x512xf32>
    %20 = arith.mulf %19, %16 : vector<16x512xf32>
    %21 = arith.select %18, %16, %20 : vector<16x512xi1>, vector<16x512xf32>
    %22 = arith.truncf %21 : vector<16x512xf32> to vector<16x512xbf16>
    %c0_14 = arith.constant 0 : index
    %c0_15 = arith.constant 0 : index
    %23 = vector.load %arg6[%c0_14, %c0_15] : memref<512x1024xi8, #tpu.memory_space<vmem>>, vector<512x1024xi8>
    %24 = arith.sitofp %23 : vector<512x1024xi8> to vector<512x1024xbf16>
    %cst_16 = arith.constant dense<0.000000e+00> : vector<16x1024xf32>
    %25 = tpu.matmul %22, %24, %cst_16 {dimension_numbers = #tpu.dot_dimension_numbers<[1], [0], [0], [1], [0, 0, 1, 1], [], []>} : vector<16x512xbf16>, vector<512x1024xbf16>, vector<16x1024xf32> -> vector<16x1024xf32>
    %c0_17 = arith.constant 0 : index
    %c0_18 = arith.constant 0 : index
    %26 = vector.load %arg7[%c0_17, %c0_18] : memref<1x1024xf32, #tpu.memory_space<vmem>>, vector<1x1024xf32>
    %27 = vector.broadcast %26 : vector<1x1024xf32> to vector<16x1024xf32>
    %28 = arith.mulf %25, %27 : vector<16x1024xf32>
    %c0_19 = arith.constant 0 : index
    %c0_20 = arith.constant 0 : index
    %29 = vector.load %arg8[%c0_19, %c0_20] : memref<1x1024xf32, #tpu.memory_space<vmem>>, vector<1x1024xf32>
    %30 = vector.broadcast %29 : vector<1x1024xf32> to vector<16x1024xf32>
    %31 = arith.addf %28, %30 : vector<16x1024xf32>
    %cst_21 = arith.constant 0.000000e+00 : f32
    %32 = vector.broadcast %cst_21 : f32 to vector<16x1024xf32>
    %33 = arith.cmpf ogt, %31, %32 : vector<16x1024xf32>
    %cst_22 = arith.constant 2.000000e-01 : f32
    %34 = vector.broadcast %cst_22 : f32 to vector<16x1024xf32>
    %35 = arith.mulf %34, %31 : vector<16x1024xf32>
    %36 = arith.select %33, %31, %35 : vector<16x1024xi1>, vector<16x1024xf32>
    %37 = arith.truncf %36 : vector<16x1024xf32> to vector<16x1024xbf16>
    %c0_23 = arith.constant 0 : index
    %c0_24 = arith.constant 0 : index
    %38 = vector.load %arg9[%c0_23, %c0_24] : memref<1024x768xi8, #tpu.memory_space<vmem>>, vector<1024x768xi8>
    %39 = arith.sitofp %38 : vector<1024x768xi8> to vector<1024x768xbf16>
    %cst_25 = arith.constant dense<0.000000e+00> : vector<16x768xf32>
    %40 = tpu.matmul %37, %39, %cst_25 {dimension_numbers = #tpu.dot_dimension_numbers<[1], [0], [0], [1], [0, 0, 1, 1], [], []>} : vector<16x1024xbf16>, vector<1024x768xbf16>, vector<16x768xf32> -> vector<16x768xf32>
    %c0_26 = arith.constant 0 : index
    %c0_27 = arith.constant 0 : index
    %41 = vector.load %arg10[%c0_26, %c0_27] : memref<1x768xf32, #tpu.memory_space<vmem>>, vector<1x768xf32>
    %42 = vector.broadcast %41 : vector<1x768xf32> to vector<16x768xf32>
    %43 = arith.mulf %40, %42 : vector<16x768xf32>
    %c0_28 = arith.constant 0 : index
    %c0_29 = arith.constant 0 : index
    %44 = vector.load %arg11[%c0_28, %c0_29] : memref<1x768xf32, #tpu.memory_space<vmem>>, vector<1x768xf32>
    %45 = vector.broadcast %44 : vector<1x768xf32> to vector<16x768xf32>
    %46 = arith.addf %43, %45 : vector<16x768xf32>
    %47 = math.tanh %46 : vector<16x768xf32>
    %48 = arith.truncf %47 : vector<16x768xf32> to vector<16x768xbf16>
    %c0_30 = arith.constant 0 : index
    %c0_31 = arith.constant 0 : index
    %49 = vector.load %arg12[%c0_30, %c0_31] : memref<16x768xbf16, #tpu.memory_space<vmem>>, vector<16x768xbf16>
    tpu.vector_store %arg12[%c0_30, %c0_31], %48 {strides = array<i32>} : memref<16x768xbf16, #tpu.memory_space<vmem>>, vector<16x768xbf16>,
    return
  }
  func.func @transform_0(%arg0: i32) -> (i32, i32) {
    %c0_i32 = arith.constant 0 : i32
    %c0_i32_0 = arith.constant 0 : i32
    return %arg0, %c0_i32 : i32, i32
  }
  func.func @transform_1(%arg0: i32) -> (i32, i32) {
    %c0_i32 = arith.constant 0 : i32
    %c0_i32_0 = arith.constant 0 : i32
    %c0_i32_1 = arith.constant 0 : i32
    return %c0_i32, %c0_i32_0 : i32, i32
  }
  func.func @transform_2(%arg0: i32) -> (i32, i32) {
    %c0_i32 = arith.constant 0 : i32
    %c0_i32_0 = arith.constant 0 : i32
    %c0_i32_1 = arith.constant 0 : i32
    return %c0_i32, %c0_i32_0 : i32, i32
  }
  func.func @transform_3(%arg0: i32) -> (i32, i32) {
    %c0_i32 = arith.constant 0 : i32
    %c0_i32_0 = arith.constant 0 : i32
    %c0_i32_1 = arith.constant 0 : i32
    return %c0_i32, %c0_i32_0 : i32, i32
  }
  func.func @transform_4(%arg0: i32) -> (i32, i32) {
    %c0_i32 = arith.constant 0 : i32
    %c0_i32_0 = arith.constant 0 : i32
    %c0_i32_1 = arith.constant 0 : i32
    return %c0_i32, %c0_i32_0 : i32, i32
  }
  func.func @transform_5(%arg0: i32) -> (i32, i32) {
    %c0_i32 = arith.constant 0 : i32
    %c0_i32_0 = arith.constant 0 : i32
    %c0_i32_1 = arith.constant 0 : i32
    return %c0_i32, %c0_i32_0 : i32, i32
  }
  func.func @transform_6(%arg0: i32) -> (i32, i32) {
    %c0_i32 = arith.constant 0 : i32
    %c0_i32_0 = arith.constant 0 : i32
    %c0_i32_1 = arith.constant 0 : i32
    return %c0_i32, %c0_i32_0 : i32, i32
  }
  func.func @transform_7(%arg0: i32) -> (i32, i32) {
    %c0_i32 = arith.constant 0 : i32
    %c0_i32_0 = arith.constant 0 : i32
    %c0_i32_1 = arith.constant 0 : i32
    return %c0_i32, %c0_i32_0 : i32, i32
  }
  func.func @transform_8(%arg0: i32) -> (i32, i32) {
    %c0_i32 = arith.constant 0 : i32
    %c0_i32_0 = arith.constant 0 : i32
    %c0_i32_1 = arith.constant 0 : i32
    return %c0_i32, %c0_i32_0 : i32, i32
  }
  func.func @transform_9(%arg0: i32) -> (i32, i32) {
    %c0_i32 = arith.constant 0 : i32
    %c0_i32_0 = arith.constant 0 : i32
    %c0_i32_1 = arith.constant 0 : i32
    return %c0_i32, %c0_i32_0 : i32, i32
  }
  func.func @transform_10(%arg0: i32) -> (i32, i32) {
    %c0_i32 = arith.constant 0 : i32
    %c0_i32_0 = arith.constant 0 : i32
    %c0_i32_1 = arith.constant 0 : i32
    return %c0_i32, %c0_i32_0 : i32, i32
  }
  func.func @transform_11(%arg0: i32) -> (i32, i32) {
    %c0_i32 = arith.constant 0 : i32
    %c0_i32_0 = arith.constant 0 : i32
    return %arg0, %c0_i32 : i32, i32
  }
}

</mosaic_0001>

<bundles_post_ra>
// kernel: tpu_custom_call.1
= control target key start
LH: loop header
LB: loop body
LE: loop exit
PB: predicated region body
PF: predicated region fallthrough
CT: control target
= control target key end

     0   :  { %16 = vsyncpa [#allocation3], 0  ;;  %s3941_s0 = inlined_call_operand.hbm [shape: bf16[16,32], index: 0, kind: input, shape index: {}]   ;;  %s3942_s1 = inlined_call_operand.hbm [shape: bf16[32,256], index: 1, kind: input, shape index: {}]   ;;  %s3943_s2 = inlined_call_operand.hbm [shape: f32[1,256], index: 2, kind: input, shape index: {}]   ;;  %s3944_s3 = inlined_call_operand.hbm [shape: bf16[256,512], index: 3, kind: input, shape index: {}]   ;;  %s3945_s4 = inlined_call_operand.hbm [shape: f32[1,512], index: 4, kind: input, shape index: {}]   ;;  %s3946_s5 = inlined_call_operand.hbm [shape: s8[512,1024], index: 5, kind: input, shape index: {}]   ;;  %s3947_s6 = inlined_call_operand.hbm [shape: f32[1,1024], index: 6, kind: input, shape index: {}]   ;;  %s3948_s7 = inlined_call_operand.hbm [shape: f32[1,1024], index: 7, kind: input, shape index: {}]   ;;  %s3949_s8 = inlined_call_operand.hbm [shape: s8[1024,768], index: 8, kind: input, shape index: {}]   ;;  %s3950_s9 = inlined_call_operand.hbm [shape: f32[1,768], index: 9, kind: input, shape index: {}]   ;;  %s3951_s10 = inlined_call_operand.hbm [shape: f32[1,768], index: 10, kind: input, shape index: {}]   ;;  %s3952_s11 = inlined_call_operand.hbm [shape: bf16[16,768], index: 11, kind: output, shape index: {}]  }
   0x1   :  { %17 = vsyncpa [#allocation6], 0 }
   0x2   :  { %18 = vsyncpa [#allocation9], 0 }
   0x3   :  { %19 = vsyncpa [#allocation12], 0 }
   0x4   :  { %20 = vsyncpa [#allocation15], 0 }
   0x5   :  { %21 = vsyncpa [#allocation18], 0 }
   0x6   :  { %22 = vsyncpa [#allocation4], 0  ;;  %s3522_s17 = smov [#allocation5]   ;;  %s3244_s21 = scalar_lea.hbm %s3942_s1, 512 }
   0x7   :  { %s40_s18 = sshll.u32 %s3522_s17, 4  ;;  %p3245_p0 = scmp.ne.s32.totalorder %s3942_s1, %s3244_s21  ;;  %s41_s18 = int_to_ptr.vmem [resolvable:$true] %s40_s18 }
   0x8   :  { %p3248_p1 = scmp.lt.u32.totalorder %s3244_s21, %s3942_s1 }
   0xa   :  { %p3250_p2 = pnand %p3248_p1, %p3245_p0 }
   0xc   :  { %3253 = shalt.err (!%p3250_p2)
}
   0xd   :  { %s3254_s26 = scalar_lea.vmem %s41_s18, 512  ;;  %p3259_p4 = scmp.lt.s32.totalorder %s41_s18, %s41_s18 }
   0xe   :  { %p3255_p3 = scmp.ne.s32.totalorder %s41_s18, %s3254_s26  ;;  %p3260_p5 = scmp.lt.s32.totalorder %s3254_s26, %s3254_s26 }
  0x10   :  { %p3261_p6 = por %p3260_p5, %p3259_p4 }
  0x12   :  { %p3262_p7 = pnand %p3261_p6, %p3255_p3 }
  0x14   :  { %3265 = shalt.err (!%p3262_p7)
}
  0x15   :  { %s3523_s27 = smov 128   ;;  %s3524_s28 = smov 8  }
  0x16   :  { %46 = dma.hbm_to_vmem [thread:$0]  %s3942_s1, 512, %s41_s18, [#allocation6], %s3523_s27, %s3523_s27, %s3524_s28  }
  0x17   :  { %s3525_s12 = smov [#allocation8]   ;;  %s3266_s16 = scalar_lea.hbm %s3944_s3, 8192 }
  0x18   :  { %s62_s13 = sshll.u32 %s3525_s12, 4  ;;  %p3267_p8 = scmp.ne.s32.totalorder %s3944_s3, %s3266_s16  ;;  %s63_s13 = int_to_ptr.vmem [resolvable:$true] %s62_s13 }
  0x19   :  { %p3270_p9 = scmp.lt.u32.totalorder %s3266_s16, %s3944_s3 }
  0x1b   :  { %p3272_p10 = pnand %p3270_p9, %p3267_p8 }
  0x1d   :  { %3275 = shalt.err (!%p3272_p10)
}
  0x1e   :  { %s3276_s22 = scalar_lea.vmem %s63_s13, 8192  ;;  %p3281_p12 = scmp.lt.s32.totalorder %s63_s13, %s63_s13 }
  0x1f   :  { %p3277_p11 = scmp.ne.s32.totalorder %s63_s13, %s3276_s22  ;;  %p3282_p13 = scmp.lt.s32.totalorder %s3276_s22, %s3276_s22 }
  0x21   :  { %p3283_p0 = por %p3282_p13, %p3281_p12 }
  0x23   :  { %p3284_p1 = pnand %p3283_p0, %p3277_p11 }
  0x25   :  { %3287 = shalt.err (!%p3284_p1)
}
  0x26   :  { %s3526_s1 = smov 256   ;;  %s3527_s18 = smov 16  }
  0x27   :  { %68 = dma.hbm_to_vmem [thread:$0]  %s3944_s3, 8192, %s63_s13, [#allocation9], %s3526_s1, %s3526_s1, %s3527_s18  }
  0x28   :  { %s3528_s25 = smov [#allocation11]   ;;  %s3288_s29 = scalar_lea.hbm %s3946_s5, 16384 }
  0x29   :  { %s84_s26 = sshll.u32 %s3528_s25, 4  ;;  %p3289_p2 = scmp.ne.s32.totalorder %s3946_s5, %s3288_s29  ;;  %s85_s26 = int_to_ptr.vmem [resolvable:$true] %s84_s26 }
  0x2a   :  { %p3292_p3 = scmp.lt.u32.totalorder %s3288_s29, %s3946_s5 }
  0x2c   :  { %p3294_p4 = pnand %p3292_p3, %p3289_p2 }
  0x2e   :  { %3297 = shalt.err (!%p3294_p4)
}
  0x2f   :  { %s3298_s16 = scalar_lea.vmem %s85_s26, 16384  ;;  %p3303_p6 = scmp.lt.s32.totalorder %s85_s26, %s85_s26 }
  0x30   :  { %p3299_p5 = scmp.ne.s32.totalorder %s85_s26, %s3298_s16  ;;  %p3304_p7 = scmp.lt.s32.totalorder %s3298_s16, %s3298_s16 }
  0x32   :  { %p3305_p8 = por %p3304_p7, %p3303_p6 }
  0x34   :  { %p3306_p9 = pnand %p3305_p8, %p3299_p5 }
  0x36   :  { %3309 = shalt.err (!%p3306_p9)
}
  0x37   :  { %s3529_s3 = smov 1024   ;;  %s3530_s13 = smov 64  }
  0x38   :  { %90 = dma.hbm_to_vmem [thread:$0]  %s3946_s5, 16384, %s85_s26, [#allocation12], %s3529_s3, %s3529_s3, %s3530_s13  }
  0x39   :  { %s3531_s20 = smov [#allocation14]   ;;  %s3532_s22 = smov [#allocation17]  }
  0x3a   :  { %s107_s21 = sshll.u32 %s3531_s20, 4  ;;  %s129_s1 = sshll.u32 %s3532_s22, 4  ;;  %s108_s21 = int_to_ptr.vmem [resolvable:$true] %s107_s21  ;;  %s130_s1 = int_to_ptr.vmem [resolvable:$true] %s129_s1 }
  0x3b   :  { %s3310_s24 = scalar_lea.hbm %s3948_s7, 128 }
  0x3c   :  { %p3311_p10 = scmp.ne.s32.totalorder %s3948_s7, %s3310_s24  ;;  %p3314_p11 = scmp.lt.u32.totalorder %s3310_s24, %s3948_s7 }
  0x3e   :  { %p3316_p12 = pnand %p3314_p11, %p3311_p10 }
  0x40   :  { %3319 = shalt.err (!%p3316_p12)
}
  0x41   :  { %s3320_s5 = scalar_lea.vmem %s108_s21, 128  ;;  %p3325_p0 = scmp.lt.s32.totalorder %s108_s21, %s108_s21 }
  0x42   :  { %p3321_p13 = scmp.ne.s32.totalorder %s108_s21, %s3320_s5  ;;  %p3326_p1 = scmp.lt.s32.totalorder %s3320_s5, %s3320_s5 }
  0x44   :  { %p3327_p2 = por %p3326_p1, %p3325_p0 }
  0x46   :  { %p3328_p3 = pnand %p3327_p2, %p3321_p13 }
  0x48   :  { %3331 = shalt.err (!%p3328_p3)
}
  0x49   :  { %110 = dma.hbm_to_vmem [thread:$0]  %s3948_s7, 128, %s108_s21, [#allocation15]  }
  0x4a   :  { %s3332_s15 = scalar_lea.hbm %s3950_s9, 96 }
  0x4b   :  { %p3333_p4 = scmp.ne.s32.totalorder %s3950_s9, %s3332_s15  ;;  %p3336_p5 = scmp.lt.u32.totalorder %s3332_s15, %s3950_s9 }
  0x4d   :  { %p3338_p6 = pnand %p3336_p5, %p3333_p4 }
  0x4f   :  { %3341 = shalt.err (!%p3338_p6)
}
  0x50   :  { %s3342_s20 = scalar_lea.vmem %s130_s1, 96  ;;  %p3347_p8 = scmp.lt.s32.totalorder %s130_s1, %s130_s1 }
  0x51   :  { %p3343_p7 = scmp.ne.s32.totalorder %s130_s1, %s3342_s20  ;;  %p3348_p9 = scmp.lt.s32.totalorder %s3342_s20, %s3342_s20 }
  0x53   :  { %p3349_p10 = por %p3348_p9, %p3347_p8 }
  0x55   :  { %p3350_p11 = pnand %p3349_p10, %p3343_p7 }
  0x57   :  { %3353 = shalt.err (!%p3350_p11)
}
  0x58   :  { %132 = dma.hbm_to_vmem [thread:$0]  %s3950_s9, 96, %s130_s1, [#allocation18]  }
  0x59   :  { %s3533_s22 = smov [#allocation2]   ;;  %s3354_s25 = scalar_lea.hbm %s3941_s0, 128 }
  0x5a   :  { %s28_s18 = sshll.u32 %s3533_s22, 4  ;;  %p3355_p12 = scmp.ne.s32.totalorder %s3941_s0, %s3354_s25  ;;  %s29_s18 = int_to_ptr.vmem [resolvable:$true] %s28_s18 }
  0x5b   :  { %p3358_p13 = scmp.lt.u32.totalorder %s3354_s25, %s3941_s0 }
  0x5d   :  { %p3360_p0 = pnand %p3358_p13, %p3355_p12 }
  0x5f   :  { %3363 = shalt.err (!%p3360_p0)
}
  0x60   :  { %s3364_s26 = scalar_lea.vmem %s29_s18, 128  ;;  %p3369_p2 = scmp.lt.s32.totalorder %s29_s18, %s29_s18 }
  0x61   :  { %p3365_p1 = scmp.ne.s32.totalorder %s29_s18, %s3364_s26  ;;  %p3370_p3 = scmp.lt.s32.totalorder %s3364_s26, %s3364_s26 }
  0x63   :  { %p3371_p4 = por %p3370_p3, %p3369_p2 }
  0x65   :  { %p3372_p5 = pnand %p3371_p4, %p3365_p1 }
  0x67   :  { %3375 = shalt.err (!%p3372_p5)
}
  0x68   :  { %s3534_s9 = smov 4   ;;  %s3535_s12 = smov [#allocation7]  }
  0x69   :  { %34 = dma.hbm_to_vmem [thread:$0]  %s3941_s0, 128, %s29_s18, [#allocation3], %s3530_s13, %s3530_s13, %s3534_s9  }
  0x6a   :  { %s53_s14 = sshll.u32 %s3535_s12, 4  ;;  %s3536_s15 = smov [#allocation10]   ;;  %s54_s14 = int_to_ptr.vmem [resolvable:$true] %s53_s14 }
  0x6b   :  { %s75_s16 = sshll.u32 %s3536_s15, 4  ;;  %s3376_s19 = scalar_lea.hbm %s3943_s2, 32  ;;  %s76_s16 = int_to_ptr.vmem [resolvable:$true] %s75_s16 }
  0x6c   :  { %p3377_p6 = scmp.ne.s32.totalorder %s3943_s2, %s3376_s19  ;;  %p3380_p7 = scmp.lt.u32.totalorder %s3376_s19, %s3943_s2 }
  0x6e   :  { %p3382_p8 = pnand %p3380_p7, %p3377_p6 }
  0x70   :  { %3385 = shalt.err (!%p3382_p8)
}
  0x71   :  { %s3386_s0 = scalar_lea.vmem %s54_s14, 32  ;;  %p3391_p10 = scmp.lt.s32.totalorder %s54_s14, %s54_s14 }
  0x72   :  { %p3387_p9 = scmp.ne.s32.totalorder %s54_s14, %s3386_s0  ;;  %p3392_p11 = scmp.lt.s32.totalorder %s3386_s0, %s3386_s0 }
  0x74   :  { %p3393_p12 = por %p3392_p11, %p3391_p10 }
  0x76   :  { %p3394_p13 = pnand %p3393_p12, %p3387_p9 }
  0x78   :  { %3397 = shalt.err (!%p3394_p13)
}
  0x79   :  { %56 = dma.hbm_to_vmem [thread:$0]  %s3943_s2, 32, %s54_s14, [#allocation6]  }
  0x7a   :  { %s3398_s25 = scalar_lea.hbm %s3945_s4, 64 }
  0x7b   :  { %p3399_p0 = scmp.ne.s32.totalorder %s3945_s4, %s3398_s25  ;;  %p3402_p1 = scmp.lt.u32.totalorder %s3398_s25, %s3945_s4 }
  0x7d   :  { %p3404_p2 = pnand %p3402_p1, %p3399_p0 }
  0x7f   :  { %3407 = shalt.err (!%p3404_p2)
}
  0x80   :  { %s3408_s26 = scalar_lea.vmem %s76_s16, 64  ;;  %p3413_p4 = scmp.lt.s32.totalorder %s76_s16, %s76_s16 }
  0x81   :  { %p3409_p3 = scmp.ne.s32.totalorder %s76_s16, %s3408_s26  ;;  %p3414_p5 = scmp.lt.s32.totalorder %s3408_s26, %s3408_s26 }
  0x83   :  { %p3415_p6 = por %p3414_p5, %p3413_p4 }
  0x85   :  { %p3416_p7 = pnand %p3415_p6, %p3409_p3 }
  0x87   :  { %3419 = shalt.err (!%p3416_p7)
}
  0x88   :  { %78 = dma.hbm_to_vmem [thread:$0]  %s3945_s4, 64, %s76_s16, [#allocation9]  }
  0x89   :  { %s3537_s1 = smov [#allocation13]   ;;  %s3538_s12 = smov [#allocation16]  }
  0x8a   :  { %s97_s30 = sshll.u32 %s3537_s1, 4  ;;  %s116_s14 = sshll.u32 %s3538_s12, 4  ;;  %s98_s30 = int_to_ptr.vmem [resolvable:$true] %s97_s30  ;;  %s117_s14 = int_to_ptr.vmem [resolvable:$true] %s116_s14 }
  0x8b   :  { %s3420_s17 = scalar_lea.hbm %s3947_s6, 128 }
  0x8c   :  { %p3421_p8 = scmp.ne.s32.totalorder %s3947_s6, %s3420_s17  ;;  %p3424_p9 = scmp.lt.u32.totalorder %s3420_s17, %s3947_s6 }
  0x8e   :  { %p3426_p10 = pnand %p3424_p9, %p3421_p8 }
  0x90   :  { %3429 = shalt.err (!%p3426_p10)
}
  0x91   :  { %s3430_s4 = scalar_lea.vmem %s98_s30, 128  ;;  %p3435_p12 = scmp.lt.s32.totalorder %s98_s30, %s98_s30 }
  0x92   :  { %p3431_p11 = scmp.ne.s32.totalorder %s98_s30, %s3430_s4  ;;  %p3436_p13 = scmp.lt.s32.totalorder %s3430_s4, %s3430_s4 }
  0x94   :  { %p3437_p0 = por %p3436_p13, %p3435_p12 }
  0x96   :  { %p3438_p1 = pnand %p3437_p0, %p3431_p11 }
  0x98   :  { %3441 = shalt.err (!%p3438_p1)
}
  0x99   :  { %100 = dma.hbm_to_vmem [thread:$0]  %s3947_s6, 128, %s98_s30, [#allocation12]  }
  0x9a   :  { %s3442_s18 = scalar_lea.hbm %s3949_s8, 24576 }
  0x9b   :  { %p3443_p2 = scmp.ne.s32.totalorder %s3949_s8, %s3442_s18  ;;  %p3446_p3 = scmp.lt.u32.totalorder %s3442_s18, %s3949_s8 }
  0x9d   :  { %p3448_p4 = pnand %p3446_p3, %p3443_p2 }
  0x9f   :  { %3451 = shalt.err (!%p3448_p4)
}
  0xa0   :  { %s3452_s28 = scalar_lea.vmem %s117_s14, 24576  ;;  %p3457_p6 = scmp.lt.s32.totalorder %s117_s14, %s117_s14 }
  0xa1   :  { %p3453_p5 = scmp.ne.s32.totalorder %s117_s14, %s3452_s28  ;;  %p3458_p7 = scmp.lt.s32.totalorder %s3452_s28, %s3452_s28 }
  0xa3   :  { %p3459_p8 = por %p3458_p7, %p3457_p6 }
  0xa5   :  { %p3460_p9 = pnand %p3459_p8, %p3453_p5 }
  0xa7   :  { %3463 = shalt.err (!%p3460_p9)
}
  0xa8   :  { %s3539_s6 = smov 768   ;;  %s3540_s29 = smov 48  }
  0xa9   :  { %122 = dma.hbm_to_vmem [thread:$0]  %s3949_s8, 24576, %s117_s14, [#allocation15], %s3539_s6, %s3539_s6, %s3540_s29  }
  0xaa   :  { %s3541_s2 = smov [#allocation19]   ;;  %s3464_s12 = scalar_lea.hbm %s3951_s10, 96 }
  0xab   :  { %s139_s9 = sshll.u32 %s3541_s2, 4  ;;  %p3465_p10 = scmp.ne.s32.totalorder %s3951_s10, %s3464_s12  ;;  %s140_s9 = int_to_ptr.vmem [resolvable:$true] %s139_s9 }
  0xac   :  { %p3468_p11 = scmp.lt.u32.totalorder %s3464_s12, %s3951_s10 }
  0xae   :  { %p3470_p12 = pnand %p3468_p11, %p3465_p10 }
  0xb0   :  { %3473 = shalt.err (!%p3470_p12)
}
  0xb1   :  { %s3474_s20 = scalar_lea.vmem %s140_s9, 96  ;;  %p3479_p0 = scmp.lt.s32.totalorder %s140_s9, %s140_s9 }
  0xb2   :  { %p3475_p13 = scmp.ne.s32.totalorder %s140_s9, %s3474_s20  ;;  %p3480_p1 = scmp.lt.s32.totalorder %s3474_s20, %s3474_s20 }
  0xb4   :  { %p3481_p2 = por %p3480_p1, %p3479_p0 }
  0xb6   :  { %p3482_p3 = pnand %p3481_p2, %p3475_p13 }
  0xb8   :  { %3485 = shalt.err (!%p3482_p3)
}
  0xb9   :  { %142 = dma.hbm_to_vmem [thread:$0]  %s3951_s10, 96, %s140_s9, [#allocation18]  }
  0xba   :  { %3508 = dma.done.wait [#allocation3], 128  }
  0xbb   :  { %3509 = vsyncadd [#allocation3], 4294967168 }
  0xbc   :  { %3510 = dma.done.wait [#allocation6], 544  }
  0xbd   :  { %3511 = vsyncadd [#allocation6], 4294966752 }
  0xbe   :  { %3512 = dma.done.wait [#allocation9], 8256  }
  0xbf   :  { %3513 = vsyncadd [#allocation9], 4294959040 }
  0xc0   :  { %3514 = dma.done.wait [#allocation12], 16512  }
  0xc1   :  { %3515 = vsyncadd [#allocation12], 4294950784 }
  0xc2   :  { %3516 = dma.done.wait [#allocation15], 24704  }
  0xc3   :  { %3517 = vsyncadd [#allocation15], 4294942592 }
  0xc4   :  { %3518 = dma.done.wait [#allocation18], 192  }
  0xc5   :  { %3519 = vsyncadd [#allocation18], 4294967104  ;;  %v3542_v0 = vmov 0   ;;  %v3115_v1 = vld [vmem:[#allocation5 + $0x4] ss:$8 sps:$4 sm:$0xff]   ;;  %v3121_v6 = vld [vmem:[#allocation2] sm:$0xff]   ;;  %v185_v39 = vlaneseq }
  0xc6   :  { %256 = vmatprep.mubr.bf16.mxu0 %v3542_v0  ;;  %v3117_v2 = vld [vmem:[#allocation5] ss:$8 sps:$4 sm:$0xff]   ;;  %224 = vmatprep.subr.bf16.mxu0 %v3115_v1  ;;  %v3118_v3 = vld [vmem:[#allocation5 + $0x14] ss:$8 sps:$4 sm:$0xff]   ;;  %v3120_v4 = vld [vmem:[#allocation5 + $0x10] ss:$8 sps:$4 sm:$0xff]  }
  0xc7   :  { %225 = vmatpush1.bf16.msra.mxu0 %v3117_v2  ;;  %v3124_v5 = vld [vmem:[#allocation8 + $0x4] ss:$16 sps:$4 sm:$0xff]   ;;  %vm220_vm0 = vcmask 261120   ;;  %v3122_v7 = vld [vmem:[#allocation8] ss:$16 sps:$4 sm:$0xff]   ;;  %v3741_v40 = vshrl.u32 %v185_v39, 7 }
  0xc8   :  { %226 = vmatprep.subr.bf16.mxu0 %v3118_v3  ;;  %v3127_v8 = vld [vmem:[#allocation8 + $0x24] ss:$16 sps:$4 sm:$0xff]   ;;  %v3125_v9 = vld [vmem:[#allocation8 + $0x20] ss:$16 sps:$4 sm:$0xff]   ;;  %v3172_v38 = vld [vmem:[#allocation8 + $0xc] ss:$16 sps:$4 sm:$0xff]  }
  0xc9   :  { %v3130_v10 = vld [vmem:[#allocation8 + $0x44] ss:$16 sps:$4 sm:$0xff]   ;;  %v3128_v11 = vld [vmem:[#allocation8 + $0x40] ss:$16 sps:$4 sm:$0xff]   ;;  %v3744_v41 = vsub.s32 0, %v3741_v40  ;;  %v3747_v43 = vsub.s32 1, %v3741_v40 }
  0xca   :  { %v3133_v12 = vld [vmem:[#allocation8 + $0x64] ss:$16 sps:$4 sm:$0xff]   ;;  %v3131_v13 = vld [vmem:[#allocation8 + $0x60] ss:$16 sps:$4 sm:$0xff]   ;;  %v183_v42 = vld [vmem:[#allocation7] sm:$0x3] }
  0xcb   :  { %227 = vmatpush1.bf16.msra.mxu0 %v3120_v4  ;;  %v3136_v14 = vld [vmem:[#allocation8 + $0x84] ss:$16 sps:$4 sm:$0xff]   ;;  %v3134_v15 = vld [vmem:[#allocation8 + $0x80] ss:$16 sps:$4 sm:$0xff]   ;;  %v188_v44 = vrot.slane %v183_v42, %v3744_v41  ;;  %v192_v45 = vrot.slane %v183_v42, %v3747_v43  ;;  %v3170_v0 = vld [vmem:[#allocation8 + $0x8] ss:$16 sps:$4 sm:$0xff]  }
  0xcc   :  { %687 = vmatprep.subr.bf16.mxu0 %v3124_v5  ;;  %v3139_v16 = vld [vmem:[#allocation8 + $0xa4] ss:$16 sps:$4 sm:$0xff]   ;;  %v3137_v17 = vld [vmem:[#allocation8 + $0xa0] ss:$16 sps:$4 sm:$0xff]   ;;  %v3175_v1 = vld [vmem:[#allocation8 + $0x2c] ss:$16 sps:$4 sm:$0xff]  }
  0xcd   :  { %v3142_v18 = vld [vmem:[#allocation8 + $0xc4] ss:$16 sps:$4 sm:$0xff]   ;;  %v3140_v19 = vld [vmem:[#allocation8 + $0xc0] ss:$16 sps:$4 sm:$0xff]   ;;  %v3173_v2 = vld [vmem:[#allocation8 + $0x28] ss:$16 sps:$4 sm:$0xff]  }
  0xce   :  { %2962 = vmatmul.mubr.msk.bf16.vlgmr.msra.gmra.mrb[0].mxu0 %vm220_vm0, %v3121_v6  ;;  %v3145_v20 = vld [vmem:[#allocation8 + $0xe4] ss:$16 sps:$4 sm:$0xff]   ;;  %v3143_v21 = vld [vmem:[#allocation8 + $0xe0] ss:$16 sps:$4 sm:$0xff]   ;;  %v3178_v3 = vld [vmem:[#allocation8 + $0x4c] ss:$16 sps:$4 sm:$0xff]  }
  0xcf   :  { %688 = vmatpush1.bf16.msra.mxu0 %v3122_v7  ;;  %v3148_v22 = vld [vmem:[#allocation8 + $0x104] ss:$16 sps:$4 sm:$0xff]   ;;  %v3146_v23 = vld [vmem:[#allocation8 + $0x100] ss:$16 sps:$4 sm:$0xff]   ;;  %v3176_v4 = vld [vmem:[#allocation8 + $0x48] ss:$16 sps:$4 sm:$0xff]  }
  0xd0   :  { %689 = vmatprep.subr.bf16.mxu0 %v3127_v8  ;;  %v3151_v24 = vld [vmem:[#allocation8 + $0x124] ss:$16 sps:$4 sm:$0xff]   ;;  %v3149_v25 = vld [vmem:[#allocation8 + $0x120] ss:$16 sps:$4 sm:$0xff]   ;;  %v3181_v5 = vld [vmem:[#allocation8 + $0x6c] ss:$16 sps:$4 sm:$0xff]  }
  0xd1   :  { %v3154_v26 = vld [vmem:[#allocation8 + $0x144] ss:$16 sps:$4 sm:$0xff]   ;;  %v3152_v27 = vld [vmem:[#allocation8 + $0x140] ss:$16 sps:$4 sm:$0xff]   ;;  %v3179_v6 = vld [vmem:[#allocation8 + $0x68] ss:$16 sps:$4 sm:$0xff]  }
  0xd2   :  { %v3157_v28 = vld [vmem:[#allocation8 + $0x164] ss:$16 sps:$4 sm:$0xff]   ;;  %v3155_v29 = vld [vmem:[#allocation8 + $0x160] ss:$16 sps:$4 sm:$0xff]   ;;  %v3184_v7 = vld [vmem:[#allocation8 + $0x8c] ss:$16 sps:$4 sm:$0xff]  }
  0xd3   :  { %690 = vmatpush1.bf16.msra.mxu0 %v3125_v9  ;;  %v3160_v30 = vld [vmem:[#allocation8 + $0x184] ss:$16 sps:$4 sm:$0xff]   ;;  %v3158_v31 = vld [vmem:[#allocation8 + $0x180] ss:$16 sps:$4 sm:$0xff]   ;;  %v3182_v8 = vld [vmem:[#allocation8 + $0x88] ss:$16 sps:$4 sm:$0xff]  }
  0xd4   :  { %691 = vmatprep.subr.bf16.mxu0 %v3130_v10  ;;  %v3163_v32 = vld [vmem:[#allocation8 + $0x1a4] ss:$16 sps:$4 sm:$0xff]   ;;  %v3161_v33 = vld [vmem:[#allocation8 + $0x1a0] ss:$16 sps:$4 sm:$0xff]   ;;  %v3187_v9 = vld [vmem:[#allocation8 + $0xac] ss:$16 sps:$4 sm:$0xff]  }
  0xd5   :  { %v3166_v34 = vld [vmem:[#allocation8 + $0x1c4] ss:$16 sps:$4 sm:$0xff]   ;;  %v3164_v35 = vld [vmem:[#allocation8 + $0x1c0] ss:$16 sps:$4 sm:$0xff]   ;;  %v3185_v10 = vld [vmem:[#allocation8 + $0xa8] ss:$16 sps:$4 sm:$0xff]  }
  0xd6   :  { %v3169_v36 = vld [vmem:[#allocation8 + $0x1e4] ss:$16 sps:$4 sm:$0xff]   ;;  %v3167_v37 = vld [vmem:[#allocation8 + $0x1e0] ss:$16 sps:$4 sm:$0xff]   ;;  %s3543_s10 = smov [#allocation20]  }
  0xd7   :  { %692 = vmatpush1.bf16.msra.mxu0 %v3128_v11  ;;  %v3190_v11 = vld [vmem:[#allocation8 + $0xcc] ss:$16 sps:$4 sm:$0xff]   ;;  %v809_v39 = vld [vmem:[#allocation11 + $0x40] sm:$0xff]  ;;  %s2940_s7 = sshll.u32 %s3543_s10, 4  ;;  %s2941_s7 = int_to_ptr.vmem [resolvable:$true] %s2940_s7 }
  0xd8   :  { %693 = vmatprep.subr.bf16.mxu0 %v3133_v12  ;;  %v3188_v12 = vld [vmem:[#allocation8 + $0xc8] ss:$16 sps:$4 sm:$0xff]   ;;  %v945_v42 = vunpack.c.l.s8.bf16 %v809_v39  ;;  %s3486_s21 = scalar_lea.vmem %s2941_s7, 768  ;;  %p3491_p5 = scmp.lt.s32.totalorder %s2941_s7, %s2941_s7 }
  0xd9   :  { %p3487_p4 = scmp.ne.s32.totalorder %s2941_s7, %s3486_s21  ;;  %p3492_p6 = scmp.lt.s32.totalorder %s3486_s21, %s3486_s21 }
  0xdb   :  { %694 = vmatpush1.bf16.msra.mxu0 %v3131_v13  ;;  %v3193_v13 = vld [vmem:[#allocation8 + $0xec] ss:$16 sps:$4 sm:$0xff]   ;;  %p3493_p7 = por %p3492_p6, %p3491_p5 }
  0xdc   :  { %695 = vmatprep.subr.bf16.mxu0 %v3136_v14  ;;  %v3191_v14 = vld [vmem:[#allocation8 + $0xe8] ss:$16 sps:$4 sm:$0xff]  }
  0xdd   :  { %p3494_p8 = pnand %p3493_p7, %p3487_p4 }
  0xdf   :  { %696 = vmatpush1.bf16.msra.mxu0 %v3134_v15  ;;  %v3196_v15 = vld [vmem:[#allocation8 + $0x10c] ss:$16 sps:$4 sm:$0xff]  }
  0xe0   :  { %697 = vmatprep.subr.bf16.mxu0 %v3139_v16  ;;  %v3194_v16 = vld [vmem:[#allocation8 + $0x108] ss:$16 sps:$4 sm:$0xff]  }
  0xe3   :  { %698 = vmatpush1.bf16.msra.mxu0 %v3137_v17  ;;  %v3199_v17 = vld [vmem:[#allocation8 + $0x12c] ss:$16 sps:$4 sm:$0xff]  }
  0xe4   :  { %699 = vmatprep.subr.bf16.mxu0 %v3142_v18  ;;  %v3197_v18 = vld [vmem:[#allocation8 + $0x128] ss:$16 sps:$4 sm:$0xff]  }
  0xe7   :  { %700 = vmatpush1.bf16.msra.mxu0 %v3140_v19  ;;  %v3202_v19 = vld [vmem:[#allocation8 + $0x14c] ss:$16 sps:$4 sm:$0xff]  }
  0xe8   :  { %701 = vmatprep.subr.bf16.mxu0 %v3145_v20  ;;  %v3200_v20 = vld [vmem:[#allocation8 + $0x148] ss:$16 sps:$4 sm:$0xff]  }
  0xeb   :  { %702 = vmatpush1.bf16.msra.mxu0 %v3143_v21  ;;  %v3205_v21 = vld [vmem:[#allocation8 + $0x16c] ss:$16 sps:$4 sm:$0xff]  }
  0xec   :  { %703 = vmatprep.subr.bf16.mxu0 %v3148_v22  ;;  %v3203_v22 = vld [vmem:[#allocation8 + $0x168] ss:$16 sps:$4 sm:$0xff]  }
  0xef   :  { %704 = vmatpush1.bf16.msra.mxu0 %v3146_v23  ;;  %v3208_v23 = vld [vmem:[#allocation8 + $0x18c] ss:$16 sps:$4 sm:$0xff]  }
  0xf0   :  { %705 = vmatprep.subr.bf16.mxu0 %v3151_v24  ;;  %v3206_v24 = vld [vmem:[#allocation8 + $0x188] ss:$16 sps:$4 sm:$0xff]  }
  0xf3   :  { %706 = vmatpush1.bf16.msra.mxu0 %v3149_v25  ;;  %v3211_v25 = vld [vmem:[#allocation8 + $0x1ac] ss:$16 sps:$4 sm:$0xff]  }
  0xf4   :  { %707 = vmatprep.subr.bf16.mxu0 %v3154_v26  ;;  %v3209_v26 = vld [vmem:[#allocation8 + $0x1a8] ss:$16 sps:$4 sm:$0xff]  }
  0xf7   :  { %708 = vmatpush1.bf16.msra.mxu0 %v3152_v27  ;;  %v3214_v27 = vld [vmem:[#allocation8 + $0x1cc] ss:$16 sps:$4 sm:$0xff]  }
  0xf8   :  { %709 = vmatprep.subr.bf16.mxu0 %v3157_v28  ;;  %v3212_v28 = vld [vmem:[#allocation8 + $0x1c8] ss:$16 sps:$4 sm:$0xff]  }
  0xfb   :  { %710 = vmatpush1.bf16.msra.mxu0 %v3155_v29  ;;  %v3217_v29 = vld [vmem:[#allocation8 + $0x1ec] ss:$16 sps:$4 sm:$0xff]  }
  0xfc   :  { %711 = vmatprep.subr.bf16.mxu0 %v3160_v30  ;;  %v802_v30 = vld [vmem:[#allocation11 + $0x8] sm:$0xff] }
  0xff   :  { %712 = vmatpush1.bf16.msra.mxu0 %v3158_v31  ;;  %v3215_v31 = vld [vmem:[#allocation8 + $0x1e8] ss:$16 sps:$4 sm:$0xff]  }
 0x100   :  { %713 = vmatprep.subr.bf16.mxu0 %v3163_v32  ;;  %v930_v32 = vunpack.c.l.s8.bf16 %v802_v30 }
 0x103   :  { %714 = vmatpush1.bf16.msra.mxu0 %v3161_v33  ;;  %v801_v33 = vld [vmem:[#allocation11] sm:$0xff] }
 0x104   :  { %715 = vmatprep.subr.bf16.mxu0 %v3166_v34  ;;  %v929_v34 = vunpack.c.l.s8.bf16 %v801_v33 }
 0x107   :  { %716 = vmatpush1.bf16.msra.mxu0 %v3164_v35  ;;  %v938_v35 = vunpack.c.h.s8.bf16 %v802_v30 }
 0x108   :  { %717 = vmatprep.subr.bf16.mxu0 %v3169_v36  ;;  %v810_v36 = vld [vmem:[#allocation11 + $0x48] sm:$0xff] }
 0x10b   :  { %718 = vmatpush1.bf16.msra.mxu0 %v3167_v37  ;;  %v937_v37 = vunpack.c.h.s8.bf16 %v801_v33  ;;  %v890_v33 = vld [vmem:[#allocation11 + $0x2c8] sm:$0xff] }
 0x10c   :  { %730 = vmatprep.subr.bf16.mxu0 %v3172_v38  ;;  %v946_v38 = vunpack.c.l.s8.bf16 %v810_v36 }
 0x1a1   :  { %v258_v46 = vpop.f32.mrb[0].mxu0 }
 0x1a2   :  { %v259_v47 = vadd.f32 %v258_v46, %v188_v44  ;;  %v260_v48 = vpop.f32.mrb[1].mxu0  ;;  %v953_v46 = vunpack.c.h.s8.bf16 %v809_v39  ;;  %v3755_v39 = vld [vmem:[#allocation11 + $0x18] sm:$0xff] }
 0x1a3   :  { %v261_v49 = vadd.f32 %v260_v48, %v192_v45  ;;  %v262_v50 = vpop.f32.mrb[2].mxu0  ;;  %v817_v48 = vld [vmem:[#allocation11 + $0x80] sm:$0xff] }
 0x1a4   :  { %v271_v51 = vmul.f32 0.2, %v259_v47  ;;  %v263_v52 = vadd.f32 %v262_v50, %v188_v44  ;;  %v264_v53 = vpop.f32.mrb[3].mxu0  ;;  %vm267_vm1 = vcmp.gt.f32.partialorder %v259_v47, 0.0  ;;  %v954_v44 = vunpack.c.h.s8.bf16 %v810_v36 }
 0x1a5   :  { %v272_v54 = vmul.f32 0.2, %v261_v49  ;;  %v265_v55 = vadd.f32 %v264_v53, %v192_v45  ;;  %vm268_vm2 = vcmp.gt.f32.partialorder %v261_v49, 0.0  ;;  %v818_v45 = vld [vmem:[#allocation11 + $0x88] sm:$0xff] }
 0x1a6   :  { %vm269_vm3 = vcmp.gt.f32.partialorder %v263_v52, 0.0  ;;  %v273_v56 = vmul.f32 0.2, %v263_v52  ;;  %v275_v58 = vsel %vm267_vm1, %v259_v47, %v271_v51  ;;  %v962_v47 = vunpack.c.l.s8.bf16 %v818_v45  ;;  %v826_v51 = vld [vmem:[#allocation11 + $0xc8] sm:$0xff] }
 0x1a7   :  { %vm270_vm4 = vcmp.gt.f32.partialorder %v265_v55, 0.0  ;;  %v274_v57 = vmul.f32 0.2, %v265_v55  ;;  %v276_v61 = vsel %vm268_vm2, %v261_v49, %v272_v54  ;;  %v961_v49 = vunpack.c.l.s8.bf16 %v817_v48  ;;  %v825_v54 = vld [vmem:[#allocation11 + $0xc0] sm:$0xff] }
 0x1a8   :  { %v277_v59 = vsel %vm269_vm3, %v263_v52, %v273_v56  ;;  %v970_v50 = vunpack.c.h.s8.bf16 %v818_v45  ;;  %v969_v52 = vunpack.c.h.s8.bf16 %v817_v48  ;;  %v978_v53 = vunpack.c.l.s8.bf16 %v826_v51 }
 0x1a9   :  { %v3751_v60 = vpack.c.bf16 %v277_v59, %v275_v58  ;;  %v278_v62 = vsel %vm270_vm4, %v265_v55, %v274_v57  ;;  %v977_v55 = vunpack.c.l.s8.bf16 %v825_v54  ;;  %v986_v56 = vunpack.c.h.s8.bf16 %v826_v51  ;;  %v834_v57 = vld [vmem:[#allocation11 + $0x108] sm:$0xff] }
 0x1aa   :  { %v280_v63 = vpack.c.bf16 %v278_v62, %v276_v61  ;;  %v985_v58 = vunpack.c.h.s8.bf16 %v825_v54  ;;  %v994_v59 = vunpack.c.l.s8.bf16 %v834_v57  ;;  %v866_v61 = vld [vmem:[#allocation11 + $0x208] sm:$0xff] }
 0x1ab   :  { %v1058_v62 = vunpack.c.l.s8.bf16 %v866_v61 }
 0x1ac   :  { %719 = vmatprep.mubr.bf16.mxu0 %v280_v63 }
 0x1ad   :  { %720 = vmatmul.mubr.bf16.vlgmr.msra.gmra.mrb[4].mxu0 %v3751_v60  ;;  %1228 = vmatprep.subr.bf16.mxu1 %v1058_v62 }
 0x1ae   :  { %731 = vmatpush1.bf16.msra.mxu0 %v3170_v0  ;;  %762 = vmatprep.mubr.bf16.mxu0 %v280_v63  ;;  %v1066_v63 = vunpack.c.h.s8.bf16 %v866_v61  ;;  %v865_v0 = vld [vmem:[#allocation11 + $0x200] sm:$0xff] }
 0x1af   :  { %732 = vmatprep.subr.bf16.mxu0 %v3175_v1  ;;  %v913_v61 = vld [vmem:[#allocation11 + $0x380] sm:$0xff] }
 0x1b0   :  { %v1153_v62 = vunpack.c.l.s8.bf16 %v913_v61 }
 0x1b2   :  { %733 = vmatpush1.bf16.msra.mxu0 %v3173_v2  ;;  %v1057_v2 = vunpack.c.l.s8.bf16 %v865_v0 }
 0x1b3   :  { %734 = vmatprep.subr.bf16.mxu0 %v3178_v3  ;;  %v1002_v3 = vunpack.c.h.s8.bf16 %v834_v57 }
 0x1b4   :  { %1229 = vmatpush1.bf16.msra.mxu1 %v1057_v2 }
 0x1b5   :  { %1230 = vmatprep.subr.bf16.mxu1 %v1066_v63 }
 0x1b6   :  { %735 = vmatpush1.bf16.msra.mxu0 %v3176_v4  ;;  %v842_v4 = vld [vmem:[#allocation11 + $0x148] sm:$0xff] }
 0x1b7   :  { %736 = vmatprep.subr.bf16.mxu0 %v3181_v5  ;;  %v1065_v5 = vunpack.c.h.s8.bf16 %v865_v0  ;;  %v1161_v0 = vunpack.c.h.s8.bf16 %v913_v61 }
 0x1b9   :  { %1231 = vmatpush1.bf16.msra.mxu1 %v1065_v5 }
 0x1ba   :  { %737 = vmatpush1.bf16.msra.mxu0 %v3179_v6 }
 0x1bb   :  { %738 = vmatprep.subr.bf16.mxu0 %v3184_v7  ;;  %v1010_v7 = vunpack.c.l.s8.bf16 %v842_v4 }
 0x1be   :  { %739 = vmatpush1.bf16.msra.mxu0 %v3182_v8  ;;  %v841_v8 = vld [vmem:[#allocation11 + $0x140] sm:$0xff] }
 0x1bf   :  { %740 = vmatprep.subr.bf16.mxu0 %v3187_v9  ;;  %v874_v9 = vld [vmem:[#allocation11 + $0x248] sm:$0xff] }
 0x1c2   :  { %741 = vmatpush1.bf16.msra.mxu0 %v3185_v10  ;;  %v1074_v10 = vunpack.c.l.s8.bf16 %v874_v9 }
 0x1c3   :  { %742 = vmatprep.subr.bf16.mxu0 %v3190_v11  ;;  %v873_v11 = vld [vmem:[#allocation11 + $0x240] sm:$0xff] }
 0x1c4   :  { %1232 = vmatprep.subr.bf16.mxu1 %v1074_v10 }
 0x1c6   :  { %743 = vmatpush1.bf16.msra.mxu0 %v3188_v12  ;;  %v1009_v12 = vunpack.c.l.s8.bf16 %v841_v8 }
 0x1c7   :  { %744 = vmatprep.subr.bf16.mxu0 %v3193_v13  ;;  %v1073_v13 = vunpack.c.l.s8.bf16 %v873_v11 }
 0x1c9   :  { %1233 = vmatpush1.bf16.msra.mxu1 %v1073_v13 }
 0x1ca   :  { %745 = vmatpush1.bf16.msra.mxu0 %v3191_v14  ;;  %v1018_v14 = vunpack.c.h.s8.bf16 %v842_v4 }
 0x1cb   :  { %746 = vmatprep.subr.bf16.mxu0 %v3196_v15  ;;  %v850_v15 = vld [vmem:[#allocation11 + $0x188] sm:$0xff] }
 0x1ce   :  { %747 = vmatpush1.bf16.msra.mxu0 %v3194_v16  ;;  %v1082_v16 = vunpack.c.h.s8.bf16 %v874_v9  ;;  %v3761_v9 = vld [vmem:[#allocation10] sm:$0xf] }
 0x1cf   :  { %748 = vmatprep.subr.bf16.mxu0 %v3199_v17  ;;  %v1081_v17 = vunpack.c.h.s8.bf16 %v873_v11  ;;  %v350_v10 = vrot.slane %v3761_v9, %v3744_v41  ;;  %v354_v11 = vrot.slane %v3761_v9, %v3747_v43 }
 0x1d0   :  { %1234 = vmatprep.subr.bf16.mxu1 %v1082_v16 }
 0x1d1   :  { %1235 = vmatpush1.bf16.msra.mxu1 %v1081_v17 }
 0x1d2   :  { %749 = vmatpush1.bf16.msra.mxu0 %v3197_v18  ;;  %v1017_v18 = vunpack.c.h.s8.bf16 %v841_v8 }
 0x1d3   :  { %750 = vmatprep.subr.bf16.mxu0 %v3202_v19  ;;  %v1026_v19 = vunpack.c.l.s8.bf16 %v850_v15 }
 0x1d6   :  { %751 = vmatpush1.bf16.msra.mxu0 %v3200_v20  ;;  %v849_v20 = vld [vmem:[#allocation11 + $0x180] sm:$0xff] }
 0x1d7   :  { %752 = vmatprep.subr.bf16.mxu0 %v3205_v21  ;;  %v882_v21 = vld [vmem:[#allocation11 + $0x288] sm:$0xff]  ;;  %v1033_v30 = vunpack.c.h.s8.bf16 %v849_v20 }
 0x1da   :  { %753 = vmatpush1.bf16.msra.mxu0 %v3203_v22  ;;  %v1090_v22 = vunpack.c.l.s8.bf16 %v882_v21 }
 0x1db   :  { %754 = vmatprep.subr.bf16.mxu0 %v3208_v23  ;;  %v881_v23 = vld [vmem:[#allocation11 + $0x280] sm:$0xff] }
 0x1dc   :  { %1236 = vmatprep.subr.bf16.mxu1 %v1090_v22 }
 0x1de   :  { %755 = vmatpush1.bf16.msra.mxu0 %v3206_v24  ;;  %v1025_v24 = vunpack.c.l.s8.bf16 %v849_v20 }
 0x1df   :  { %756 = vmatprep.subr.bf16.mxu0 %v3211_v25  ;;  %v1089_v25 = vunpack.c.l.s8.bf16 %v881_v23 }
 0x1e1   :  { %1237 = vmatpush1.bf16.msra.mxu1 %v1089_v25 }
 0x1e2   :  { %757 = vmatpush1.bf16.msra.mxu0 %v3209_v26  ;;  %v1034_v26 = vunpack.c.h.s8.bf16 %v850_v15 }
 0x1e3   :  { %758 = vmatprep.subr.bf16.mxu0 %v3214_v27  ;;  %v858_v27 = vld [vmem:[#allocation11 + $0x1c8] sm:$0xff] }
 0x1e6   :  { %759 = vmatpush1.bf16.msra.mxu0 %v3212_v28  ;;  %v1098_v28 = vunpack.c.h.s8.bf16 %v882_v21 }
 0x1e7   :  { %760 = vmatprep.subr.bf16.mxu0 %v3217_v29  ;;  %v1097_v29 = vunpack.c.h.s8.bf16 %v881_v23 }
 0x1e8   :  { %1238 = vmatprep.subr.bf16.mxu1 %v1098_v28 }
 0x1e9   :  { %1239 = vmatpush1.bf16.msra.mxu1 %v1097_v29 }
 0x1ea   :  { %761 = vmatpush1.bf16.msra.mxu0 %v3215_v31  ;;  %v1042_v31 = vunpack.c.l.s8.bf16 %v858_v27 }
 0x1eb   :  { %1185 = vmatprep.subr.bf16.mxu0 %v930_v32  ;;  %v857_v32 = vld [vmem:[#allocation11 + $0x1c0] sm:$0xff] }
 0x1ec   :  { %v1041_v36 = vunpack.c.l.s8.bf16 %v857_v32  ;;  %v1049_v45 = vunpack.c.h.s8.bf16 %v857_v32  ;;  %v940_v32 = vunpack.c.h.s8.bf16 %v3755_v39 }
 0x1ed   :  { %763 = vmatmul.mubr.bf16.vlgmr.msra.gmra.mrb[8].mxu0 %v3751_v60  ;;  %v833_v60 = vld [vmem:[#allocation11 + $0x100] sm:$0xff] }
 0x1ee   :  { %1186 = vmatpush1.bf16.msra.mxu0 %v929_v34  ;;  %v993_v1 = vunpack.c.l.s8.bf16 %v833_v60  ;;  %v1001_v6 = vunpack.c.h.s8.bf16 %v833_v60  ;;  %v1106_v34 = vunpack.c.l.s8.bf16 %v890_v33 }
 0x1ef   :  { %1187 = vmatprep.subr.bf16.mxu0 %v938_v35  ;;  %v889_v35 = vld [vmem:[#allocation11 + $0x2c0] sm:$0xff] }
 0x1f0   :  { %1240 = vmatprep.subr.bf16.mxu1 %v1106_v34 }
 0x1f2   :  { %1188 = vmatpush1.bf16.msra.mxu0 %v937_v37  ;;  %v1105_v37 = vunpack.c.l.s8.bf16 %v889_v35 }
 0x1f3   :  { %1189 = vmatprep.subr.bf16.mxu0 %v946_v38  ;;  %v1050_v38 = vunpack.c.h.s8.bf16 %v858_v27 }
 0x1f4   :  { %1241 = vmatpush1.bf16.msra.mxu1 %v1105_v37 }
 0x1f6   :  { %1190 = vmatpush1.bf16.msra.mxu0 %v945_v42  ;;  %v1114_v42 = vunpack.c.h.s8.bf16 %v890_v33  ;;  %v812_v33 = vld [vmem:[#allocation11 + $0x58] sm:$0xff] }
 0x1f7   :  { %1191 = vmatprep.subr.bf16.mxu0 %v954_v44  ;;  %v1113_v44 = vunpack.c.h.s8.bf16 %v889_v35  ;;  %v948_v35 = vunpack.c.l.s8.bf16 %v812_v33 }
 0x1f8   :  { %1242 = vmatprep.subr.bf16.mxu1 %v1114_v42  ;;  %v820_v42 = vld [vmem:[#allocation11 + $0x98] sm:$0xff] }
 0x1f9   :  { %1243 = vmatpush1.bf16.msra.mxu1 %v1113_v44 }
 0x1fa   :  { %1192 = vmatpush1.bf16.msra.mxu0 %v953_v46  ;;  %v932_v46 = vunpack.c.l.s8.bf16 %v3755_v39  ;;  %v964_v39 = vunpack.c.l.s8.bf16 %v820_v42 }
 0x1fb   :  { %1193 = vmatprep.subr.bf16.mxu0 %v962_v47  ;;  %v898_v47 = vld [vmem:[#allocation11 + $0x308] sm:$0xff] }
 0x1fc   :  { %v1122_v48 = vunpack.c.l.s8.bf16 %v898_v47  ;;  %v1130_v51 = vunpack.c.h.s8.bf16 %v898_v47  ;;  %v972_v47 = vunpack.c.h.s8.bf16 %v820_v42 }
 0x1fe   :  { %1194 = vmatpush1.bf16.msra.mxu0 %v961_v49  ;;  %v897_v49 = vld [vmem:[#allocation11 + $0x300] sm:$0xff]  ;;  %1244 = vmatprep.subr.bf16.mxu1 %v1122_v48  ;;  %v828_v48 = vld [vmem:[#allocation11 + $0xd8] sm:$0xff] }
 0x1ff   :  { %1195 = vmatprep.subr.bf16.mxu0 %v970_v50  ;;  %v1121_v50 = vunpack.c.l.s8.bf16 %v897_v49 }
 0x201   :  { %1245 = vmatpush1.bf16.msra.mxu1 %v1121_v50  ;;  %v980_v50 = vunpack.c.l.s8.bf16 %v828_v48 }
 0x202   :  { %1196 = vmatpush1.bf16.msra.mxu0 %v969_v52  ;;  %v1129_v52 = vunpack.c.h.s8.bf16 %v897_v49  ;;  %1246 = vmatprep.subr.bf16.mxu1 %v1130_v51  ;;  %v827_v51 = vld [vmem:[#allocation11 + $0xd0] sm:$0xff] }
 0x203   :  { %1197 = vmatprep.subr.bf16.mxu0 %v978_v53  ;;  %v906_v53 = vld [vmem:[#allocation11 + $0x348] sm:$0xff] }
 0x204   :  { %v1138_v54 = vunpack.c.l.s8.bf16 %v906_v53  ;;  %v1146_v57 = vunpack.c.h.s8.bf16 %v906_v53  ;;  %v988_v53 = vunpack.c.h.s8.bf16 %v828_v48 }
 0x205   :  { %1247 = vmatpush1.bf16.msra.mxu1 %v1129_v52  ;;  %v979_v52 = vunpack.c.l.s8.bf16 %v827_v51 }
 0x206   :  { %1198 = vmatpush1.bf16.msra.mxu0 %v977_v55  ;;  %v905_v55 = vld [vmem:[#allocation11 + $0x340] sm:$0xff]  ;;  %1248 = vmatprep.subr.bf16.mxu1 %v1138_v54  ;;  %v836_v54 = vld [vmem:[#allocation11 + $0x118] sm:$0xff] }
 0x207   :  { %1199 = vmatprep.subr.bf16.mxu0 %v986_v56  ;;  %v1137_v56 = vunpack.c.l.s8.bf16 %v905_v55 }
 0x209   :  { %1249 = vmatpush1.bf16.msra.mxu1 %v1137_v56  ;;  %v996_v56 = vunpack.c.l.s8.bf16 %v836_v54 }
 0x20a   :  { %1200 = vmatpush1.bf16.msra.mxu0 %v985_v58  ;;  %v1145_v58 = vunpack.c.h.s8.bf16 %v905_v55  ;;  %1250 = vmatprep.subr.bf16.mxu1 %v1146_v57  ;;  %v987_v55 = vunpack.c.h.s8.bf16 %v827_v51  ;;  %v835_v57 = vld [vmem:[#allocation11 + $0x110] sm:$0xff]  ;;  %v814_v51 = vld [vmem:[#allocation11 + $0x68] sm:$0xff] }
 0x20b   :  { %1201 = vmatprep.subr.bf16.mxu0 %v994_v59  ;;  %v914_v59 = vld [vmem:[#allocation11 + $0x388] sm:$0xff]  ;;  %v1003_v61 = vunpack.c.h.s8.bf16 %v835_v57 }
 0x20c   :  { %v1154_v60 = vunpack.c.l.s8.bf16 %v914_v59  ;;  %v1162_v63 = vunpack.c.h.s8.bf16 %v914_v59  ;;  %v1004_v59 = vunpack.c.h.s8.bf16 %v836_v54 }
 0x20d   :  { %1251 = vmatpush1.bf16.msra.mxu1 %v1145_v58  ;;  %v995_v58 = vunpack.c.l.s8.bf16 %v835_v57  ;;  %v813_v57 = vld [vmem:[#allocation11 + $0x60] sm:$0xff] }
 0x20e   :  { %1202 = vmatpush1.bf16.msra.mxu0 %v993_v1  ;;  %1252 = vmatprep.subr.bf16.mxu1 %v1154_v60  ;;  %v922_v1 = vld [vmem:[#allocation11 + $0x3c8] sm:$0xff]  ;;  %v844_v60 = vld [vmem:[#allocation11 + $0x158] sm:$0xff] }
 0x20f   :  { %1203 = vmatprep.subr.bf16.mxu0 %v1002_v3  ;;  %v1170_v2 = vunpack.c.l.s8.bf16 %v922_v1  ;;  %v921_v3 = vld [vmem:[#allocation11 + $0x3c0] sm:$0xff]  ;;  %v1178_v5 = vunpack.c.h.s8.bf16 %v922_v1  ;;  %v1020_v1 = vunpack.c.h.s8.bf16 %v844_v60 }
 0x210   :  { %v1169_v4 = vunpack.c.l.s8.bf16 %v921_v3 }
 0x211   :  { %1253 = vmatpush1.bf16.msra.mxu1 %v1153_v62  ;;  %v1012_v62 = vunpack.c.l.s8.bf16 %v844_v60  ;;  %v958_v60 = vunpack.c.h.s8.bf16 %v814_v51 }
 0x212   :  { %1204 = vmatpush1.bf16.msra.mxu0 %v1001_v6  ;;  %1254 = vmatprep.subr.bf16.mxu1 %v1162_v63  ;;  %v1177_v6 = vunpack.c.h.s8.bf16 %v921_v3  ;;  %v843_v63 = vld [vmem:[#allocation11 + $0x150] sm:$0xff] }
 0x213   :  { %1205 = vmatprep.subr.bf16.mxu0 %v1010_v7  ;;  %v3758_v7 = vld [vmem:[#allocation11 + $0x28] sm:$0xff]  ;;  %v1019_v3 = vunpack.c.h.s8.bf16 %v843_v63 }
 0x214   :  { %v934_v8 = vunpack.c.l.s8.bf16 %v3758_v7 }
 0x215   :  { %1255 = vmatpush1.bf16.msra.mxu1 %v1161_v0  ;;  %v1011_v0 = vunpack.c.l.s8.bf16 %v843_v63  ;;  %v884_v63 = vld [vmem:[#allocation11 + $0x298] sm:$0xff] }
 0x216   :  { %1206 = vmatpush1.bf16.msra.mxu0 %v1009_v12  ;;  %1256 = vmatprep.subr.bf16.mxu1 %v1170_v2  ;;  %v852_v2 = vld [vmem:[#allocation11 + $0x198] sm:$0xff] }
 0x217   :  { %1207 = vmatprep.subr.bf16.mxu0 %v1018_v14 }
 0x219   :  { %1257 = vmatpush1.bf16.msra.mxu1 %v1169_v4  ;;  %v1028_v4 = vunpack.c.l.s8.bf16 %v852_v2 }
 0x21a   :  { %1208 = vmatpush1.bf16.msra.mxu0 %v1017_v18  ;;  %1258 = vmatprep.subr.bf16.mxu1 %v1178_v5  ;;  %v851_v5 = vld [vmem:[#allocation11 + $0x190] sm:$0xff] }
 0x21b   :  { %1209 = vmatprep.subr.bf16.mxu0 %v1026_v19 }
 0x21d   :  { %1259 = vmatpush1.bf16.msra.mxu1 %v1177_v6  ;;  %v1027_v6 = vunpack.c.l.s8.bf16 %v851_v5 }
 0x21e   :  { %1210 = vmatpush1.bf16.msra.mxu0 %v1025_v24  ;;  %1357 = vmatprep.subr.bf16.mxu1 %v934_v8  ;;  %v803_v24 = vld [vmem:[#allocation11 + $0x10] sm:$0xff]  ;;  %v3776_v8 = vsub.s32 2, %v3741_v40 }
 0x21f   :  { %1211 = vmatprep.subr.bf16.mxu0 %v1034_v26  ;;  %v939_v34 = vunpack.c.h.s8.bf16 %v803_v24 }
 0x222   :  { %1212 = vmatpush1.bf16.msra.mxu0 %v1033_v30 }
 0x223   :  { %1213 = vmatprep.subr.bf16.mxu0 %v1042_v31  ;;  %v931_v31 = vunpack.c.l.s8.bf16 %v803_v24 }
 0x226   :  { %1214 = vmatpush1.bf16.msra.mxu0 %v1041_v36  ;;  %v811_v36 = vld [vmem:[#allocation11 + $0x50] sm:$0xff] }
 0x227   :  { %1215 = vmatprep.subr.bf16.mxu0 %v1050_v38  ;;  %v947_v37 = vunpack.c.l.s8.bf16 %v811_v36  ;;  %v956_v38 = vunpack.c.h.s8.bf16 %v812_v33  ;;  %v955_v44 = vunpack.c.h.s8.bf16 %v811_v36  ;;  %v805_v36 = vld [vmem:[#allocation11 + $0x20] sm:$0xff] }
 0x22a   :  { %1216 = vmatpush1.bf16.msra.mxu0 %v1049_v45  ;;  %v819_v45 = vld [vmem:[#allocation11 + $0x90] sm:$0xff] }
 0x22b   :  { %1271 = vmatprep.subr.bf16.mxu0 %v932_v46  ;;  %v963_v46 = vunpack.c.l.s8.bf16 %v819_v45  ;;  %v971_v49 = vunpack.c.h.s8.bf16 %v819_v45 }
 0x280   :  { %v721_v12 = vpop.f32.mrb[4].mxu0 }
 0x281   :  { %v722_v13 = vadd.f32 %v721_v12, %v350_v10  ;;  %v723_v14 = vpop.f32.mrb[5].mxu0  ;;  %v860_v12 = vld [vmem:[#allocation11 + $0x1d8] sm:$0xff] }
 0x282   :  { %v724_v15 = vadd.f32 %v723_v14, %v354_v11  ;;  %v725_v16 = vpop.f32.mrb[6].mxu0  ;;  %v1035_v14 = vunpack.c.h.s8.bf16 %v851_v5  ;;  %v1052_v24 = vunpack.c.h.s8.bf16 %v860_v12  ;;  %v883_v5 = vld [vmem:[#allocation11 + $0x290] sm:$0xff] }
 0x283   :  { %v781_v17 = vmul.f32 0.2, %v722_v13  ;;  %v726_v18 = vadd.f32 %v725_v16, %v350_v10  ;;  %v727_v19 = vpop.f32.mrb[7].mxu0  ;;  %vm773_vm5 = vcmp.gt.f32.partialorder %v722_v13, 0.0  ;;  %v1036_v10 = vunpack.c.h.s8.bf16 %v852_v2 }
 0x284   :  { %v782_v20 = vmul.f32 0.2, %v724_v15  ;;  %v728_v21 = vadd.f32 %v727_v19, %v354_v11  ;;  %vm774_vm6 = vcmp.gt.f32.partialorder %v724_v15, 0.0  ;;  %v3779_v11 = vsub.s32 3, %v3741_v40 }
 0x285   :  { %vm777_vm7 = vcmp.gt.f32.partialorder %v726_v18, 0.0  ;;  %v785_v22 = vmul.f32 0.2, %v726_v18  ;;  %v789_v25 = vsel %vm773_vm5, %v722_v13, %v781_v17  ;;  %v358_v13 = vrot.slane %v3761_v9, %v3776_v8  ;;  %v859_v17 = vld [vmem:[#allocation11 + $0x1d0] sm:$0xff] }
 0x286   :  { %vm778_vm8 = vcmp.gt.f32.partialorder %v728_v21, 0.0  ;;  %v786_v23 = vmul.f32 0.2, %v728_v21  ;;  %v790_v27 = vsel %vm774_vm6, %v724_v15, %v782_v20  ;;  %v362_v15 = vrot.slane %v3761_v9, %v3779_v11 }
 0x287   :  { %v793_v26 = vsel %vm777_vm7, %v726_v18, %v785_v22  ;;  %v1044_v16 = vunpack.c.l.s8.bf16 %v860_v12  ;;  %v1051_v33 = vunpack.c.h.s8.bf16 %v859_v17 }
 0x288   :  { %v3767_v28 = vpack.c.bf16 %v793_v26, %v789_v25  ;;  %v794_v29 = vsel %vm778_vm8, %v728_v21, %v786_v23  ;;  %v1043_v21 = vunpack.c.l.s8.bf16 %v859_v17  ;;  %v1099_v17 = vunpack.c.h.s8.bf16 %v883_v5 }
 0x289   :  { %v3769_v30 = vpack.c.bf16 %v794_v29, %v790_v27  ;;  %v868_v29 = vld [vmem:[#allocation11 + $0x218] sm:$0xff] }
 0x28b   :  { %1217 = vmatprep.mubr.bf16.mxu0 %v3769_v30 }
 0x28c   :  { %1218 = vmatmul.mubr.bf16.vlgmr.msra.gmra.mrb[12].mxu0 %v3767_v28 }
 0x28d   :  { %1272 = vmatpush1.bf16.msra.mxu0 %v931_v31  ;;  %1303 = vmatprep.mubr.bf16.mxu0 %v3769_v30 }
 0x28e   :  { %1273 = vmatprep.subr.bf16.mxu0 %v940_v32 }
 0x291   :  { %1274 = vmatpush1.bf16.msra.mxu0 %v939_v34 }
 0x292   :  { %1275 = vmatprep.subr.bf16.mxu0 %v948_v35  ;;  %v1060_v35 = vunpack.c.l.s8.bf16 %v868_v29 }
 0x295   :  { %1276 = vmatpush1.bf16.msra.mxu0 %v947_v37  ;;  %v867_v37 = vld [vmem:[#allocation11 + $0x210] sm:$0xff] }
 0x296   :  { %1277 = vmatprep.subr.bf16.mxu0 %v956_v38  ;;  %v1059_v48 = vunpack.c.l.s8.bf16 %v867_v37  ;;  %v1067_v54 = vunpack.c.h.s8.bf16 %v867_v37 }
 0x299   :  { %1278 = vmatpush1.bf16.msra.mxu0 %v955_v44 }
 0x29a   :  { %1279 = vmatprep.subr.bf16.mxu0 %v964_v39 }
 0x29d   :  { %1280 = vmatpush1.bf16.msra.mxu0 %v963_v46 }
 0x29e   :  { %1281 = vmatprep.subr.bf16.mxu0 %v972_v47  ;;  %v933_v47 = vunpack.c.l.s8.bf16 %v805_v36 }
 0x2a1   :  { %1282 = vmatpush1.bf16.msra.mxu0 %v971_v49  ;;  %v942_v49 = vunpack.c.h.s8.bf16 %v3758_v7  ;;  %v949_v7 = vunpack.c.l.s8.bf16 %v813_v57 }
 0x2a2   :  { %1283 = vmatprep.subr.bf16.mxu0 %v980_v50  ;;  %v1068_v50 = vunpack.c.h.s8.bf16 %v868_v29 }
 0x2a5   :  { %1284 = vmatpush1.bf16.msra.mxu0 %v979_v52  ;;  %v876_v52 = vld [vmem:[#allocation11 + $0x258] sm:$0xff] }
 0x2a6   :  { %1285 = vmatprep.subr.bf16.mxu0 %v988_v53  ;;  %v941_v53 = vunpack.c.h.s8.bf16 %v805_v36 }
 0x2a9   :  { %1286 = vmatpush1.bf16.msra.mxu0 %v987_v55  ;;  %v950_v55 = vunpack.c.l.s8.bf16 %v814_v51  ;;  %v907_v51 = vld [vmem:[#allocation11 + $0x350] sm:$0xff] }
 0x2aa   :  { %1287 = vmatprep.subr.bf16.mxu0 %v996_v56  ;;  %v1076_v56 = vunpack.c.l.s8.bf16 %v876_v52 }
 0x2ad   :  { %1288 = vmatpush1.bf16.msra.mxu0 %v995_v58  ;;  %v875_v58 = vld [vmem:[#allocation11 + $0x250] sm:$0xff] }
 0x2ae   :  { %1289 = vmatprep.subr.bf16.mxu0 %v1004_v59  ;;  %v1075_v59 = vunpack.c.l.s8.bf16 %v875_v58 }
 0x2b1   :  { %1290 = vmatpush1.bf16.msra.mxu0 %v1003_v61  ;;  %v1084_v61 = vunpack.c.h.s8.bf16 %v876_v52 }
 0x2b2   :  { %1291 = vmatprep.subr.bf16.mxu0 %v1012_v62  ;;  %v822_v62 = vld [vmem:[#allocation11 + $0xa8] sm:$0xff] }
 0x2b3   :  { %v966_v2 = vunpack.c.l.s8.bf16 %v822_v62  ;;  %v974_v12 = vunpack.c.h.s8.bf16 %v822_v62  ;;  %v915_v62 = vld [vmem:[#allocation11 + $0x390] sm:$0xff] }
 0x2b5   :  { %1292 = vmatpush1.bf16.msra.mxu0 %v1011_v0  ;;  %v957_v0 = vunpack.c.h.s8.bf16 %v813_v57  ;;  %v916_v57 = vld [vmem:[#allocation11 + $0x398] sm:$0xff] }
 0x2b6   :  { %1293 = vmatprep.subr.bf16.mxu0 %v1020_v1  ;;  %v1083_v1 = vunpack.c.h.s8.bf16 %v875_v58 }
 0x2b9   :  { %1294 = vmatpush1.bf16.msra.mxu0 %v1019_v3  ;;  %v1092_v3 = vunpack.c.l.s8.bf16 %v884_v63 }
 0x2ba   :  { %1295 = vmatprep.subr.bf16.mxu0 %v1028_v4  ;;  %v821_v4 = vld [vmem:[#allocation11 + $0xa0] sm:$0xff] }
 0x2bd   :  { %1296 = vmatpush1.bf16.msra.mxu0 %v1027_v6  ;;  %v965_v6 = vunpack.c.l.s8.bf16 %v821_v4 }
 0x2be   :  { %1297 = vmatprep.subr.bf16.mxu0 %v1036_v10  ;;  %v1091_v10 = vunpack.c.l.s8.bf16 %v883_v5 }
 0x2c0   :  { %v764_v18 = vpop.f32.mrb[8].mxu0 }
 0x2c1   :  { %v765_v19 = vadd.f32 %v764_v18, %v358_v13  ;;  %v766_v20 = vpop.f32.mrb[9].mxu0  ;;  %1298 = vmatpush1.bf16.msra.mxu0 %v1035_v14  ;;  %v830_v14 = vld [vmem:[#allocation11 + $0xe8] sm:$0xff] }
 0x2c2   :  { %v767_v22 = vadd.f32 %v766_v20, %v362_v15  ;;  %v768_v23 = vpop.f32.mrb[10].mxu0  ;;  %1299 = vmatprep.subr.bf16.mxu0 %v1044_v16  ;;  %v973_v16 = vunpack.c.h.s8.bf16 %v821_v4  ;;  %v982_v18 = vunpack.c.l.s8.bf16 %v830_v14  ;;  %v829_v20 = vld [vmem:[#allocation11 + $0xe0] sm:$0xff]  ;;  %v924_v4 = vld [vmem:[#allocation11 + $0x3d8] sm:$0xff] }
 0x2c3   :  { %v783_v25 = vmul.f32 0.2, %v765_v19  ;;  %v769_v26 = vadd.f32 %v768_v23, %v358_v13  ;;  %v770_v27 = vpop.f32.mrb[11].mxu0  ;;  %vm775_vm9 = vcmp.gt.f32.partialorder %v765_v19, 0.0  ;;  %v1100_v13 = vunpack.c.h.s8.bf16 %v884_v63 }
 0x2c4   :  { %v784_v31 = vmul.f32 0.2, %v767_v22  ;;  %v771_v32 = vadd.f32 %v770_v27, %v362_v15  ;;  %vm776_vm10 = vcmp.gt.f32.partialorder %v767_v22, 0.0  ;;  %v892_v15 = vld [vmem:[#allocation11 + $0x2d8] sm:$0xff]  ;;  %v989_v29 = vunpack.c.h.s8.bf16 %v829_v20 }
 0x2c5   :  { %vm779_vm11 = vcmp.gt.f32.partialorder %v769_v26, 0.0  ;;  %v787_v9 = vmul.f32 0.2, %v769_v26  ;;  %1300 = vmatpush1.bf16.msra.mxu0 %v1043_v21  ;;  %v791_v38 = vsel %vm775_vm9, %v765_v19, %v783_v25  ;;  %v1108_v19 = vunpack.c.l.s8.bf16 %v892_v15  ;;  %v891_v21 = vld [vmem:[#allocation11 + $0x2d0] sm:$0xff]  ;;  %v900_v27 = vld [vmem:[#allocation11 + $0x318] sm:$0xff] }
 0x2c6   :  { %vm780_vm12 = vcmp.gt.f32.partialorder %v771_v32, 0.0  ;;  %v788_v34 = vmul.f32 0.2, %v771_v32  ;;  %1301 = vmatprep.subr.bf16.mxu0 %v1052_v24  ;;  %v792_v44 = vsel %vm776_vm10, %v767_v22, %v784_v31  ;;  %v981_v22 = vunpack.c.l.s8.bf16 %v829_v20  ;;  %v808_v20 = vld [vmem:[#allocation11 + $0x38] sm:$0xff] }
 0x2c7   :  { %v795_v42 = vsel %vm779_vm11, %v769_v26, %v787_v9  ;;  %v1107_v23 = vunpack.c.l.s8.bf16 %v891_v21  ;;  %v990_v24 = vunpack.c.h.s8.bf16 %v830_v14  ;;  %v1116_v25 = vunpack.c.h.s8.bf16 %v892_v15  ;;  %v838_v26 = vld [vmem:[#allocation11 + $0x128] sm:$0xff]  ;;  %v923_v14 = vld [vmem:[#allocation11 + $0x3d0] sm:$0xff] }
 0x2c8   :  { %v3785_v39 = vpack.c.bf16 %v795_v42, %v791_v38  ;;  %v796_v45 = vsel %vm780_vm12, %v771_v32, %v788_v34  ;;  %v1115_v31 = vunpack.c.h.s8.bf16 %v891_v21  ;;  %v998_v32 = vunpack.c.l.s8.bf16 %v838_v26  ;;  %v899_v34 = vld [vmem:[#allocation11 + $0x310] sm:$0xff]  ;;  %v846_v42 = vld [vmem:[#allocation11 + $0x168] sm:$0xff] }
 0x2c9   :  { %v3787_v46 = vpack.c.bf16 %v796_v45, %v792_v44  ;;  %1302 = vmatpush1.bf16.msra.mxu0 %v1051_v33  ;;  %v1124_v9 = vunpack.c.l.s8.bf16 %v900_v27  ;;  %v837_v33 = vld [vmem:[#allocation11 + $0x120] sm:$0xff]  ;;  %v1123_v36 = vunpack.c.l.s8.bf16 %v899_v34  ;;  %v1006_v37 = vunpack.c.h.s8.bf16 %v838_v26  ;;  %v908_v44 = vld [vmem:[#allocation11 + $0x358] sm:$0xff]  ;;  %v807_v26 = vld [vmem:[#allocation11 + $0x30] sm:$0xff] }
 0x2ca   :  { %1314 = vmatprep.subr.bf16.mxu0 %v1060_v35  ;;  %v997_v35 = vunpack.c.l.s8.bf16 %v837_v33  ;;  %v1132_v38 = vunpack.c.h.s8.bf16 %v900_v27  ;;  %v1005_v45 = vunpack.c.h.s8.bf16 %v837_v33  ;;  %v816_v33 = vld [vmem:[#allocation11 + $0x78] sm:$0xff] }
 0x2cb   :  { %1260 = vmatprep.mubr.bf16.mxu1 %v3787_v46 }
 0x2cc   :  { %1261 = vmatmul.mubr.bf16.vlgmr.msra.gmra.mrb[0].mxu1 %v3785_v39  ;;  %1304 = vmatmul.mubr.bf16.vlgmr.msra.gmra.mrb[16].mxu0 %v3767_v28 }
 0x2cd   :  { %1358 = vmatpush1.bf16.msra.mxu1 %v933_v47  ;;  %1315 = vmatpush1.bf16.msra.mxu0 %v1059_v48  ;;  %v1131_v47 = vunpack.c.h.s8.bf16 %v899_v34  ;;  %v1014_v48 = vunpack.c.l.s8.bf16 %v846_v42 }
 0x2ce   :  { %1346 = vmatprep.mubr.bf16.mxu0 %v3787_v46  ;;  %1389 = vmatprep.mubr.bf16.mxu1 %v3769_v30 }
 0x2cf   :  { %1359 = vmatprep.subr.bf16.mxu1 %v942_v49  ;;  %1316 = vmatprep.subr.bf16.mxu0 %v1068_v50  ;;  %v1140_v49 = vunpack.c.l.s8.bf16 %v908_v44  ;;  %v845_v50 = vld [vmem:[#allocation11 + $0x160] sm:$0xff] }
 0x2d0   :  { %v1013_v52 = vunpack.c.l.s8.bf16 %v845_v50  ;;  %v1021_v58 = vunpack.c.h.s8.bf16 %v845_v50  ;;  %v824_v50 = vld [vmem:[#allocation11 + $0xb8] sm:$0xff] }
 0x2d1   :  { %1360 = vmatpush1.bf16.msra.mxu1 %v941_v53  ;;  %1317 = vmatpush1.bf16.msra.mxu0 %v1067_v54  ;;  %v1139_v53 = vunpack.c.l.s8.bf16 %v907_v51  ;;  %v1022_v54 = vunpack.c.h.s8.bf16 %v846_v42  ;;  %v815_v42 = vld [vmem:[#allocation11 + $0x70] sm:$0xff] }
 0x2d2   :  { %1361 = vmatprep.subr.bf16.mxu1 %v950_v55  ;;  %1318 = vmatprep.subr.bf16.mxu0 %v1076_v56  ;;  %v1148_v55 = vunpack.c.h.s8.bf16 %v908_v44  ;;  %v854_v56 = vld [vmem:[#allocation11 + $0x1a8] sm:$0xff] }
 0x2d5   :  { %1362 = vmatpush1.bf16.msra.mxu1 %v949_v7  ;;  %1319 = vmatpush1.bf16.msra.mxu0 %v1075_v59  ;;  %v1147_v7 = vunpack.c.h.s8.bf16 %v907_v51  ;;  %v1030_v59 = vunpack.c.l.s8.bf16 %v854_v56 }
 0x2d6   :  { %1363 = vmatprep.subr.bf16.mxu1 %v958_v60  ;;  %1320 = vmatprep.subr.bf16.mxu0 %v1084_v61  ;;  %v1156_v60 = vunpack.c.l.s8.bf16 %v916_v57  ;;  %v853_v61 = vld [vmem:[#allocation11 + $0x1a0] sm:$0xff] }
 0x2d7   :  { %v1029_v63 = vunpack.c.l.s8.bf16 %v853_v61  ;;  %v1037_v5 = vunpack.c.h.s8.bf16 %v853_v61 }
 0x2d9   :  { %1364 = vmatpush1.bf16.msra.mxu1 %v957_v0  ;;  %1321 = vmatpush1.bf16.msra.mxu0 %v1083_v1  ;;  %v1155_v0 = vunpack.c.l.s8.bf16 %v915_v62  ;;  %v1038_v1 = vunpack.c.h.s8.bf16 %v854_v56 }
 0x2da   :  { %1365 = vmatprep.subr.bf16.mxu1 %v966_v2  ;;  %1322 = vmatprep.subr.bf16.mxu0 %v1092_v3  ;;  %v1164_v2 = vunpack.c.h.s8.bf16 %v916_v57  ;;  %v862_v3 = vld [vmem:[#allocation11 + $0x1e8] sm:$0xff] }
 0x2dd   :  { %1366 = vmatpush1.bf16.msra.mxu1 %v965_v6  ;;  %1323 = vmatpush1.bf16.msra.mxu0 %v1091_v10  ;;  %v1163_v6 = vunpack.c.h.s8.bf16 %v915_v62  ;;  %v1046_v10 = vunpack.c.l.s8.bf16 %v862_v3 }
 0x2de   :  { %1367 = vmatprep.subr.bf16.mxu1 %v974_v12  ;;  %1324 = vmatprep.subr.bf16.mxu0 %v1100_v13  ;;  %v1172_v12 = vunpack.c.l.s8.bf16 %v924_v4  ;;  %v861_v13 = vld [vmem:[#allocation11 + $0x1e0] sm:$0xff] }
 0x2df   :  { %v1045_v15 = vunpack.c.l.s8.bf16 %v861_v13  ;;  %v1053_v21 = vunpack.c.h.s8.bf16 %v861_v13 }
 0x2e1   :  { %1368 = vmatpush1.bf16.msra.mxu1 %v973_v16  ;;  %1325 = vmatpush1.bf16.msra.mxu0 %v1099_v17  ;;  %v1171_v16 = vunpack.c.l.s8.bf16 %v923_v14  ;;  %v1054_v17 = vunpack.c.h.s8.bf16 %v862_v3 }
 0x2e2   :  { %1369 = vmatprep.subr.bf16.mxu1 %v982_v18  ;;  %1326 = vmatprep.subr.bf16.mxu0 %v1108_v19  ;;  %v1180_v18 = vunpack.c.h.s8.bf16 %v924_v4  ;;  %v870_v19 = vld [vmem:[#allocation11 + $0x228] sm:$0xff] }
 0x2e5   :  { %1370 = vmatpush1.bf16.msra.mxu1 %v981_v22  ;;  %1327 = vmatpush1.bf16.msra.mxu0 %v1107_v23  ;;  %v1179_v22 = vunpack.c.h.s8.bf16 %v923_v14  ;;  %v1062_v23 = vunpack.c.l.s8.bf16 %v870_v19 }
 0x2e6   :  { %1371 = vmatprep.subr.bf16.mxu1 %v990_v24  ;;  %1328 = vmatprep.subr.bf16.mxu0 %v1116_v25  ;;  %v869_v24 = vld [vmem:[#allocation11 + $0x220] sm:$0xff]  ;;  %v936_v25 = vunpack.c.l.s8.bf16 %v808_v20 }
 0x2e7   :  { %v1061_v27 = vunpack.c.l.s8.bf16 %v869_v24  ;;  %v1069_v34 = vunpack.c.h.s8.bf16 %v869_v24  ;;  %v848_v24 = vld [vmem:[#allocation11 + $0x178] sm:$0xff] }
 0x2e9   :  { %1372 = vmatpush1.bf16.msra.mxu1 %v989_v29  ;;  %1329 = vmatpush1.bf16.msra.mxu0 %v1115_v31  ;;  %v935_v29 = vunpack.c.l.s8.bf16 %v807_v26  ;;  %v1070_v31 = vunpack.c.h.s8.bf16 %v870_v19 }
 0x2ea   :  { %1373 = vmatprep.subr.bf16.mxu1 %v998_v32  ;;  %1330 = vmatprep.subr.bf16.mxu0 %v1124_v9  ;;  %v944_v32 = vunpack.c.h.s8.bf16 %v808_v20  ;;  %v878_v9 = vld [vmem:[#allocation11 + $0x268] sm:$0xff] }
 0x2ed   :  { %1374 = vmatpush1.bf16.msra.mxu1 %v997_v35  ;;  %1331 = vmatpush1.bf16.msra.mxu0 %v1123_v36  ;;  %v943_v35 = vunpack.c.h.s8.bf16 %v807_v26  ;;  %v1078_v36 = vunpack.c.l.s8.bf16 %v878_v9 }
 0x2ee   :  { %1375 = vmatprep.subr.bf16.mxu1 %v1006_v37  ;;  %1332 = vmatprep.subr.bf16.mxu0 %v1132_v38  ;;  %v877_v37 = vld [vmem:[#allocation11 + $0x260] sm:$0xff]  ;;  %v952_v38 = vunpack.c.l.s8.bf16 %v816_v33 }
 0x2ef   :  { %v1077_v44 = vunpack.c.l.s8.bf16 %v877_v37  ;;  %v1085_v51 = vunpack.c.h.s8.bf16 %v877_v37  ;;  %v856_v37 = vld [vmem:[#allocation11 + $0x1b8] sm:$0xff] }
 0x2f1   :  { %1376 = vmatpush1.bf16.msra.mxu1 %v1005_v45  ;;  %1333 = vmatpush1.bf16.msra.mxu0 %v1131_v47  ;;  %v951_v45 = vunpack.c.l.s8.bf16 %v815_v42  ;;  %v1086_v47 = vunpack.c.h.s8.bf16 %v878_v9 }
 0x2f2   :  { %1377 = vmatprep.subr.bf16.mxu1 %v1014_v48  ;;  %1334 = vmatprep.subr.bf16.mxu0 %v1140_v49  ;;  %v960_v48 = vunpack.c.h.s8.bf16 %v816_v33  ;;  %v886_v49 = vld [vmem:[#allocation11 + $0x2a8] sm:$0xff] }
 0x2f5   :  { %1378 = vmatpush1.bf16.msra.mxu1 %v1013_v52  ;;  %1335 = vmatpush1.bf16.msra.mxu0 %v1139_v53  ;;  %v1094_v52 = vunpack.c.l.s8.bf16 %v886_v49  ;;  %v885_v53 = vld [vmem:[#allocation11 + $0x2a0] sm:$0xff] }
 0x2f6   :  { %1379 = vmatprep.subr.bf16.mxu1 %v1022_v54  ;;  %1336 = vmatprep.subr.bf16.mxu0 %v1148_v55  ;;  %v968_v54 = vunpack.c.l.s8.bf16 %v824_v50  ;;  %v823_v55 = vld [vmem:[#allocation11 + $0xb0] sm:$0xff]  ;;  %v1093_v56 = vunpack.c.l.s8.bf16 %v885_v53  ;;  %v1101_v61 = vunpack.c.h.s8.bf16 %v885_v53  ;;  %v864_v53 = vld [vmem:[#allocation11 + $0x1f8] sm:$0xff] }
 0x2f7   :  { %v967_v57 = vunpack.c.l.s8.bf16 %v823_v55  ;;  %v975_v62 = vunpack.c.h.s8.bf16 %v823_v55 }
 0x2f9   :  { %1380 = vmatpush1.bf16.msra.mxu1 %v1021_v58  ;;  %1337 = vmatpush1.bf16.msra.mxu0 %v1147_v7  ;;  %v1102_v58 = vunpack.c.h.s8.bf16 %v886_v49  ;;  %v976_v7 = vunpack.c.h.s8.bf16 %v824_v50 }
 0x2fa   :  { %1381 = vmatprep.subr.bf16.mxu1 %v1030_v59  ;;  %1338 = vmatprep.subr.bf16.mxu0 %v1156_v60  ;;  %v894_v59 = vld [vmem:[#allocation11 + $0x2e8] sm:$0xff]  ;;  %v832_v60 = vld [vmem:[#allocation11 + $0xf8] sm:$0xff] }
 0x2fd   :  { %1382 = vmatpush1.bf16.msra.mxu1 %v1029_v63  ;;  %1339 = vmatpush1.bf16.msra.mxu0 %v1155_v0  ;;  %v1110_v63 = vunpack.c.l.s8.bf16 %v894_v59  ;;  %v893_v0 = vld [vmem:[#allocation11 + $0x2e0] sm:$0xff] }
 0x2fe   :  { %1383 = vmatprep.subr.bf16.mxu1 %v1038_v1  ;;  %1340 = vmatprep.subr.bf16.mxu0 %v1164_v2  ;;  %v984_v1 = vunpack.c.l.s8.bf16 %v832_v60  ;;  %v831_v2 = vld [vmem:[#allocation11 + $0xf0] sm:$0xff]  ;;  %v1109_v3 = vunpack.c.l.s8.bf16 %v893_v0  ;;  %v1117_v13 = vunpack.c.h.s8.bf16 %v893_v0  ;;  %v872_v0 = vld [vmem:[#allocation11 + $0x238] sm:$0xff] }
 0x2ff   :  { %v983_v4 = vunpack.c.l.s8.bf16 %v831_v2  ;;  %v991_v14 = vunpack.c.h.s8.bf16 %v831_v2 }
 0x301   :  { %1384 = vmatpush1.bf16.msra.mxu1 %v1037_v5  ;;  %1341 = vmatpush1.bf16.msra.mxu0 %v1163_v6  ;;  %v1118_v5 = vunpack.c.h.s8.bf16 %v894_v59  ;;  %v992_v6 = vunpack.c.h.s8.bf16 %v832_v60 }
 0x302   :  { %1385 = vmatprep.subr.bf16.mxu1 %v1046_v10  ;;  %1342 = vmatprep.subr.bf16.mxu0 %v1172_v12  ;;  %v902_v10 = vld [vmem:[#allocation11 + $0x328] sm:$0xff]  ;;  %v840_v12 = vld [vmem:[#allocation11 + $0x138] sm:$0xff] }
 0x305   :  { %1386 = vmatpush1.bf16.msra.mxu1 %v1045_v15  ;;  %1343 = vmatpush1.bf16.msra.mxu0 %v1171_v16  ;;  %v1126_v15 = vunpack.c.l.s8.bf16 %v902_v10  ;;  %v901_v16 = vld [vmem:[#allocation11 + $0x320] sm:$0xff] }
 0x306   :  { %1387 = vmatprep.subr.bf16.mxu1 %v1054_v17  ;;  %1344 = vmatprep.subr.bf16.mxu0 %v1180_v18  ;;  %v1000_v17 = vunpack.c.l.s8.bf16 %v840_v12  ;;  %v839_v18 = vld [vmem:[#allocation11 + $0x130] sm:$0xff]  ;;  %v1125_v19 = vunpack.c.l.s8.bf16 %v901_v16 }
 0x307   :  { %v999_v20 = vunpack.c.l.s8.bf16 %v839_v18  ;;  %v1007_v26 = vunpack.c.h.s8.bf16 %v839_v18 }
 0x309   :  { %1388 = vmatpush1.bf16.msra.mxu1 %v1053_v21  ;;  %1345 = vmatpush1.bf16.msra.mxu0 %v1179_v22  ;;  %v1134_v21 = vunpack.c.h.s8.bf16 %v902_v10  ;;  %v1008_v22 = vunpack.c.h.s8.bf16 %v840_v12 }
 0x30a   :  { %1400 = vmatprep.subr.bf16.mxu1 %v1062_v23  ;;  %1443 = vmatprep.subr.bf16.mxu0 %v936_v25  ;;  %v910_v23 = vld [vmem:[#allocation11 + $0x368] sm:$0xff]  ;;  %v1133_v25 = vunpack.c.h.s8.bf16 %v901_v16  ;;  %v880_v16 = vld [vmem:[#allocation11 + $0x278] sm:$0xff] }
 0x30c   :  { %1390 = vmatmul.mubr.bf16.vlgmr.msra.gmra.mrb[4].mxu1 %v3767_v28  ;;  %1347 = vmatmul.mubr.bf16.vlgmr.msra.gmra.mrb[16].mxu0 %v3785_v39 }
 0x30d   :  { %1401 = vmatpush1.bf16.msra.mxu1 %v1061_v27  ;;  %1432 = vmatprep.mubr.bf16.mxu1 %v3787_v46  ;;  %v1142_v27 = vunpack.c.l.s8.bf16 %v910_v23 }
 0x30e   :  { %1444 = vmatpush1.bf16.msra.mxu0 %v935_v29  ;;  %1475 = vmatprep.mubr.bf16.mxu0 %v3769_v30  ;;  %v959_v30 = vunpack.c.h.s8.bf16 %v815_v42  ;;  %v909_v29 = vld [vmem:[#allocation11 + $0x360] sm:$0xff] }
 0x30f   :  { %1402 = vmatprep.subr.bf16.mxu1 %v1070_v31  ;;  %1445 = vmatprep.subr.bf16.mxu0 %v944_v32  ;;  %v1016_v31 = vunpack.c.l.s8.bf16 %v848_v24  ;;  %v847_v32 = vld [vmem:[#allocation11 + $0x170] sm:$0xff]  ;;  %v1141_v9 = vunpack.c.l.s8.bf16 %v909_v29 }
 0x310   :  { %v1015_v33 = vunpack.c.l.s8.bf16 %v847_v32  ;;  %v1023_v42 = vunpack.c.h.s8.bf16 %v847_v32  ;;  %v1713_v32 = vld [vmem:[#allocation16 + $0x60] sm:$0xff] }
 0x311   :  { %1403 = vmatpush1.bf16.msra.mxu1 %v1069_v34  ;;  %v1150_v34 = vunpack.c.h.s8.bf16 %v910_v23 }
 0x312   :  { %1446 = vmatpush1.bf16.msra.mxu0 %v943_v35  ;;  %1404 = vmatprep.subr.bf16.mxu1 %v1078_v36  ;;  %v1024_v35 = vunpack.c.h.s8.bf16 %v848_v24  ;;  %v918_v36 = vld [vmem:[#allocation11 + $0x3a8] sm:$0xff] }
 0x313   :  { %1447 = vmatprep.subr.bf16.mxu0 %v952_v38  ;;  %v1149_v38 = vunpack.c.h.s8.bf16 %v909_v29 }
 0x315   :  { %1405 = vmatpush1.bf16.msra.mxu1 %v1077_v44  ;;  %v1158_v44 = vunpack.c.l.s8.bf16 %v918_v36 }
 0x316   :  { %1448 = vmatpush1.bf16.msra.mxu0 %v951_v45  ;;  %1406 = vmatprep.subr.bf16.mxu1 %v1086_v47  ;;  %v917_v45 = vld [vmem:[#allocation11 + $0x3a0] sm:$0xff]  ;;  %v1032_v47 = vunpack.c.l.s8.bf16 %v856_v37 }
 0x317   :  { %1449 = vmatprep.subr.bf16.mxu0 %v960_v48  ;;  %v855_v48 = vld [vmem:[#allocation11 + $0x1b0] sm:$0xff]  ;;  %v1157_v49 = vunpack.c.l.s8.bf16 %v917_v45 }
 0x318   :  { %v1031_v50 = vunpack.c.l.s8.bf16 %v855_v48  ;;  %v1039_v55 = vunpack.c.h.s8.bf16 %v855_v48  ;;  %v1719_v48 = vld [vmem:[#allocation16 + $0x90] sm:$0xff] }
 0x319   :  { %1407 = vmatpush1.bf16.msra.mxu1 %v1085_v51  ;;  %v1166_v51 = vunpack.c.h.s8.bf16 %v918_v36 }
 0x31a   :  { %1450 = vmatpush1.bf16.msra.mxu0 %v959_v30  ;;  %1408 = vmatprep.subr.bf16.mxu1 %v1094_v52  ;;  %v1040_v30 = vunpack.c.h.s8.bf16 %v856_v37  ;;  %v926_v52 = vld [vmem:[#allocation11 + $0x3e8] sm:$0xff] }
 0x31b   :  { %1451 = vmatprep.subr.bf16.mxu0 %v968_v54  ;;  %v1165_v54 = vunpack.c.h.s8.bf16 %v917_v45 }
 0x31d   :  { %1409 = vmatpush1.bf16.msra.mxu1 %v1093_v56  ;;  %v1174_v56 = vunpack.c.l.s8.bf16 %v926_v52 }
 0x31e   :  { %1452 = vmatpush1.bf16.msra.mxu0 %v967_v57  ;;  %1410 = vmatprep.subr.bf16.mxu1 %v1102_v58  ;;  %v925_v57 = vld [vmem:[#allocation11 + $0x3e0] sm:$0xff]  ;;  %v1048_v58 = vunpack.c.l.s8.bf16 %v864_v53 }
 0x31f   :  { %1453 = vmatprep.subr.bf16.mxu0 %v976_v7  ;;  %v863_v7 = vld [vmem:[#allocation11 + $0x1f0] sm:$0xff]  ;;  %v1173_v59 = vunpack.c.l.s8.bf16 %v925_v57 }
 0x320   :  { %v1047_v60 = vunpack.c.l.s8.bf16 %v863_v7  ;;  %v1055_v2 = vunpack.c.h.s8.bf16 %v863_v7  ;;  %v904_v7 = vld [vmem:[#allocation11 + $0x338] sm:$0xff] }
 0x321   :  { %1411 = vmatpush1.bf16.msra.mxu1 %v1101_v61  ;;  %v1182_v61 = vunpack.c.h.s8.bf16 %v926_v52 }
 0x322   :  { %1454 = vmatpush1.bf16.msra.mxu0 %v975_v62  ;;  %1412 = vmatprep.subr.bf16.mxu1 %v1110_v63  ;;  %v1056_v62 = vunpack.c.h.s8.bf16 %v864_v53  ;;  %v1702_v63 = vld [vmem:[#allocation16 + $0x8] sm:$0xff]  ;;  %v1929_v53 = vunpack.c.l.s8.bf16 %v1719_v48 }
 0x323   :  { %1455 = vmatprep.subr.bf16.mxu0 %v984_v1  ;;  %v1181_v1 = vunpack.c.h.s8.bf16 %v925_v57 }
 0x325   :  { %1413 = vmatpush1.bf16.msra.mxu1 %v1109_v3  ;;  %v1894_v3 = vunpack.c.l.s8.bf16 %v1702_v63 }
 0x326   :  { %1456 = vmatpush1.bf16.msra.mxu0 %v983_v4  ;;  %1414 = vmatprep.subr.bf16.mxu1 %v1118_v5  ;;  %v1701_v4 = vld [vmem:[#allocation16] sm:$0xff]  ;;  %v1064_v5 = vunpack.c.l.s8.bf16 %v872_v0 }
 0x327   :  { %1457 = vmatprep.subr.bf16.mxu0 %v992_v6  ;;  %v871_v6 = vld [vmem:[#allocation11 + $0x230] sm:$0xff]  ;;  %v1893_v10 = vunpack.c.l.s8.bf16 %v1701_v4 }
 0x328   :  { %v1063_v12 = vunpack.c.l.s8.bf16 %v871_v6  ;;  %v1071_v18 = vunpack.c.h.s8.bf16 %v871_v6  ;;  %v912_v6 = vld [vmem:[#allocation11 + $0x378] sm:$0xff] }
 0x329   :  { %1415 = vmatpush1.bf16.msra.mxu1 %v1117_v13  ;;  %v1072_v13 = vunpack.c.h.s8.bf16 %v872_v0  ;;  %v903_v0 = vld [vmem:[#allocation11 + $0x330] sm:$0xff] }
 0x32a   :  { %1458 = vmatpush1.bf16.msra.mxu0 %v991_v14  ;;  %1416 = vmatprep.subr.bf16.mxu1 %v1126_v15  ;;  %v1900_v14 = vunpack.c.h.s8.bf16 %v1702_v63  ;;  %v1708_v15 = vld [vmem:[#allocation16 + $0x38] sm:$0xff]  ;;  %v1128_v63 = vunpack.c.l.s8.bf16 %v904_v7 }
 0x32b   :  { %1459 = vmatprep.subr.bf16.mxu0 %v1000_v17  ;;  %v1899_v17 = vunpack.c.h.s8.bf16 %v1701_v4  ;;  %v1136_v4 = vunpack.c.h.s8.bf16 %v904_v7 }
 0x32d   :  { %1417 = vmatpush1.bf16.msra.mxu1 %v1125_v19  ;;  %v1906_v19 = vunpack.c.l.s8.bf16 %v1708_v15 }
 0x32e   :  { %1460 = vmatpush1.bf16.msra.mxu0 %v999_v20  ;;  %1418 = vmatprep.subr.bf16.mxu1 %v1134_v21  ;;  %v1707_v20 = vld [vmem:[#allocation16 + $0x30] sm:$0xff]  ;;  %v1080_v21 = vunpack.c.l.s8.bf16 %v880_v16 }
 0x32f   :  { %1461 = vmatprep.subr.bf16.mxu0 %v1008_v22  ;;  %v879_v22 = vld [vmem:[#allocation11 + $0x270] sm:$0xff]  ;;  %v1905_v23 = vunpack.c.l.s8.bf16 %v1707_v20  ;;  %v1911_v29 = vunpack.c.h.s8.bf16 %v1707_v20  ;;  %v1152_v20 = vunpack.c.h.s8.bf16 %v912_v6 }
 0x330   :  { %v1079_v24 = vunpack.c.l.s8.bf16 %v879_v22 }
 0x331   :  { %1419 = vmatpush1.bf16.msra.mxu1 %v1133_v25  ;;  %v1912_v25 = vunpack.c.h.s8.bf16 %v1708_v15  ;;  %v1144_v15 = vunpack.c.l.s8.bf16 %v912_v6 }
 0x332   :  { %1462 = vmatpush1.bf16.msra.mxu0 %v1007_v26  ;;  %1420 = vmatprep.subr.bf16.mxu1 %v1142_v27  ;;  %v1714_v26 = vld [vmem:[#allocation16 + $0x68] sm:$0xff] }
 0x333   :  { %1463 = vmatprep.subr.bf16.mxu0 %v1016_v31  ;;  %v888_v27 = vld [vmem:[#allocation11 + $0x2b8] sm:$0xff]  ;;  %v1918_v31 = vunpack.c.l.s8.bf16 %v1714_v26  ;;  %v1924_v36 = vunpack.c.h.s8.bf16 %v1714_v26 }
 0x334   :  { %v1104_v37 = vunpack.c.h.s8.bf16 %v888_v27 }
 0x335   :  { %1421 = vmatpush1.bf16.msra.mxu1 %v1141_v9  ;;  %v1096_v9 = vunpack.c.l.s8.bf16 %v888_v27  ;;  %v919_v27 = vld [vmem:[#allocation11 + $0x3b0] sm:$0xff] }
 0x336   :  { %1464 = vmatpush1.bf16.msra.mxu0 %v1015_v33  ;;  %1422 = vmatprep.subr.bf16.mxu1 %v1150_v34  ;;  %v887_v33 = vld [vmem:[#allocation11 + $0x2b0] sm:$0xff]  ;;  %v1917_v34 = vunpack.c.l.s8.bf16 %v1713_v32 }
 0x337   :  { %1465 = vmatprep.subr.bf16.mxu0 %v1024_v35  ;;  %v1095_v35 = vunpack.c.l.s8.bf16 %v887_v33  ;;  %v1103_v45 = vunpack.c.h.s8.bf16 %v887_v33  ;;  %v928_v33 = vld [vmem:[#allocation11 + $0x3f8] sm:$0xff] }
 0x339   :  { %1423 = vmatpush1.bf16.msra.mxu1 %v1149_v38  ;;  %v1720_v38 = vld [vmem:[#allocation16 + $0x98] sm:$0xff] }
 0x33a   :  { %1466 = vmatpush1.bf16.msra.mxu0 %v1023_v42  ;;  %1424 = vmatprep.subr.bf16.mxu1 %v1158_v44  ;;  %v896_v42 = vld [vmem:[#allocation11 + $0x2f8] sm:$0xff]  ;;  %v1923_v44 = vunpack.c.h.s8.bf16 %v1713_v32 }
 0x33b   :  { %1467 = vmatprep.subr.bf16.mxu0 %v1032_v47  ;;  %v1930_v47 = vunpack.c.l.s8.bf16 %v1720_v38  ;;  %v1120_v57 = vunpack.c.h.s8.bf16 %v896_v42 }
 0x33d   :  { %1425 = vmatpush1.bf16.msra.mxu1 %v1157_v49 }
 0x33e   :  { %1468 = vmatpush1.bf16.msra.mxu0 %v1031_v50  ;;  %1426 = vmatprep.subr.bf16.mxu1 %v1166_v51  ;;  %v1112_v50 = vunpack.c.l.s8.bf16 %v896_v42  ;;  %v895_v51 = vld [vmem:[#allocation11 + $0x2f0] sm:$0xff] }
 0x33f   :  { %1469 = vmatprep.subr.bf16.mxu0 %v1040_v30  ;;  %v927_v42 = vld [vmem:[#allocation11 + $0x3f0] sm:$0xff] }
 0x341   :  { %1427 = vmatpush1.bf16.msra.mxu1 %v1165_v54 }
 0x342   :  { %1470 = vmatpush1.bf16.msra.mxu0 %v1039_v55  ;;  %1428 = vmatprep.subr.bf16.mxu1 %v1174_v56  ;;  %v1111_v55 = vunpack.c.l.s8.bf16 %v895_v51  ;;  %v1936_v56 = vunpack.c.h.s8.bf16 %v1720_v38  ;;  %v1176_v38 = vunpack.c.l.s8.bf16 %v928_v33 }
 0x343   :  { %1471 = vmatprep.subr.bf16.mxu0 %v1048_v58  ;;  %v1726_v58 = vld [vmem:[#allocation16 + $0xc8] sm:$0xff] }
 0x345   :  { %1429 = vmatpush1.bf16.msra.mxu1 %v1173_v59  ;;  %v1935_v59 = vunpack.c.h.s8.bf16 %v1719_v48  ;;  %v1184_v48 = vunpack.c.h.s8.bf16 %v928_v33  ;;  %v1728_v33 = vld [vmem:[#allocation16 + $0xd8] sm:$0xff] }
 0x346   :  { %1472 = vmatpush1.bf16.msra.mxu0 %v1047_v60  ;;  %1430 = vmatprep.subr.bf16.mxu1 %v1182_v61  ;;  %v1119_v60 = vunpack.c.h.s8.bf16 %v895_v51  ;;  %v1942_v61 = vunpack.c.l.s8.bf16 %v1726_v58  ;;  %v1704_v51 = vld [vmem:[#allocation16 + $0x18] sm:$0xff] }
 0x347   :  { %1473 = vmatprep.subr.bf16.mxu0 %v1056_v62  ;;  %v1725_v62 = vld [vmem:[#allocation16 + $0xc0] sm:$0xff] }
 0x349   :  { %1431 = vmatpush1.bf16.msra.mxu1 %v1181_v1  ;;  %v1941_v1 = vunpack.c.l.s8.bf16 %v1725_v62 }
 0x34a   :  { %1474 = vmatpush1.bf16.msra.mxu0 %v1055_v2  ;;  %2277 = vmatprep.subr.bf16.mxu1 %v1894_v3  ;;  %v1127_v2 = vunpack.c.l.s8.bf16 %v903_v0  ;;  %v1948_v3 = vunpack.c.h.s8.bf16 %v1726_v58  ;;  %v1703_v58 = vld [vmem:[#allocation16 + $0x10] sm:$0xff] }
 0x34b   :  { %1486 = vmatprep.subr.bf16.mxu0 %v1064_v5  ;;  %v1732_v5 = vld [vmem:[#allocation16 + $0xf8] sm:$0xff]  ;;  %v1895_v7 = vunpack.c.l.s8.bf16 %v1703_v58 }
 0x34c   :  { %1433 = vmatmul.mubr.bf16.vlgmr.msra.gmra.mrb[4].mxu1 %v3785_v39 }
 0x34d   :  { %1476 = vmatmul.mubr.bf16.vlgmr.msra.gmra.mrb[20].mxu0 %v3767_v28  ;;  %2278 = vmatpush1.bf16.msra.mxu1 %v1893_v10  ;;  %v1088_v28 = vunpack.c.h.s8.bf16 %v880_v16  ;;  %v1947_v10 = vunpack.c.h.s8.bf16 %v1725_v62  ;;  %v911_v16 = vld [vmem:[#allocation11 + $0x370] sm:$0xff] }
 0x34e   :  { %1487 = vmatpush1.bf16.msra.mxu0 %v1063_v12  ;;  %1518 = vmatprep.mubr.bf16.mxu0 %v3787_v46  ;;  %v1087_v46 = vunpack.c.h.s8.bf16 %v879_v22  ;;  %v1135_v12 = vunpack.c.h.s8.bf16 %v903_v0  ;;  %v920_v22 = vld [vmem:[#allocation11 + $0x3b8] sm:$0xff] }
 0x34f   :  { %1488 = vmatprep.subr.bf16.mxu0 %v1072_v13  ;;  %2279 = vmatprep.subr.bf16.mxu1 %v1900_v14  ;;  %v1954_v13 = vunpack.c.l.s8.bf16 %v1732_v5  ;;  %v1731_v14 = vld [vmem:[#allocation16 + $0xf0] sm:$0xff]  ;;  %v1160_v26 = vunpack.c.l.s8.bf16 %v920_v22  ;;  %v1168_v32 = vunpack.c.h.s8.bf16 %v920_v22 }
 0x351   :  { %2280 = vmatpush1.bf16.msra.mxu1 %v1899_v17  ;;  %v1953_v17 = vunpack.c.l.s8.bf16 %v1731_v14 }
 0x352   :  { %1489 = vmatpush1.bf16.msra.mxu0 %v1071_v18  ;;  %2281 = vmatprep.subr.bf16.mxu1 %v1906_v19  ;;  %v1143_v18 = vunpack.c.l.s8.bf16 %v911_v16  ;;  %v1960_v19 = vunpack.c.h.s8.bf16 %v1732_v5  ;;  %v1715_v5 = vld [vmem:[#allocation16 + $0x70] sm:$0xff] }
 0x353   :  { %1490 = vmatprep.subr.bf16.mxu0 %v1080_v21  ;;  %v1738_v21 = vld [vmem:[#allocation16 + $0x128] sm:$0xff]  ;;  %v1919_v6 = vunpack.c.l.s8.bf16 %v1715_v5 }
 0x355   :  { %2282 = vmatpush1.bf16.msra.mxu1 %v1905_v23  ;;  %v1959_v23 = vunpack.c.h.s8.bf16 %v1731_v14 }
 0x356   :  { %1491 = vmatpush1.bf16.msra.mxu0 %v1079_v24  ;;  %2283 = vmatprep.subr.bf16.mxu1 %v1912_v25  ;;  %v1151_v24 = vunpack.c.h.s8.bf16 %v911_v16  ;;  %v1966_v25 = vunpack.c.l.s8.bf16 %v1738_v21 }
 0x357   :  { %1492 = vmatprep.subr.bf16.mxu0 %v1088_v28  ;;  %v1737_v28 = vld [vmem:[#allocation16 + $0x120] sm:$0xff] }
 0x359   :  { %2284 = vmatpush1.bf16.msra.mxu1 %v1911_v29  ;;  %v1965_v29 = vunpack.c.l.s8.bf16 %v1737_v28 }
 0x35a   :  { %1493 = vmatpush1.bf16.msra.mxu0 %v1087_v46  ;;  %2285 = vmatprep.subr.bf16.mxu1 %v1918_v31  ;;  %v1159_v46 = vunpack.c.l.s8.bf16 %v919_v27  ;;  %v1972_v31 = vunpack.c.h.s8.bf16 %v1738_v21 }
 0x35b   :  { %1494 = vmatprep.subr.bf16.mxu0 %v1096_v9  ;;  %v1744_v9 = vld [vmem:[#allocation16 + $0x158] sm:$0xff] }
 0x35d   :  { %2286 = vmatpush1.bf16.msra.mxu1 %v1917_v34  ;;  %v1971_v34 = vunpack.c.h.s8.bf16 %v1737_v28 }
 0x35e   :  { %1495 = vmatpush1.bf16.msra.mxu0 %v1095_v35  ;;  %2287 = vmatprep.subr.bf16.mxu1 %v1924_v36  ;;  %v1167_v35 = vunpack.c.h.s8.bf16 %v919_v27  ;;  %v1978_v36 = vunpack.c.l.s8.bf16 %v1744_v9 }
 0x35f   :  { %v3802_v49 = vpop.f32.mrb[12].mxu0  ;;  %1496 = vmatprep.subr.bf16.mxu0 %v1104_v37  ;;  %v1743_v37 = vld [vmem:[#allocation16 + $0x150] sm:$0xff] }
 0x360   :  { %v3804_v30 = vpop.f32.mrb[13].mxu0 }
 0x361   :  { %v3806_v52 = vpop.f32.mrb[14].mxu0  ;;  %2288 = vmatpush1.bf16.msra.mxu1 %v1923_v44  ;;  %v1977_v44 = vunpack.c.l.s8.bf16 %v1743_v37 }
 0x362   :  { %1497 = vmatpush1.bf16.msra.mxu0 %v1103_v45  ;;  %v3808_v54 = vpop.f32.mrb[15].mxu0  ;;  %2289 = vmatprep.subr.bf16.mxu1 %v1930_v47  ;;  %v1175_v45 = vunpack.c.l.s8.bf16 %v927_v42  ;;  %v1984_v47 = vunpack.c.h.s8.bf16 %v1744_v9 }
 0x363   :  { %1498 = vmatprep.subr.bf16.mxu0 %v1112_v50  ;;  %v3810_v50 = vld [vmem:[#allocation16 + $0x188] sm:$0xff] }
 0x365   :  { %2290 = vmatpush1.bf16.msra.mxu1 %v1929_v53  ;;  %v1983_v53 = vunpack.c.h.s8.bf16 %v1743_v37 }
 0x366   :  { %1499 = vmatpush1.bf16.msra.mxu0 %v1111_v55  ;;  %2291 = vmatprep.subr.bf16.mxu1 %v1936_v56  ;;  %v1183_v55 = vunpack.c.h.s8.bf16 %v927_v42  ;;  %v1990_v56 = vunpack.c.l.s8.bf16 %v3810_v50  ;;  %v1944_v42 = vunpack.c.l.s8.bf16 %v1728_v33 }
 0x367   :  { %1500 = vmatprep.subr.bf16.mxu0 %v1120_v57  ;;  %v1896_v57 = vunpack.c.l.s8.bf16 %v1704_v51 }
 0x369   :  { %2292 = vmatpush1.bf16.msra.mxu1 %v1935_v59  ;;  %v1902_v59 = vunpack.c.h.s8.bf16 %v1704_v51 }
 0x36a   :  { %1501 = vmatpush1.bf16.msra.mxu0 %v1119_v60  ;;  %2293 = vmatprep.subr.bf16.mxu1 %v1942_v61  ;;  %v1710_v60 = vld [vmem:[#allocation16 + $0x48] sm:$0xff]  ;;  %v1901_v61 = vunpack.c.h.s8.bf16 %v1703_v58 }
 0x36b   :  { %1502 = vmatprep.subr.bf16.mxu0 %v1128_v63  ;;  %v1908_v62 = vunpack.c.l.s8.bf16 %v1710_v60  ;;  %v1709_v63 = vld [vmem:[#allocation16 + $0x40] sm:$0xff] }
 0x36c   :  { %v1907_v0 = vunpack.c.l.s8.bf16 %v1709_v63 }
 0x36d   :  { %2294 = vmatpush1.bf16.msra.mxu1 %v1941_v1  ;;  %v1914_v1 = vunpack.c.h.s8.bf16 %v1710_v60  ;;  %v1734_v60 = vld [vmem:[#allocation16 + $0x108] sm:$0xff] }
 0x36e   :  { %1503 = vmatpush1.bf16.msra.mxu0 %v1127_v2  ;;  %2295 = vmatprep.subr.bf16.mxu1 %v1948_v3  ;;  %v1716_v2 = vld [vmem:[#allocation16 + $0x78] sm:$0xff]  ;;  %v1913_v3 = vunpack.c.h.s8.bf16 %v1709_v63 }
 0x36f   :  { %1504 = vmatprep.subr.bf16.mxu0 %v1136_v4  ;;  %v1920_v4 = vunpack.c.l.s8.bf16 %v1716_v2  ;;  %v1756_v63 = vld [vmem:[#allocation16 + $0x1b8] sm:$0xff] }
 0x371   :  { %2296 = vmatpush1.bf16.msra.mxu1 %v1947_v10  ;;  %v3814_v10 = vld [vmem:[#allocation13] sm:$0xff] }
 0x372   :  { %1505 = vmatpush1.bf16.msra.mxu0 %v1135_v12  ;;  %2297 = vmatprep.subr.bf16.mxu1 %v1954_v13  ;;  %v1722_v12 = vld [vmem:[#allocation16 + $0xa8] sm:$0xff]  ;;  %v3816_v13 = vld [vmem:[#allocation14] sm:$0xff]  ;;  %v1534_v14 = vrot.slane %v3814_v10, %v3744_v41 }
 0x373   :  { %1506 = vmatprep.subr.bf16.mxu0 %v1144_v15  ;;  %v1925_v15 = vunpack.c.h.s8.bf16 %v1715_v5  ;;  %v1592_v21 = vrot.slane %v3816_v13, %v3744_v41 }
 0x375   :  { %2298 = vmatpush1.bf16.msra.mxu1 %v1953_v17  ;;  %v1538_v17 = vrot.slane %v3814_v10, %v3747_v43 }
 0x376   :  { %1507 = vmatpush1.bf16.msra.mxu0 %v1143_v18  ;;  %2299 = vmatprep.subr.bf16.mxu1 %v1960_v19  ;;  %v1932_v18 = vunpack.c.l.s8.bf16 %v1722_v12  ;;  %v1721_v19 = vld [vmem:[#allocation16 + $0xa0] sm:$0xff] }
 0x377   :  { %1508 = vmatprep.subr.bf16.mxu0 %v1152_v20  ;;  %v1937_v37 = vunpack.c.h.s8.bf16 %v1721_v19 }
 0x379   :  { %2300 = vmatpush1.bf16.msra.mxu1 %v1959_v23 }
 0x37a   :  { %1509 = vmatpush1.bf16.msra.mxu0 %v1151_v24  ;;  %2301 = vmatprep.subr.bf16.mxu1 %v1966_v25  ;;  %v1596_v24 = vrot.slane %v3816_v13, %v3747_v43 }
 0x37b   :  { %1510 = vmatprep.subr.bf16.mxu0 %v1160_v26 }
 0x37d   :  { %2302 = vmatpush1.bf16.msra.mxu1 %v1965_v29  ;;  %v1931_v29 = vunpack.c.l.s8.bf16 %v1721_v19 }
 0x37e   :  { %1511 = vmatpush1.bf16.msra.mxu0 %v1159_v46  ;;  %2303 = vmatprep.subr.bf16.mxu1 %v1972_v31 }
 0x37f   :  { %1512 = vmatprep.subr.bf16.mxu0 %v1168_v32 }
 0x381   :  { %2304 = vmatpush1.bf16.msra.mxu1 %v1971_v34 }
 0x382   :  { %1513 = vmatpush1.bf16.msra.mxu0 %v1167_v35  ;;  %2305 = vmatprep.subr.bf16.mxu1 %v1978_v36 }
 0x383   :  { %1514 = vmatprep.subr.bf16.mxu0 %v1176_v38 }
 0x385   :  { %2306 = vmatpush1.bf16.msra.mxu1 %v1977_v44  ;;  %v1727_v44 = vld [vmem:[#allocation16 + $0xd0] sm:$0xff] }
 0x386   :  { %1515 = vmatpush1.bf16.msra.mxu0 %v1175_v45  ;;  %2307 = vmatprep.subr.bf16.mxu1 %v1984_v47  ;;  %v1749_v47 = vld [vmem:[#allocation16 + $0x180] sm:$0xff] }
 0x387   :  { %1516 = vmatprep.subr.bf16.mxu0 %v1184_v48  ;;  %v1943_v48 = vunpack.c.l.s8.bf16 %v1727_v44 }
 0x389   :  { %2308 = vmatpush1.bf16.msra.mxu1 %v1983_v53 }
 0x38a   :  { %1517 = vmatpush1.bf16.msra.mxu0 %v1183_v55  ;;  %2320 = vmatprep.subr.bf16.mxu1 %v1990_v56 }
 0x38b   :  { %2449 = vmatprep.subr.bf16.mxu0 %v1896_v57 }
 0x38d   :  { %1519 = vmatmul.mubr.bf16.vlgmr.msra.gmra.mrb[20].mxu0 %v3785_v39  ;;  %v1926_v39 = vunpack.c.h.s8.bf16 %v1716_v2  ;;  %v1995_v2 = vunpack.c.h.s8.bf16 %v1749_v47 }
 0x38e   :  { %2450 = vmatpush1.bf16.msra.mxu0 %v1895_v7  ;;  %v1989_v7 = vunpack.c.l.s8.bf16 %v1749_v47 }
 0x38f   :  { %2451 = vmatprep.subr.bf16.mxu0 %v1902_v59  ;;  %v1950_v59 = vunpack.c.h.s8.bf16 %v1728_v33 }
 0x392   :  { %2452 = vmatpush1.bf16.msra.mxu0 %v1901_v61  ;;  %v1996_v61 = vunpack.c.h.s8.bf16 %v3810_v50  ;;  %v1962_v50 = vunpack.c.h.s8.bf16 %v1734_v60 }
 0x393   :  { %2453 = vmatprep.subr.bf16.mxu0 %v1908_v62  ;;  %v1949_v62 = vunpack.c.h.s8.bf16 %v1727_v44  ;;  %v1773_v44 = vld [vmem:[#allocation16 + $0x240] sm:$0xff] }
 0x394   :  { %v2037_v47 = vunpack.c.l.s8.bf16 %v1773_v44 }
 0x396   :  { %2454 = vmatpush1.bf16.msra.mxu0 %v1907_v0  ;;  %v1956_v0 = vunpack.c.l.s8.bf16 %v1734_v60 }
 0x397   :  { %2455 = vmatprep.subr.bf16.mxu0 %v1914_v1  ;;  %v1733_v1 = vld [vmem:[#allocation16 + $0x100] sm:$0xff] }
 0x398   :  { %v1955_v5 = vunpack.c.l.s8.bf16 %v1733_v1 }
 0x39a   :  { %2456 = vmatpush1.bf16.msra.mxu0 %v1913_v3  ;;  %v2002_v3 = vunpack.c.l.s8.bf16 %v1756_v63 }
 0x39b   :  { %2457 = vmatprep.subr.bf16.mxu0 %v1920_v4  ;;  %v1755_v4 = vld [vmem:[#allocation16 + $0x1b0] sm:$0xff] }
 0x39e   :  { %2458 = vmatpush1.bf16.msra.mxu0 %v1919_v6  ;;  %v2001_v6 = vunpack.c.l.s8.bf16 %v1755_v4 }
 0x39f   :  { %v1262_v16 = vpop.f32.mrb[0].mxu1  ;;  %2459 = vmatprep.subr.bf16.mxu0 %v1926_v39  ;;  %v1740_v39 = vld [vmem:[#allocation16 + $0x138] sm:$0xff] }
 0x3a0   :  { %v1263_v20 = vadd.f32 %v1262_v16, %v3802_v49  ;;  %v1264_v22 = vpop.f32.mrb[1].mxu1  ;;  %v1938_v49 = vunpack.c.h.s8.bf16 %v1722_v12  ;;  %v2008_v12 = vunpack.c.h.s8.bf16 %v1756_v63  ;;  %v1968_v16 = vunpack.c.l.s8.bf16 %v1740_v39 }
 0x3a1   :  { %v1265_v23 = vadd.f32 %v1264_v22, %v3804_v30  ;;  %v1266_v25 = vpop.f32.mrb[2].mxu1  ;;  %v1974_v22 = vunpack.c.h.s8.bf16 %v1740_v39 }
 0x3a2   :  { %v1571_v28 = vmul.f32 %v1534_v14, %v1263_v20  ;;  %v1267_v26 = vadd.f32 %v1266_v25, %v3806_v52  ;;  %2460 = vmatpush1.bf16.msra.mxu0 %v1925_v15  ;;  %v1268_v27 = vpop.f32.mrb[3].mxu1  ;;  %v1762_v15 = vld [vmem:[#allocation16 + $0x1e8] sm:$0xff]  ;;  %v1761_v20 = vld [vmem:[#allocation16 + $0x1e0] sm:$0xff] }
 0x3a3   :  { %v1572_v46 = vmul.f32 %v1538_v17, %v1265_v23  ;;  %v1269_v31 = vadd.f32 %v1268_v27, %v3808_v54  ;;  %2461 = vmatprep.subr.bf16.mxu0 %v1932_v18  ;;  %v2007_v18 = vunpack.c.h.s8.bf16 %v1755_v4  ;;  %v2014_v19 = vunpack.c.l.s8.bf16 %v1762_v15  ;;  %v1786_v4 = vld [vmem:[#allocation16 + $0x2a8] sm:$0xff] }
 0x3a4   :  { %v1629_v32 = vadd.f32 %v1592_v21, %v1571_v28  ;;  %v1579_v9 = vmul.f32 %v1534_v14, %v1267_v26  ;;  %v1961_v14 = vunpack.c.h.s8.bf16 %v1733_v1  ;;  %v2013_v23 = vunpack.c.l.s8.bf16 %v1761_v20  ;;  %v1768_v26 = vld [vmem:[#allocation16 + $0x218] sm:$0xff] }
 0x3a5   :  { %v1630_v34 = vadd.f32 %v1596_v24, %v1572_v46  ;;  %v1580_v30 = vmul.f32 %v1538_v17, %v1269_v31  ;;  %v1739_v17 = vld [vmem:[#allocation16 + $0x130] sm:$0xff]  ;;  %v2020_v25 = vunpack.c.h.s8.bf16 %v1762_v15  ;;  %v2019_v46 = vunpack.c.h.s8.bf16 %v1761_v20  ;;  %v1764_v1 = vld [vmem:[#allocation16 + $0x1f8] sm:$0xff] }
 0x3a6   :  { %v1661_v35 = vmul.f32 0.2, %v1629_v32  ;;  %v1637_v36 = vadd.f32 %v1592_v21, %v1579_v9  ;;  %2462 = vmatpush1.bf16.msra.mxu0 %v1931_v29  ;;  %vm1645_vm13 = vcmp.gt.f32.partialorder %v1629_v32, 0.0  ;;  %v1967_v21 = vunpack.c.l.s8.bf16 %v1739_v17  ;;  %v1745_v29 = vld [vmem:[#allocation16 + $0x160] sm:$0xff] }
 0x3a7   :  { %v1662_v38 = vmul.f32 0.2, %v1630_v34  ;;  %v1638_v52 = vadd.f32 %v1596_v24, %v1580_v30  ;;  %2463 = vmatprep.subr.bf16.mxu0 %v1938_v49  ;;  %vm1646_vm15 = vcmp.gt.f32.partialorder %v1630_v34, 0.0  ;;  %v1746_v24 = vld [vmem:[#allocation16 + $0x168] sm:$0xff]  ;;  %v1973_v28 = vunpack.c.h.s8.bf16 %v1739_v17  ;;  %v1767_v49 = vld [vmem:[#allocation16 + $0x210] sm:$0xff] }
 0x3a8   :  { %vm1653_vm14 = vcmp.gt.f32.partialorder %v1637_v36, 0.0  ;;  %v1669_v45 = vmul.f32 0.2, %v1637_v36  ;;  %v1677_v51 = vsel %vm1645_vm13, %v1629_v32, %v1661_v35  ;;  %v1980_v27 = vunpack.c.l.s8.bf16 %v1746_v24 }
 0x3a9   :  { %v1670_v54 = vmul.f32 0.2, %v1638_v52  ;;  %vm1654_vm0 = vcmp.gt.f32.partialorder %v1638_v52, 0.0  ;;  %v1678_v55 = vsel %vm1646_vm15, %v1630_v34, %v1662_v38  ;;  %v2026_v31 = vunpack.c.l.s8.bf16 %v1768_v26  ;;  %v1752_v34 = vld [vmem:[#allocation16 + $0x198] sm:$0xff]  ;;  %v1751_v38 = vld [vmem:[#allocation16 + $0x190] sm:$0xff] }
 0x3aa   :  { %2464 = vmatpush1.bf16.msra.mxu0 %v1937_v37  ;;  %v1685_v53 = vsel %vm1653_vm14, %v1637_v36, %v1669_v45  ;;  %v1979_v32 = vunpack.c.l.s8.bf16 %v1745_v29  ;;  %v1986_v9 = vunpack.c.h.s8.bf16 %v1746_v24  ;;  %v2025_v33 = vunpack.c.l.s8.bf16 %v1767_v49  ;;  %v1774_v36 = vld [vmem:[#allocation16 + $0x248] sm:$0xff] }
 0x3ab   :  { %2465 = vmatprep.subr.bf16.mxu0 %v1944_v42  ;;  %v1686_v56 = vsel %vm1654_vm0, %v1638_v52, %v1670_v54  ;;  %v3830_v57 = vpack.c.bf16 %v1685_v53, %v1677_v51  ;;  %v2032_v30 = vunpack.c.h.s8.bf16 %v1768_v26  ;;  %v1985_v35 = vunpack.c.h.s8.bf16 %v1745_v29  ;;  %v1769_v26 = vld [vmem:[#allocation16 + $0x220] sm:$0xff] }
 0x3ac   :  { %v3832_v58 = vpack.c.bf16 %v1686_v56, %v1678_v55  ;;  %v1992_v37 = vunpack.c.l.s8.bf16 %v1752_v34  ;;  %v2031_v52 = vunpack.c.h.s8.bf16 %v1767_v49  ;;  %v2038_v42 = vunpack.c.l.s8.bf16 %v1774_v36  ;;  %v1780_v55 = vld [vmem:[#allocation16 + $0x278] sm:$0xff] }
 0x3ad   :  { %v1991_v45 = vunpack.c.l.s8.bf16 %v1751_v38  ;;  %v1998_v54 = vunpack.c.h.s8.bf16 %v1752_v34  ;;  %v2044_v51 = vunpack.c.h.s8.bf16 %v1774_v36  ;;  %v1997_v53 = vunpack.c.h.s8.bf16 %v1751_v38 }
 0x3ae   :  { %2466 = vmatpush1.bf16.msra.mxu0 %v1943_v48  ;;  %2309 = vmatprep.mubr.bf16.mxu1 %v3832_v58  ;;  %v1758_v48 = vld [vmem:[#allocation16 + $0x1c8] sm:$0xff]  ;;  %v2050_v60 = vunpack.c.l.s8.bf16 %v1780_v55  ;;  %v2062_v39 = vunpack.c.l.s8.bf16 %v1786_v4  ;;  %v2022_v15 = vunpack.c.h.s8.bf16 %v1764_v1  ;;  %v2068_v20 = vunpack.c.h.s8.bf16 %v1786_v4 }
 0x3af   :  { %2481 = vmatprep.mubr.bf16.mxu0 %v3832_v58  ;;  %2310 = vmatmul.mubr.bf16.vlgmr.msra.gmra.mrb[8].mxu1 %v3830_v57  ;;  %v2004_v56 = vunpack.c.l.s8.bf16 %v1758_v48  ;;  %v2010_v63 = vunpack.c.h.s8.bf16 %v1758_v48 }
 0x3b0   :  { %2321 = vmatpush1.bf16.msra.mxu1 %v1989_v7  ;;  %2467 = vmatprep.subr.bf16.mxu0 %v1950_v59  ;;  %v1757_v7 = vld [vmem:[#allocation16 + $0x1c0] sm:$0xff]  ;;  %v2043_v59 = vunpack.c.h.s8.bf16 %v1773_v44 }
 0x3b1   :  { %2322 = vmatprep.subr.bf16.mxu1 %v1996_v61  ;;  %v1779_v61 = vld [vmem:[#allocation16 + $0x270] sm:$0xff] }
 0x3b2   :  { %2468 = vmatpush1.bf16.msra.mxu0 %v1949_v62  ;;  %v2003_v62 = vunpack.c.l.s8.bf16 %v1757_v7 }
 0x3b3   :  { %2469 = vmatprep.subr.bf16.mxu0 %v1956_v0  ;;  %v2049_v0 = vunpack.c.l.s8.bf16 %v1779_v61 }
 0x3b4   :  { %2323 = vmatpush1.bf16.msra.mxu1 %v1995_v2  ;;  %v2056_v2 = vunpack.c.h.s8.bf16 %v1780_v55  ;;  %v1798_v55 = vld [vmem:[#allocation16 + $0x308] sm:$0xff] }
 0x3b5   :  { %2324 = vmatprep.subr.bf16.mxu1 %v2002_v3  ;;  %v2009_v3 = vunpack.c.h.s8.bf16 %v1757_v7 }
 0x3b6   :  { %2470 = vmatpush1.bf16.msra.mxu0 %v1955_v5  ;;  %v2016_v5 = vunpack.c.l.s8.bf16 %v1764_v1 }
 0x3b7   :  { %2471 = vmatprep.subr.bf16.mxu0 %v1962_v50  ;;  %v1763_v50 = vld [vmem:[#allocation16 + $0x1f0] sm:$0xff] }
 0x3b8   :  { %2325 = vmatpush1.bf16.msra.mxu1 %v2001_v6  ;;  %v2055_v6 = vunpack.c.h.s8.bf16 %v1779_v61 }
 0x3b9   :  { %2326 = vmatprep.subr.bf16.mxu1 %v2008_v12  ;;  %v1785_v12 = vld [vmem:[#allocation16 + $0x2a0] sm:$0xff] }
 0x3ba   :  { %2472 = vmatpush1.bf16.msra.mxu0 %v1961_v14  ;;  %v2015_v14 = vunpack.c.l.s8.bf16 %v1763_v50  ;;  %v2061_v17 = vunpack.c.l.s8.bf16 %v1785_v12 }
 0x3bb   :  { %2473 = vmatprep.subr.bf16.mxu0 %v1968_v16  ;;  %v1542_v16 = vrot.slane %v3814_v10, %v3776_v8 }
 0x3bc   :  { %2327 = vmatpush1.bf16.msra.mxu1 %v2007_v18  ;;  %v1770_v18 = vld [vmem:[#allocation16 + $0x228] sm:$0xff] }
 0x3bd   :  { %2328 = vmatprep.subr.bf16.mxu1 %v2014_v19  ;;  %v1546_v19 = vrot.slane %v3814_v10, %v3779_v11  ;;  %v2034_v38 = vunpack.c.h.s8.bf16 %v1770_v18 }
 0x3be   :  { %2474 = vmatpush1.bf16.msra.mxu0 %v1967_v21  ;;  %v1600_v21 = vrot.slane %v3816_v13, %v3776_v8 }
 0x3bf   :  { %2475 = vmatprep.subr.bf16.mxu0 %v1974_v22  ;;  %v2021_v22 = vunpack.c.h.s8.bf16 %v1763_v50 }
 0x3c0   :  { %2329 = vmatpush1.bf16.msra.mxu1 %v2013_v23  ;;  %v1792_v23 = vld [vmem:[#allocation16 + $0x2d8] sm:$0xff] }
 0x3c1   :  { %2330 = vmatprep.subr.bf16.mxu1 %v2020_v25  ;;  %v1604_v25 = vrot.slane %v3816_v13, %v3779_v11  ;;  %v2080_v48 = vunpack.c.h.s8.bf16 %v1792_v23 }
 0x3c2   :  { %2476 = vmatpush1.bf16.msra.mxu0 %v1973_v28  ;;  %v2028_v28 = vunpack.c.l.s8.bf16 %v1770_v18 }
 0x3c3   :  { %2477 = vmatprep.subr.bf16.mxu0 %v1980_v27 }
 0x3c4   :  { %2331 = vmatpush1.bf16.msra.mxu1 %v2019_v46  ;;  %v2067_v46 = vunpack.c.h.s8.bf16 %v1785_v12  ;;  %v2092_v12 = vunpack.c.h.s8.bf16 %v1798_v55 }
 0x3c5   :  { %2332 = vmatprep.subr.bf16.mxu1 %v2026_v31 }
 0x3c6   :  { %2478 = vmatpush1.bf16.msra.mxu0 %v1979_v32  ;;  %v2074_v32 = vunpack.c.l.s8.bf16 %v1792_v23 }
 0x3c7   :  { %2479 = vmatprep.subr.bf16.mxu0 %v1986_v9  ;;  %v1791_v9 = vld [vmem:[#allocation16 + $0x2d0] sm:$0xff] }
 0x3c8   :  { %2333 = vmatpush1.bf16.msra.mxu1 %v2025_v33  ;;  %v2073_v44 = vunpack.c.l.s8.bf16 %v1791_v9 }
 0x3c9   :  { %2334 = vmatprep.subr.bf16.mxu1 %v2032_v30 }
 0x3ca   :  { %2480 = vmatpush1.bf16.msra.mxu0 %v1985_v35  ;;  %v2027_v35 = vunpack.c.l.s8.bf16 %v1769_v26 }
 0x3cb   :  { %2492 = vmatprep.subr.bf16.mxu0 %v1992_v37 }
 0x3cc   :  { %2335 = vmatpush1.bf16.msra.mxu1 %v2031_v52 }
 0x3cd   :  { %2482 = vmatmul.mubr.bf16.vlgmr.msra.gmra.mrb[24].mxu0 %v3830_v57  ;;  %2336 = vmatprep.subr.bf16.mxu1 %v2038_v42 }
 0x3ce   :  { %2493 = vmatpush1.bf16.msra.mxu0 %v1991_v45  ;;  %v1776_v45 = vld [vmem:[#allocation16 + $0x258] sm:$0xff] }
 0x3cf   :  { %2494 = vmatprep.subr.bf16.mxu0 %v1998_v54  ;;  %v2040_v7 = vunpack.c.l.s8.bf16 %v1776_v45  ;;  %v2046_v50 = vunpack.c.h.s8.bf16 %v1776_v45 }
 0x3d0   :  { %2337 = vmatpush1.bf16.msra.mxu1 %v2037_v47 }
 0x3d1   :  { %2338 = vmatprep.subr.bf16.mxu1 %v2044_v51 }
 0x3d2   :  { %2495 = vmatpush1.bf16.msra.mxu0 %v1997_v53  ;;  %v2033_v53 = vunpack.c.h.s8.bf16 %v1769_v26  ;;  %v1810_v26 = vld [vmem:[#allocation16 + $0x368] sm:$0xff] }
 0x3d3   :  { %2496 = vmatprep.subr.bf16.mxu0 %v2004_v56 }
 0x3d4   :  { %2339 = vmatpush1.bf16.msra.mxu1 %v2043_v59  ;;  %v1775_v59 = vld [vmem:[#allocation16 + $0x250] sm:$0xff] }
 0x3d5   :  { %2340 = vmatprep.subr.bf16.mxu1 %v2050_v60 }
 0x3d6   :  { %2497 = vmatpush1.bf16.msra.mxu0 %v2003_v62  ;;  %v2079_v62 = vunpack.c.h.s8.bf16 %v1791_v9 }
 0x3d7   :  { %2498 = vmatprep.subr.bf16.mxu0 %v2010_v63 }
 0x3d8   :  { %2341 = vmatpush1.bf16.msra.mxu1 %v2049_v0 }
 0x3d9   :  { %2342 = vmatprep.subr.bf16.mxu1 %v2056_v2  ;;  %v2086_v2 = vunpack.c.l.s8.bf16 %v1798_v55  ;;  %v1822_v55 = vld [vmem:[#allocation16 + $0x3c8] sm:$0xff] }
 0x3da   :  { %2499 = vmatpush1.bf16.msra.mxu0 %v2009_v3  ;;  %v1797_v3 = vld [vmem:[#allocation16 + $0x300] sm:$0xff] }
 0x3db   :  { %2500 = vmatprep.subr.bf16.mxu0 %v2016_v5  ;;  %v2039_v5 = vunpack.c.l.s8.bf16 %v1775_v59  ;;  %v2091_v18 = vunpack.c.h.s8.bf16 %v1797_v3 }
 0x3dc   :  { %2343 = vmatpush1.bf16.msra.mxu1 %v2055_v6  ;;  %v2085_v6 = vunpack.c.l.s8.bf16 %v1797_v3  ;;  %v2140_v3 = vunpack.c.h.s8.bf16 %v1822_v55 }
 0x3dd   :  { %2344 = vmatprep.subr.bf16.mxu1 %v2062_v39  ;;  %v1782_v39 = vld [vmem:[#allocation16 + $0x288] sm:$0xff] }
 0x3de   :  { %2501 = vmatpush1.bf16.msra.mxu0 %v2015_v14  ;;  %v2045_v14 = vunpack.c.h.s8.bf16 %v1775_v59 }
 0x3df   :  { %v1348_v24 = vpop.f32.mrb[16].mxu0  ;;  %2502 = vmatprep.subr.bf16.mxu0 %v2022_v15  ;;  %v1804_v15 = vld [vmem:[#allocation16 + $0x338] sm:$0xff] }
 0x3e0   :  { %v1573_v27 = vmul.f32 %v1542_v16, %v1348_v24  ;;  %2345 = vmatpush1.bf16.msra.mxu1 %v2061_v17  ;;  %v1350_v29 = vpop.f32.mrb[17].mxu0  ;;  %v1781_v17 = vld [vmem:[#allocation16 + $0x280] sm:$0xff]  ;;  %v1788_v24 = vld [vmem:[#allocation16 + $0x2b8] sm:$0xff] }
 0x3e1   :  { %v1574_v31 = vmul.f32 %v1546_v19, %v1350_v29  ;;  %v1352_v49 = vpop.f32.mrb[18].mxu0  ;;  %2346 = vmatprep.subr.bf16.mxu1 %v2068_v20  ;;  %v1803_v20 = vld [vmem:[#allocation16 + $0x330] sm:$0xff]  ;;  %v2070_v9 = vunpack.c.h.s8.bf16 %v1788_v24 }
 0x3e2   :  { %v1631_v33 = vadd.f32 %v1600_v21, %v1573_v27  ;;  %v1581_v34 = vmul.f32 %v1542_v16, %v1352_v49  ;;  %2503 = vmatpush1.bf16.msra.mxu0 %v2021_v22  ;;  %v1354_v30 = vpop.f32.mrb[19].mxu0  ;;  %v2052_v16 = vunpack.c.l.s8.bf16 %v1782_v39  ;;  %v2058_v22 = vunpack.c.h.s8.bf16 %v1782_v39  ;;  %v1787_v29 = vld [vmem:[#allocation16 + $0x2b0] sm:$0xff]  ;;  %v1809_v49 = vld [vmem:[#allocation16 + $0x360] sm:$0xff] }
 0x3e3   :  { %v1632_v36 = vadd.f32 %v1604_v25, %v1574_v31  ;;  %v1582_v37 = vmul.f32 %v1546_v19, %v1354_v30  ;;  %2504 = vmatprep.subr.bf16.mxu0 %v2028_v28  ;;  %v2098_v19 = vunpack.c.l.s8.bf16 %v1804_v15  ;;  %v2097_v23 = vunpack.c.l.s8.bf16 %v1803_v20  ;;  %v1805_v39 = vld [vmem:[#allocation16 + $0x340] sm:$0xff] }
 0x3e4   :  { %v1663_v52 = vmul.f32 0.2, %v1631_v33  ;;  %v1639_v42 = vadd.f32 %v1600_v21, %v1581_v34  ;;  %2347 = vmatpush1.bf16.msra.mxu1 %v2067_v46  ;;  %vm1647_vm1 = vcmp.gt.f32.partialorder %v1631_v33, 0.0  ;;  %v2051_v21 = vunpack.c.l.s8.bf16 %v1781_v17  ;;  %v1794_v34 = vld [vmem:[#allocation16 + $0x2e8] sm:$0xff] }
 0x3e5   :  { %v1664_v54 = vmul.f32 0.2, %v1632_v36  ;;  %v1640_v47 = vadd.f32 %v1604_v25, %v1582_v37  ;;  %2348 = vmatprep.subr.bf16.mxu1 %v2074_v32  ;;  %vm1648_vm2 = vcmp.gt.f32.partialorder %v1632_v36, 0.0  ;;  %v2104_v25 = vunpack.c.h.s8.bf16 %v1804_v15  ;;  %v1827_v15 = vld [vmem:[#allocation16 + $0x3f0] sm:$0xff] }
 0x3e6   :  { %vm1655_vm3 = vcmp.gt.f32.partialorder %v1639_v42, 0.0  ;;  %v1671_v51 = vmul.f32 0.2, %v1639_v42  ;;  %2505 = vmatpush1.bf16.msra.mxu0 %v2027_v35  ;;  %v1679_v60 = vsel %vm1647_vm1, %v1631_v33, %v1663_v52  ;;  %v2057_v28 = vunpack.c.h.s8.bf16 %v1781_v17 }
 0x3e7   :  { %vm1656_vm4 = vcmp.gt.f32.partialorder %v1640_v47, 0.0  ;;  %v1672_v56 = vmul.f32 0.2, %v1640_v47  ;;  %2506 = vmatprep.subr.bf16.mxu0 %v2034_v38  ;;  %v1680_v63 = vsel %vm1648_vm2, %v1632_v36, %v1664_v54  ;;  %v2064_v27 = vunpack.c.l.s8.bf16 %v1788_v24  ;;  %v1816_v36 = vld [vmem:[#allocation16 + $0x398] sm:$0xff]  ;;  %v1793_v38 = vld [vmem:[#allocation16 + $0x2e0] sm:$0xff]  ;;  %v1811_v24 = vld [vmem:[#allocation16 + $0x370] sm:$0xff] }
 0x3e8   :  { %v1687_v61 = vsel %vm1655_vm3, %v1639_v42, %v1671_v51  ;;  %2349 = vmatpush1.bf16.msra.mxu1 %v2073_v44  ;;  %v2103_v46 = vunpack.c.h.s8.bf16 %v1803_v20  ;;  %v2110_v31 = vunpack.c.l.s8.bf16 %v1810_v26  ;;  %v2063_v32 = vunpack.c.l.s8.bf16 %v1787_v29  ;;  %v1815_v44 = vld [vmem:[#allocation16 + $0x390] sm:$0xff] }
 0x3e9   :  { %2350 = vmatprep.subr.bf16.mxu1 %v2080_v48  ;;  %v1688_v0 = vsel %vm1656_vm4, %v1640_v47, %v1672_v56  ;;  %v3849_v1 = vpack.c.bf16 %v1687_v61, %v1679_v60  ;;  %v2109_v33 = vunpack.c.l.s8.bf16 %v1809_v49  ;;  %v2116_v30 = vunpack.c.h.s8.bf16 %v1810_v26  ;;  %v1800_v48 = vld [vmem:[#allocation16 + $0x318] sm:$0xff]  ;;  %v1821_v61 = vld [vmem:[#allocation16 + $0x3c0] sm:$0xff] }
 0x3ea   :  { %2507 = vmatpush1.bf16.msra.mxu0 %v2033_v53  ;;  %v3851_v4 = vpack.c.bf16 %v1688_v0, %v1680_v63  ;;  %v2069_v35 = vunpack.c.h.s8.bf16 %v1787_v29  ;;  %v2076_v37 = vunpack.c.l.s8.bf16 %v1794_v34  ;;  %v2115_v52 = vunpack.c.h.s8.bf16 %v1809_v49  ;;  %v1833_v29 = vld [vmem:[#allocation16 + $0x420] sm:$0xff] }
 0x3eb   :  { %2508 = vmatprep.subr.bf16.mxu0 %v2040_v7  ;;  %v2122_v42 = vunpack.c.l.s8.bf16 %v1816_v36  ;;  %v2075_v45 = vunpack.c.l.s8.bf16 %v1793_v38  ;;  %v2082_v54 = vunpack.c.h.s8.bf16 %v1794_v34  ;;  %v2121_v47 = vunpack.c.l.s8.bf16 %v1815_v44  ;;  %v1799_v7 = vld [vmem:[#allocation16 + $0x310] sm:$0xff] }
 0x3ec   :  { %2351 = vmatpush1.bf16.msra.mxu1 %v2079_v62  ;;  %2352 = vmatprep.mubr.bf16.mxu1 %v3851_v4  ;;  %v2128_v51 = vunpack.c.h.s8.bf16 %v1816_v36  ;;  %v2081_v53 = vunpack.c.h.s8.bf16 %v1793_v38  ;;  %v2088_v56 = vunpack.c.l.s8.bf16 %v1800_v48  ;;  %v2127_v59 = vunpack.c.h.s8.bf16 %v1815_v44  ;;  %v1840_v36 = vld [vmem:[#allocation16 + $0x458] sm:$0xff] }
 0x3ed   :  { %2524 = vmatprep.mubr.bf16.mxu0 %v3851_v4  ;;  %2363 = vmatprep.subr.bf16.mxu1 %v2086_v2  ;;  %v2134_v60 = vunpack.c.l.s8.bf16 %v1822_v55  ;;  %v2087_v62 = vunpack.c.l.s8.bf16 %v1799_v7  ;;  %v2094_v63 = vunpack.c.h.s8.bf16 %v1800_v48  ;;  %v2133_v0 = vunpack.c.l.s8.bf16 %v1821_v61  ;;  %v1806_v2 = vld [vmem:[#allocation16 + $0x348] sm:$0xff] }
 0x3ee   :  { %2509 = vmatpush1.bf16.msra.mxu0 %v2039_v5  ;;  %v2093_v5 = vunpack.c.h.s8.bf16 %v1799_v7  ;;  %v2106_v17 = vunpack.c.h.s8.bf16 %v1806_v2  ;;  %v2170_v48 = vunpack.c.l.s8.bf16 %v1840_v36 }
 0x3ef   :  { %2353 = vmatmul.mubr.bf16.vlgmr.msra.gmra.mrb[8].mxu1 %v3849_v1  ;;  %2510 = vmatprep.subr.bf16.mxu0 %v2046_v50  ;;  %v1828_v50 = vld [vmem:[#allocation16 + $0x3f8] sm:$0xff] }
 0x3f0   :  { %2364 = vmatpush1.bf16.msra.mxu1 %v2085_v6  ;;  %v2100_v6 = vunpack.c.l.s8.bf16 %v1806_v2  ;;  %v2152_v20 = vunpack.c.h.s8.bf16 %v1828_v50 }
 0x3f1   :  { %2365 = vmatprep.subr.bf16.mxu1 %v2092_v12  ;;  %v2139_v12 = vunpack.c.h.s8.bf16 %v1821_v61 }
 0x3f2   :  { %2511 = vmatpush1.bf16.msra.mxu0 %v2045_v14  ;;  %v2146_v14 = vunpack.c.l.s8.bf16 %v1828_v50 }
 0x3f3   :  { %2512 = vmatprep.subr.bf16.mxu0 %v2052_v16  ;;  %v2099_v16 = vunpack.c.l.s8.bf16 %v1805_v39 }
 0x3f4   :  { %2366 = vmatpush1.bf16.msra.mxu1 %v2091_v18  ;;  %v2145_v18 = vunpack.c.l.s8.bf16 %v1827_v15 }
 0x3f5   :  { %2367 = vmatprep.subr.bf16.mxu1 %v2098_v19  ;;  %v1812_v19 = vld [vmem:[#allocation16 + $0x378] sm:$0xff] }
 0x3f6   :  { %2513 = vmatpush1.bf16.msra.mxu0 %v2051_v21  ;;  %v2105_v21 = vunpack.c.h.s8.bf16 %v1805_v39  ;;  %v1846_v39 = vld [vmem:[#allocation16 + $0x488] sm:$0xff] }
 0x3f7   :  { %2514 = vmatprep.subr.bf16.mxu0 %v2058_v22  ;;  %v1834_v22 = vld [vmem:[#allocation16 + $0x428] sm:$0xff] }
 0x3f8   :  { %2368 = vmatpush1.bf16.msra.mxu1 %v2097_v23  ;;  %v2112_v23 = vunpack.c.l.s8.bf16 %v1812_v19  ;;  %v2158_v26 = vunpack.c.l.s8.bf16 %v1834_v22  ;;  %v2164_v34 = vunpack.c.h.s8.bf16 %v1834_v22  ;;  %v2182_v22 = vunpack.c.l.s8.bf16 %v1846_v39 }
 0x3f9   :  { %2369 = vmatprep.subr.bf16.mxu1 %v2104_v25  ;;  %v2151_v25 = vunpack.c.h.s8.bf16 %v1827_v15  ;;  %v1823_v15 = vld [vmem:[#allocation16 + $0x3d0] sm:$0xff] }
 0x3fa   :  { %2515 = vmatpush1.bf16.msra.mxu0 %v2057_v28  ;;  %v3858_v28 = vsub.s32 4, %v3741_v40 }
 0x3fb   :  { %2516 = vmatprep.subr.bf16.mxu0 %v2064_v27  ;;  %v3861_v27 = vsub.s32 5, %v3741_v40 }
 0x3fc   :  { %2370 = vmatpush1.bf16.msra.mxu1 %v2103_v46  ;;  %v2111_v46 = vunpack.c.l.s8.bf16 %v1811_v24  ;;  %v1550_v49 = vrot.slane %v3814_v10, %v3858_v28 }
 0x3fd   :  { %2371 = vmatprep.subr.bf16.mxu1 %v2110_v31  ;;  %v2118_v31 = vunpack.c.h.s8.bf16 %v1812_v19  ;;  %v1612_v38 = vrot.slane %v3816_v13, %v3861_v27 }
 0x3fe   :  { %2517 = vmatpush1.bf16.msra.mxu0 %v2063_v32  ;;  %v2157_v32 = vunpack.c.l.s8.bf16 %v1833_v29 }
 0x3ff   :  { %2518 = vmatprep.subr.bf16.mxu0 %v2070_v9  ;;  %v1818_v9 = vld [vmem:[#allocation16 + $0x3a8] sm:$0xff] }
 0x400   :  { %2372 = vmatpush1.bf16.msra.mxu1 %v2109_v33  ;;  %v1554_v33 = vrot.slane %v3814_v10, %v3861_v27 }
 0x401   :  { %2373 = vmatprep.subr.bf16.mxu1 %v2116_v30  ;;  %v1608_v30 = vrot.slane %v3816_v13, %v3858_v28  ;;  %v2130_v13 = vunpack.c.h.s8.bf16 %v1818_v9 }
 0x402   :  { %2519 = vmatpush1.bf16.msra.mxu0 %v2069_v35  ;;  %v2117_v35 = vunpack.c.h.s8.bf16 %v1811_v24 }
 0x403   :  { %2520 = vmatprep.subr.bf16.mxu0 %v2076_v37 }
 0x404   :  { %2374 = vmatpush1.bf16.msra.mxu1 %v2115_v52  ;;  %v2124_v52 = vunpack.c.l.s8.bf16 %v1818_v9 }
 0x405   :  { %2375 = vmatprep.subr.bf16.mxu1 %v2122_v42  ;;  %v1817_v42 = vld [vmem:[#allocation16 + $0x3a0] sm:$0xff] }
 0x406   :  { %2521 = vmatpush1.bf16.msra.mxu0 %v2075_v45  ;;  %v2123_v7 = vunpack.c.l.s8.bf16 %v1817_v42 }
 0x407   :  { %2522 = vmatprep.subr.bf16.mxu0 %v2082_v54  ;;  %v2163_v54 = vunpack.c.h.s8.bf16 %v1833_v29 }
 0x408   :  { %2376 = vmatpush1.bf16.msra.mxu1 %v2121_v47 }
 0x409   :  { %2377 = vmatprep.subr.bf16.mxu1 %v2128_v51  ;;  %v1839_v51 = vld [vmem:[#allocation16 + $0x450] sm:$0xff] }
 0x40a   :  { %2523 = vmatpush1.bf16.msra.mxu0 %v2081_v53 }
 0x40b   :  { %2535 = vmatprep.subr.bf16.mxu0 %v2088_v56 }
 0x40c   :  { %2378 = vmatpush1.bf16.msra.mxu1 %v2127_v59 }
 0x40d   :  { %2525 = vmatmul.mubr.bf16.vlgmr.msra.gmra.mrb[24].mxu0 %v3849_v1  ;;  %2379 = vmatprep.subr.bf16.mxu1 %v2134_v60 }
 0x40e   :  { %2536 = vmatpush1.bf16.msra.mxu0 %v2087_v62 }
 0x40f   :  { %2537 = vmatprep.subr.bf16.mxu0 %v2094_v63  ;;  %v2169_v63 = vunpack.c.l.s8.bf16 %v1839_v51 }
 0x410   :  { %2380 = vmatpush1.bf16.msra.mxu1 %v2133_v0  ;;  %v1824_v0 = vld [vmem:[#allocation16 + $0x3d8] sm:$0xff] }
 0x411   :  { %2381 = vmatprep.subr.bf16.mxu1 %v2140_v3 }
 0x412   :  { %2538 = vmatpush1.bf16.msra.mxu0 %v2093_v5  ;;  %v2176_v5 = vunpack.c.h.s8.bf16 %v1840_v36 }
 0x413   :  { %2539 = vmatprep.subr.bf16.mxu0 %v2100_v6  ;;  %v2129_v6 = vunpack.c.h.s8.bf16 %v1817_v42 }
 0x414   :  { %2382 = vmatpush1.bf16.msra.mxu1 %v2139_v12 }
 0x415   :  { %2383 = vmatprep.subr.bf16.mxu1 %v2146_v14  ;;  %v2136_v14 = vunpack.c.l.s8.bf16 %v1824_v0 }
 0x416   :  { %2540 = vmatpush1.bf16.msra.mxu0 %v2099_v16 }
 0x417   :  { %2541 = vmatprep.subr.bf16.mxu0 %v2106_v17 }
 0x418   :  { %2384 = vmatpush1.bf16.msra.mxu1 %v2145_v18  ;;  %v2175_v18 = vunpack.c.h.s8.bf16 %v1839_v51  ;;  %v1857_v51 = vld [vmem:[#allocation16 + $0x4e0] sm:$0xff] }
 0x419   :  { %2385 = vmatprep.subr.bf16.mxu1 %v2152_v20 }
 0x41a   :  { %2542 = vmatpush1.bf16.msra.mxu0 %v2105_v21 }
 0x41b   :  { %2543 = vmatprep.subr.bf16.mxu0 %v2112_v23  ;;  %v1845_v23 = vld [vmem:[#allocation16 + $0x480] sm:$0xff] }
 0x41c   :  { %2386 = vmatpush1.bf16.msra.mxu1 %v2151_v25  ;;  %v2135_v25 = vunpack.c.l.s8.bf16 %v1823_v15  ;;  %v2181_v29 = vunpack.c.l.s8.bf16 %v1845_v23 }
 0x41d   :  { %2387 = vmatprep.subr.bf16.mxu1 %v2158_v26  ;;  %v2142_v26 = vunpack.c.h.s8.bf16 %v1824_v0 }
 0x41e   :  { %2544 = vmatpush1.bf16.msra.mxu0 %v2111_v46  ;;  %v1830_v46 = vld [vmem:[#allocation16 + $0x408] sm:$0xff] }
 0x41f   :  { %v1434_v37 = vpop.f32.mrb[4].mxu1  ;;  %2545 = vmatprep.subr.bf16.mxu0 %v2118_v31  ;;  %v2188_v31 = vunpack.c.h.s8.bf16 %v1846_v39  ;;  %v2148_v9 = vunpack.c.l.s8.bf16 %v1830_v46 }
 0x420   :  { %v1575_v44 = vmul.f32 %v1550_v49, %v1434_v37  ;;  %v1436_v45 = vpop.f32.mrb[5].mxu1  ;;  %2388 = vmatpush1.bf16.msra.mxu1 %v2157_v32  ;;  %v1852_v32 = vld [vmem:[#allocation16 + $0x4b8] sm:$0xff]  ;;  %v2154_v37 = vunpack.c.h.s8.bf16 %v1830_v46 }
 0x421   :  { %v1576_v47 = vmul.f32 %v1554_v33, %v1436_v45  ;;  %v1438_v10 = vpop.f32.mrb[6].mxu1  ;;  %2389 = vmatprep.subr.bf16.mxu1 %v2164_v34  ;;  %v2187_v34 = vunpack.c.h.s8.bf16 %v1845_v23  ;;  %v2200_v42 = vunpack.c.h.s8.bf16 %v1852_v32  ;;  %v1858_v45 = vld [vmem:[#allocation16 + $0x4e8] sm:$0xff]  ;;  %v1876_v46 = vld [vmem:[#allocation16 + $0x578] sm:$0xff] }
 0x422   :  { %v1633_v53 = vadd.f32 %v1608_v30, %v1575_v44  ;;  %v1583_v55 = vmul.f32 %v1550_v49, %v1438_v10  ;;  %v1440_v56 = vpop.f32.mrb[7].mxu1  ;;  %2546 = vmatpush1.bf16.msra.mxu0 %v2117_v35  ;;  %v2141_v49 = vunpack.c.h.s8.bf16 %v1823_v15  ;;  %v1851_v35 = vld [vmem:[#allocation16 + $0x4b0] sm:$0xff] }
 0x423   :  { %v1634_v59 = vadd.f32 %v1612_v38, %v1576_v47  ;;  %v1584_v60 = vmul.f32 %v1554_v33, %v1440_v56  ;;  %2547 = vmatprep.subr.bf16.mxu0 %v2124_v52  ;;  %v1829_v33 = vld [vmem:[#allocation16 + $0x400] sm:$0xff]  ;;  %v1836_v52 = vld [vmem:[#allocation16 + $0x438] sm:$0xff]  ;;  %v1835_v47 = vld [vmem:[#allocation16 + $0x430] sm:$0xff]  ;;  %v2199_v10 = vunpack.c.h.s8.bf16 %v1851_v35  ;;  %v2205_v56 = vunpack.c.l.s8.bf16 %v1857_v51 }
 0x424   :  { %v1665_v61 = vmul.f32 0.2, %v1633_v53  ;;  %v1641_v62 = vadd.f32 %v1608_v30, %v1583_v55  ;;  %2390 = vmatpush1.bf16.msra.mxu1 %v2163_v54  ;;  %vm1649_vm5 = vcmp.gt.f32.partialorder %v1633_v53, 0.0  ;;  %v2194_v30 = vunpack.c.l.s8.bf16 %v1852_v32 }
 0x425   :  { %v1666_v2 = vmul.f32 0.2, %v1634_v59  ;;  %v1642_v3 = vadd.f32 %v1612_v38, %v1584_v60  ;;  %2391 = vmatprep.subr.bf16.mxu1 %v2170_v48  ;;  %vm1650_vm6 = vcmp.gt.f32.partialorder %v1634_v59, 0.0  ;;  %v2147_v36 = vunpack.c.l.s8.bf16 %v1829_v33 }
 0x426   :  { %vm1657_vm7 = vcmp.gt.f32.partialorder %v1641_v62, 0.0  ;;  %v1673_v50 = vmul.f32 0.2, %v1641_v62  ;;  %2548 = vmatpush1.bf16.msra.mxu0 %v2123_v7  ;;  %v1681_v16 = vsel %vm1649_vm5, %v1633_v53, %v1665_v61  ;;  %v2193_v38 = vunpack.c.l.s8.bf16 %v1851_v35  ;;  %v1842_v7 = vld [vmem:[#allocation16 + $0x468] sm:$0xff] }
 0x427   :  { %vm1658_vm8 = vcmp.gt.f32.partialorder %v1642_v3, 0.0  ;;  %v1674_v12 = vmul.f32 0.2, %v1642_v3  ;;  %2549 = vmatprep.subr.bf16.mxu0 %v2130_v13  ;;  %v1682_v19 = vsel %vm1650_vm6, %v1634_v59, %v1666_v2  ;;  %v2153_v44 = vunpack.c.h.s8.bf16 %v1829_v33  ;;  %v1864_v13 = vld [vmem:[#allocation16 + $0x518] sm:$0xff]  ;;  %v1863_v2 = vld [vmem:[#allocation16 + $0x510] sm:$0xff] }
 0x428   :  { %v1689_v17 = vsel %vm1657_vm7, %v1641_v62, %v1673_v50  ;;  %2392 = vmatpush1.bf16.msra.mxu1 %v2169_v63  ;;  %v2160_v54 = vunpack.c.l.s8.bf16 %v1836_v52  ;;  %v2206_v48 = vunpack.c.l.s8.bf16 %v1858_v45  ;;  %v2159_v53 = vunpack.c.l.s8.bf16 %v1835_v47  ;;  %v1841_v62 = vld [vmem:[#allocation16 + $0x460] sm:$0xff]  ;;  %v1875_v33 = vld [vmem:[#allocation16 + $0x570] sm:$0xff] }
 0x429   :  { %2393 = vmatprep.subr.bf16.mxu1 %v2176_v5  ;;  %v1690_v20 = vsel %vm1658_vm8, %v1642_v3, %v1674_v12  ;;  %v3873_v21 = vpack.c.bf16 %v1689_v17, %v1681_v16  ;;  %v2166_v55 = vunpack.c.h.s8.bf16 %v1836_v52  ;;  %v2212_v59 = vunpack.c.h.s8.bf16 %v1858_v45  ;;  %v1847_v16 = vld [vmem:[#allocation16 + $0x490] sm:$0xff]  ;;  %v1882_v52 = vld [vmem:[#allocation16 + $0x5a8] sm:$0xff] }
 0x42a   :  { %2550 = vmatpush1.bf16.msra.mxu0 %v2129_v6  ;;  %v3875_v24 = vpack.c.bf16 %v1690_v20, %v1682_v19  ;;  %v2165_v60 = vunpack.c.h.s8.bf16 %v1835_v47  ;;  %v2172_v61 = vunpack.c.l.s8.bf16 %v1842_v7  ;;  %v2211_v63 = vunpack.c.h.s8.bf16 %v1857_v51  ;;  %v1848_v6 = vld [vmem:[#allocation16 + $0x498] sm:$0xff]  ;;  %v1869_v19 = vld [vmem:[#allocation16 + $0x540] sm:$0xff] }
 0x42b   :  { %2551 = vmatprep.subr.bf16.mxu0 %v2136_v14  ;;  %v2218_v0 = vunpack.c.l.s8.bf16 %v1864_v13  ;;  %v2171_v3 = vunpack.c.l.s8.bf16 %v1841_v62  ;;  %v2178_v5 = vunpack.c.h.s8.bf16 %v1842_v7  ;;  %v2217_v50 = vunpack.c.l.s8.bf16 %v1863_v2  ;;  %v1870_v14 = vld [vmem:[#allocation16 + $0x548] sm:$0xff]  ;;  %v3242_v7 = vld [vmem:[#allocation13] sm:$0xff] }
 0x42c   :  { %2394 = vmatpush1.bf16.msra.mxu1 %v2175_v18  ;;  %2395 = vmatprep.mubr.bf16.mxu1 %v3875_v24  ;;  %v2224_v39 = vunpack.c.h.s8.bf16 %v1864_v13  ;;  %v2177_v12 = vunpack.c.h.s8.bf16 %v1841_v62  ;;  %v2184_v15 = vunpack.c.l.s8.bf16 %v1848_v6  ;;  %v2223_v17 = vunpack.c.h.s8.bf16 %v1863_v2  ;;  %v1888_v62 = vld [vmem:[#allocation16 + $0x5d8] sm:$0xff] }
 0x42d   :  { %2567 = vmatprep.mubr.bf16.mxu0 %v3875_v24  ;;  %2406 = vmatprep.subr.bf16.mxu1 %v2182_v22  ;;  %v2230_v18 = vunpack.c.l.s8.bf16 %v1870_v14  ;;  %v2183_v20 = vunpack.c.l.s8.bf16 %v1847_v16  ;;  %v2190_v22 = vunpack.c.h.s8.bf16 %v1848_v6  ;;  %v2229_v23 = vunpack.c.l.s8.bf16 %v1869_v19 }
 0x42e   :  { %2552 = vmatpush1.bf16.msra.mxu0 %v2135_v25  ;;  %v1854_v25 = vld [vmem:[#allocation16 + $0x4c8] sm:$0xff]  ;;  %v2235_v32 = vunpack.c.h.s8.bf16 %v1869_v19  ;;  %v2241_v35 = vunpack.c.l.s8.bf16 %v1875_v33  ;;  %v2247_v45 = vunpack.c.h.s8.bf16 %v1875_v33  ;;  %v1557_v47 = vsub.s32 6, %v3741_v40 }
 0x42f   :  { %2396 = vmatmul.mubr.bf16.vlgmr.msra.gmra.mrb[8].mxu1 %v3873_v21  ;;  %2553 = vmatprep.subr.bf16.mxu0 %v2142_v26  ;;  %v2236_v26 = vunpack.c.h.s8.bf16 %v1870_v14  ;;  %v1561_v51 = vsub.s32 7, %v3741_v40  ;;  %v1887_v14 = vld [vmem:[#allocation16 + $0x5d0] sm:$0xff] }
 0x430   :  { %2407 = vmatpush1.bf16.msra.mxu1 %v2181_v29  ;;  %v2189_v29 = vunpack.c.h.s8.bf16 %v1847_v16 }
 0x431   :  { %2408 = vmatprep.subr.bf16.mxu1 %v2188_v31  ;;  %v2196_v31 = vunpack.c.l.s8.bf16 %v1854_v25  ;;  %v1562_v13 = vrot.slane %v3242_v7, %v1561_v51 }
 0x432   :  { %2554 = vmatpush1.bf16.msra.mxu0 %v2141_v49  ;;  %v1853_v49 = vld [vmem:[#allocation16 + $0x4c0] sm:$0xff] }
 0x433   :  { %2555 = vmatprep.subr.bf16.mxu0 %v2148_v9  ;;  %v2242_v9 = vunpack.c.l.s8.bf16 %v1876_v46 }
 0x434   :  { %2409 = vmatpush1.bf16.msra.mxu1 %v2187_v34  ;;  %v2195_v34 = vunpack.c.l.s8.bf16 %v1853_v49 }
 0x435   :  { %2410 = vmatprep.subr.bf16.mxu1 %v2194_v30  ;;  %v2202_v30 = vunpack.c.h.s8.bf16 %v1854_v25 }
 0x436   :  { %2556 = vmatpush1.bf16.msra.mxu0 %v2147_v36  ;;  %v1860_v36 = vld [vmem:[#allocation16 + $0x4f8] sm:$0xff] }
 0x437   :  { %2557 = vmatprep.subr.bf16.mxu0 %v2154_v37  ;;  %v2248_v37 = vunpack.c.h.s8.bf16 %v1876_v46 }
 0x438   :  { %2411 = vmatpush1.bf16.msra.mxu1 %v2193_v38  ;;  %v2201_v38 = vunpack.c.h.s8.bf16 %v1853_v49  ;;  %v2272_v49 = vunpack.c.h.s8.bf16 %v1888_v62 }
 0x439   :  { %2412 = vmatprep.subr.bf16.mxu1 %v2200_v42  ;;  %v2208_v42 = vunpack.c.l.s8.bf16 %v1860_v36 }
 0x43a   :  { %2558 = vmatpush1.bf16.msra.mxu0 %v2153_v44  ;;  %v1859_v44 = vld [vmem:[#allocation16 + $0x4f0] sm:$0xff] }
 0x43b   :  { %2559 = vmatprep.subr.bf16.mxu0 %v2160_v54  ;;  %v2254_v54 = vunpack.c.l.s8.bf16 %v1882_v52 }
 0x43c   :  { %2413 = vmatpush1.bf16.msra.mxu1 %v2199_v10  ;;  %v1881_v10 = vld [vmem:[#allocation16 + $0x5a0] sm:$0xff] }
 0x43d   :  { %2414 = vmatprep.subr.bf16.mxu1 %v2206_v48  ;;  %v2207_v48 = vunpack.c.l.s8.bf16 %v1859_v44 }
 0x43e   :  { %2560 = vmatpush1.bf16.msra.mxu0 %v2159_v53  ;;  %v2214_v53 = vunpack.c.h.s8.bf16 %v1860_v36  ;;  %v1706_v36 = vld [vmem:[#allocation16 + $0x28] sm:$0xff] }
 0x43f   :  { %2561 = vmatprep.subr.bf16.mxu0 %v2166_v55  ;;  %v2253_v55 = vunpack.c.l.s8.bf16 %v1881_v10 }
 0x440   :  { %2415 = vmatpush1.bf16.msra.mxu1 %v2205_v56  ;;  %v1866_v56 = vld [vmem:[#allocation16 + $0x528] sm:$0xff] }
 0x441   :  { %2416 = vmatprep.subr.bf16.mxu1 %v2212_v59  ;;  %v1558_v59 = vrot.slane %v3242_v7, %v1557_v47  ;;  %v2220_v2 = vunpack.c.l.s8.bf16 %v1866_v56  ;;  %v1904_v7 = vunpack.c.h.s8.bf16 %v1706_v36 }
 0x442   :  { %2562 = vmatpush1.bf16.msra.mxu0 %v2165_v60  ;;  %v2260_v60 = vunpack.c.h.s8.bf16 %v1882_v52 }
 0x443   :  { %2563 = vmatprep.subr.bf16.mxu0 %v2172_v61  ;;  %v2213_v61 = vunpack.c.h.s8.bf16 %v1859_v44 }
 0x444   :  { %2417 = vmatpush1.bf16.msra.mxu1 %v2211_v63  ;;  %v3243_v63 = vld [vmem:[#allocation14] sm:$0xff] }
 0x445   :  { %2418 = vmatprep.subr.bf16.mxu1 %v2218_v0  ;;  %v1616_v0 = vrot.slane %v3243_v63, %v1557_v47  ;;  %v1620_v40 = vrot.slane %v3243_v63, %v1561_v51 }
 0x446   :  { %2564 = vmatpush1.bf16.msra.mxu0 %v2171_v3  ;;  %v1865_v3 = vld [vmem:[#allocation16 + $0x520] sm:$0xff] }
 0x447   :  { %2565 = vmatprep.subr.bf16.mxu0 %v2178_v5  ;;  %v2225_v33 = vunpack.c.h.s8.bf16 %v1865_v3 }
 0x448   :  { %2419 = vmatpush1.bf16.msra.mxu1 %v2217_v50  ;;  %v2259_v50 = vunpack.c.h.s8.bf16 %v1881_v10 }
 0x449   :  { %2420 = vmatprep.subr.bf16.mxu1 %v2224_v39 }
 0x44a   :  { %2566 = vmatpush1.bf16.msra.mxu0 %v2177_v12  ;;  %v2266_v12 = vunpack.c.l.s8.bf16 %v1888_v62 }
 0x44b   :  { %2578 = vmatprep.subr.bf16.mxu0 %v2184_v15 }
 0x44c   :  { %2421 = vmatpush1.bf16.msra.mxu1 %v2223_v17  ;;  %v2219_v17 = vunpack.c.l.s8.bf16 %v1865_v3 }
 0x44d   :  { %2568 = vmatmul.mubr.bf16.vlgmr.msra.gmra.mrb[24].mxu0 %v3873_v21  ;;  %2422 = vmatprep.subr.bf16.mxu1 %v2230_v18 }
 0x44e   :  { %2579 = vmatpush1.bf16.msra.mxu0 %v2183_v20 }
 0x44f   :  { %2580 = vmatprep.subr.bf16.mxu0 %v2190_v22  ;;  %v2226_v22 = vunpack.c.h.s8.bf16 %v1866_v56  ;;  %v1878_v56 = vld [vmem:[#allocation16 + $0x588] sm:$0xff] }
 0x450   :  { %2423 = vmatpush1.bf16.msra.mxu1 %v2229_v23  ;;  %v2250_v3 = vunpack.c.h.s8.bf16 %v1878_v56 }
 0x451   :  { %2424 = vmatprep.subr.bf16.mxu1 %v2236_v26  ;;  %v2265_v26 = vunpack.c.l.s8.bf16 %v1887_v14 }
 0x452   :  { %2581 = vmatpush1.bf16.msra.mxu0 %v2189_v29  ;;  %v1872_v29 = vld [vmem:[#allocation16 + $0x558] sm:$0xff] }
 0x453   :  { %2582 = vmatprep.subr.bf16.mxu0 %v2196_v31 }
 0x454   :  { %2425 = vmatpush1.bf16.msra.mxu1 %v2235_v32 }
 0x455   :  { %2426 = vmatprep.subr.bf16.mxu1 %v2242_v9 }
 0x456   :  { %2583 = vmatpush1.bf16.msra.mxu0 %v2195_v34  ;;  %v1871_v34 = vld [vmem:[#allocation16 + $0x550] sm:$0xff] }
 0x457   :  { %2584 = vmatprep.subr.bf16.mxu0 %v2202_v30  ;;  %v2231_v44 = vunpack.c.l.s8.bf16 %v1871_v34 }
 0x458   :  { %2427 = vmatpush1.bf16.msra.mxu1 %v2241_v35  ;;  %v2232_v35 = vunpack.c.l.s8.bf16 %v1872_v29 }
 0x459   :  { %2428 = vmatprep.subr.bf16.mxu1 %v2248_v37 }
 0x45a   :  { %2585 = vmatpush1.bf16.msra.mxu0 %v2201_v38  ;;  %v2271_v38 = vunpack.c.h.s8.bf16 %v1887_v14  ;;  %v1883_v14 = vld [vmem:[#allocation16 + $0x5b0] sm:$0xff] }
 0x45b   :  { %2586 = vmatprep.subr.bf16.mxu0 %v2208_v42 }
 0x45c   :  { %2429 = vmatpush1.bf16.msra.mxu1 %v2247_v45  ;;  %v1705_v45 = vld [vmem:[#allocation16 + $0x20] sm:$0xff] }
 0x45d   :  { %2430 = vmatprep.subr.bf16.mxu1 %v2254_v54  ;;  %v1903_v62 = vunpack.c.h.s8.bf16 %v1705_v45 }
 0x45e   :  { %2587 = vmatpush1.bf16.msra.mxu0 %v2207_v48  ;;  %v1898_v48 = vunpack.c.l.s8.bf16 %v1706_v36 }
 0x45f   :  { %2588 = vmatprep.subr.bf16.mxu0 %v2214_v53  ;;  %v2238_v53 = vunpack.c.h.s8.bf16 %v1872_v29  ;;  %v1889_v29 = vld [vmem:[#allocation16 + $0x5e0] sm:$0xff] }
 0x460   :  { %v1520_v5 = vpop.f32.mrb[20].mxu0  ;;  %2431 = vmatpush1.bf16.msra.mxu1 %v2253_v55  ;;  %v1897_v55 = vunpack.c.l.s8.bf16 %v1705_v45 }
 0x461   :  { %v1577_v6 = vmul.f32 %v1558_v59, %v1520_v5  ;;  %v1522_v39 = vpop.f32.mrb[21].mxu0  ;;  %2432 = vmatprep.subr.bf16.mxu1 %v2260_v60  ;;  %v1712_v60 = vld [vmem:[#allocation16 + $0x58] sm:$0xff] }
 0x462   :  { %v1578_v15 = vmul.f32 %v1562_v13, %v1522_v39  ;;  %v1524_v16 = vpop.f32.mrb[22].mxu0  ;;  %2589 = vmatpush1.bf16.msra.mxu0 %v2213_v61  ;;  %v1877_v61 = vld [vmem:[#allocation16 + $0x580] sm:$0xff]  ;;  %v1910_v63 = vunpack.c.l.s8.bf16 %v1712_v60  ;;  %v1718_v39 = vld [vmem:[#allocation16 + $0x88] sm:$0xff] }
 0x463   :  { %v1635_v18 = vadd.f32 %v1616_v0, %v1577_v6  ;;  %v1585_v19 = vmul.f32 %v1558_v59, %v1524_v16  ;;  %v1526_v20 = vpop.f32.mrb[23].mxu0  ;;  %2590 = vmatprep.subr.bf16.mxu0 %v2220_v2  ;;  %v2237_v59 = vunpack.c.h.s8.bf16 %v1871_v34  ;;  %v2243_v2 = vunpack.c.l.s8.bf16 %v1877_v61  ;;  %v1717_v16 = vld [vmem:[#allocation16 + $0x80] sm:$0xff] }
 0x464   :  { %v1636_v23 = vadd.f32 %v1620_v40, %v1578_v15  ;;  %v1586_v25 = vmul.f32 %v1562_v13, %v1526_v20  ;;  %2433 = vmatpush1.bf16.msra.mxu1 %v2259_v50  ;;  %v2244_v13 = vunpack.c.l.s8.bf16 %v1878_v56  ;;  %v1916_v50 = vunpack.c.h.s8.bf16 %v1712_v60  ;;  %v1890_v20 = vld [vmem:[#allocation16 + $0x5e8] sm:$0xff] }
 0x465   :  { %v1667_v46 = vmul.f32 0.2, %v1635_v18  ;;  %v1643_v31 = vadd.f32 %v1616_v0, %v1585_v19  ;;  %2434 = vmatprep.subr.bf16.mxu1 %v2266_v12  ;;  %vm1651_vm9 = vcmp.gt.f32.partialorder %v1635_v18, 0.0  ;;  %v1711_v0 = vld [vmem:[#allocation16 + $0x50] sm:$0xff]  ;;  %v2249_v6 = vunpack.c.h.s8.bf16 %v1877_v61  ;;  %v1748_v61 = vld [vmem:[#allocation16 + $0x178] sm:$0xff] }
 0x466   :  { %v1668_v32 = vmul.f32 0.2, %v1636_v23  ;;  %v1644_v9 = vadd.f32 %v1620_v40, %v1586_v25  ;;  %2591 = vmatpush1.bf16.msra.mxu0 %v2219_v17  ;;  %vm1652_vm10 = vcmp.gt.f32.partialorder %v1636_v23, 0.0  ;;  %v1909_v5 = vunpack.c.l.s8.bf16 %v1711_v0  ;;  %v1884_v40 = vld [vmem:[#allocation16 + $0x5b8] sm:$0xff] }
 0x467   :  { %vm1659_vm11 = vcmp.gt.f32.partialorder %v1643_v31, 0.0  ;;  %v1675_v30 = vmul.f32 0.2, %v1643_v31  ;;  %2592 = vmatprep.subr.bf16.mxu0 %v2226_v22  ;;  %v1683_v52 = vsel %vm1651_vm9, %v1635_v18, %v1667_v46  ;;  %v2256_v12 = vunpack.c.l.s8.bf16 %v1884_v40  ;;  %v1724_v25 = vld [vmem:[#allocation16 + $0xb8] sm:$0xff] }
 0x468   :  { %vm1660_vm12 = vcmp.gt.f32.partialorder %v1644_v9, 0.0  ;;  %v1676_v37 = vmul.f32 0.2, %v1644_v9  ;;  %2435 = vmatpush1.bf16.msra.mxu1 %v2265_v26  ;;  %v1684_v54 = vsel %vm1652_vm10, %v1636_v23, %v1668_v32  ;;  %v1922_v15 = vunpack.c.l.s8.bf16 %v1718_v39 }
 0x469   :  { %v1691_v42 = vsel %vm1659_vm11, %v1643_v31, %v1675_v30  ;;  %2436 = vmatprep.subr.bf16.mxu1 %v2272_v49  ;;  %v2255_v17 = vunpack.c.l.s8.bf16 %v1883_v14  ;;  %v2262_v18 = vunpack.c.h.s8.bf16 %v1884_v40  ;;  %v1921_v19 = vunpack.c.l.s8.bf16 %v1717_v16  ;;  %v1723_v49 = vld [vmem:[#allocation16 + $0xb0] sm:$0xff] }
 0x46a   :  { %2593 = vmatpush1.bf16.msra.mxu0 %v2225_v33  ;;  %v1692_v47 = vsel %vm1660_vm12, %v1644_v9, %v1676_v37  ;;  %v3885_v10 = vpack.c.bf16 %v1691_v42, %v1683_v52  ;;  %v1928_v22 = vunpack.c.h.s8.bf16 %v1718_v39  ;;  %v2261_v23 = vunpack.c.h.s8.bf16 %v1883_v14  ;;  %v1760_v14 = vld [vmem:[#allocation16 + $0x1d8] sm:$0xff] }
 0x46b   :  { %v3887_v51 = vpack.c.bf16 %v1692_v47, %v1684_v54  ;;  %2594 = vmatprep.subr.bf16.mxu0 %v2232_v35  ;;  %v2268_v26 = vunpack.c.l.s8.bf16 %v1890_v20  ;;  %v1927_v46 = vunpack.c.h.s8.bf16 %v1717_v16  ;;  %v1934_v31 = vunpack.c.l.s8.bf16 %v1724_v25  ;;  %v1730_v35 = vld [vmem:[#allocation16 + $0xe8] sm:$0xff]  ;;  %v1735_v47 = vld [vmem:[#allocation16 + $0x110] sm:$0xff] }
 0x46c   :  { %2437 = vmatpush1.bf16.msra.mxu1 %v2271_v38  ;;  %v2267_v32 = vunpack.c.l.s8.bf16 %v1889_v29  ;;  %v2274_v9 = vunpack.c.h.s8.bf16 %v1890_v20  ;;  %v1933_v33 = vunpack.c.l.s8.bf16 %v1723_v49  ;;  %v1940_v34 = vunpack.c.h.s8.bf16 %v1724_v25  ;;  %v1729_v38 = vld [vmem:[#allocation16 + $0xe0] sm:$0xff]  ;;  %v1759_v16 = vld [vmem:[#allocation16 + $0x1d0] sm:$0xff] }
 0x46d   :  { %2438 = vmatprep.mubr.bf16.mxu1 %v3887_v51  ;;  %2610 = vmatprep.mubr.bf16.mxu0 %v3887_v51  ;;  %v2273_v30 = vunpack.c.h.s8.bf16 %v1889_v29  ;;  %v1939_v36 = vunpack.c.h.s8.bf16 %v1723_v49  ;;  %v1946_v37 = vunpack.c.l.s8.bf16 %v1730_v35  ;;  %v1945_v52 = vunpack.c.l.s8.bf16 %v1729_v38 }
 0x46e   :  { %2595 = vmatpush1.bf16.msra.mxu0 %v2231_v44  ;;  %2621 = vmatprep.subr.bf16.mxu1 %v1898_v48  ;;  %v1952_v42 = vunpack.c.h.s8.bf16 %v1730_v35  ;;  %v1736_v44 = vld [vmem:[#allocation16 + $0x118] sm:$0xff]  ;;  %v1951_v45 = vunpack.c.h.s8.bf16 %v1729_v38  ;;  %v1957_v48 = vunpack.c.l.s8.bf16 %v1735_v47  ;;  %v1963_v56 = vunpack.c.h.s8.bf16 %v1735_v47 }
 0x46f   :  { %2439 = vmatmul.mubr.bf16.vlgmr.msra.gmra.mrb[8].mxu1 %v3885_v10  ;;  %2596 = vmatprep.subr.bf16.mxu0 %v2238_v53  ;;  %v1958_v54 = vunpack.c.l.s8.bf16 %v1736_v44  ;;  %v1964_v53 = vunpack.c.h.s8.bf16 %v1736_v44  ;;  %v2011_v20 = vunpack.c.h.s8.bf16 %v1759_v16 }
 0x470   :  { %2622 = vmatpush1.bf16.msra.mxu1 %v1897_v55  ;;  %2653 = vmatprep.mubr.bf16.mxu1 %v3832_v58  ;;  %v1915_v58 = vunpack.c.h.s8.bf16 %v1711_v0  ;;  %v1742_v55 = vld [vmem:[#allocation16 + $0x148] sm:$0xff]  ;;  %v1747_v0 = vld [vmem:[#allocation16 + $0x170] sm:$0xff] }
 0x471   :  { %2623 = vmatprep.subr.bf16.mxu1 %v1904_v7  ;;  %v1970_v7 = vunpack.c.l.s8.bf16 %v1742_v55  ;;  %v1987_v40 = vunpack.c.h.s8.bf16 %v1747_v0 }
 0x472   :  { %2597 = vmatpush1.bf16.msra.mxu0 %v2237_v59  ;;  %v1741_v59 = vld [vmem:[#allocation16 + $0x140] sm:$0xff] }
 0x473   :  { %2598 = vmatprep.subr.bf16.mxu0 %v2244_v13  ;;  %v1969_v60 = vunpack.c.l.s8.bf16 %v1741_v59  ;;  %v1976_v13 = vunpack.c.h.s8.bf16 %v1742_v55 }
 0x474   :  { %2624 = vmatpush1.bf16.msra.mxu1 %v1903_v62  ;;  %v1975_v62 = vunpack.c.h.s8.bf16 %v1741_v59 }
 0x475   :  { %2625 = vmatprep.subr.bf16.mxu1 %v1910_v63  ;;  %v1982_v63 = vunpack.c.l.s8.bf16 %v1748_v61 }
 0x476   :  { %2599 = vmatpush1.bf16.msra.mxu0 %v2243_v2  ;;  %v1981_v2 = vunpack.c.l.s8.bf16 %v1747_v0 }
 0x477   :  { %2600 = vmatprep.subr.bf16.mxu0 %v2250_v3  ;;  %v1988_v3 = vunpack.c.h.s8.bf16 %v1748_v61 }
 0x478   :  { %2626 = vmatpush1.bf16.msra.mxu1 %v1909_v5  ;;  %v1754_v5 = vld [vmem:[#allocation16 + $0x1a8] sm:$0xff] }
 0x479   :  { %2627 = vmatprep.subr.bf16.mxu1 %v1916_v50  ;;  %v1994_v50 = vunpack.c.l.s8.bf16 %v1754_v5 }
 0x47a   :  { %2601 = vmatpush1.bf16.msra.mxu0 %v2249_v6  ;;  %v1753_v6 = vld [vmem:[#allocation16 + $0x1a0] sm:$0xff] }
 0x47b   :  { %2602 = vmatprep.subr.bf16.mxu0 %v2256_v12  ;;  %v1993_v39 = vunpack.c.l.s8.bf16 %v1753_v6  ;;  %v2000_v12 = vunpack.c.h.s8.bf16 %v1754_v5 }
 0x47c   :  { %2628 = vmatpush1.bf16.msra.mxu1 %v1915_v58  ;;  %v1999_v58 = vunpack.c.h.s8.bf16 %v1753_v6 }
 0x47d   :  { %2629 = vmatprep.subr.bf16.mxu1 %v1922_v15  ;;  %v2006_v15 = vunpack.c.l.s8.bf16 %v1760_v14 }
 0x47e   :  { %2603 = vmatpush1.bf16.msra.mxu0 %v2255_v17  ;;  %v2005_v17 = vunpack.c.l.s8.bf16 %v1759_v16 }
 0x47f   :  { %2604 = vmatprep.subr.bf16.mxu0 %v2262_v18  ;;  %v2012_v18 = vunpack.c.h.s8.bf16 %v1760_v14 }
 0x480   :  { %2630 = vmatpush1.bf16.msra.mxu1 %v1921_v19  ;;  %v1766_v19 = vld [vmem:[#allocation16 + $0x208] sm:$0xff] }
 0x481   :  { %2631 = vmatprep.subr.bf16.mxu1 %v1928_v22  ;;  %v2018_v22 = vunpack.c.l.s8.bf16 %v1766_v19 }
 0x482   :  { %2605 = vmatpush1.bf16.msra.mxu0 %v2261_v23  ;;  %v1765_v23 = vld [vmem:[#allocation16 + $0x200] sm:$0xff] }
 0x483   :  { %2606 = vmatprep.subr.bf16.mxu0 %v2268_v26  ;;  %v2017_v25 = vunpack.c.l.s8.bf16 %v1765_v23  ;;  %v1772_v26 = vld [vmem:[#allocation16 + $0x238] sm:$0xff] }
 0x484   :  { %2632 = vmatpush1.bf16.msra.mxu1 %v1927_v46  ;;  %v2030_v29 = vunpack.c.l.s8.bf16 %v1772_v26  ;;  %v1771_v46 = vld [vmem:[#allocation16 + $0x230] sm:$0xff]  ;;  %v2036_v49 = vunpack.c.h.s8.bf16 %v1772_v26 }
 0x485   :  { %2633 = vmatprep.subr.bf16.mxu1 %v1934_v31  ;;  %v2029_v31 = vunpack.c.l.s8.bf16 %v1771_v46 }
 0x486   :  { %2607 = vmatpush1.bf16.msra.mxu0 %v2267_v32  ;;  %v1778_v32 = vld [vmem:[#allocation16 + $0x268] sm:$0xff] }
 0x487   :  { %2608 = vmatprep.subr.bf16.mxu0 %v2274_v9  ;;  %v2035_v9 = vunpack.c.h.s8.bf16 %v1771_v46  ;;  %v2048_v35 = vunpack.c.h.s8.bf16 %v1778_v32 }
 0x488   :  { %2634 = vmatpush1.bf16.msra.mxu1 %v1933_v33  ;;  %v2042_v33 = vunpack.c.l.s8.bf16 %v1778_v32 }
 0x489   :  { %2635 = vmatprep.subr.bf16.mxu1 %v1940_v34  ;;  %v1777_v34 = vld [vmem:[#allocation16 + $0x260] sm:$0xff] }
 0x48a   :  { %2609 = vmatpush1.bf16.msra.mxu0 %v2273_v30  ;;  %v2041_v30 = vunpack.c.l.s8.bf16 %v1777_v34 }
 0x48c   :  { %2636 = vmatpush1.bf16.msra.mxu1 %v1939_v36  ;;  %v1784_v36 = vld [vmem:[#allocation16 + $0x298] sm:$0xff] }
 0x48d   :  { %2611 = vmatmul.mubr.bf16.vlgmr.msra.gmra.mrb[24].mxu0 %v3885_v10  ;;  %2637 = vmatprep.subr.bf16.mxu1 %v1946_v37  ;;  %v2047_v37 = vunpack.c.h.s8.bf16 %v1777_v34  ;;  %v2054_v38 = vunpack.c.l.s8.bf16 %v1784_v36  ;;  %v2060_v44 = vunpack.c.h.s8.bf16 %v1784_v36 }
 0x490   :  { %2638 = vmatpush1.bf16.msra.mxu1 %v1945_v52  ;;  %v1783_v52 = vld [vmem:[#allocation16 + $0x290] sm:$0xff] }
 0x491   :  { %2639 = vmatprep.subr.bf16.mxu1 %v1952_v42  ;;  %v2053_v42 = vunpack.c.l.s8.bf16 %v1783_v52 }
 0x494   :  { %2640 = vmatpush1.bf16.msra.mxu1 %v1951_v45  ;;  %v1790_v45 = vld [vmem:[#allocation16 + $0x2c8] sm:$0xff] }
 0x495   :  { %2641 = vmatprep.subr.bf16.mxu1 %v1958_v54  ;;  %v2059_v54 = vunpack.c.h.s8.bf16 %v1783_v52  ;;  %v2066_v47 = vunpack.c.l.s8.bf16 %v1790_v45  ;;  %v2072_v55 = vunpack.c.h.s8.bf16 %v1790_v45 }
 0x498   :  { %2642 = vmatpush1.bf16.msra.mxu1 %v1957_v48  ;;  %v1789_v48 = vld [vmem:[#allocation16 + $0x2c0] sm:$0xff] }
 0x499   :  { %2643 = vmatprep.subr.bf16.mxu1 %v1964_v53  ;;  %v2065_v53 = vunpack.c.l.s8.bf16 %v1789_v48 }
 0x49c   :  { %2644 = vmatpush1.bf16.msra.mxu1 %v1963_v56  ;;  %v1796_v56 = vld [vmem:[#allocation16 + $0x2f8] sm:$0xff] }
 0x49d   :  { %2645 = vmatprep.subr.bf16.mxu1 %v1970_v7  ;;  %v2071_v7 = vunpack.c.h.s8.bf16 %v1789_v48  ;;  %v2078_v59 = vunpack.c.l.s8.bf16 %v1796_v56  ;;  %v2084_v61 = vunpack.c.h.s8.bf16 %v1796_v56 }
 0x4a0   :  { %2646 = vmatpush1.bf16.msra.mxu1 %v1969_v60  ;;  %v1795_v60 = vld [vmem:[#allocation16 + $0x2f0] sm:$0xff] }
 0x4a1   :  { %2647 = vmatprep.subr.bf16.mxu1 %v1976_v13  ;;  %v2077_v13 = vunpack.c.l.s8.bf16 %v1795_v60 }
 0x4a4   :  { %2648 = vmatpush1.bf16.msra.mxu1 %v1975_v62  ;;  %v1802_v62 = vld [vmem:[#allocation16 + $0x328] sm:$0xff] }
 0x4a5   :  { %2649 = vmatprep.subr.bf16.mxu1 %v1982_v63  ;;  %v2083_v63 = vunpack.c.h.s8.bf16 %v1795_v60  ;;  %v2090_v0 = vunpack.c.l.s8.bf16 %v1802_v62  ;;  %v2096_v5 = vunpack.c.h.s8.bf16 %v1802_v62 }
 0x4a8   :  { %2650 = vmatpush1.bf16.msra.mxu1 %v1981_v2  ;;  %v1801_v2 = vld [vmem:[#allocation16 + $0x320] sm:$0xff] }
 0x4a9   :  { %2651 = vmatprep.subr.bf16.mxu1 %v1988_v3  ;;  %v2089_v3 = vunpack.c.l.s8.bf16 %v1801_v2 }
 0x4ac   :  { %2652 = vmatpush1.bf16.msra.mxu1 %v1987_v40  ;;  %v1808_v40 = vld [vmem:[#allocation16 + $0x358] sm:$0xff] }
 0x4ad   :  { %2664 = vmatprep.subr.bf16.mxu1 %v1994_v50  ;;  %v2095_v50 = vunpack.c.h.s8.bf16 %v1801_v2  ;;  %v2102_v6 = vunpack.c.l.s8.bf16 %v1808_v40  ;;  %v2108_v14 = vunpack.c.h.s8.bf16 %v1808_v40 }
 0x4af   :  { %2654 = vmatmul.mubr.bf16.vlgmr.msra.gmra.mrb[12].mxu1 %v3830_v57  ;;  %v2024_v57 = vunpack.c.h.s8.bf16 %v1766_v19  ;;  %v1820_v19 = vld [vmem:[#allocation16 + $0x3b8] sm:$0xff] }
 0x4b0   :  { %2665 = vmatpush1.bf16.msra.mxu1 %v1993_v39  ;;  %2696 = vmatprep.mubr.bf16.mxu1 %v3851_v4  ;;  %v2023_v4 = vunpack.c.h.s8.bf16 %v1765_v23  ;;  %v1807_v39 = vld [vmem:[#allocation16 + $0x350] sm:$0xff] }
 0x4b1   :  { %2666 = vmatprep.subr.bf16.mxu1 %v2000_v12  ;;  %v2101_v12 = vunpack.c.l.s8.bf16 %v1807_v39 }
 0x4b4   :  { %2667 = vmatpush1.bf16.msra.mxu1 %v1999_v58  ;;  %v1814_v58 = vld [vmem:[#allocation16 + $0x388] sm:$0xff] }
 0x4b5   :  { %2668 = vmatprep.subr.bf16.mxu1 %v2006_v15  ;;  %v2107_v15 = vunpack.c.h.s8.bf16 %v1807_v39  ;;  %v2114_v16 = vunpack.c.l.s8.bf16 %v1814_v58 }
 0x4b8   :  { %2669 = vmatpush1.bf16.msra.mxu1 %v2005_v17  ;;  %v1813_v17 = vld [vmem:[#allocation16 + $0x380] sm:$0xff] }
 0x4b9   :  { %2670 = vmatprep.subr.bf16.mxu1 %v2012_v18  ;;  %v2113_v18 = vunpack.c.l.s8.bf16 %v1813_v17 }
 0x4bc   :  { %2671 = vmatpush1.bf16.msra.mxu1 %v2011_v20  ;;  %v2126_v20 = vunpack.c.l.s8.bf16 %v1820_v19 }
 0x4bd   :  { %2672 = vmatprep.subr.bf16.mxu1 %v2018_v22  ;;  %v1819_v22 = vld [vmem:[#allocation16 + $0x3b0] sm:$0xff] }
 0x4be   :  { %v2125_v23 = vunpack.c.l.s8.bf16 %v1819_v22  ;;  %v2131_v26 = vunpack.c.h.s8.bf16 %v1819_v22 }
 0x4c0   :  { %2673 = vmatpush1.bf16.msra.mxu1 %v2017_v25  ;;  %v2132_v25 = vunpack.c.h.s8.bf16 %v1820_v19 }
 0x4c1   :  { %2674 = vmatprep.subr.bf16.mxu1 %v2024_v57  ;;  %v1826_v57 = vld [vmem:[#allocation16 + $0x3e8] sm:$0xff] }
 0x4c4   :  { %2675 = vmatpush1.bf16.msra.mxu1 %v2023_v4  ;;  %v2138_v4 = vunpack.c.l.s8.bf16 %v1826_v57 }
 0x4c5   :  { %2676 = vmatprep.subr.bf16.mxu1 %v2030_v29  ;;  %v1825_v29 = vld [vmem:[#allocation16 + $0x3e0] sm:$0xff] }
 0x4c6   :  { %v2137_v46 = vunpack.c.l.s8.bf16 %v1825_v29  ;;  %v2143_v32 = vunpack.c.h.s8.bf16 %v1825_v29 }
 0x4c8   :  { %2677 = vmatpush1.bf16.msra.mxu1 %v2029_v31  ;;  %v2144_v31 = vunpack.c.h.s8.bf16 %v1826_v57 }
 0x4c9   :  { %2678 = vmatprep.subr.bf16.mxu1 %v2036_v49  ;;  %v1832_v49 = vld [vmem:[#allocation16 + $0x418] sm:$0xff] }
 0x4cc   :  { %2679 = vmatpush1.bf16.msra.mxu1 %v2035_v9  ;;  %v2150_v9 = vunpack.c.l.s8.bf16 %v1832_v49 }
 0x4cd   :  { %2680 = vmatprep.subr.bf16.mxu1 %v2042_v33  ;;  %v1831_v33 = vld [vmem:[#allocation16 + $0x410] sm:$0xff] }
 0x4ce   :  { %v2149_v34 = vunpack.c.l.s8.bf16 %v1831_v33  ;;  %v2155_v36 = vunpack.c.h.s8.bf16 %v1831_v33 }
 0x4d0   :  { %2681 = vmatpush1.bf16.msra.mxu1 %v2041_v30  ;;  %v2156_v30 = vunpack.c.h.s8.bf16 %v1832_v49  ;;  %v1874_v49 = vld [vmem:[#allocation16 + $0x568] sm:$0xff] }
 0x4d1   :  { %2682 = vmatprep.subr.bf16.mxu1 %v2048_v35  ;;  %v1838_v35 = vld [vmem:[#allocation16 + $0x448] sm:$0xff]  ;;  %v2234_v33 = vunpack.c.l.s8.bf16 %v1874_v49 }
 0x4d4   :  { %2683 = vmatpush1.bf16.msra.mxu1 %v2047_v37  ;;  %v2162_v37 = vunpack.c.l.s8.bf16 %v1838_v35 }
 0x4d5   :  { %2684 = vmatprep.subr.bf16.mxu1 %v2054_v38  ;;  %v1837_v38 = vld [vmem:[#allocation16 + $0x440] sm:$0xff] }
 0x4d6   :  { %v2161_v52 = vunpack.c.l.s8.bf16 %v1837_v38  ;;  %v2167_v45 = vunpack.c.h.s8.bf16 %v1837_v38 }
 0x4d8   :  { %2685 = vmatpush1.bf16.msra.mxu1 %v2053_v42  ;;  %v2168_v42 = vunpack.c.h.s8.bf16 %v1838_v35  ;;  %v2240_v35 = vunpack.c.h.s8.bf16 %v1874_v49 }
 0x4d9   :  { %2686 = vmatprep.subr.bf16.mxu1 %v2060_v44  ;;  %v1844_v44 = vld [vmem:[#allocation16 + $0x478] sm:$0xff] }
 0x4dc   :  { %2687 = vmatpush1.bf16.msra.mxu1 %v2059_v54  ;;  %v2174_v54 = vunpack.c.l.s8.bf16 %v1844_v44 }
 0x4dd   :  { %2688 = vmatprep.subr.bf16.mxu1 %v2066_v47  ;;  %v1843_v47 = vld [vmem:[#allocation16 + $0x470] sm:$0xff] }
 0x4de   :  { %v2173_v48 = vunpack.c.l.s8.bf16 %v1843_v47  ;;  %v2179_v56 = vunpack.c.h.s8.bf16 %v1843_v47 }
 0x4e0   :  { %2689 = vmatpush1.bf16.msra.mxu1 %v2065_v53  ;;  %v2180_v53 = vunpack.c.h.s8.bf16 %v1844_v44 }
 0x4e1   :  { %2690 = vmatprep.subr.bf16.mxu1 %v2072_v55  ;;  %v1850_v55 = vld [vmem:[#allocation16 + $0x4a8] sm:$0xff] }
 0x4e4   :  { %2691 = vmatpush1.bf16.msra.mxu1 %v2071_v7  ;;  %v2186_v7 = vunpack.c.l.s8.bf16 %v1850_v55 }
 0x4e5   :  { %2692 = vmatprep.subr.bf16.mxu1 %v2078_v59  ;;  %v1849_v59 = vld [vmem:[#allocation16 + $0x4a0] sm:$0xff] }
 0x4e6   :  { %v2185_v60 = vunpack.c.l.s8.bf16 %v1849_v59  ;;  %v2191_v62 = vunpack.c.h.s8.bf16 %v1849_v59 }
 0x4e8   :  { %2693 = vmatpush1.bf16.msra.mxu1 %v2077_v13  ;;  %v2192_v13 = vunpack.c.h.s8.bf16 %v1850_v55 }
 0x4e9   :  { %2694 = vmatprep.subr.bf16.mxu1 %v2084_v61  ;;  %v1856_v61 = vld [vmem:[#allocation16 + $0x4d8] sm:$0xff] }
 0x4ec   :  { %2695 = vmatpush1.bf16.msra.mxu1 %v2083_v63  ;;  %v2198_v63 = vunpack.c.l.s8.bf16 %v1856_v61 }
 0x4ed   :  { %2707 = vmatprep.subr.bf16.mxu1 %v2090_v0  ;;  %v1855_v0 = vld [vmem:[#allocation16 + $0x4d0] sm:$0xff] }
 0x4ee   :  { %v2197_v2 = vunpack.c.l.s8.bf16 %v1855_v0  ;;  %v2203_v40 = vunpack.c.h.s8.bf16 %v1855_v0  ;;  %v1892_v0 = vld [vmem:[#allocation16 + $0x5f8] sm:$0xff] }
 0x4ef   :  { %2697 = vmatmul.mubr.bf16.vlgmr.msra.gmra.mrb[12].mxu1 %v3849_v1  ;;  %v2120_v1 = vunpack.c.h.s8.bf16 %v1814_v58 }
 0x4f0   :  { %2708 = vmatpush1.bf16.msra.mxu1 %v2089_v3  ;;  %2739 = vmatprep.mubr.bf16.mxu1 %v3875_v24  ;;  %v2119_v24 = vunpack.c.h.s8.bf16 %v1813_v17  ;;  %v2204_v3 = vunpack.c.h.s8.bf16 %v1856_v61 }
 0x4f1   :  { %2709 = vmatprep.subr.bf16.mxu1 %v2096_v5  ;;  %v1862_v5 = vld [vmem:[#allocation16 + $0x508] sm:$0xff] }
 0x4f4   :  { %2710 = vmatpush1.bf16.msra.mxu1 %v2095_v50  ;;  %v2210_v50 = vunpack.c.l.s8.bf16 %v1862_v5 }
 0x4f5   :  { %2711 = vmatprep.subr.bf16.mxu1 %v2102_v6  ;;  %v1861_v6 = vld [vmem:[#allocation16 + $0x500] sm:$0xff] }
 0x4f6   :  { %v2209_v39 = vunpack.c.l.s8.bf16 %v1861_v6 }
 0x4f8   :  { %2712 = vmatpush1.bf16.msra.mxu1 %v2101_v12  ;;  %v3902_v12 = vld [vmem:[#allocation19] sm:$0x3f] }
 0x4f9   :  { %2713 = vmatprep.subr.bf16.mxu1 %v2108_v14  ;;  %v1868_v14 = vld [vmem:[#allocation16 + $0x538] sm:$0xff]  ;;  %v2842_v17 = vrot.slane %v3902_v12, %v3744_v41 }
 0x4fc   :  { %2714 = vmatpush1.bf16.msra.mxu1 %v2107_v15 }
 0x4fd   :  { %2715 = vmatprep.subr.bf16.mxu1 %v2114_v16  ;;  %v2215_v16 = vunpack.c.h.s8.bf16 %v1861_v6 }
 0x500   :  { %2716 = vmatpush1.bf16.msra.mxu1 %v2113_v18  ;;  %v2222_v18 = vunpack.c.l.s8.bf16 %v1868_v14 }
 0x501   :  { %2717 = vmatprep.subr.bf16.mxu1 %v2120_v1  ;;  %v1867_v1 = vld [vmem:[#allocation16 + $0x530] sm:$0xff] }
 0x502   :  { %v2221_v57 = vunpack.c.l.s8.bf16 %v1867_v1 }
 0x504   :  { %2718 = vmatpush1.bf16.msra.mxu1 %v2119_v24  ;;  %v2846_v24 = vrot.slane %v3902_v12, %v3747_v43 }
 0x505   :  { %2719 = vmatprep.subr.bf16.mxu1 %v2126_v20 }
 0x508   :  { %2720 = vmatpush1.bf16.msra.mxu1 %v2125_v23 }
 0x509   :  { %2721 = vmatprep.subr.bf16.mxu1 %v2132_v25 }
 0x50c   :  { %2722 = vmatpush1.bf16.msra.mxu1 %v2131_v26 }
 0x50d   :  { %2723 = vmatprep.subr.bf16.mxu1 %v2138_v4 }
 0x510   :  { %2724 = vmatpush1.bf16.msra.mxu1 %v2137_v46  ;;  %v2228_v46 = vunpack.c.h.s8.bf16 %v1868_v14 }
 0x511   :  { %2725 = vmatprep.subr.bf16.mxu1 %v2144_v31 }
 0x514   :  { %2726 = vmatpush1.bf16.msra.mxu1 %v2143_v32 }
 0x515   :  { %2727 = vmatprep.subr.bf16.mxu1 %v2150_v9 }
 0x518   :  { %2728 = vmatpush1.bf16.msra.mxu1 %v2149_v34  ;;  %v1873_v34 = vld [vmem:[#allocation16 + $0x560] sm:$0xff] }
 0x519   :  { %2729 = vmatprep.subr.bf16.mxu1 %v2156_v30  ;;  %v2233_v30 = vunpack.c.l.s8.bf16 %v1873_v34 }
 0x51c   :  { %2730 = vmatpush1.bf16.msra.mxu1 %v2155_v36  ;;  %v1880_v36 = vld [vmem:[#allocation16 + $0x598] sm:$0xff] }
 0x51d   :  { %2731 = vmatprep.subr.bf16.mxu1 %v2162_v37  ;;  %v2239_v37 = vunpack.c.h.s8.bf16 %v1873_v34  ;;  %v2252_v55 = vunpack.c.h.s8.bf16 %v1880_v36 }
 0x520   :  { %2732 = vmatpush1.bf16.msra.mxu1 %v2161_v52  ;;  %v2246_v52 = vunpack.c.l.s8.bf16 %v1880_v36 }
 0x521   :  { %2733 = vmatprep.subr.bf16.mxu1 %v2168_v42  ;;  %v1879_v42 = vld [vmem:[#allocation16 + $0x590] sm:$0xff] }
 0x524   :  { %2734 = vmatpush1.bf16.msra.mxu1 %v2167_v45 }
 0x525   :  { %2735 = vmatprep.subr.bf16.mxu1 %v2174_v54 }
 0x528   :  { %2736 = vmatpush1.bf16.msra.mxu1 %v2173_v48  ;;  %v2245_v48 = vunpack.c.l.s8.bf16 %v1879_v42 }
 0x529   :  { %2737 = vmatprep.subr.bf16.mxu1 %v2180_v53 }
 0x52c   :  { %2738 = vmatpush1.bf16.msra.mxu1 %v2179_v56  ;;  %v1886_v56 = vld [vmem:[#allocation16 + $0x5c8] sm:$0xff] }
 0x52d   :  { %2750 = vmatprep.subr.bf16.mxu1 %v2186_v7  ;;  %v2251_v7 = vunpack.c.h.s8.bf16 %v1879_v42  ;;  %v2258_v59 = vunpack.c.l.s8.bf16 %v1886_v56 }
 0x52f   :  { %2740 = vmatmul.mubr.bf16.vlgmr.msra.gmra.mrb[12].mxu1 %v3873_v21  ;;  %v3900_v21 = vld [vmem:[#allocation17] sm:$0x3f] }
 0x530   :  { %2751 = vmatpush1.bf16.msra.mxu1 %v2185_v60  ;;  %2782 = vmatprep.mubr.bf16.mxu1 %v3887_v51  ;;  %v2216_v51 = vunpack.c.h.s8.bf16 %v1862_v5  ;;  %v2798_v58 = vrot.slane %v3900_v21, %v3744_v41  ;;  %v2802_v15 = vrot.slane %v3900_v21, %v3747_v43  ;;  %v2227_v43 = vunpack.c.h.s8.bf16 %v1867_v1  ;;  %v1885_v60 = vld [vmem:[#allocation16 + $0x5c0] sm:$0xff] }
 0x531   :  { %2752 = vmatprep.subr.bf16.mxu1 %v2192_v13  ;;  %v2257_v13 = vunpack.c.l.s8.bf16 %v1885_v60  ;;  %v2806_v61 = vrot.slane %v3900_v21, %v3776_v8  ;;  %v2854_v5 = vrot.slane %v3902_v12, %v3779_v11 }
 0x534   :  { %2753 = vmatpush1.bf16.msra.mxu1 %v2191_v62  ;;  %v2264_v62 = vunpack.c.h.s8.bf16 %v1886_v56 }
 0x535   :  { %2754 = vmatprep.subr.bf16.mxu1 %v2198_v63  ;;  %v2810_v63 = vrot.slane %v3900_v21, %v3779_v11 }
 0x538   :  { %2755 = vmatpush1.bf16.msra.mxu1 %v2197_v2  ;;  %v2850_v2 = vrot.slane %v3902_v12, %v3776_v8 }
 0x539   :  { %2756 = vmatprep.subr.bf16.mxu1 %v2204_v3 }
 0x53c   :  { %2757 = vmatpush1.bf16.msra.mxu1 %v2203_v40  ;;  %v2263_v40 = vunpack.c.h.s8.bf16 %v1885_v60 }
 0x53d   :  { %2758 = vmatprep.subr.bf16.mxu1 %v2210_v50 }
 0x540   :  { %2759 = vmatpush1.bf16.msra.mxu1 %v2209_v39  ;;  %v2270_v39 = vunpack.c.l.s8.bf16 %v1892_v0 }
 0x541   :  { %2760 = vmatprep.subr.bf16.mxu1 %v2216_v51  ;;  %v1891_v51 = vld [vmem:[#allocation16 + $0x5f0] sm:$0xff] }
 0x542   :  { %v2440_v19 = vpop.f32.mrb[8].mxu1  ;;  %v2269_v8 = vunpack.c.l.s8.bf16 %v1891_v51 }
 0x543   :  { %v2825_v20 = vmul.f32 %v2798_v58, %v2440_v19  ;;  %v2442_v22 = vpop.f32.mrb[9].mxu1 }
 0x544   :  { %v2826_v23 = vmul.f32 %v2802_v15, %v2442_v22  ;;  %v2444_v25 = vpop.f32.mrb[10].mxu1  ;;  %2761 = vmatpush1.bf16.msra.mxu1 %v2215_v16 }
 0x545   :  { %v2869_v26 = vadd.f32 %v2842_v17, %v2825_v20  ;;  %v2831_v4 = vmul.f32 %v2798_v58, %v2444_v25  ;;  %v2446_v29 = vpop.f32.mrb[11].mxu1  ;;  %2762 = vmatprep.subr.bf16.mxu1 %v2222_v18  ;;  %v2275_v20 = vunpack.c.h.s8.bf16 %v1891_v51 }
 0x546   :  { %v2870_v31 = vadd.f32 %v2846_v24, %v2826_v23  ;;  %v2832_v41 = vmul.f32 %v2802_v15, %v2446_v29  ;;  %v2814_v29 = vrot.slane %v3900_v21, %v3858_v28 }
 0x547   :  { %3218 = vtanh.f32 %v2869_v26  ;;  %v2875_v32 = vadd.f32 %v2842_v17, %v2831_v4 }
 0x548   :  { %3220 = vtanh.f32 %v2870_v31  ;;  %v2876_v9 = vadd.f32 %v2846_v24, %v2832_v41  ;;  %2763 = vmatpush1.bf16.msra.mxu1 %v2221_v57  ;;  %v2276_v24 = vunpack.c.h.s8.bf16 %v1892_v0  ;;  %v2858_v31 = vrot.slane %v3902_v12, %v3858_v28 }
 0x549   :  { %3222 = vtanh.f32 %v2875_v32  ;;  %2764 = vmatprep.subr.bf16.mxu1 %v2228_v46  ;;  %v2818_v46 = vrot.slane %v3900_v21, %v3861_v27 }
 0x54a   :  { %3224 = vtanh.f32 %v2876_v9 }
 0x54c   :  { %2765 = vmatpush1.bf16.msra.mxu1 %v2227_v43 }
 0x54d   :  { %2766 = vmatprep.subr.bf16.mxu1 %v2234_v33 }
 0x550   :  { %2767 = vmatpush1.bf16.msra.mxu1 %v2233_v30 }
 0x551   :  { %v3219_v38 = vpop.eup %3218  ;;  %2768 = vmatprep.subr.bf16.mxu1 %v2240_v35 }
 0x552   :  { %v3221_v44 = vpop.eup %3220 }
 0x553   :  { %v3223_v45 = vpop.eup %3222  ;;  %v3033_v54 = vpack.c.bf16 %v3221_v44, %v3219_v38 }
 0x554   :  { %v3225_v47 = vpop.eup %3224  ;;  %2769 = vmatpush1.bf16.msra.mxu1 %v2239_v37 }
 0x555   :  { %2929 = vst [vmem:[#allocation20] sm:$0xff] %v3033_v54  ;;  %v3036_v53 = vpack.c.bf16 %v3225_v47, %v3223_v45  ;;  %2770 = vmatprep.subr.bf16.mxu1 %v2246_v52 }
 0x557   :  { %2932 = vst [vmem:[#allocation20 + $0x18] sm:$0xff] %v3036_v53 }
 0x558   :  { %2771 = vmatpush1.bf16.msra.mxu1 %v2245_v48 }
 0x559   :  { %2772 = vmatprep.subr.bf16.mxu1 %v2252_v55 }
 0x55c   :  { %2773 = vmatpush1.bf16.msra.mxu1 %v2251_v7 }
 0x55d   :  { %2774 = vmatprep.subr.bf16.mxu1 %v2258_v59 }
 0x560   :  { %v2612_v3 = vpop.f32.mrb[24].mxu0  ;;  %2775 = vmatpush1.bf16.msra.mxu1 %v2257_v13 }
 0x561   :  { %v2827_v50 = vmul.f32 %v2806_v61, %v2612_v3  ;;  %v2614_v6 = vpop.f32.mrb[25].mxu0  ;;  %2776 = vmatprep.subr.bf16.mxu1 %v2264_v62 }
 0x562   :  { %v2828_v14 = vmul.f32 %v2810_v63, %v2614_v6  ;;  %v2616_v58 = vpop.f32.mrb[26].mxu0 }
 0x563   :  { %v2871_v15 = vadd.f32 %v2850_v2, %v2827_v50  ;;  %v2833_v16 = vmul.f32 %v2806_v61, %v2616_v58  ;;  %v2618_v17 = vpop.f32.mrb[27].mxu0 }
 0x564   :  { %v2872_v18 = vadd.f32 %v2854_v5, %v2828_v14  ;;  %v2834_v1 = vmul.f32 %v2810_v63, %v2618_v17  ;;  %2777 = vmatpush1.bf16.msra.mxu1 %v2263_v40 }
 0x565   :  { %3226 = vtanh.f32 %v2871_v15  ;;  %v2877_v19 = vadd.f32 %v2850_v2, %v2833_v16  ;;  %2778 = vmatprep.subr.bf16.mxu1 %v2270_v39 }
 0x566   :  { %3228 = vtanh.f32 %v2872_v18  ;;  %v2878_v11 = vadd.f32 %v2854_v5, %v2834_v1 }
 0x567   :  { %3230 = vtanh.f32 %v2877_v19 }
 0x568   :  { %3232 = vtanh.f32 %v2878_v11  ;;  %2779 = vmatpush1.bf16.msra.mxu1 %v2269_v8 }
 0x569   :  { %2780 = vmatprep.subr.bf16.mxu1 %v2276_v24 }
 0x56c   :  { %2781 = vmatpush1.bf16.msra.mxu1 %v2275_v20 }
 0x56f   :  { %v3227_v22 = vpop.eup %3226  ;;  %2783 = vmatmul.mubr.bf16.vlgmr.msra.gmra.mrb[12].mxu1 %v3885_v10  ;;  %v2862_v10 = vrot.slane %v3902_v12, %v3861_v27 }
 0x570   :  { %v3229_v23 = vpop.eup %3228 }
 0x571   :  { %v3231_v25 = vpop.eup %3230  ;;  %v3034_v57 = vpack.c.bf16 %v3229_v23, %v3227_v22 }
 0x572   :  { %v3233_v26 = vpop.eup %3232 }
 0x573   :  { %2930 = vst [vmem:[#allocation20 + $0x8] sm:$0xff] %v3034_v57  ;;  %v3037_v4 = vpack.c.bf16 %v3233_v26, %v3231_v25 }
 0x575   :  { %2933 = vst [vmem:[#allocation20 + $0x20] sm:$0xff] %v3037_v4 }
 0x642   :  { %v2784_v41 = vpop.f32.mrb[12].mxu1 }
 0x643   :  { %v2829_v49 = vmul.f32 %v2814_v29, %v2784_v41  ;;  %v2786_v32 = vpop.f32.mrb[13].mxu1 }
 0x644   :  { %v2830_v9 = vmul.f32 %v2818_v46, %v2786_v32  ;;  %v2788_v43 = vpop.f32.mrb[14].mxu1 }
 0x645   :  { %v2873_v33 = vadd.f32 %v2858_v31, %v2829_v49  ;;  %v2835_v34 = vmul.f32 %v2814_v29, %v2788_v43  ;;  %v2790_v30 = vpop.f32.mrb[15].mxu1 }
 0x646   :  { %v2874_v35 = vadd.f32 %v2862_v10, %v2830_v9  ;;  %v2836_v36 = vmul.f32 %v2818_v46, %v2790_v30 }
 0x647   :  { %3234 = vtanh.f32 %v2873_v33  ;;  %v2879_v37 = vadd.f32 %v2858_v31, %v2835_v34 }
 0x648   :  { %3236 = vtanh.f32 %v2874_v35  ;;  %v2880_v21 = vadd.f32 %v2862_v10, %v2836_v36 }
 0x649   :  { %3238 = vtanh.f32 %v2879_v37 }
 0x64a   :  { %3240 = vtanh.f32 %v2880_v21 }
 0x651   :  { %v3235_v28 = vpop.eup %3234 }
 0x652   :  { %v3237_v38 = vpop.eup %3236 }
 0x653   :  { %v3239_v27 = vpop.eup %3238  ;;  %v3035_v12 = vpack.c.bf16 %v3237_v38, %v3235_v28 }
 0x654   :  { %v3241_v52 = vpop.eup %3240 }
 0x655   :  { %2931 = vst [vmem:[#allocation20 + $0x10] sm:$0xff] %v3035_v12  ;;  %v3038_v42 = vpack.c.bf16 %v3241_v52, %v3239_v27 }
 0x657   :  { %2934 = vst [vmem:[#allocation20 + $0x28] sm:$0xff] %v3038_v42 }
 0x658   :  { %3497 = shalt.err (!%p3494_p8)
}
 0x659   :  { %s3498_s22 = scalar_lea.hbm %s3952_s11, 768 }
 0x65a   :  { %p3499_p9 = scmp.ne.s32.totalorder %s3952_s11, %s3498_s22  ;;  %p3502_p10 = scmp.lt.u32.totalorder %s3498_s22, %s3952_s11 }
 0x65c   :  { %p3504_p11 = pnand %p3502_p10, %p3499_p9 }
 0x65e   :  { %3507 = shalt.err (!%p3504_p11)
}
 0x65f   :  { %s3544_s24 = smov 384   ;;  %s3545_s25 = smov 24  }
 0x660   :  { %2946 = dma.vmem_to_hbm [thread:$0]  %s2941_s7, 768, %s3952_s11, [#allocation4], %s3544_s24, %s3544_s24, %s3545_s25  }
 0x661   :  { %3520 = dma.done.wait [#allocation4], 768  }
 0x662   :  { %3521 = vsyncadd [#allocation4], 4294966528 }
 0x663   :  { %2950 = vsyncpa [#allocation3], 1 }
 0x664   :  { %2951 = vsyncpa [#allocation6], 1 }
 0x665   :  { %2952 = vsyncpa [#allocation9], 1 }
 0x666   :  { %2953 = vsyncpa [#allocation12], 1 }
 0x667   :  { %2954 = vsyncpa [#allocation15], 1 }
 0x668   :  { %2955 = vsyncpa [#allocation18], 1 }
 0x669   :  { %2956 = vsyncpa [#allocation4], 1 }

// kernel: tpu_custom_call.1
= control target key start
LH: loop header
LB: loop body
LE: loop exit
PB: predicated region body
PF: predicated region fallthrough
CT: control target
= control target key end

     0   :  { %16 = vsyncpa [#allocation3], 0  ;;  %s3941_s0 = inlined_call_operand.hbm [shape: bf16[16,32], index: 0, kind: input, shape index: {}]   ;;  %s3942_s1 = inlined_call_operand.hbm [shape: bf16[32,256], index: 1, kind: input, shape index: {}]   ;;  %s3943_s2 = inlined_call_operand.hbm [shape: f32[1,256], index: 2, kind: input, shape index: {}]   ;;  %s3944_s3 = inlined_call_operand.hbm [shape: bf16[256,512], index: 3, kind: input, shape index: {}]   ;;  %s3945_s4 = inlined_call_operand.hbm [shape: f32[1,512], index: 4, kind: input, shape index: {}]   ;;  %s3946_s5 = inlined_call_operand.hbm [shape: s8[512,1024], index: 5, kind: input, shape index: {}]   ;;  %s3947_s6 = inlined_call_operand.hbm [shape: f32[1,1024], index: 6, kind: input, shape index: {}]   ;;  %s3948_s7 = inlined_call_operand.hbm [shape: f32[1,1024], index: 7, kind: input, shape index: {}]   ;;  %s3949_s8 = inlined_call_operand.hbm [shape: s8[1024,768], index: 8, kind: input, shape index: {}]   ;;  %s3950_s9 = inlined_call_operand.hbm [shape: f32[1,768], index: 9, kind: input, shape index: {}]   ;;  %s3951_s10 = inlined_call_operand.hbm [shape: f32[1,768], index: 10, kind: input, shape index: {}]   ;;  %s3952_s11 = inlined_call_operand.hbm [shape: bf16[16,768], index: 11, kind: output, shape index: {}]  }
   0x1   :  { %17 = vsyncpa [#allocation6], 0 }
   0x2   :  { %18 = vsyncpa [#allocation9], 0 }
   0x3   :  { %19 = vsyncpa [#allocation12], 0 }
   0x4   :  { %20 = vsyncpa [#allocation15], 0 }
   0x5   :  { %21 = vsyncpa [#allocation18], 0 }
   0x6   :  { %22 = vsyncpa [#allocation4], 0  ;;  %s3522_s17 = smov [#allocation5]   ;;  %s3244_s21 = scalar_lea.hbm %s3942_s1, 512 }
   0x7   :  { %s40_s18 = sshll.u32 %s3522_s17, 4  ;;  %p3245_p0 = scmp.ne.s32.totalorder %s3942_s1, %s3244_s21  ;;  %s41_s18 = int_to_ptr.vmem [resolvable:$true] %s40_s18 }
   0x8   :  { %p3248_p1 = scmp.lt.u32.totalorder %s3244_s21, %s3942_s1 }
   0xa   :  { %p3250_p2 = pnand %p3248_p1, %p3245_p0 }
   0xc   :  { %3253 = shalt.err (!%p3250_p2)
}
   0xd   :  { %s3254_s26 = scalar_lea.vmem %s41_s18, 512  ;;  %p3259_p4 = scmp.lt.s32.totalorder %s41_s18, %s41_s18 }
   0xe   :  { %p3255_p3 = scmp.ne.s32.totalorder %s41_s18, %s3254_s26  ;;  %p3260_p5 = scmp.lt.s32.totalorder %s3254_s26, %s3254_s26 }
  0x10   :  { %p3261_p6 = por %p3260_p5, %p3259_p4 }
  0x12   :  { %p3262_p7 = pnand %p3261_p6, %p3255_p3 }
  0x14   :  { %3265 = shalt.err (!%p3262_p7)
}
  0x15   :  { %s3523_s27 = smov 128   ;;  %s3524_s28 = smov 8  }
  0x16   :  { %46 = dma.hbm_to_vmem [thread:$0]  %s3942_s1, 512, %s41_s18, [#allocation6], %s3523_s27, %s3523_s27, %s3524_s28  }
  0x17   :  { %s3525_s12 = smov [#allocation8]   ;;  %s3266_s16 = scalar_lea.hbm %s3944_s3, 8192 }
  0x18   :  { %s62_s13 = sshll.u32 %s3525_s12, 4  ;;  %p3267_p8 = scmp.ne.s32.totalorder %s3944_s3, %s3266_s16  ;;  %s63_s13 = int_to_ptr.vmem [resolvable:$true] %s62_s13 }
  0x19   :  { %p3270_p9 = scmp.lt.u32.totalorder %s3266_s16, %s3944_s3 }
  0x1b   :  { %p3272_p10 = pnand %p3270_p9, %p3267_p8 }
  0x1d   :  { %3275 = shalt.err (!%p3272_p10)
}
  0x1e   :  { %s3276_s22 = scalar_lea.vmem %s63_s13, 8192  ;;  %p3281_p12 = scmp.lt.s32.totalorder %s63_s13, %s63_s13 }
  0x1f   :  { %p3277_p11 = scmp.ne.s32.totalorder %s63_s13, %s3276_s22  ;;  %p3282_p13 = scmp.lt.s32.totalorder %s3276_s22, %s3276_s22 }
  0x21   :  { %p3283_p0 = por %p3282_p13, %p3281_p12 }
  0x23   :  { %p3284_p1 = pnand %p3283_p0, %p3277_p11 }
  0x25   :  { %3287 = shalt.err (!%p3284_p1)
}
  0x26   :  { %s3526_s1 = smov 256   ;;  %s3527_s18 = smov 16  }
  0x27   :  { %68 = dma.hbm_to_vmem [thread:$0]  %s3944_s3, 8192, %s63_s13, [#allocation9], %s3526_s1, %s3526_s1, %s3527_s18  }
  0x28   :  { %s3528_s25 = smov [#allocation11]   ;;  %s3288_s29 = scalar_lea.hbm %s3946_s5, 16384 }
  0x29   :  { %s84_s26 = sshll.u32 %s3528_s25, 4  ;;  %p3289_p2 = scmp.ne.s32.totalorder %s3946_s5, %s3288_s29  ;;  %s85_s26 = int_to_ptr.vmem [resolvable:$true] %s84_s26 }
  0x2a   :  { %p3292_p3 = scmp.lt.u32.totalorder %s3288_s29, %s3946_s5 }
  0x2c   :  { %p3294_p4 = pnand %p3292_p3, %p3289_p2 }
  0x2e   :  { %3297 = shalt.err (!%p3294_p4)
}
  0x2f   :  { %s3298_s16 = scalar_lea.vmem %s85_s26, 16384  ;;  %p3303_p6 = scmp.lt.s32.totalorder %s85_s26, %s85_s26 }
  0x30   :  { %p3299_p5 = scmp.ne.s32.totalorder %s85_s26, %s3298_s16  ;;  %p3304_p7 = scmp.lt.s32.totalorder %s3298_s16, %s3298_s16 }
  0x32   :  { %p3305_p8 = por %p3304_p7, %p3303_p6 }
  0x34   :  { %p3306_p9 = pnand %p3305_p8, %p3299_p5 }
  0x36   :  { %3309 = shalt.err (!%p3306_p9)
}
  0x37   :  { %s3529_s3 = smov 1024   ;;  %s3530_s13 = smov 64  }
  0x38   :  { %90 = dma.hbm_to_vmem [thread:$0]  %s3946_s5, 16384, %s85_s26, [#allocation12], %s3529_s3, %s3529_s3, %s3530_s13  }
  0x39   :  { %s3531_s20 = smov [#allocation14]   ;;  %s3532_s22 = smov [#allocation17]  }
  0x3a   :  { %s107_s21 = sshll.u32 %s3531_s20, 4  ;;  %s129_s1 = sshll.u32 %s3532_s22, 4  ;;  %s108_s21 = int_to_ptr.vmem [resolvable:$true] %s107_s21  ;;  %s130_s1 = int_to_ptr.vmem [resolvable:$true] %s129_s1 }
  0x3b   :  { %s3310_s24 = scalar_lea.hbm %s3948_s7, 128 }
  0x3c   :  { %p3311_p10 = scmp.ne.s32.totalorder %s3948_s7, %s3310_s24  ;;  %p3314_p11 = scmp.lt.u32.totalorder %s3310_s24, %s3948_s7 }
  0x3e   :  { %p3316_p12 = pnand %p3314_p11, %p3311_p10 }
  0x40   :  { %3319 = shalt.err (!%p3316_p12)
}
  0x41   :  { %s3320_s5 = scalar_lea.vmem %s108_s21, 128  ;;  %p3325_p0 = scmp.lt.s32.totalorder %s108_s21, %s108_s21 }
  0x42   :  { %p3321_p13 = scmp.ne.s32.totalorder %s108_s21, %s3320_s5  ;;  %p3326_p1 = scmp.lt.s32.totalorder %s3320_s5, %s3320_s5 }
  0x44   :  { %p3327_p2 = por %p3326_p1, %p3325_p0 }
  0x46   :  { %p3328_p3 = pnand %p3327_p2, %p3321_p13 }
  0x48   :  { %3331 = shalt.err (!%p3328_p3)
}
  0x49   :  { %110 = dma.hbm_to_vmem [thread:$0]  %s3948_s7, 128, %s108_s21, [#allocation15]  }
  0x4a   :  { %s3332_s15 = scalar_lea.hbm %s3950_s9, 96 }
  0x4b   :  { %p3333_p4 = scmp.ne.s32.totalorder %s3950_s9, %s3332_s15  ;;  %p3336_p5 = scmp.lt.u32.totalorder %s3332_s15, %s3950_s9 }
  0x4d   :  { %p3338_p6 = pnand %p3336_p5, %p3333_p4 }
  0x4f   :  { %3341 = shalt.err (!%p3338_p6)
}
  0x50   :  { %s3342_s20 = scalar_lea.vmem %s130_s1, 96  ;;  %p3347_p8 = scmp.lt.s32.totalorder %s130_s1, %s130_s1 }
  0x51   :  { %p3343_p7 = scmp.ne.s32.totalorder %s130_s1, %s3342_s20  ;;  %p3348_p9 = scmp.lt.s32.totalorder %s3342_s20, %s3342_s20 }
  0x53   :  { %p3349_p10 = por %p3348_p9, %p3347_p8 }
  0x55   :  { %p3350_p11 = pnand %p3349_p10, %p3343_p7 }
  0x57   :  { %3353 = shalt.err (!%p3350_p11)
}
  0x58   :  { %132 = dma.hbm_to_vmem [thread:$0]  %s3950_s9, 96, %s130_s1, [#allocation18]  }
  0x59   :  { %s3533_s22 = smov [#allocation2]   ;;  %s3354_s25 = scalar_lea.hbm %s3941_s0, 128 }
  0x5a   :  { %s28_s18 = sshll.u32 %s3533_s22, 4  ;;  %p3355_p12 = scmp.ne.s32.totalorder %s3941_s0, %s3354_s25  ;;  %s29_s18 = int_to_ptr.vmem [resolvable:$true] %s28_s18 }
  0x5b   :  { %p3358_p13 = scmp.lt.u32.totalorder %s3354_s25, %s3941_s0 }
  0x5d   :  { %p3360_p0 = pnand %p3358_p13, %p3355_p12 }
  0x5f   :  { %3363 = shalt.err (!%p3360_p0)
}
  0x60   :  { %s3364_s26 = scalar_lea.vmem %s29_s18, 128  ;;  %p3369_p2 = scmp.lt.s32.totalorder %s29_s18, %s29_s18 }
  0x61   :  { %p3365_p1 = scmp.ne.s32.totalorder %s29_s18, %s3364_s26  ;;  %p3370_p3 = scmp.lt.s32.totalorder %s3364_s26, %s3364_s26 }
  0x63   :  { %p3371_p4 = por %p3370_p3, %p3369_p2 }
  0x65   :  { %p3372_p5 = pnand %p3371_p4, %p3365_p1 }
  0x67   :  { %3375 = shalt.err (!%p3372_p5)
}
  0x68   :  { %s3534_s9 = smov 4   ;;  %s3535_s12 = smov [#allocation7]  }
  0x69   :  { %34 = dma.hbm_to_vmem [thread:$0]  %s3941_s0, 128, %s29_s18, [#allocation3], %s3530_s13, %s3530_s13, %s3534_s9  }
  0x6a   :  { %s53_s14 = sshll.u32 %s3535_s12, 4  ;;  %s3536_s15 = smov [#allocation10]   ;;  %s54_s14 = int_to_ptr.vmem [resolvable:$true] %s53_s14 }
  0x6b   :  { %s75_s16 = sshll.u32 %s3536_s15, 4  ;;  %s3376_s19 = scalar_lea.hbm %s3943_s2, 32  ;;  %s76_s16 = int_to_ptr.vmem [resolvable:$true] %s75_s16 }
  0x6c   :  { %p3377_p6 = scmp.ne.s32.totalorder %s3943_s2, %s3376_s19  ;;  %p3380_p7 = scmp.lt.u32.totalorder %s3376_s19, %s3943_s2 }
  0x6e   :  { %p3382_p8 = pnand %p3380_p7, %p3377_p6 }
  0x70   :  { %3385 = shalt.err (!%p3382_p8)
}
  0x71   :  { %s3386_s0 = scalar_lea.vmem %s54_s14, 32  ;;  %p3391_p10 = scmp.lt.s32.totalorder %s54_s14, %s54_s14 }
  0x72   :  { %p3387_p9 = scmp.ne.s32.totalorder %s54_s14, %s3386_s0  ;;  %p3392_p11 = scmp.lt.s32.totalorder %s3386_s0, %s3386_s0 }
  0x74   :  { %p3393_p12 = por %p3392_p11, %p3391_p10 }
  0x76   :  { %p3394_p13 = pnand %p3393_p12, %p3387_p9 }
  0x78   :  { %3397 = shalt.err (!%p3394_p13)
}
  0x79   :  { %56 = dma.hbm_to_vmem [thread:$0]  %s3943_s2, 32, %s54_s14, [#allocation6]  }
  0x7a   :  { %s3398_s25 = scalar_lea.hbm %s3945_s4, 64 }
  0x7b   :  { %p3399_p0 = scmp.ne.s32.totalorder %s3945_s4, %s3398_s25  ;;  %p3402_p1 = scmp.lt.u32.totalorder %s3398_s25, %s3945_s4 }
  0x7d   :  { %p3404_p2 = pnand %p3402_p1, %p3399_p0 }
  0x7f   :  { %3407 = shalt.err (!%p3404_p2)
}
  0x80   :  { %s3408_s26 = scalar_lea.vmem %s76_s16, 64  ;;  %p3413_p4 = scmp.lt.s32.totalorder %s76_s16, %s76_s16 }
  0x81   :  { %p3409_p3 = scmp.ne.s32.totalorder %s76_s16, %s3408_s26  ;;  %p3414_p5 = scmp.lt.s32.totalorder %s3408_s26, %s3408_s26 }
  0x83   :  { %p3415_p6 = por %p3414_p5, %p3413_p4 }
  0x85   :  { %p3416_p7 = pnand %p3415_p6, %p3409_p3 }
  0x87   :  { %3419 = shalt.err (!%p3416_p7)
}
  0x88   :  { %78 = dma.hbm_to_vmem [thread:$0]  %s3945_s4, 64, %s76_s16, [#allocation9]  }
  0x89   :  { %s3537_s1 = smov [#allocation13]   ;;  %s3538_s12 = smov [#allocation16]  }
  0x8a   :  { %s97_s30 = sshll.u32 %s3537_s1, 4  ;;  %s116_s14 = sshll.u32 %s3538_s12, 4  ;;  %s98_s30 = int_to_ptr.vmem [resolvable:$true] %s97_s30  ;;  %s117_s14 = int_to_ptr.vmem [resolvable:$true] %s116_s14 }
  0x8b   :  { %s3420_s17 = scalar_lea.hbm %s3947_s6, 128 }
  0x8c   :  { %p3421_p8 = scmp.ne.s32.totalorder %s3947_s6, %s3420_s17  ;;  %p3424_p9 = scmp.lt.u32.totalorder %s3420_s17, %s3947_s6 }
  0x8e   :  { %p3426_p10 = pnand %p3424_p9, %p3421_p8 }
  0x90   :  { %3429 = shalt.err (!%p3426_p10)
}
  0x91   :  { %s3430_s4 = scalar_lea.vmem %s98_s30, 128  ;;  %p3435_p12 = scmp.lt.s32.totalorder %s98_s30, %s98_s30 }
  0x92   :  { %p3431_p11 = scmp.ne.s32.totalorder %s98_s30, %s3430_s4  ;;  %p3436_p13 = scmp.lt.s32.totalorder %s3430_s4, %s3430_s4 }
  0x94   :  { %p3437_p0 = por %p3436_p13, %p3435_p12 }
  0x96   :  { %p3438_p1 = pnand %p3437_p0, %p3431_p11 }
  0x98   :  { %3441 = shalt.err (!%p3438_p1)
}
  0x99   :  { %100 = dma.hbm_to_vmem [thread:$0]  %s3947_s6, 128, %s98_s30, [#allocation12]  }
  0x9a   :  { %s3442_s18 = scalar_lea.hbm %s3949_s8, 24576 }
  0x9b   :  { %p3443_p2 = scmp.ne.s32.totalorder %s3949_s8, %s3442_s18  ;;  %p3446_p3 = scmp.lt.u32.totalorder %s3442_s18, %s3949_s8 }
  0x9d   :  { %p3448_p4 = pnand %p3446_p3, %p3443_p2 }
  0x9f   :  { %3451 = shalt.err (!%p3448_p4)
}
  0xa0   :  { %s3452_s28 = scalar_lea.vmem %s117_s14, 24576  ;;  %p3457_p6 = scmp.lt.s32.totalorder %s117_s14, %s117_s14 }
  0xa1   :  { %p3453_p5 = scmp.ne.s32.totalorder %s117_s14, %s3452_s28  ;;  %p3458_p7 = scmp.lt.s32.totalorder %s3452_s28, %s3452_s28 }
  0xa3   :  { %p3459_p8 = por %p3458_p7, %p3457_p6 }
  0xa5   :  { %p3460_p9 = pnand %p3459_p8, %p3453_p5 }
  0xa7   :  { %3463 = shalt.err (!%p3460_p9)
}
  0xa8   :  { %s3539_s6 = smov 768   ;;  %s3540_s29 = smov 48  }
  0xa9   :  { %122 = dma.hbm_to_vmem [thread:$0]  %s3949_s8, 24576, %s117_s14, [#allocation15], %s3539_s6, %s3539_s6, %s3540_s29  }
  0xaa   :  { %s3541_s2 = smov [#allocation19]   ;;  %s3464_s12 = scalar_lea.hbm %s3951_s10, 96 }
  0xab   :  { %s139_s9 = sshll.u32 %s3541_s2, 4  ;;  %p3465_p10 = scmp.ne.s32.totalorder %s3951_s10, %s3464_s12  ;;  %s140_s9 = int_to_ptr.vmem [resolvable:$true] %s139_s9 }
  0xac   :  { %p3468_p11 = scmp.lt.u32.totalorder %s3464_s12, %s3951_s10 }
  0xae   :  { %p3470_p12 = pnand %p3468_p11, %p3465_p10 }
  0xb0   :  { %3473 = shalt.err (!%p3470_p12)
}
  0xb1   :  { %s3474_s20 = scalar_lea.vmem %s140_s9, 96  ;;  %p3479_p0 = scmp.lt.s32.totalorder %s140_s9, %s140_s9 }
  0xb2   :  { %p3475_p13 = scmp.ne.s32.totalorder %s140_s9, %s3474_s20  ;;  %p3480_p1 = scmp.lt.s32.totalorder %s3474_s20, %s3474_s20 }
  0xb4   :  { %p3481_p2 = por %p3480_p1, %p3479_p0 }
  0xb6   :  { %p3482_p3 = pnand %p3481_p2, %p3475_p13 }
  0xb8   :  { %3485 = shalt.err (!%p3482_p3)
}
  0xb9   :  { %142 = dma.hbm_to_vmem [thread:$0]  %s3951_s10, 96, %s140_s9, [#allocation18]  }
  0xba   :  { %3508 = dma.done.wait [#allocation3], 128  }
  0xbb   :  { %3509 = vsyncadd [#allocation3], 4294967168 }
  0xbc   :  { %3510 = dma.done.wait [#allocation6], 544  }
  0xbd   :  { %3511 = vsyncadd [#allocation6], 4294966752 }
  0xbe   :  { %3512 = dma.done.wait [#allocation9], 8256  }
  0xbf   :  { %3513 = vsyncadd [#allocation9], 4294959040 }
  0xc0   :  { %3514 = dma.done.wait [#allocation12], 16512  }
  0xc1   :  { %3515 = vsyncadd [#allocation12], 4294950784 }
  0xc2   :  { %3516 = dma.done.wait [#allocation15], 24704  }
  0xc3   :  { %3517 = vsyncadd [#allocation15], 4294942592 }
  0xc4   :  { %3518 = dma.done.wait [#allocation18], 192  }
  0xc5   :  { %3519 = vsyncadd [#allocation18], 4294967104  ;;  %v3542_v0 = vmov 0   ;;  %v3115_v1 = vld [vmem:[#allocation5 + $0x4] ss:$8 sps:$4 sm:$0xff]   ;;  %v3121_v6 = vld [vmem:[#allocation2] sm:$0xff]   ;;  %v185_v39 = vlaneseq }
  0xc6   :  { %256 = vmatprep.mubr.bf16.mxu0 %v3542_v0  ;;  %v3117_v2 = vld [vmem:[#allocation5] ss:$8 sps:$4 sm:$0xff]   ;;  %224 = vmatprep.subr.bf16.mxu0 %v3115_v1  ;;  %v3118_v3 = vld [vmem:[#allocation5 + $0x14] ss:$8 sps:$4 sm:$0xff]   ;;  %v3120_v4 = vld [vmem:[#allocation5 + $0x10] ss:$8 sps:$4 sm:$0xff]  }
  0xc7   :  { %225 = vmatpush1.bf16.msra.mxu0 %v3117_v2  ;;  %v3124_v5 = vld [vmem:[#allocation8 + $0x4] ss:$16 sps:$4 sm:$0xff]   ;;  %vm220_vm0 = vcmask 261120   ;;  %v3122_v7 = vld [vmem:[#allocation8] ss:$16 sps:$4 sm:$0xff]   ;;  %v3741_v40 = vshrl.u32 %v185_v39, 7 }
  0xc8   :  { %226 = vmatprep.subr.bf16.mxu0 %v3118_v3  ;;  %v3127_v8 = vld [vmem:[#allocation8 + $0x24] ss:$16 sps:$4 sm:$0xff]   ;;  %v3125_v9 = vld [vmem:[#allocation8 + $0x20] ss:$16 sps:$4 sm:$0xff]   ;;  %v3172_v38 = vld [vmem:[#allocation8 + $0xc] ss:$16 sps:$4 sm:$0xff]  }
  0xc9   :  { %v3130_v10 = vld [vmem:[#allocation8 + $0x44] ss:$16 sps:$4 sm:$0xff]   ;;  %v3128_v11 = vld [vmem:[#allocation8 + $0x40] ss:$16 sps:$4 sm:$0xff]   ;;  %v3744_v41 = vsub.s32 0, %v3741_v40  ;;  %v3747_v43 = vsub.s32 1, %v3741_v40 }
  0xca   :  { %v3133_v12 = vld [vmem:[#allocation8 + $0x64] ss:$16 sps:$4 sm:$0xff]   ;;  %v3131_v13 = vld [vmem:[#allocation8 + $0x60] ss:$16 sps:$4 sm:$0xff]   ;;  %v183_v42 = vld [vmem:[#allocation7] sm:$0x3] }
  0xcb   :  { %227 = vmatpush1.bf16.msra.mxu0 %v3120_v4  ;;  %v3136_v14 = vld [vmem:[#allocation8 + $0x84] ss:$16 sps:$4 sm:$0xff]   ;;  %v3134_v15 = vld [vmem:[#allocation8 + $0x80] ss:$16 sps:$4 sm:$0xff]   ;;  %v188_v44 = vrot.slane %v183_v42, %v3744_v41  ;;  %v192_v45 = vrot.slane %v183_v42, %v3747_v43  ;;  %v3170_v0 = vld [vmem:[#allocation8 + $0x8] ss:$16 sps:$4 sm:$0xff]  }
  0xcc   :  { %687 = vmatprep.subr.bf16.mxu0 %v3124_v5  ;;  %v3139_v16 = vld [vmem:[#allocation8 + $0xa4] ss:$16 sps:$4 sm:$0xff]   ;;  %v3137_v17 = vld [vmem:[#allocation8 + $0xa0] ss:$16 sps:$4 sm:$0xff]   ;;  %v3175_v1 = vld [vmem:[#allocation8 + $0x2c] ss:$16 sps:$4 sm:$0xff]  }
  0xcd   :  { %v3142_v18 = vld [vmem:[#allocation8 + $0xc4] ss:$16 sps:$4 sm:$0xff]   ;;  %v3140_v19 = vld [vmem:[#allocation8 + $0xc0] ss:$16 sps:$4 sm:$0xff]   ;;  %v3173_v2 = vld [vmem:[#allocation8 + $0x28] ss:$16 sps:$4 sm:$0xff]  }
  0xce   :  { %2962 = vmatmul.mubr.msk.bf16.vlgmr.msra.gmra.mrb[0].mxu0 %vm220_vm0, %v3121_v6  ;;  %v3145_v20 = vld [vmem:[#allocation8 + $0xe4] ss:$16 sps:$4 sm:$0xff]   ;;  %v3143_v21 = vld [vmem:[#allocation8 + $0xe0] ss:$16 sps:$4 sm:$0xff]   ;;  %v3178_v3 = vld [vmem:[#allocation8 + $0x4c] ss:$16 sps:$4 sm:$0xff]  }
  0xcf   :  { %688 = vmatpush1.bf16.msra.mxu0 %v3122_v7  ;;  %v3148_v22 = vld [vmem:[#allocation8 + $0x104] ss:$16 sps:$4 sm:$0xff]   ;;  %v3146_v23 = vld [vmem:[#allocation8 + $0x100] ss:$16 sps:$4 sm:$0xff]   ;;  %v3176_v4 = vld [vmem:[#allocation8 + $0x48] ss:$16 sps:$4 sm:$0xff]  }
  0xd0   :  { %689 = vmatprep.subr.bf16.mxu0 %v3127_v8  ;;  %v3151_v24 = vld [vmem:[#allocation8 + $0x124] ss:$16 sps:$4 sm:$0xff]   ;;  %v3149_v25 = vld [vmem:[#allocation8 + $0x120] ss:$16 sps:$4 sm:$0xff]   ;;  %v3181_v5 = vld [vmem:[#allocation8 + $0x6c] ss:$16 sps:$4 sm:$0xff]  }
  0xd1   :  { %v3154_v26 = vld [vmem:[#allocation8 + $0x144] ss:$16 sps:$4 sm:$0xff]   ;;  %v3152_v27 = vld [vmem:[#allocation8 + $0x140] ss:$16 sps:$4 sm:$0xff]   ;;  %v3179_v6 = vld [vmem:[#allocation8 + $0x68] ss:$16 sps:$4 sm:$0xff]  }
  0xd2   :  { %v3157_v28 = vld [vmem:[#allocation8 + $0x164] ss:$16 sps:$4 sm:$0xff]   ;;  %v3155_v29 = vld [vmem:[#allocation8 + $0x160] ss:$16 sps:$4 sm:$0xff]   ;;  %v3184_v7 = vld [vmem:[#allocation8 + $0x8c] ss:$16 sps:$4 sm:$0xff]  }
  0xd3   :  { %690 = vmatpush1.bf16.msra.mxu0 %v3125_v9  ;;  %v3160_v30 = vld [vmem:[#allocation8 + $0x184] ss:$16 sps:$4 sm:$0xff]   ;;  %v3158_v31 = vld [vmem:[#allocation8 + $0x180] ss:$16 sps:$4 sm:$0xff]   ;;  %v3182_v8 = vld [vmem:[#allocation8 + $0x88] ss:$16 sps:$4 sm:$0xff]  }
  0xd4   :  { %691 = vmatprep.subr.bf16.mxu0 %v3130_v10  ;;  %v3163_v32 = vld [vmem:[#allocation8 + $0x1a4] ss:$16 sps:$4 sm:$0xff]   ;;  %v3161_v33 = vld [vmem:[#allocation8 + $0x1a0] ss:$16 sps:$4 sm:$0xff]   ;;  %v3187_v9 = vld [vmem:[#allocation8 + $0xac] ss:$16 sps:$4 sm:$0xff]  }
  0xd5   :  { %v3166_v34 = vld [vmem:[#allocation8 + $0x1c4] ss:$16 sps:$4 sm:$0xff]   ;;  %v3164_v35 = vld [vmem:[#allocation8 + $0x1c0] ss:$16 sps:$4 sm:$0xff]   ;;  %v3185_v10 = vld [vmem:[#allocation8 + $0xa8] ss:$16 sps:$4 sm:$0xff]  }
  0xd6   :  { %v3169_v36 = vld [vmem:[#allocation8 + $0x1e4] ss:$16 sps:$4 sm:$0xff]   ;;  %v3167_v37 = vld [vmem:[#allocation8 + $0x1e0] ss:$16 sps:$4 sm:$0xff]   ;;  %s3543_s10 = smov [#allocation20]  }
  0xd7   :  { %692 = vmatpush1.bf16.msra.mxu0 %v3128_v11  ;;  %v3190_v11 = vld [vmem:[#allocation8 + $0xcc] ss:$16 sps:$4 sm:$0xff]   ;;  %v809_v39 = vld [vmem:[#allocation11 + $0x40] sm:$0xff]  ;;  %s2940_s7 = sshll.u32 %s3543_s10, 4  ;;  %s2941_s7 = int_to_ptr.vmem [resolvable:$true] %s2940_s7 }
  0xd8   :  { %693 = vmatprep.subr.bf16.mxu0 %v3133_v12  ;;  %v3188_v12 = vld [vmem:[#allocation8 + $0xc8] ss:$16 sps:$4 sm:$0xff]   ;;  %v945_v42 = vunpack.c.l.s8.bf16 %v809_v39  ;;  %s3486_s21 = scalar_lea.vmem %s2941_s7, 768  ;;  %p3491_p5 = scmp.lt.s32.totalorder %s2941_s7, %s2941_s7 }
  0xd9   :  { %p3487_p4 = scmp.ne.s32.totalorder %s2941_s7, %s3486_s21  ;;  %p3492_p6 = scmp.lt.s32.totalorder %s3486_s21, %s3486_s21 }
  0xdb   :  { %694 = vmatpush1.bf16.msra.mxu0 %v3131_v13  ;;  %v3193_v13 = vld [vmem:[#allocation8 + $0xec] ss:$16 sps:$4 sm:$0xff]   ;;  %p3493_p7 = por %p3492_p6, %p3491_p5 }
  0xdc   :  { %695 = vmatprep.subr.bf16.mxu0 %v3136_v14  ;;  %v3191_v14 = vld [vmem:[#allocation8 + $0xe8] ss:$16 sps:$4 sm:$0xff]  }
  0xdd   :  { %p3494_p8 = pnand %p3493_p7, %p3487_p4 }
  0xdf   :  { %696 = vmatpush1.bf16.msra.mxu0 %v3134_v15  ;;  %v3196_v15 = vld [vmem:[#allocation8 + $0x10c] ss:$16 sps:$4 sm:$0xff]  }
  0xe0   :  { %697 = vmatprep.subr.bf16.mxu0 %v3139_v16  ;;  %v3194_v16 = vld [vmem:[#allocation8 + $0x108] ss:$16 sps:$4 sm:$0xff]  }
  0xe3   :  { %698 = vmatpush1.bf16.msra.mxu0 %v3137_v17  ;;  %v3199_v17 = vld [vmem:[#allocation8 + $0x12c] ss:$16 sps:$4 sm:$0xff]  }
  0xe4   :  { %699 = vmatprep.subr.bf16.mxu0 %v3142_v18  ;;  %v3197_v18 = vld [vmem:[#allocation8 + $0x128] ss:$16 sps:$4 sm:$0xff]  }
  0xe7   :  { %700 = vmatpush1.bf16.msra.mxu0 %v3140_v19  ;;  %v3202_v19 = vld [vmem:[#allocation8 + $0x14c] ss:$16 sps:$4 sm:$0xff]  }
  0xe8   :  { %701 = vmatprep.subr.bf16.mxu0 %v3145_v20  ;;  %v3200_v20 = vld [vmem:[#allocation8 + $0x148] ss:$16 sps:$4 sm:$0xff]  }
  0xeb   :  { %702 = vmatpush1.bf16.msra.mxu0 %v3143_v21  ;;  %v3205_v21 = vld [vmem:[#allocation8 + $0x16c] ss:$16 sps:$4 sm:$0xff]  }
  0xec   :  { %703 = vmatprep.subr.bf16.mxu0 %v3148_v22  ;;  %v3203_v22 = vld [vmem:[#allocation8 + $0x168] ss:$16 sps:$4 sm:$0xff]  }
  0xef   :  { %704 = vmatpush1.bf16.msra.mxu0 %v3146_v23  ;;  %v3208_v23 = vld [vmem:[#allocation8 + $0x18c] ss:$16 sps:$4 sm:$0xff]  }
  0xf0   :  { %705 = vmatprep.subr.bf16.mxu0 %v3151_v24  ;;  %v3206_v24 = vld [vmem:[#allocation8 + $0x188] ss:$16 sps:$4 sm:$0xff]  }
  0xf3   :  { %706 = vmatpush1.bf16.msra.mxu0 %v3149_v25  ;;  %v3211_v25 = vld [vmem:[#allocation8 + $0x1ac] ss:$16 sps:$4 sm:$0xff]  }
  0xf4   :  { %707 = vmatprep.subr.bf16.mxu0 %v3154_v26  ;;  %v3209_v26 = vld [vmem:[#allocation8 + $0x1a8] ss:$16 sps:$4 sm:$0xff]  }
  0xf7   :  { %708 = vmatpush1.bf16.msra.mxu0 %v3152_v27  ;;  %v3214_v27 = vld [vmem:[#allocation8 + $0x1cc] ss:$16 sps:$4 sm:$0xff]  }
  0xf8   :  { %709 = vmatprep.subr.bf16.mxu0 %v3157_v28  ;;  %v3212_v28 = vld [vmem:[#allocation8 + $0x1c8] ss:$16 sps:$4 sm:$0xff]  }
  0xfb   :  { %710 = vmatpush1.bf16.msra.mxu0 %v3155_v29  ;;  %v3217_v29 = vld [vmem:[#allocation8 + $0x1ec] ss:$16 sps:$4 sm:$0xff]  }
  0xfc   :  { %711 = vmatprep.subr.bf16.mxu0 %v3160_v30  ;;  %v802_v30 = vld [vmem:[#allocation11 + $0x8] sm:$0xff] }
  0xff   :  { %712 = vmatpush1.bf16.msra.mxu0 %v3158_v31  ;;  %v3215_v31 = vld [vmem:[#allocation8 + $0x1e8] ss:$16 sps:$4 sm:$0xff]  }
 0x100   :  { %713 = vmatprep.subr.bf16.mxu0 %v3163_v32  ;;  %v930_v32 = vunpack.c.l.s8.bf16 %v802_v30 }
 0x103   :  { %714 = vmatpush1.bf16.msra.mxu0 %v3161_v33  ;;  %v801_v33 = vld [vmem:[#allocation11] sm:$0xff] }
 0x104   :  { %715 = vmatprep.subr.bf16.mxu0 %v3166_v34  ;;  %v929_v34 = vunpack.c.l.s8.bf16 %v801_v33 }
 0x107   :  { %716 = vmatpush1.bf16.msra.mxu0 %v3164_v35  ;;  %v938_v35 = vunpack.c.h.s8.bf16 %v802_v30 }
 0x108   :  { %717 = vmatprep.subr.bf16.mxu0 %v3169_v36  ;;  %v810_v36 = vld [vmem:[#allocation11 + $0x48] sm:$0xff] }
 0x10b   :  { %718 = vmatpush1.bf16.msra.mxu0 %v3167_v37  ;;  %v937_v37 = vunpack.c.h.s8.bf16 %v801_v33  ;;  %v890_v33 = vld [vmem:[#allocation11 + $0x2c8] sm:$0xff] }
 0x10c   :  { %730 = vmatprep.subr.bf16.mxu0 %v3172_v38  ;;  %v946_v38 = vunpack.c.l.s8.bf16 %v810_v36 }
 0x1a1   :  { %v258_v46 = vpop.f32.mrb[0].mxu0 }
 0x1a2   :  { %v259_v47 = vadd.f32 %v258_v46, %v188_v44  ;;  %v260_v48 = vpop.f32.mrb[1].mxu0  ;;  %v953_v46 = vunpack.c.h.s8.bf16 %v809_v39  ;;  %v3755_v39 = vld [vmem:[#allocation11 + $0x18] sm:$0xff] }
 0x1a3   :  { %v261_v49 = vadd.f32 %v260_v48, %v192_v45  ;;  %v262_v50 = vpop.f32.mrb[2].mxu0  ;;  %v817_v48 = vld [vmem:[#allocation11 + $0x80] sm:$0xff] }
 0x1a4   :  { %v271_v51 = vmul.f32 0.2, %v259_v47  ;;  %v263_v52 = vadd.f32 %v262_v50, %v188_v44  ;;  %v264_v53 = vpop.f32.mrb[3].mxu0  ;;  %vm267_vm1 = vcmp.gt.f32.partialorder %v259_v47, 0.0  ;;  %v954_v44 = vunpack.c.h.s8.bf16 %v810_v36 }
 0x1a5   :  { %v272_v54 = vmul.f32 0.2, %v261_v49  ;;  %v265_v55 = vadd.f32 %v264_v53, %v192_v45  ;;  %vm268_vm2 = vcmp.gt.f32.partialorder %v261_v49, 0.0  ;;  %v818_v45 = vld [vmem:[#allocation11 + $0x88] sm:$0xff] }
 0x1a6   :  { %vm269_vm3 = vcmp.gt.f32.partialorder %v263_v52, 0.0  ;;  %v273_v56 = vmul.f32 0.2, %v263_v52  ;;  %v275_v58 = vsel %vm267_vm1, %v259_v47, %v271_v51  ;;  %v962_v47 = vunpack.c.l.s8.bf16 %v818_v45  ;;  %v826_v51 = vld [vmem:[#allocation11 + $0xc8] sm:$0xff] }
 0x1a7   :  { %vm270_vm4 = vcmp.gt.f32.partialorder %v265_v55, 0.0  ;;  %v274_v57 = vmul.f32 0.2, %v265_v55  ;;  %v276_v61 = vsel %vm268_vm2, %v261_v49, %v272_v54  ;;  %v961_v49 = vunpack.c.l.s8.bf16 %v817_v48  ;;  %v825_v54 = vld [vmem:[#allocation11 + $0xc0] sm:$0xff] }
 0x1a8   :  { %v277_v59 = vsel %vm269_vm3, %v263_v52, %v273_v56  ;;  %v970_v50 = vunpack.c.h.s8.bf16 %v818_v45  ;;  %v969_v52 = vunpack.c.h.s8.bf16 %v817_v48  ;;  %v978_v53 = vunpack.c.l.s8.bf16 %v826_v51 }
 0x1a9   :  { %v3751_v60 = vpack.c.bf16 %v277_v59, %v275_v58  ;;  %v278_v62 = vsel %vm270_vm4, %v265_v55, %v274_v57  ;;  %v977_v55 = vunpack.c.l.s8.bf16 %v825_v54  ;;  %v986_v56 = vunpack.c.h.s8.bf16 %v826_v51  ;;  %v834_v57 = vld [vmem:[#allocation11 + $0x108] sm:$0xff] }
 0x1aa   :  { %v280_v63 = vpack.c.bf16 %v278_v62, %v276_v61  ;;  %v985_v58 = vunpack.c.h.s8.bf16 %v825_v54  ;;  %v994_v59 = vunpack.c.l.s8.bf16 %v834_v57  ;;  %v866_v61 = vld [vmem:[#allocation11 + $0x208] sm:$0xff] }
 0x1ab   :  { %v1058_v62 = vunpack.c.l.s8.bf16 %v866_v61 }
 0x1ac   :  { %719 = vmatprep.mubr.bf16.mxu0 %v280_v63 }
 0x1ad   :  { %720 = vmatmul.mubr.bf16.vlgmr.msra.gmra.mrb[4].mxu0 %v3751_v60  ;;  %1228 = vmatprep.subr.bf16.mxu1 %v1058_v62 }
 0x1ae   :  { %731 = vmatpush1.bf16.msra.mxu0 %v3170_v0  ;;  %762 = vmatprep.mubr.bf16.mxu0 %v280_v63  ;;  %v1066_v63 = vunpack.c.h.s8.bf16 %v866_v61  ;;  %v865_v0 = vld [vmem:[#allocation11 + $0x200] sm:$0xff] }
 0x1af   :  { %732 = vmatprep.subr.bf16.mxu0 %v3175_v1  ;;  %v913_v61 = vld [vmem:[#allocation11 + $0x380] sm:$0xff] }
 0x1b0   :  { %v1153_v62 = vunpack.c.l.s8.bf16 %v913_v61 }
 0x1b2   :  { %733 = vmatpush1.bf16.msra.mxu0 %v3173_v2  ;;  %v1057_v2 = vunpack.c.l.s8.bf16 %v865_v0 }
 0x1b3   :  { %734 = vmatprep.subr.bf16.mxu0 %v3178_v3  ;;  %v1002_v3 = vunpack.c.h.s8.bf16 %v834_v57 }
 0x1b4   :  { %1229 = vmatpush1.bf16.msra.mxu1 %v1057_v2 }
 0x1b5   :  { %1230 = vmatprep.subr.bf16.mxu1 %v1066_v63 }
 0x1b6   :  { %735 = vmatpush1.bf16.msra.mxu0 %v3176_v4  ;;  %v842_v4 = vld [vmem:[#allocation11 + $0x148] sm:$0xff] }
 0x1b7   :  { %736 = vmatprep.subr.bf16.mxu0 %v3181_v5  ;;  %v1065_v5 = vunpack.c.h.s8.bf16 %v865_v0  ;;  %v1161_v0 = vunpack.c.h.s8.bf16 %v913_v61 }
 0x1b9   :  { %1231 = vmatpush1.bf16.msra.mxu1 %v1065_v5 }
 0x1ba   :  { %737 = vmatpush1.bf16.msra.mxu0 %v3179_v6 }
 0x1bb   :  { %738 = vmatprep.subr.bf16.mxu0 %v3184_v7  ;;  %v1010_v7 = vunpack.c.l.s8.bf16 %v842_v4 }
 0x1be   :  { %739 = vmatpush1.bf16.msra.mxu0 %v3182_v8  ;;  %v841_v8 = vld [vmem:[#allocation11 + $0x140] sm:$0xff] }
 0x1bf   :  { %740 = vmatprep.subr.bf16.mxu0 %v3187_v9  ;;  %v874_v9 = vld [vmem:[#allocation11 + $0x248] sm:$0xff] }
 0x1c2   :  { %741 = vmatpush1.bf16.msra.mxu0 %v3185_v10  ;;  %v1074_v10 = vunpack.c.l.s8.bf16 %v874_v9 }
 0x1c3   :  { %742 = vmatprep.subr.bf16.mxu0 %v3190_v11  ;;  %v873_v11 = vld [vmem:[#allocation11 + $0x240] sm:$0xff] }
 0x1c4   :  { %1232 = vmatprep.subr.bf16.mxu1 %v1074_v10 }
 0x1c6   :  { %743 = vmatpush1.bf16.msra.mxu0 %v3188_v12  ;;  %v1009_v12 = vunpack.c.l.s8.bf16 %v841_v8 }
 0x1c7   :  { %744 = vmatprep.subr.bf16.mxu0 %v3193_v13  ;;  %v1073_v13 = vunpack.c.l.s8.bf16 %v873_v11 }
 0x1c9   :  { %1233 = vmatpush1.bf16.msra.mxu1 %v1073_v13 }
 0x1ca   :  { %745 = vmatpush1.bf16.msra.mxu0 %v3191_v14  ;;  %v1018_v14 = vunpack.c.h.s8.bf16 %v842_v4 }
 0x1cb   :  { %746 = vmatprep.subr.bf16.mxu0 %v3196_v15  ;;  %v850_v15 = vld [vmem:[#allocation11 + $0x188] sm:$0xff] }
 0x1ce   :  { %747 = vmatpush1.bf16.msra.mxu0 %v3194_v16  ;;  %v1082_v16 = vunpack.c.h.s8.bf16 %v874_v9  ;;  %v3761_v9 = vld [vmem:[#allocation10] sm:$0xf] }
 0x1cf   :  { %748 = vmatprep.subr.bf16.mxu0 %v3199_v17  ;;  %v1081_v17 = vunpack.c.h.s8.bf16 %v873_v11  ;;  %v350_v10 = vrot.slane %v3761_v9, %v3744_v41  ;;  %v354_v11 = vrot.slane %v3761_v9, %v3747_v43 }
 0x1d0   :  { %1234 = vmatprep.subr.bf16.mxu1 %v1082_v16 }
 0x1d1   :  { %1235 = vmatpush1.bf16.msra.mxu1 %v1081_v17 }
 0x1d2   :  { %749 = vmatpush1.bf16.msra.mxu0 %v3197_v18  ;;  %v1017_v18 = vunpack.c.h.s8.bf16 %v841_v8 }
 0x1d3   :  { %750 = vmatprep.subr.bf16.mxu0 %v3202_v19  ;;  %v1026_v19 = vunpack.c.l.s8.bf16 %v850_v15 }
 0x1d6   :  { %751 = vmatpush1.bf16.msra.mxu0 %v3200_v20  ;;  %v849_v20 = vld [vmem:[#allocation11 + $0x180] sm:$0xff] }
 0x1d7   :  { %752 = vmatprep.subr.bf16.mxu0 %v3205_v21  ;;  %v882_v21 = vld [vmem:[#allocation11 + $0x288] sm:$0xff]  ;;  %v1033_v30 = vunpack.c.h.s8.bf16 %v849_v20 }
 0x1da   :  { %753 = vmatpush1.bf16.msra.mxu0 %v3203_v22  ;;  %v1090_v22 = vunpack.c.l.s8.bf16 %v882_v21 }
 0x1db   :  { %754 = vmatprep.subr.bf16.mxu0 %v3208_v23  ;;  %v881_v23 = vld [vmem:[#allocation11 + $0x280] sm:$0xff] }
 0x1dc   :  { %1236 = vmatprep.subr.bf16.mxu1 %v1090_v22 }
 0x1de   :  { %755 = vmatpush1.bf16.msra.mxu0 %v3206_v24  ;;  %v1025_v24 = vunpack.c.l.s8.bf16 %v849_v20 }
 0x1df   :  { %756 = vmatprep.subr.bf16.mxu0 %v3211_v25  ;;  %v1089_v25 = vunpack.c.l.s8.bf16 %v881_v23 }
 0x1e1   :  { %1237 = vmatpush1.bf16.msra.mxu1 %v1089_v25 }
 0x1e2   :  { %757 = vmatpush1.bf16.msra.mxu0 %v3209_v26  ;;  %v1034_v26 = vunpack.c.h.s8.bf16 %v850_v15 }
 0x1e3   :  { %758 = vmatprep.subr.bf16.mxu0 %v3214_v27  ;;  %v858_v27 = vld [vmem:[#allocation11 + $0x1c8] sm:$0xff] }
 0x1e6   :  { %759 = vmatpush1.bf16.msra.mxu0 %v3212_v28  ;;  %v1098_v28 = vunpack.c.h.s8.bf16 %v882_v21 }
 0x1e7   :  { %760 = vmatprep.subr.bf16.mxu0 %v3217_v29  ;;  %v1097_v29 = vunpack.c.h.s8.bf16 %v881_v23 }
 0x1e8   :  { %1238 = vmatprep.subr.bf16.mxu1 %v1098_v28 }
 0x1e9   :  { %1239 = vmatpush1.bf16.msra.mxu1 %v1097_v29 }
 0x1ea   :  { %761 = vmatpush1.bf16.msra.mxu0 %v3215_v31  ;;  %v1042_v31 = vunpack.c.l.s8.bf16 %v858_v27 }
 0x1eb   :  { %1185 = vmatprep.subr.bf16.mxu0 %v930_v32  ;;  %v857_v32 = vld [vmem:[#allocation11 + $0x1c0] sm:$0xff] }
 0x1ec   :  { %v1041_v36 = vunpack.c.l.s8.bf16 %v857_v32  ;;  %v1049_v45 = vunpack.c.h.s8.bf16 %v857_v32  ;;  %v940_v32 = vunpack.c.h.s8.bf16 %v3755_v39 }
 0x1ed   :  { %763 = vmatmul.mubr.bf16.vlgmr.msra.gmra.mrb[8].mxu0 %v3751_v60  ;;  %v833_v60 = vld [vmem:[#allocation11 + $0x100] sm:$0xff] }
 0x1ee   :  { %1186 = vmatpush1.bf16.msra.mxu0 %v929_v34  ;;  %v993_v1 = vunpack.c.l.s8.bf16 %v833_v60  ;;  %v1001_v6 = vunpack.c.h.s8.bf16 %v833_v60  ;;  %v1106_v34 = vunpack.c.l.s8.bf16 %v890_v33 }
 0x1ef   :  { %1187 = vmatprep.subr.bf16.mxu0 %v938_v35  ;;  %v889_v35 = vld [vmem:[#allocation11 + $0x2c0] sm:$0xff] }
 0x1f0   :  { %1240 = vmatprep.subr.bf16.mxu1 %v1106_v34 }
 0x1f2   :  { %1188 = vmatpush1.bf16.msra.mxu0 %v937_v37  ;;  %v1105_v37 = vunpack.c.l.s8.bf16 %v889_v35 }
 0x1f3   :  { %1189 = vmatprep.subr.bf16.mxu0 %v946_v38  ;;  %v1050_v38 = vunpack.c.h.s8.bf16 %v858_v27 }
 0x1f4   :  { %1241 = vmatpush1.bf16.msra.mxu1 %v1105_v37 }
 0x1f6   :  { %1190 = vmatpush1.bf16.msra.mxu0 %v945_v42  ;;  %v1114_v42 = vunpack.c.h.s8.bf16 %v890_v33  ;;  %v812_v33 = vld [vmem:[#allocation11 + $0x58] sm:$0xff] }
 0x1f7   :  { %1191 = vmatprep.subr.bf16.mxu0 %v954_v44  ;;  %v1113_v44 = vunpack.c.h.s8.bf16 %v889_v35  ;;  %v948_v35 = vunpack.c.l.s8.bf16 %v812_v33 }
 0x1f8   :  { %1242 = vmatprep.subr.bf16.mxu1 %v1114_v42  ;;  %v820_v42 = vld [vmem:[#allocation11 + $0x98] sm:$0xff] }
 0x1f9   :  { %1243 = vmatpush1.bf16.msra.mxu1 %v1113_v44 }
 0x1fa   :  { %1192 = vmatpush1.bf16.msra.mxu0 %v953_v46  ;;  %v932_v46 = vunpack.c.l.s8.bf16 %v3755_v39  ;;  %v964_v39 = vunpack.c.l.s8.bf16 %v820_v42 }
 0x1fb   :  { %1193 = vmatprep.subr.bf16.mxu0 %v962_v47  ;;  %v898_v47 = vld [vmem:[#allocation11 + $0x308] sm:$0xff] }
 0x1fc   :  { %v1122_v48 = vunpack.c.l.s8.bf16 %v898_v47  ;;  %v1130_v51 = vunpack.c.h.s8.bf16 %v898_v47  ;;  %v972_v47 = vunpack.c.h.s8.bf16 %v820_v42 }
 0x1fe   :  { %1194 = vmatpush1.bf16.msra.mxu0 %v961_v49  ;;  %v897_v49 = vld [vmem:[#allocation11 + $0x300] sm:$0xff]  ;;  %1244 = vmatprep.subr.bf16.mxu1 %v1122_v48  ;;  %v828_v48 = vld [vmem:[#allocation11 + $0xd8] sm:$0xff] }
 0x1ff   :  { %1195 = vmatprep.subr.bf16.mxu0 %v970_v50  ;;  %v1121_v50 = vunpack.c.l.s8.bf16 %v897_v49 }
 0x201   :  { %1245 = vmatpush1.bf16.msra.mxu1 %v1121_v50  ;;  %v980_v50 = vunpack.c.l.s8.bf16 %v828_v48 }
 0x202   :  { %1196 = vmatpush1.bf16.msra.mxu0 %v969_v52  ;;  %v1129_v52 = vunpack.c.h.s8.bf16 %v897_v49  ;;  %1246 = vmatprep.subr.bf16.mxu1 %v1130_v51  ;;  %v827_v51 = vld [vmem:[#allocation11 + $0xd0] sm:$0xff] }
 0x203   :  { %1197 = vmatprep.subr.bf16.mxu0 %v978_v53  ;;  %v906_v53 = vld [vmem:[#allocation11 + $0x348] sm:$0xff] }
 0x204   :  { %v1138_v54 = vunpack.c.l.s8.bf16 %v906_v53  ;;  %v1146_v57 = vunpack.c.h.s8.bf16 %v906_v53  ;;  %v988_v53 = vunpack.c.h.s8.bf16 %v828_v48 }
 0x205   :  { %1247 = vmatpush1.bf16.msra.mxu1 %v1129_v52  ;;  %v979_v52 = vunpack.c.l.s8.bf16 %v827_v51 }
 0x206   :  { %1198 = vmatpush1.bf16.msra.mxu0 %v977_v55  ;;  %v905_v55 = vld [vmem:[#allocation11 + $0x340] sm:$0xff]  ;;  %1248 = vmatprep.subr.bf16.mxu1 %v1138_v54  ;;  %v836_v54 = vld [vmem:[#allocation11 + $0x118] sm:$0xff] }
 0x207   :  { %1199 = vmatprep.subr.bf16.mxu0 %v986_v56  ;;  %v1137_v56 = vunpack.c.l.s8.bf16 %v905_v55 }
 0x209   :  { %1249 = vmatpush1.bf16.msra.mxu1 %v1137_v56  ;;  %v996_v56 = vunpack.c.l.s8.bf16 %v836_v54 }
 0x20a   :  { %1200 = vmatpush1.bf16.msra.mxu0 %v985_v58  ;;  %v1145_v58 = vunpack.c.h.s8.bf16 %v905_v55  ;;  %1250 = vmatprep.subr.bf16.mxu1 %v1146_v57  ;;  %v987_v55 = vunpack.c.h.s8.bf16 %v827_v51  ;;  %v835_v57 = vld [vmem:[#allocation11 + $0x110] sm:$0xff]  ;;  %v814_v51 = vld [vmem:[#allocation11 + $0x68] sm:$0xff] }
 0x20b   :  { %1201 = vmatprep.subr.bf16.mxu0 %v994_v59  ;;  %v914_v59 = vld [vmem:[#allocation11 + $0x388] sm:$0xff]  ;;  %v1003_v61 = vunpack.c.h.s8.bf16 %v835_v57 }
 0x20c   :  { %v1154_v60 = vunpack.c.l.s8.bf16 %v914_v59  ;;  %v1162_v63 = vunpack.c.h.s8.bf16 %v914_v59  ;;  %v1004_v59 = vunpack.c.h.s8.bf16 %v836_v54 }
 0x20d   :  { %1251 = vmatpush1.bf16.msra.mxu1 %v1145_v58  ;;  %v995_v58 = vunpack.c.l.s8.bf16 %v835_v57  ;;  %v813_v57 = vld [vmem:[#allocation11 + $0x60] sm:$0xff] }
 0x20e   :  { %1202 = vmatpush1.bf16.msra.mxu0 %v993_v1  ;;  %1252 = vmatprep.subr.bf16.mxu1 %v1154_v60  ;;  %v922_v1 = vld [vmem:[#allocation11 + $0x3c8] sm:$0xff]  ;;  %v844_v60 = vld [vmem:[#allocation11 + $0x158] sm:$0xff] }
 0x20f   :  { %1203 = vmatprep.subr.bf16.mxu0 %v1002_v3  ;;  %v1170_v2 = vunpack.c.l.s8.bf16 %v922_v1  ;;  %v921_v3 = vld [vmem:[#allocation11 + $0x3c0] sm:$0xff]  ;;  %v1178_v5 = vunpack.c.h.s8.bf16 %v922_v1  ;;  %v1020_v1 = vunpack.c.h.s8.bf16 %v844_v60 }
 0x210   :  { %v1169_v4 = vunpack.c.l.s8.bf16 %v921_v3 }
 0x211   :  { %1253 = vmatpush1.bf16.msra.mxu1 %v1153_v62  ;;  %v1012_v62 = vunpack.c.l.s8.bf16 %v844_v60  ;;  %v958_v60 = vunpack.c.h.s8.bf16 %v814_v51 }
 0x212   :  { %1204 = vmatpush1.bf16.msra.mxu0 %v1001_v6  ;;  %1254 = vmatprep.subr.bf16.mxu1 %v1162_v63  ;;  %v1177_v6 = vunpack.c.h.s8.bf16 %v921_v3  ;;  %v843_v63 = vld [vmem:[#allocation11 + $0x150] sm:$0xff] }
 0x213   :  { %1205 = vmatprep.subr.bf16.mxu0 %v1010_v7  ;;  %v3758_v7 = vld [vmem:[#allocation11 + $0x28] sm:$0xff]  ;;  %v1019_v3 = vunpack.c.h.s8.bf16 %v843_v63 }
 0x214   :  { %v934_v8 = vunpack.c.l.s8.bf16 %v3758_v7 }
 0x215   :  { %1255 = vmatpush1.bf16.msra.mxu1 %v1161_v0  ;;  %v1011_v0 = vunpack.c.l.s8.bf16 %v843_v63  ;;  %v884_v63 = vld [vmem:[#allocation11 + $0x298] sm:$0xff] }
 0x216   :  { %1206 = vmatpush1.bf16.msra.mxu0 %v1009_v12  ;;  %1256 = vmatprep.subr.bf16.mxu1 %v1170_v2  ;;  %v852_v2 = vld [vmem:[#allocation11 + $0x198] sm:$0xff] }
 0x217   :  { %1207 = vmatprep.subr.bf16.mxu0 %v1018_v14 }
 0x219   :  { %1257 = vmatpush1.bf16.msra.mxu1 %v1169_v4  ;;  %v1028_v4 = vunpack.c.l.s8.bf16 %v852_v2 }
 0x21a   :  { %1208 = vmatpush1.bf16.msra.mxu0 %v1017_v18  ;;  %1258 = vmatprep.subr.bf16.mxu1 %v1178_v5  ;;  %v851_v5 = vld [vmem:[#allocation11 + $0x190] sm:$0xff] }
 0x21b   :  { %1209 = vmatprep.subr.bf16.mxu0 %v1026_v19 }
 0x21d   :  { %1259 = vmatpush1.bf16.msra.mxu1 %v1177_v6  ;;  %v1027_v6 = vunpack.c.l.s8.bf16 %v851_v5 }
 0x21e   :  { %1210 = vmatpush1.bf16.msra.mxu0 %v1025_v24  ;;  %1357 = vmatprep.subr.bf16.mxu1 %v934_v8  ;;  %v803_v24 = vld [vmem:[#allocation11 + $0x10] sm:$0xff]  ;;  %v3776_v8 = vsub.s32 2, %v3741_v40 }
 0x21f   :  { %1211 = vmatprep.subr.bf16.mxu0 %v1034_v26  ;;  %v939_v34 = vunpack.c.h.s8.bf16 %v803_v24 }
 0x222   :  { %1212 = vmatpush1.bf16.msra.mxu0 %v1033_v30 }
 0x223   :  { %1213 = vmatprep.subr.bf16.mxu0 %v1042_v31  ;;  %v931_v31 = vunpack.c.l.s8.bf16 %v803_v24 }
 0x226   :  { %1214 = vmatpush1.bf16.msra.mxu0 %v1041_v36  ;;  %v811_v36 = vld [vmem:[#allocation11 + $0x50] sm:$0xff] }
 0x227   :  { %1215 = vmatprep.subr.bf16.mxu0 %v1050_v38  ;;  %v947_v37 = vunpack.c.l.s8.bf16 %v811_v36  ;;  %v956_v38 = vunpack.c.h.s8.bf16 %v812_v33  ;;  %v955_v44 = vunpack.c.h.s8.bf16 %v811_v36  ;;  %v805_v36 = vld [vmem:[#allocation11 + $0x20] sm:$0xff] }
 0x22a   :  { %1216 = vmatpush1.bf16.msra.mxu0 %v1049_v45  ;;  %v819_v45 = vld [vmem:[#allocation11 + $0x90] sm:$0xff] }
 0x22b   :  { %1271 = vmatprep.subr.bf16.mxu0 %v932_v46  ;;  %v963_v46 = vunpack.c.l.s8.bf16 %v819_v45  ;;  %v971_v49 = vunpack.c.h.s8.bf16 %v819_v45 }
 0x280   :  { %v721_v12 = vpop.f32.mrb[4].mxu0 }
 0x281   :  { %v722_v13 = vadd.f32 %v721_v12, %v350_v10  ;;  %v723_v14 = vpop.f32.mrb[5].mxu0  ;;  %v860_v12 = vld [vmem:[#allocation11 + $0x1d8] sm:$0xff] }
 0x282   :  { %v724_v15 = vadd.f32 %v723_v14, %v354_v11  ;;  %v725_v16 = vpop.f32.mrb[6].mxu0  ;;  %v1035_v14 = vunpack.c.h.s8.bf16 %v851_v5  ;;  %v1052_v24 = vunpack.c.h.s8.bf16 %v860_v12  ;;  %v883_v5 = vld [vmem:[#allocation11 + $0x290] sm:$0xff] }
 0x283   :  { %v781_v17 = vmul.f32 0.2, %v722_v13  ;;  %v726_v18 = vadd.f32 %v725_v16, %v350_v10  ;;  %v727_v19 = vpop.f32.mrb[7].mxu0  ;;  %vm773_vm5 = vcmp.gt.f32.partialorder %v722_v13, 0.0  ;;  %v1036_v10 = vunpack.c.h.s8.bf16 %v852_v2 }
 0x284   :  { %v782_v20 = vmul.f32 0.2, %v724_v15  ;;  %v728_v21 = vadd.f32 %v727_v19, %v354_v11  ;;  %vm774_vm6 = vcmp.gt.f32.partialorder %v724_v15, 0.0  ;;  %v3779_v11 = vsub.s32 3, %v3741_v40 }
 0x285   :  { %vm777_vm7 = vcmp.gt.f32.partialorder %v726_v18, 0.0  ;;  %v785_v22 = vmul.f32 0.2, %v726_v18  ;;  %v789_v25 = vsel %vm773_vm5, %v722_v13, %v781_v17  ;;  %v358_v13 = vrot.slane %v3761_v9, %v3776_v8  ;;  %v859_v17 = vld [vmem:[#allocation11 + $0x1d0] sm:$0xff] }
 0x286   :  { %vm778_vm8 = vcmp.gt.f32.partialorder %v728_v21, 0.0  ;;  %v786_v23 = vmul.f32 0.2, %v728_v21  ;;  %v790_v27 = vsel %vm774_vm6, %v724_v15, %v782_v20  ;;  %v362_v15 = vrot.slane %v3761_v9, %v3779_v11 }
 0x287   :  { %v793_v26 = vsel %vm777_vm7, %v726_v18, %v785_v22  ;;  %v1044_v16 = vunpack.c.l.s8.bf16 %v860_v12  ;;  %v1051_v33 = vunpack.c.h.s8.bf16 %v859_v17 }
 0x288   :  { %v3767_v28 = vpack.c.bf16 %v793_v26, %v789_v25  ;;  %v794_v29 = vsel %vm778_vm8, %v728_v21, %v786_v23  ;;  %v1043_v21 = vunpack.c.l.s8.bf16 %v859_v17  ;;  %v1099_v17 = vunpack.c.h.s8.bf16 %v883_v5 }
 0x289   :  { %v3769_v30 = vpack.c.bf16 %v794_v29, %v790_v27  ;;  %v868_v29 = vld [vmem:[#allocation11 + $0x218] sm:$0xff] }
 0x28b   :  { %1217 = vmatprep.mubr.bf16.mxu0 %v3769_v30 }
 0x28c   :  { %1218 = vmatmul.mubr.bf16.vlgmr.msra.gmra.mrb[12].mxu0 %v3767_v28 }
 0x28d   :  { %1272 = vmatpush1.bf16.msra.mxu0 %v931_v31  ;;  %1303 = vmatprep.mubr.bf16.mxu0 %v3769_v30 }
 0x28e   :  { %1273 = vmatprep.subr.bf16.mxu0 %v940_v32 }
 0x291   :  { %1274 = vmatpush1.bf16.msra.mxu0 %v939_v34 }
 0x292   :  { %1275 = vmatprep.subr.bf16.mxu0 %v948_v35  ;;  %v1060_v35 = vunpack.c.l.s8.bf16 %v868_v29 }
 0x295   :  { %1276 = vmatpush1.bf16.msra.mxu0 %v947_v37  ;;  %v867_v37 = vld [vmem:[#allocation11 + $0x210] sm:$0xff] }
 0x296   :  { %1277 = vmatprep.subr.bf16.mxu0 %v956_v38  ;;  %v1059_v48 = vunpack.c.l.s8.bf16 %v867_v37  ;;  %v1067_v54 = vunpack.c.h.s8.bf16 %v867_v37 }
 0x299   :  { %1278 = vmatpush1.bf16.msra.mxu0 %v955_v44 }
 0x29a   :  { %1279 = vmatprep.subr.bf16.mxu0 %v964_v39 }
 0x29d   :  { %1280 = vmatpush1.bf16.msra.mxu0 %v963_v46 }
 0x29e   :  { %1281 = vmatprep.subr.bf16.mxu0 %v972_v47  ;;  %v933_v47 = vunpack.c.l.s8.bf16 %v805_v36 }
 0x2a1   :  { %1282 = vmatpush1.bf16.msra.mxu0 %v971_v49  ;;  %v942_v49 = vunpack.c.h.s8.bf16 %v3758_v7  ;;  %v949_v7 = vunpack.c.l.s8.bf16 %v813_v57 }
 0x2a2   :  { %1283 = vmatprep.subr.bf16.mxu0 %v980_v50  ;;  %v1068_v50 = vunpack.c.h.s8.bf16 %v868_v29 }
 0x2a5   :  { %1284 = vmatpush1.bf16.msra.mxu0 %v979_v52  ;;  %v876_v52 = vld [vmem:[#allocation11 + $0x258] sm:$0xff] }
 0x2a6   :  { %1285 = vmatprep.subr.bf16.mxu0 %v988_v53  ;;  %v941_v53 = vunpack.c.h.s8.bf16 %v805_v36 }
 0x2a9   :  { %1286 = vmatpush1.bf16.msra.mxu0 %v987_v55  ;;  %v950_v55 = vunpack.c.l.s8.bf16 %v814_v51  ;;  %v907_v51 = vld [vmem:[#allocation11 + $0x350] sm:$0xff] }
 0x2aa   :  { %1287 = vmatprep.subr.bf16.mxu0 %v996_v56  ;;  %v1076_v56 = vunpack.c.l.s8.bf16 %v876_v52 }
 0x2ad   :  { %1288 = vmatpush1.bf16.msra.mxu0 %v995_v58  ;;  %v875_v58 = vld [vmem:[#allocation11 + $0x250] sm:$0xff] }
 0x2ae   :  { %1289 = vmatprep.subr.bf16.mxu0 %v1004_v59  ;;  %v1075_v59 = vunpack.c.l.s8.bf16 %v875_v58 }
 0x2b1   :  { %1290 = vmatpush1.bf16.msra.mxu0 %v1003_v61  ;;  %v1084_v61 = vunpack.c.h.s8.bf16 %v876_v52 }
 0x2b2   :  { %1291 = vmatprep.subr.bf16.mxu0 %v1012_v62  ;;  %v822_v62 = vld [vmem:[#allocation11 + $0xa8] sm:$0xff] }
 0x2b3   :  { %v966_v2 = vunpack.c.l.s8.bf16 %v822_v62  ;;  %v974_v12 = vunpack.c.h.s8.bf16 %v822_v62  ;;  %v915_v62 = vld [vmem:[#allocation11 + $0x390] sm:$0xff] }
 0x2b5   :  { %1292 = vmatpush1.bf16.msra.mxu0 %v1011_v0  ;;  %v957_v0 = vunpack.c.h.s8.bf16 %v813_v57  ;;  %v916_v57 = vld [vmem:[#allocation11 + $0x398] sm:$0xff] }
 0x2b6   :  { %1293 = vmatprep.subr.bf16.mxu0 %v1020_v1  ;;  %v1083_v1 = vunpack.c.h.s8.bf16 %v875_v58 }
 0x2b9   :  { %1294 = vmatpush1.bf16.msra.mxu0 %v1019_v3  ;;  %v1092_v3 = vunpack.c.l.s8.bf16 %v884_v63 }
 0x2ba   :  { %1295 = vmatprep.subr.bf16.mxu0 %v1028_v4  ;;  %v821_v4 = vld [vmem:[#allocation11 + $0xa0] sm:$0xff] }
 0x2bd   :  { %1296 = vmatpush1.bf16.msra.mxu0 %v1027_v6  ;;  %v965_v6 = vunpack.c.l.s8.bf16 %v821_v4 }
 0x2be   :  { %1297 = vmatprep.subr.bf16.mxu0 %v1036_v10  ;;  %v1091_v10 = vunpack.c.l.s8.bf16 %v883_v5 }
 0x2c0   :  { %v764_v18 = vpop.f32.mrb[8].mxu0 }
 0x2c1   :  { %v765_v19 = vadd.f32 %v764_v18, %v358_v13  ;;  %v766_v20 = vpop.f32.mrb[9].mxu0  ;;  %1298 = vmatpush1.bf16.msra.mxu0 %v1035_v14  ;;  %v830_v14 = vld [vmem:[#allocation11 + $0xe8] sm:$0xff] }
 0x2c2   :  { %v767_v22 = vadd.f32 %v766_v20, %v362_v15  ;;  %v768_v23 = vpop.f32.mrb[10].mxu0  ;;  %1299 = vmatprep.subr.bf16.mxu0 %v1044_v16  ;;  %v973_v16 = vunpack.c.h.s8.bf16 %v821_v4  ;;  %v982_v18 = vunpack.c.l.s8.bf16 %v830_v14  ;;  %v829_v20 = vld [vmem:[#allocation11 + $0xe0] sm:$0xff]  ;;  %v924_v4 = vld [vmem:[#allocation11 + $0x3d8] sm:$0xff] }
 0x2c3   :  { %v783_v25 = vmul.f32 0.2, %v765_v19  ;;  %v769_v26 = vadd.f32 %v768_v23, %v358_v13  ;;  %v770_v27 = vpop.f32.mrb[11].mxu0  ;;  %vm775_vm9 = vcmp.gt.f32.partialorder %v765_v19, 0.0  ;;  %v1100_v13 = vunpack.c.h.s8.bf16 %v884_v63 }
 0x2c4   :  { %v784_v31 = vmul.f32 0.2, %v767_v22  ;;  %v771_v32 = vadd.f32 %v770_v27, %v362_v15  ;;  %vm776_vm10 = vcmp.gt.f32.partialorder %v767_v22, 0.0  ;;  %v892_v15 = vld [vmem:[#allocation11 + $0x2d8] sm:$0xff]  ;;  %v989_v29 = vunpack.c.h.s8.bf16 %v829_v20 }
 0x2c5   :  { %vm779_vm11 = vcmp.gt.f32.partialorder %v769_v26, 0.0  ;;  %v787_v9 = vmul.f32 0.2, %v769_v26  ;;  %1300 = vmatpush1.bf16.msra.mxu0 %v1043_v21  ;;  %v791_v38 = vsel %vm775_vm9, %v765_v19, %v783_v25  ;;  %v1108_v19 = vunpack.c.l.s8.bf16 %v892_v15  ;;  %v891_v21 = vld [vmem:[#allocation11 + $0x2d0] sm:$0xff]  ;;  %v900_v27 = vld [vmem:[#allocation11 + $0x318] sm:$0xff] }
 0x2c6   :  { %vm780_vm12 = vcmp.gt.f32.partialorder %v771_v32, 0.0  ;;  %v788_v34 = vmul.f32 0.2, %v771_v32  ;;  %1301 = vmatprep.subr.bf16.mxu0 %v1052_v24  ;;  %v792_v44 = vsel %vm776_vm10, %v767_v22, %v784_v31  ;;  %v981_v22 = vunpack.c.l.s8.bf16 %v829_v20  ;;  %v808_v20 = vld [vmem:[#allocation11 + $0x38] sm:$0xff] }
 0x2c7   :  { %v795_v42 = vsel %vm779_vm11, %v769_v26, %v787_v9  ;;  %v1107_v23 = vunpack.c.l.s8.bf16 %v891_v21  ;;  %v990_v24 = vunpack.c.h.s8.bf16 %v830_v14  ;;  %v1116_v25 = vunpack.c.h.s8.bf16 %v892_v15  ;;  %v838_v26 = vld [vmem:[#allocation11 + $0x128] sm:$0xff]  ;;  %v923_v14 = vld [vmem:[#allocation11 + $0x3d0] sm:$0xff] }
 0x2c8   :  { %v3785_v39 = vpack.c.bf16 %v795_v42, %v791_v38  ;;  %v796_v45 = vsel %vm780_vm12, %v771_v32, %v788_v34  ;;  %v1115_v31 = vunpack.c.h.s8.bf16 %v891_v21  ;;  %v998_v32 = vunpack.c.l.s8.bf16 %v838_v26  ;;  %v899_v34 = vld [vmem:[#allocation11 + $0x310] sm:$0xff]  ;;  %v846_v42 = vld [vmem:[#allocation11 + $0x168] sm:$0xff] }
 0x2c9   :  { %v3787_v46 = vpack.c.bf16 %v796_v45, %v792_v44  ;;  %1302 = vmatpush1.bf16.msra.mxu0 %v1051_v33  ;;  %v1124_v9 = vunpack.c.l.s8.bf16 %v900_v27  ;;  %v837_v33 = vld [vmem:[#allocation11 + $0x120] sm:$0xff]  ;;  %v1123_v36 = vunpack.c.l.s8.bf16 %v899_v34  ;;  %v1006_v37 = vunpack.c.h.s8.bf16 %v838_v26  ;;  %v908_v44 = vld [vmem:[#allocation11 + $0x358] sm:$0xff]  ;;  %v807_v26 = vld [vmem:[#allocation11 + $0x30] sm:$0xff] }
 0x2ca   :  { %1314 = vmatprep.subr.bf16.mxu0 %v1060_v35  ;;  %v997_v35 = vunpack.c.l.s8.bf16 %v837_v33  ;;  %v1132_v38 = vunpack.c.h.s8.bf16 %v900_v27  ;;  %v1005_v45 = vunpack.c.h.s8.bf16 %v837_v33  ;;  %v816_v33 = vld [vmem:[#allocation11 + $0x78] sm:$0xff] }
 0x2cb   :  { %1260 = vmatprep.mubr.bf16.mxu1 %v3787_v46 }
 0x2cc   :  { %1261 = vmatmul.mubr.bf16.vlgmr.msra.gmra.mrb[0].mxu1 %v3785_v39  ;;  %1304 = vmatmul.mubr.bf16.vlgmr.msra.gmra.mrb[16].mxu0 %v3767_v28 }
 0x2cd   :  { %1358 = vmatpush1.bf16.msra.mxu1 %v933_v47  ;;  %1315 = vmatpush1.bf16.msra.mxu0 %v1059_v48  ;;  %v1131_v47 = vunpack.c.h.s8.bf16 %v899_v34  ;;  %v1014_v48 = vunpack.c.l.s8.bf16 %v846_v42 }
 0x2ce   :  { %1346 = vmatprep.mubr.bf16.mxu0 %v3787_v46  ;;  %1389 = vmatprep.mubr.bf16.mxu1 %v3769_v30 }
 0x2cf   :  { %1359 = vmatprep.subr.bf16.mxu1 %v942_v49  ;;  %1316 = vmatprep.subr.bf16.mxu0 %v1068_v50  ;;  %v1140_v49 = vunpack.c.l.s8.bf16 %v908_v44  ;;  %v845_v50 = vld [vmem:[#allocation11 + $0x160] sm:$0xff] }
 0x2d0   :  { %v1013_v52 = vunpack.c.l.s8.bf16 %v845_v50  ;;  %v1021_v58 = vunpack.c.h.s8.bf16 %v845_v50  ;;  %v824_v50 = vld [vmem:[#allocation11 + $0xb8] sm:$0xff] }
 0x2d1   :  { %1360 = vmatpush1.bf16.msra.mxu1 %v941_v53  ;;  %1317 = vmatpush1.bf16.msra.mxu0 %v1067_v54  ;;  %v1139_v53 = vunpack.c.l.s8.bf16 %v907_v51  ;;  %v1022_v54 = vunpack.c.h.s8.bf16 %v846_v42  ;;  %v815_v42 = vld [vmem:[#allocation11 + $0x70] sm:$0xff] }
 0x2d2   :  { %1361 = vmatprep.subr.bf16.mxu1 %v950_v55  ;;  %1318 = vmatprep.subr.bf16.mxu0 %v1076_v56  ;;  %v1148_v55 = vunpack.c.h.s8.bf16 %v908_v44  ;;  %v854_v56 = vld [vmem:[#allocation11 + $0x1a8] sm:$0xff] }
 0x2d5   :  { %1362 = vmatpush1.bf16.msra.mxu1 %v949_v7  ;;  %1319 = vmatpush1.bf16.msra.mxu0 %v1075_v59  ;;  %v1147_v7 = vunpack.c.h.s8.bf16 %v907_v51  ;;  %v1030_v59 = vunpack.c.l.s8.bf16 %v854_v56 }
 0x2d6   :  { %1363 = vmatprep.subr.bf16.mxu1 %v958_v60  ;;  %1320 = vmatprep.subr.bf16.mxu0 %v1084_v61  ;;  %v1156_v60 = vunpack.c.l.s8.bf16 %v916_v57  ;;  %v853_v61 = vld [vmem:[#allocation11 + $0x1a0] sm:$0xff] }
 0x2d7   :  { %v1029_v63 = vunpack.c.l.s8.bf16 %v853_v61  ;;  %v1037_v5 = vunpack.c.h.s8.bf16 %v853_v61 }
 0x2d9   :  { %1364 = vmatpush1.bf16.msra.mxu1 %v957_v0  ;;  %1321 = vmatpush1.bf16.msra.mxu0 %v1083_v1  ;;  %v1155_v0 = vunpack.c.l.s8.bf16 %v915_v62  ;;  %v1038_v1 = vunpack.c.h.s8.bf16 %v854_v56 }
 0x2da   :  { %1365 = vmatprep.subr.bf16.mxu1 %v966_v2  ;;  %1322 = vmatprep.subr.bf16.mxu0 %v1092_v3  ;;  %v1164_v2 = vunpack.c.h.s8.bf16 %v916_v57  ;;  %v862_v3 = vld [vmem:[#allocation11 + $0x1e8] sm:$0xff] }
 0x2dd   :  { %1366 = vmatpush1.bf16.msra.mxu1 %v965_v6  ;;  %1323 = vmatpush1.bf16.msra.mxu0 %v1091_v10  ;;  %v1163_v6 = vunpack.c.h.s8.bf16 %v915_v62  ;;  %v1046_v10 = vunpack.c.l.s8.bf16 %v862_v3 }
 0x2de   :  { %1367 = vmatprep.subr.bf16.mxu1 %v974_v12  ;;  %1324 = vmatprep.subr.bf16.mxu0 %v1100_v13  ;;  %v1172_v12 = vunpack.c.l.s8.bf16 %v924_v4  ;;  %v861_v13 = vld [vmem:[#allocation11 + $0x1e0] sm:$0xff] }
 0x2df   :  { %v1045_v15 = vunpack.c.l.s8.bf16 %v861_v13  ;;  %v1053_v21 = vunpack.c.h.s8.bf16 %v861_v13 }
 0x2e1   :  { %1368 = vmatpush1.bf16.msra.mxu1 %v973_v16  ;;  %1325 = vmatpush1.bf16.msra.mxu0 %v1099_v17  ;;  %v1171_v16 = vunpack.c.l.s8.bf16 %v923_v14  ;;  %v1054_v17 = vunpack.c.h.s8.bf16 %v862_v3 }
 0x2e2   :  { %1369 = vmatprep.subr.bf16.mxu1 %v982_v18  ;;  %1326 = vmatprep.subr.bf16.mxu0 %v1108_v19  ;;  %v1180_v18 = vunpack.c.h.s8.bf16 %v924_v4  ;;  %v870_v19 = vld [vmem:[#allocation11 + $0x228] sm:$0xff] }
 0x2e5   :  { %1370 = vmatpush1.bf16.msra.mxu1 %v981_v22  ;;  %1327 = vmatpush1.bf16.msra.mxu0 %v1107_v23  ;;  %v1179_v22 = vunpack.c.h.s8.bf16 %v923_v14  ;;  %v1062_v23 = vunpack.c.l.s8.bf16 %v870_v19 }
 0x2e6   :  { %1371 = vmatprep.subr.bf16.mxu1 %v990_v24  ;;  %1328 = vmatprep.subr.bf16.mxu0 %v1116_v25  ;;  %v869_v24 = vld [vmem:[#allocation11 + $0x220] sm:$0xff]  ;;  %v936_v25 = vunpack.c.l.s8.bf16 %v808_v20 }
 0x2e7   :  { %v1061_v27 = vunpack.c.l.s8.bf16 %v869_v24  ;;  %v1069_v34 = vunpack.c.h.s8.bf16 %v869_v24  ;;  %v848_v24 = vld [vmem:[#allocation11 + $0x178] sm:$0xff] }
 0x2e9   :  { %1372 = vmatpush1.bf16.msra.mxu1 %v989_v29  ;;  %1329 = vmatpush1.bf16.msra.mxu0 %v1115_v31  ;;  %v935_v29 = vunpack.c.l.s8.bf16 %v807_v26  ;;  %v1070_v31 = vunpack.c.h.s8.bf16 %v870_v19 }
 0x2ea   :  { %1373 = vmatprep.subr.bf16.mxu1 %v998_v32  ;;  %1330 = vmatprep.subr.bf16.mxu0 %v1124_v9  ;;  %v944_v32 = vunpack.c.h.s8.bf16 %v808_v20  ;;  %v878_v9 = vld [vmem:[#allocation11 + $0x268] sm:$0xff] }
 0x2ed   :  { %1374 = vmatpush1.bf16.msra.mxu1 %v997_v35  ;;  %1331 = vmatpush1.bf16.msra.mxu0 %v1123_v36  ;;  %v943_v35 = vunpack.c.h.s8.bf16 %v807_v26  ;;  %v1078_v36 = vunpack.c.l.s8.bf16 %v878_v9 }
 0x2ee   :  { %1375 = vmatprep.subr.bf16.mxu1 %v1006_v37  ;;  %1332 = vmatprep.subr.bf16.mxu0 %v1132_v38  ;;  %v877_v37 = vld [vmem:[#allocation11 + $0x260] sm:$0xff]  ;;  %v952_v38 = vunpack.c.l.s8.bf16 %v816_v33 }
 0x2ef   :  { %v1077_v44 = vunpack.c.l.s8.bf16 %v877_v37  ;;  %v1085_v51 = vunpack.c.h.s8.bf16 %v877_v37  ;;  %v856_v37 = vld [vmem:[#allocation11 + $0x1b8] sm:$0xff] }
 0x2f1   :  { %1376 = vmatpush1.bf16.msra.mxu1 %v1005_v45  ;;  %1333 = vmatpush1.bf16.msra.mxu0 %v1131_v47  ;;  %v951_v45 = vunpack.c.l.s8.bf16 %v815_v42  ;;  %v1086_v47 = vunpack.c.h.s8.bf16 %v878_v9 }
 0x2f2   :  { %1377 = vmatprep.subr.bf16.mxu1 %v1014_v48  ;;  %1334 = vmatprep.subr.bf16.mxu0 %v1140_v49  ;;  %v960_v48 = vunpack.c.h.s8.bf16 %v816_v33  ;;  %v886_v49 = vld [vmem:[#allocation11 + $0x2a8] sm:$0xff] }
 0x2f5   :  { %1378 = vmatpush1.bf16.msra.mxu1 %v1013_v52  ;;  %1335 = vmatpush1.bf16.msra.mxu0 %v1139_v53  ;;  %v1094_v52 = vunpack.c.l.s8.bf16 %v886_v49  ;;  %v885_v53 = vld [vmem:[#allocation11 + $0x2a0] sm:$0xff] }
 0x2f6   :  { %1379 = vmatprep.subr.bf16.mxu1 %v1022_v54  ;;  %1336 = vmatprep.subr.bf16.mxu0 %v1148_v55  ;;  %v968_v54 = vunpack.c.l.s8.bf16 %v824_v50  ;;  %v823_v55 = vld [vmem:[#allocation11 + $0xb0] sm:$0xff]  ;;  %v1093_v56 = vunpack.c.l.s8.bf16 %v885_v53  ;;  %v1101_v61 = vunpack.c.h.s8.bf16 %v885_v53  ;;  %v864_v53 = vld [vmem:[#allocation11 + $0x1f8] sm:$0xff] }
 0x2f7   :  { %v967_v57 = vunpack.c.l.s8.bf16 %v823_v55  ;;  %v975_v62 = vunpack.c.h.s8.bf16 %v823_v55 }
 0x2f9   :  { %1380 = vmatpush1.bf16.msra.mxu1 %v1021_v58  ;;  %1337 = vmatpush1.bf16.msra.mxu0 %v1147_v7  ;;  %v1102_v58 = vunpack.c.h.s8.bf16 %v886_v49  ;;  %v976_v7 = vunpack.c.h.s8.bf16 %v824_v50 }
 0x2fa   :  { %1381 = vmatprep.subr.bf16.mxu1 %v1030_v59  ;;  %1338 = vmatprep.subr.bf16.mxu0 %v1156_v60  ;;  %v894_v59 = vld [vmem:[#allocation11 + $0x2e8] sm:$0xff]  ;;  %v832_v60 = vld [vmem:[#allocation11 + $0xf8] sm:$0xff] }
 0x2fd   :  { %1382 = vmatpush1.bf16.msra.mxu1 %v1029_v63  ;;  %1339 = vmatpush1.bf16.msra.mxu0 %v1155_v0  ;;  %v1110_v63 = vunpack.c.l.s8.bf16 %v894_v59  ;;  %v893_v0 = vld [vmem:[#allocation11 + $0x2e0] sm:$0xff] }
 0x2fe   :  { %1383 = vmatprep.subr.bf16.mxu1 %v1038_v1  ;;  %1340 = vmatprep.subr.bf16.mxu0 %v1164_v2  ;;  %v984_v1 = vunpack.c.l.s8.bf16 %v832_v60  ;;  %v831_v2 = vld [vmem:[#allocation11 + $0xf0] sm:$0xff]  ;;  %v1109_v3 = vunpack.c.l.s8.bf16 %v893_v0  ;;  %v1117_v13 = vunpack.c.h.s8.bf16 %v893_v0  ;;  %v872_v0 = vld [vmem:[#allocation11 + $0x238] sm:$0xff] }
 0x2ff   :  { %v983_v4 = vunpack.c.l.s8.bf16 %v831_v2  ;;  %v991_v14 = vunpack.c.h.s8.bf16 %v831_v2 }
 0x301   :  { %1384 = vmatpush1.bf16.msra.mxu1 %v1037_v5  ;;  %1341 = vmatpush1.bf16.msra.mxu0 %v1163_v6  ;;  %v1118_v5 = vunpack.c.h.s8.bf16 %v894_v59  ;;  %v992_v6 = vunpack.c.h.s8.bf16 %v832_v60 }
 0x302   :  { %1385 = vmatprep.subr.bf16.mxu1 %v1046_v10  ;;  %1342 = vmatprep.subr.bf16.mxu0 %v1172_v12  ;;  %v902_v10 = vld [vmem:[#allocation11 + $0x328] sm:$0xff]  ;;  %v840_v12 = vld [vmem:[#allocation11 + $0x138] sm:$0xff] }
 0x305   :  { %1386 = vmatpush1.bf16.msra.mxu1 %v1045_v15  ;;  %1343 = vmatpush1.bf16.msra.mxu0 %v1171_v16  ;;  %v1126_v15 = vunpack.c.l.s8.bf16 %v902_v10  ;;  %v901_v16 = vld [vmem:[#allocation11 + $0x320] sm:$0xff] }
 0x306   :  { %1387 = vmatprep.subr.bf16.mxu1 %v1054_v17  ;;  %1344 = vmatprep.subr.bf16.mxu0 %v1180_v18  ;;  %v1000_v17 = vunpack.c.l.s8.bf16 %v840_v12  ;;  %v839_v18 = vld [vmem:[#allocation11 + $0x130] sm:$0xff]  ;;  %v1125_v19 = vunpack.c.l.s8.bf16 %v901_v16 }
 0x307   :  { %v999_v20 = vunpack.c.l.s8.bf16 %v839_v18  ;;  %v1007_v26 = vunpack.c.h.s8.bf16 %v839_v18 }
 0x309   :  { %1388 = vmatpush1.bf16.msra.mxu1 %v1053_v21  ;;  %1345 = vmatpush1.bf16.msra.mxu0 %v1179_v22  ;;  %v1134_v21 = vunpack.c.h.s8.bf16 %v902_v10  ;;  %v1008_v22 = vunpack.c.h.s8.bf16 %v840_v12 }
 0x30a   :  { %1400 = vmatprep.subr.bf16.mxu1 %v1062_v23  ;;  %1443 = vmatprep.subr.bf16.mxu0 %v936_v25  ;;  %v910_v23 = vld [vmem:[#allocation11 + $0x368] sm:$0xff]  ;;  %v1133_v25 = vunpack.c.h.s8.bf16 %v901_v16  ;;  %v880_v16 = vld [vmem:[#allocation11 + $0x278] sm:$0xff] }
 0x30c   :  { %1390 = vmatmul.mubr.bf16.vlgmr.msra.gmra.mrb[4].mxu1 %v3767_v28  ;;  %1347 = vmatmul.mubr.bf16.vlgmr.msra.gmra.mrb[16].mxu0 %v3785_v39 }
 0x30d   :  { %1401 = vmatpush1.bf16.msra.mxu1 %v1061_v27  ;;  %1432 = vmatprep.mubr.bf16.mxu1 %v3787_v46  ;;  %v1142_v27 = vunpack.c.l.s8.bf16 %v910_v23 }
 0x30e   :  { %1444 = vmatpush1.bf16.msra.mxu0 %v935_v29  ;;  %1475 = vmatprep.mubr.bf16.mxu0 %v3769_v30  ;;  %v959_v30 = vunpack.c.h.s8.bf16 %v815_v42  ;;  %v909_v29 = vld [vmem:[#allocation11 + $0x360] sm:$0xff] }
 0x30f   :  { %1402 = vmatprep.subr.bf16.mxu1 %v1070_v31  ;;  %1445 = vmatprep.subr.bf16.mxu0 %v944_v32  ;;  %v1016_v31 = vunpack.c.l.s8.bf16 %v848_v24  ;;  %v847_v32 = vld [vmem:[#allocation11 + $0x170] sm:$0xff]  ;;  %v1141_v9 = vunpack.c.l.s8.bf16 %v909_v29 }
 0x310   :  { %v1015_v33 = vunpack.c.l.s8.bf16 %v847_v32  ;;  %v1023_v42 = vunpack.c.h.s8.bf16 %v847_v32  ;;  %v1713_v32 = vld [vmem:[#allocation16 + $0x60] sm:$0xff] }
 0x311   :  { %1403 = vmatpush1.bf16.msra.mxu1 %v1069_v34  ;;  %v1150_v34 = vunpack.c.h.s8.bf16 %v910_v23 }
 0x312   :  { %1446 = vmatpush1.bf16.msra.mxu0 %v943_v35  ;;  %1404 = vmatprep.subr.bf16.mxu1 %v1078_v36  ;;  %v1024_v35 = vunpack.c.h.s8.bf16 %v848_v24  ;;  %v918_v36 = vld [vmem:[#allocation11 + $0x3a8] sm:$0xff] }
 0x313   :  { %1447 = vmatprep.subr.bf16.mxu0 %v952_v38  ;;  %v1149_v38 = vunpack.c.h.s8.bf16 %v909_v29 }
 0x315   :  { %1405 = vmatpush1.bf16.msra.mxu1 %v1077_v44  ;;  %v1158_v44 = vunpack.c.l.s8.bf16 %v918_v36 }
 0x316   :  { %1448 = vmatpush1.bf16.msra.mxu0 %v951_v45  ;;  %1406 = vmatprep.subr.bf16.mxu1 %v1086_v47  ;;  %v917_v45 = vld [vmem:[#allocation11 + $0x3a0] sm:$0xff]  ;;  %v1032_v47 = vunpack.c.l.s8.bf16 %v856_v37 }
 0x317   :  { %1449 = vmatprep.subr.bf16.mxu0 %v960_v48  ;;  %v855_v48 = vld [vmem:[#allocation11 + $0x1b0] sm:$0xff]  ;;  %v1157_v49 = vunpack.c.l.s8.bf16 %v917_v45 }
 0x318   :  { %v1031_v50 = vunpack.c.l.s8.bf16 %v855_v48  ;;  %v1039_v55 = vunpack.c.h.s8.bf16 %v855_v48  ;;  %v1719_v48 = vld [vmem:[#allocation16 + $0x90] sm:$0xff] }
 0x319   :  { %1407 = vmatpush1.bf16.msra.mxu1 %v1085_v51  ;;  %v1166_v51 = vunpack.c.h.s8.bf16 %v918_v36 }
 0x31a   :  { %1450 = vmatpush1.bf16.msra.mxu0 %v959_v30  ;;  %1408 = vmatprep.subr.bf16.mxu1 %v1094_v52  ;;  %v1040_v30 = vunpack.c.h.s8.bf16 %v856_v37  ;;  %v926_v52 = vld [vmem:[#allocation11 + $0x3e8] sm:$0xff] }
 0x31b   :  { %1451 = vmatprep.subr.bf16.mxu0 %v968_v54  ;;  %v1165_v54 = vunpack.c.h.s8.bf16 %v917_v45 }
 0x31d   :  { %1409 = vmatpush1.bf16.msra.mxu1 %v1093_v56  ;;  %v1174_v56 = vunpack.c.l.s8.bf16 %v926_v52 }
 0x31e   :  { %1452 = vmatpush1.bf16.msra.mxu0 %v967_v57  ;;  %1410 = vmatprep.subr.bf16.mxu1 %v1102_v58  ;;  %v925_v57 = vld [vmem:[#allocation11 + $0x3e0] sm:$0xff]  ;;  %v1048_v58 = vunpack.c.l.s8.bf16 %v864_v53 }
 0x31f   :  { %1453 = vmatprep.subr.bf16.mxu0 %v976_v7  ;;  %v863_v7 = vld [vmem:[#allocation11 + $0x1f0] sm:$0xff]  ;;  %v1173_v59 = vunpack.c.l.s8.bf16 %v925_v57 }
 0x320   :  { %v1047_v60 = vunpack.c.l.s8.bf16 %v863_v7  ;;  %v1055_v2 = vunpack.c.h.s8.bf16 %v863_v7  ;;  %v904_v7 = vld [vmem:[#allocation11 + $0x338] sm:$0xff] }
 0x321   :  { %1411 = vmatpush1.bf16.msra.mxu1 %v1101_v61  ;;  %v1182_v61 = vunpack.c.h.s8.bf16 %v926_v52 }
 0x322   :  { %1454 = vmatpush1.bf16.msra.mxu0 %v975_v62  ;;  %1412 = vmatprep.subr.bf16.mxu1 %v1110_v63  ;;  %v1056_v62 = vunpack.c.h.s8.bf16 %v864_v53  ;;  %v1702_v63 = vld [vmem:[#allocation16 + $0x8] sm:$0xff]  ;;  %v1929_v53 = vunpack.c.l.s8.bf16 %v1719_v48 }
 0x323   :  { %1455 = vmatprep.subr.bf16.mxu0 %v984_v1  ;;  %v1181_v1 = vunpack.c.h.s8.bf16 %v925_v57 }
 0x325   :  { %1413 = vmatpush1.bf16.msra.mxu1 %v1109_v3  ;;  %v1894_v3 = vunpack.c.l.s8.bf16 %v1702_v63 }
 0x326   :  { %1456 = vmatpush1.bf16.msra.mxu0 %v983_v4  ;;  %1414 = vmatprep.subr.bf16.mxu1 %v1118_v5  ;;  %v1701_v4 = vld [vmem:[#allocation16] sm:$0xff]  ;;  %v1064_v5 = vunpack.c.l.s8.bf16 %v872_v0 }
 0x327   :  { %1457 = vmatprep.subr.bf16.mxu0 %v992_v6  ;;  %v871_v6 = vld [vmem:[#allocation11 + $0x230] sm:$0xff]  ;;  %v1893_v10 = vunpack.c.l.s8.bf16 %v1701_v4 }
 0x328   :  { %v1063_v12 = vunpack.c.l.s8.bf16 %v871_v6  ;;  %v1071_v18 = vunpack.c.h.s8.bf16 %v871_v6  ;;  %v912_v6 = vld [vmem:[#allocation11 + $0x378] sm:$0xff] }
 0x329   :  { %1415 = vmatpush1.bf16.msra.mxu1 %v1117_v13  ;;  %v1072_v13 = vunpack.c.h.s8.bf16 %v872_v0  ;;  %v903_v0 = vld [vmem:[#allocation11 + $0x330] sm:$0xff] }
 0x32a   :  { %1458 = vmatpush1.bf16.msra.mxu0 %v991_v14  ;;  %1416 = vmatprep.subr.bf16.mxu1 %v1126_v15  ;;  %v1900_v14 = vunpack.c.h.s8.bf16 %v1702_v63  ;;  %v1708_v15 = vld [vmem:[#allocation16 + $0x38] sm:$0xff]  ;;  %v1128_v63 = vunpack.c.l.s8.bf16 %v904_v7 }
 0x32b   :  { %1459 = vmatprep.subr.bf16.mxu0 %v1000_v17  ;;  %v1899_v17 = vunpack.c.h.s8.bf16 %v1701_v4  ;;  %v1136_v4 = vunpack.c.h.s8.bf16 %v904_v7 }
 0x32d   :  { %1417 = vmatpush1.bf16.msra.mxu1 %v1125_v19  ;;  %v1906_v19 = vunpack.c.l.s8.bf16 %v1708_v15 }
 0x32e   :  { %1460 = vmatpush1.bf16.msra.mxu0 %v999_v20  ;;  %1418 = vmatprep.subr.bf16.mxu1 %v1134_v21  ;;  %v1707_v20 = vld [vmem:[#allocation16 + $0x30] sm:$0xff]  ;;  %v1080_v21 = vunpack.c.l.s8.bf16 %v880_v16 }
 0x32f   :  { %1461 = vmatprep.subr.bf16.mxu0 %v1008_v22  ;;  %v879_v22 = vld [vmem:[#allocation11 + $0x270] sm:$0xff]  ;;  %v1905_v23 = vunpack.c.l.s8.bf16 %v1707_v20  ;;  %v1911_v29 = vunpack.c.h.s8.bf16 %v1707_v20  ;;  %v1152_v20 = vunpack.c.h.s8.bf16 %v912_v6 }
 0x330   :  { %v1079_v24 = vunpack.c.l.s8.bf16 %v879_v22 }
 0x331   :  { %1419 = vmatpush1.bf16.msra.mxu1 %v1133_v25  ;;  %v1912_v25 = vunpack.c.h.s8.bf16 %v1708_v15  ;;  %v1144_v15 = vunpack.c.l.s8.bf16 %v912_v6 }
 0x332   :  { %1462 = vmatpush1.bf16.msra.mxu0 %v1007_v26  ;;  %1420 = vmatprep.subr.bf16.mxu1 %v1142_v27  ;;  %v1714_v26 = vld [vmem:[#allocation16 + $0x68] sm:$0xff] }
 0x333   :  { %1463 = vmatprep.subr.bf16.mxu0 %v1016_v31  ;;  %v888_v27 = vld [vmem:[#allocation11 + $0x2b8] sm:$0xff]  ;;  %v1918_v31 = vunpack.c.l.s8.bf16 %v1714_v26  ;;  %v1924_v36 = vunpack.c.h.s8.bf16 %v1714_v26 }
 0x334   :  { %v1104_v37 = vunpack.c.h.s8.bf16 %v888_v27 }
 0x335   :  { %1421 = vmatpush1.bf16.msra.mxu1 %v1141_v9  ;;  %v1096_v9 = vunpack.c.l.s8.bf16 %v888_v27  ;;  %v919_v27 = vld [vmem:[#allocation11 + $0x3b0] sm:$0xff] }
 0x336   :  { %1464 = vmatpush1.bf16.msra.mxu0 %v1015_v33  ;;  %1422 = vmatprep.subr.bf16.mxu1 %v1150_v34  ;;  %v887_v33 = vld [vmem:[#allocation11 + $0x2b0] sm:$0xff]  ;;  %v1917_v34 = vunpack.c.l.s8.bf16 %v1713_v32 }
 0x337   :  { %1465 = vmatprep.subr.bf16.mxu0 %v1024_v35  ;;  %v1095_v35 = vunpack.c.l.s8.bf16 %v887_v33  ;;  %v1103_v45 = vunpack.c.h.s8.bf16 %v887_v33  ;;  %v928_v33 = vld [vmem:[#allocation11 + $0x3f8] sm:$0xff] }
 0x339   :  { %1423 = vmatpush1.bf16.msra.mxu1 %v1149_v38  ;;  %v1720_v38 = vld [vmem:[#allocation16 + $0x98] sm:$0xff] }
 0x33a   :  { %1466 = vmatpush1.bf16.msra.mxu0 %v1023_v42  ;;  %1424 = vmatprep.subr.bf16.mxu1 %v1158_v44  ;;  %v896_v42 = vld [vmem:[#allocation11 + $0x2f8] sm:$0xff]  ;;  %v1923_v44 = vunpack.c.h.s8.bf16 %v1713_v32 }
 0x33b   :  { %1467 = vmatprep.subr.bf16.mxu0 %v1032_v47  ;;  %v1930_v47 = vunpack.c.l.s8.bf16 %v1720_v38  ;;  %v1120_v57 = vunpack.c.h.s8.bf16 %v896_v42 }
 0x33d   :  { %1425 = vmatpush1.bf16.msra.mxu1 %v1157_v49 }
 0x33e   :  { %1468 = vmatpush1.bf16.msra.mxu0 %v1031_v50  ;;  %1426 = vmatprep.subr.bf16.mxu1 %v1166_v51  ;;  %v1112_v50 = vunpack.c.l.s8.bf16 %v896_v42  ;;  %v895_v51 = vld [vmem:[#allocation11 + $0x2f0] sm:$0xff] }
 0x33f   :  { %1469 = vmatprep.subr.bf16.mxu0 %v1040_v30  ;;  %v927_v42 = vld [vmem:[#allocation11 + $0x3f0] sm:$0xff] }
 0x341   :  { %1427 = vmatpush1.bf16.msra.mxu1 %v1165_v54 }
 0x342   :  { %1470 = vmatpush1.bf16.msra.mxu0 %v1039_v55  ;;  %1428 = vmatprep.subr.bf16.mxu1 %v1174_v56  ;;  %v1111_v55 = vunpack.c.l.s8.bf16 %v895_v51  ;;  %v1936_v56 = vunpack.c.h.s8.bf16 %v1720_v38  ;;  %v1176_v38 = vunpack.c.l.s8.bf16 %v928_v33 }
 0x343   :  { %1471 = vmatprep.subr.bf16.mxu0 %v1048_v58  ;;  %v1726_v58 = vld [vmem:[#allocation16 + $0xc8] sm:$0xff] }
 0x345   :  { %1429 = vmatpush1.bf16.msra.mxu1 %v1173_v59  ;;  %v1935_v59 = vunpack.c.h.s8.bf16 %v1719_v48  ;;  %v1184_v48 = vunpack.c.h.s8.bf16 %v928_v33  ;;  %v1728_v33 = vld [vmem:[#allocation16 + $0xd8] sm:$0xff] }
 0x346   :  { %1472 = vmatpush1.bf16.msra.mxu0 %v1047_v60  ;;  %1430 = vmatprep.subr.bf16.mxu1 %v1182_v61  ;;  %v1119_v60 = vunpack.c.h.s8.bf16 %v895_v51  ;;  %v1942_v61 = vunpack.c.l.s8.bf16 %v1726_v58  ;;  %v1704_v51 = vld [vmem:[#allocation16 + $0x18] sm:$0xff] }
 0x347   :  { %1473 = vmatprep.subr.bf16.mxu0 %v1056_v62  ;;  %v1725_v62 = vld [vmem:[#allocation16 + $0xc0] sm:$0xff] }
 0x349   :  { %1431 = vmatpush1.bf16.msra.mxu1 %v1181_v1  ;;  %v1941_v1 = vunpack.c.l.s8.bf16 %v1725_v62 }
 0x34a   :  { %1474 = vmatpush1.bf16.msra.mxu0 %v1055_v2  ;;  %2277 = vmatprep.subr.bf16.mxu1 %v1894_v3  ;;  %v1127_v2 = vunpack.c.l.s8.bf16 %v903_v0  ;;  %v1948_v3 = vunpack.c.h.s8.bf16 %v1726_v58  ;;  %v1703_v58 = vld [vmem:[#allocation16 + $0x10] sm:$0xff] }
 0x34b   :  { %1486 = vmatprep.subr.bf16.mxu0 %v1064_v5  ;;  %v1732_v5 = vld [vmem:[#allocation16 + $0xf8] sm:$0xff]  ;;  %v1895_v7 = vunpack.c.l.s8.bf16 %v1703_v58 }
 0x34c   :  { %1433 = vmatmul.mubr.bf16.vlgmr.msra.gmra.mrb[4].mxu1 %v3785_v39 }
 0x34d   :  { %1476 = vmatmul.mubr.bf16.vlgmr.msra.gmra.mrb[20].mxu0 %v3767_v28  ;;  %2278 = vmatpush1.bf16.msra.mxu1 %v1893_v10  ;;  %v1088_v28 = vunpack.c.h.s8.bf16 %v880_v16  ;;  %v1947_v10 = vunpack.c.h.s8.bf16 %v1725_v62  ;;  %v911_v16 = vld [vmem:[#allocation11 + $0x370] sm:$0xff] }
 0x34e   :  { %1487 = vmatpush1.bf16.msra.mxu0 %v1063_v12  ;;  %1518 = vmatprep.mubr.bf16.mxu0 %v3787_v46  ;;  %v1087_v46 = vunpack.c.h.s8.bf16 %v879_v22  ;;  %v1135_v12 = vunpack.c.h.s8.bf16 %v903_v0  ;;  %v920_v22 = vld [vmem:[#allocation11 + $0x3b8] sm:$0xff] }
 0x34f   :  { %1488 = vmatprep.subr.bf16.mxu0 %v1072_v13  ;;  %2279 = vmatprep.subr.bf16.mxu1 %v1900_v14  ;;  %v1954_v13 = vunpack.c.l.s8.bf16 %v1732_v5  ;;  %v1731_v14 = vld [vmem:[#allocation16 + $0xf0] sm:$0xff]  ;;  %v1160_v26 = vunpack.c.l.s8.bf16 %v920_v22  ;;  %v1168_v32 = vunpack.c.h.s8.bf16 %v920_v22 }
 0x351   :  { %2280 = vmatpush1.bf16.msra.mxu1 %v1899_v17  ;;  %v1953_v17 = vunpack.c.l.s8.bf16 %v1731_v14 }
 0x352   :  { %1489 = vmatpush1.bf16.msra.mxu0 %v1071_v18  ;;  %2281 = vmatprep.subr.bf16.mxu1 %v1906_v19  ;;  %v1143_v18 = vunpack.c.l.s8.bf16 %v911_v16  ;;  %v1960_v19 = vunpack.c.h.s8.bf16 %v1732_v5  ;;  %v1715_v5 = vld [vmem:[#allocation16 + $0x70] sm:$0xff] }
 0x353   :  { %1490 = vmatprep.subr.bf16.mxu0 %v1080_v21  ;;  %v1738_v21 = vld [vmem:[#allocation16 + $0x128] sm:$0xff]  ;;  %v1919_v6 = vunpack.c.l.s8.bf16 %v1715_v5 }
 0x355   :  { %2282 = vmatpush1.bf16.msra.mxu1 %v1905_v23  ;;  %v1959_v23 = vunpack.c.h.s8.bf16 %v1731_v14 }
 0x356   :  { %1491 = vmatpush1.bf16.msra.mxu0 %v1079_v24  ;;  %2283 = vmatprep.subr.bf16.mxu1 %v1912_v25  ;;  %v1151_v24 = vunpack.c.h.s8.bf16 %v911_v16  ;;  %v1966_v25 = vunpack.c.l.s8.bf16 %v1738_v21 }
 0x357   :  { %1492 = vmatprep.subr.bf16.mxu0 %v1088_v28  ;;  %v1737_v28 = vld [vmem:[#allocation16 + $0x120] sm:$0xff] }
 0x359   :  { %2284 = vmatpush1.bf16.msra.mxu1 %v1911_v29  ;;  %v1965_v29 = vunpack.c.l.s8.bf16 %v1737_v28 }
 0x35a   :  { %1493 = vmatpush1.bf16.msra.mxu0 %v1087_v46  ;;  %2285 = vmatprep.subr.bf16.mxu1 %v1918_v31  ;;  %v1159_v46 = vunpack.c.l.s8.bf16 %v919_v27  ;;  %v1972_v31 = vunpack.c.h.s8.bf16 %v1738_v21 }
 0x35b   :  { %1494 = vmatprep.subr.bf16.mxu0 %v1096_v9  ;;  %v1744_v9 = vld [vmem:[#allocation16 + $0x158] sm:$0xff] }
 0x35d   :  { %2286 = vmatpush1.bf16.msra.mxu1 %v1917_v34  ;;  %v1971_v34 = vunpack.c.h.s8.bf16 %v1737_v28 }
 0x35e   :  { %1495 = vmatpush1.bf16.msra.mxu0 %v1095_v35  ;;  %2287 = vmatprep.subr.bf16.mxu1 %v1924_v36  ;;  %v1167_v35 = vunpack.c.h.s8.bf16 %v919_v27  ;;  %v1978_v36 = vunpack.c.l.s8.bf16 %v1744_v9 }
 0x35f   :  { %v3802_v49 = vpop.f32.mrb[12].mxu0  ;;  %1496 = vmatprep.subr.bf16.mxu0 %v1104_v37  ;;  %v1743_v37 = vld [vmem:[#allocation16 + $0x150] sm:$0xff] }
 0x360   :  { %v3804_v30 = vpop.f32.mrb[13].mxu0 }
 0x361   :  { %v3806_v52 = vpop.f32.mrb[14].mxu0  ;;  %2288 = vmatpush1.bf16.msra.mxu1 %v1923_v44  ;;  %v1977_v44 = vunpack.c.l.s8.bf16 %v1743_v37 }
 0x362   :  { %1497 = vmatpush1.bf16.msra.mxu0 %v1103_v45  ;;  %v3808_v54 = vpop.f32.mrb[15].mxu0  ;;  %2289 = vmatprep.subr.bf16.mxu1 %v1930_v47  ;;  %v1175_v45 = vunpack.c.l.s8.bf16 %v927_v42  ;;  %v1984_v47 = vunpack.c.h.s8.bf16 %v1744_v9 }
 0x363   :  { %1498 = vmatprep.subr.bf16.mxu0 %v1112_v50  ;;  %v3810_v50 = vld [vmem:[#allocation16 + $0x188] sm:$0xff] }
 0x365   :  { %2290 = vmatpush1.bf16.msra.mxu1 %v1929_v53  ;;  %v1983_v53 = vunpack.c.h.s8.bf16 %v1743_v37 }
 0x366   :  { %1499 = vmatpush1.bf16.msra.mxu0 %v1111_v55  ;;  %2291 = vmatprep.subr.bf16.mxu1 %v1936_v56  ;;  %v1183_v55 = vunpack.c.h.s8.bf16 %v927_v42  ;;  %v1990_v56 = vunpack.c.l.s8.bf16 %v3810_v50  ;;  %v1944_v42 = vunpack.c.l.s8.bf16 %v1728_v33 }
 0x367   :  { %1500 = vmatprep.subr.bf16.mxu0 %v1120_v57  ;;  %v1896_v57 = vunpack.c.l.s8.bf16 %v1704_v51 }
 0x369   :  { %2292 = vmatpush1.bf16.msra.mxu1 %v1935_v59  ;;  %v1902_v59 = vunpack.c.h.s8.bf16 %v1704_v51 }
 0x36a   :  { %1501 = vmatpush1.bf16.msra.mxu0 %v1119_v60  ;;  %2293 = vmatprep.subr.bf16.mxu1 %v1942_v61  ;;  %v1710_v60 = vld [vmem:[#allocation16 + $0x48] sm:$0xff]  ;;  %v1901_v61 = vunpack.c.h.s8.bf16 %v1703_v58 }
 0x36b   :  { %1502 = vmatprep.subr.bf16.mxu0 %v1128_v63  ;;  %v1908_v62 = vunpack.c.l.s8.bf16 %v1710_v60  ;;  %v1709_v63 = vld [vmem:[#allocation16 + $0x40] sm:$0xff] }
 0x36c   :  { %v1907_v0 = vunpack.c.l.s8.bf16 %v1709_v63 }
 0x36d   :  { %2294 = vmatpush1.bf16.msra.mxu1 %v1941_v1  ;;  %v1914_v1 = vunpack.c.h.s8.bf16 %v1710_v60  ;;  %v1734_v60 = vld [vmem:[#allocation16 + $0x108] sm:$0xff] }
 0x36e   :  { %1503 = vmatpush1.bf16.msra.mxu0 %v1127_v2  ;;  %2295 = vmatprep.subr.bf16.mxu1 %v1948_v3  ;;  %v1716_v2 = vld [vmem:[#allocation16 + $0x78] sm:$0xff]  ;;  %v1913_v3 = vunpack.c.h.s8.bf16 %v1709_v63 }
 0x36f   :  { %1504 = vmatprep.subr.bf16.mxu0 %v1136_v4  ;;  %v1920_v4 = vunpack.c.l.s8.bf16 %v1716_v2  ;;  %v1756_v63 = vld [vmem:[#allocation16 + $0x1b8] sm:$0xff] }
 0x371   :  { %2296 = vmatpush1.bf16.msra.mxu1 %v1947_v10  ;;  %v3814_v10 = vld [vmem:[#allocation13] sm:$0xff] }
 0x372   :  { %1505 = vmatpush1.bf16.msra.mxu0 %v1135_v12  ;;  %2297 = vmatprep.subr.bf16.mxu1 %v1954_v13  ;;  %v1722_v12 = vld [vmem:[#allocation16 + $0xa8] sm:$0xff]  ;;  %v3816_v13 = vld [vmem:[#allocation14] sm:$0xff]  ;;  %v1534_v14 = vrot.slane %v3814_v10, %v3744_v41 }
 0x373   :  { %1506 = vmatprep.subr.bf16.mxu0 %v1144_v15  ;;  %v1925_v15 = vunpack.c.h.s8.bf16 %v1715_v5  ;;  %v1592_v21 = vrot.slane %v3816_v13, %v3744_v41 }
 0x375   :  { %2298 = vmatpush1.bf16.msra.mxu1 %v1953_v17  ;;  %v1538_v17 = vrot.slane %v3814_v10, %v3747_v43 }
 0x376   :  { %1507 = vmatpush1.bf16.msra.mxu0 %v1143_v18  ;;  %2299 = vmatprep.subr.bf16.mxu1 %v1960_v19  ;;  %v1932_v18 = vunpack.c.l.s8.bf16 %v1722_v12  ;;  %v1721_v19 = vld [vmem:[#allocation16 + $0xa0] sm:$0xff] }
 0x377   :  { %1508 = vmatprep.subr.bf16.mxu0 %v1152_v20  ;;  %v1937_v37 = vunpack.c.h.s8.bf16 %v1721_v19 }
 0x379   :  { %2300 = vmatpush1.bf16.msra.mxu1 %v1959_v23 }
 0x37a   :  { %1509 = vmatpush1.bf16.msra.mxu0 %v1151_v24  ;;  %2301 = vmatprep.subr.bf16.mxu1 %v1966_v25  ;;  %v1596_v24 = vrot.slane %v3816_v13, %v3747_v43 }
 0x37b   :  { %1510 = vmatprep.subr.bf16.mxu0 %v1160_v26 }
 0x37d   :  { %2302 = vmatpush1.bf16.msra.mxu1 %v1965_v29  ;;  %v1931_v29 = vunpack.c.l.s8.bf16 %v1721_v19 }
 0x37e   :  { %1511 = vmatpush1.bf16.msra.mxu0 %v1159_v46  ;;  %2303 = vmatprep.subr.bf16.mxu1 %v1972_v31 }
 0x37f   :  { %1512 = vmatprep.subr.bf16.mxu0 %v1168_v32 }
 0x381   :  { %2304 = vmatpush1.bf16.msra.mxu1 %v1971_v34 }
 0x382   :  { %1513 = vmatpush1.bf16.msra.mxu0 %v1167_v35  ;;  %2305 = vmatprep.subr.bf16.mxu1 %v1978_v36 }
 0x383   :  { %1514 = vmatprep.subr.bf16.mxu0 %v1176_v38 }
 0x385   :  { %2306 = vmatpush1.bf16.msra.mxu1 %v1977_v44  ;;  %v1727_v44 = vld [vmem:[#allocation16 + $0xd0] sm:$0xff] }
 0x386   :  { %1515 = vmatpush1.bf16.msra.mxu0 %v1175_v45  ;;  %2307 = vmatprep.subr.bf16.mxu1 %v1984_v47  ;;  %v1749_v47 = vld [vmem:[#allocation16 + $0x180] sm:$0xff] }
 0x387   :  { %1516 = vmatprep.subr.bf16.mxu0 %v1184_v48  ;;  %v1943_v48 = vunpack.c.l.s8.bf16 %v1727_v44 }
 0x389   :  { %2308 = vmatpush1.bf16.msra.mxu1 %v1983_v53 }
 0x38a   :  { %1517 = vmatpush1.bf16.msra.mxu0 %v1183_v55  ;;  %2320 = vmatprep.subr.bf16.mxu1 %v1990_v56 }
 0x38b   :  { %2449 = vmatprep.subr.bf16.mxu0 %v1896_v57 }
 0x38d   :  { %1519 = vmatmul.mubr.bf16.vlgmr.msra.gmra.mrb[20].mxu0 %v3785_v39  ;;  %v1926_v39 = vunpack.c.h.s8.bf16 %v1716_v2  ;;  %v1995_v2 = vunpack.c.h.s8.bf16 %v1749_v47 }
 0x38e   :  { %2450 = vmatpush1.bf16.msra.mxu0 %v1895_v7  ;;  %v1989_v7 = vunpack.c.l.s8.bf16 %v1749_v47 }
 0x38f   :  { %2451 = vmatprep.subr.bf16.mxu0 %v1902_v59  ;;  %v1950_v59 = vunpack.c.h.s8.bf16 %v1728_v33 }
 0x392   :  { %2452 = vmatpush1.bf16.msra.mxu0 %v1901_v61  ;;  %v1996_v61 = vunpack.c.h.s8.bf16 %v3810_v50  ;;  %v1962_v50 = vunpack.c.h.s8.bf16 %v1734_v60 }
 0x393   :  { %2453 = vmatprep.subr.bf16.mxu0 %v1908_v62  ;;  %v1949_v62 = vunpack.c.h.s8.bf16 %v1727_v44  ;;  %v1773_v44 = vld [vmem:[#allocation16 + $0x240] sm:$0xff] }
 0x394   :  { %v2037_v47 = vunpack.c.l.s8.bf16 %v1773_v44 }
 0x396   :  { %2454 = vmatpush1.bf16.msra.mxu0 %v1907_v0  ;;  %v1956_v0 = vunpack.c.l.s8.bf16 %v1734_v60 }
 0x397   :  { %2455 = vmatprep.subr.bf16.mxu0 %v1914_v1  ;;  %v1733_v1 = vld [vmem:[#allocation16 + $0x100] sm:$0xff] }
 0x398   :  { %v1955_v5 = vunpack.c.l.s8.bf16 %v1733_v1 }
 0x39a   :  { %2456 = vmatpush1.bf16.msra.mxu0 %v1913_v3  ;;  %v2002_v3 = vunpack.c.l.s8.bf16 %v1756_v63 }
 0x39b   :  { %2457 = vmatprep.subr.bf16.mxu0 %v1920_v4  ;;  %v1755_v4 = vld [vmem:[#allocation16 + $0x1b0] sm:$0xff] }
 0x39e   :  { %2458 = vmatpush1.bf16.msra.mxu0 %v1919_v6  ;;  %v2001_v6 = vunpack.c.l.s8.bf16 %v1755_v4 }
 0x39f   :  { %v1262_v16 = vpop.f32.mrb[0].mxu1  ;;  %2459 = vmatprep.subr.bf16.mxu0 %v1926_v39  ;;  %v1740_v39 = vld [vmem:[#allocation16 + $0x138] sm:$0xff] }
 0x3a0   :  { %v1263_v20 = vadd.f32 %v1262_v16, %v3802_v49  ;;  %v1264_v22 = vpop.f32.mrb[1].mxu1  ;;  %v1938_v49 = vunpack.c.h.s8.bf16 %v1722_v12  ;;  %v2008_v12 = vunpack.c.h.s8.bf16 %v1756_v63  ;;  %v1968_v16 = vunpack.c.l.s8.bf16 %v1740_v39 }
 0x3a1   :  { %v1265_v23 = vadd.f32 %v1264_v22, %v3804_v30  ;;  %v1266_v25 = vpop.f32.mrb[2].mxu1  ;;  %v1974_v22 = vunpack.c.h.s8.bf16 %v1740_v39 }
 0x3a2   :  { %v1571_v28 = vmul.f32 %v1534_v14, %v1263_v20  ;;  %v1267_v26 = vadd.f32 %v1266_v25, %v3806_v52  ;;  %2460 = vmatpush1.bf16.msra.mxu0 %v1925_v15  ;;  %v1268_v27 = vpop.f32.mrb[3].mxu1  ;;  %v1762_v15 = vld [vmem:[#allocation16 + $0x1e8] sm:$0xff]  ;;  %v1761_v20 = vld [vmem:[#allocation16 + $0x1e0] sm:$0xff] }
 0x3a3   :  { %v1572_v46 = vmul.f32 %v1538_v17, %v1265_v23  ;;  %v1269_v31 = vadd.f32 %v1268_v27, %v3808_v54  ;;  %2461 = vmatprep.subr.bf16.mxu0 %v1932_v18  ;;  %v2007_v18 = vunpack.c.h.s8.bf16 %v1755_v4  ;;  %v2014_v19 = vunpack.c.l.s8.bf16 %v1762_v15  ;;  %v1786_v4 = vld [vmem:[#allocation16 + $0x2a8] sm:$0xff] }
 0x3a4   :  { %v1629_v32 = vadd.f32 %v1592_v21, %v1571_v28  ;;  %v1579_v9 = vmul.f32 %v1534_v14, %v1267_v26  ;;  %v1961_v14 = vunpack.c.h.s8.bf16 %v1733_v1  ;;  %v2013_v23 = vunpack.c.l.s8.bf16 %v1761_v20  ;;  %v1768_v26 = vld [vmem:[#allocation16 + $0x218] sm:$0xff] }
 0x3a5   :  { %v1630_v34 = vadd.f32 %v1596_v24, %v1572_v46  ;;  %v1580_v30 = vmul.f32 %v1538_v17, %v1269_v31  ;;  %v1739_v17 = vld [vmem:[#allocation16 + $0x130] sm:$0xff]  ;;  %v2020_v25 = vunpack.c.h.s8.bf16 %v1762_v15  ;;  %v2019_v46 = vunpack.c.h.s8.bf16 %v1761_v20  ;;  %v1764_v1 = vld [vmem:[#allocation16 + $0x1f8] sm:$0xff] }
 0x3a6   :  { %v1661_v35 = vmul.f32 0.2, %v1629_v32  ;;  %v1637_v36 = vadd.f32 %v1592_v21, %v1579_v9  ;;  %2462 = vmatpush1.bf16.msra.mxu0 %v1931_v29  ;;  %vm1645_vm13 = vcmp.gt.f32.partialorder %v1629_v32, 0.0  ;;  %v1967_v21 = vunpack.c.l.s8.bf16 %v1739_v17  ;;  %v1745_v29 = vld [vmem:[#allocation16 + $0x160] sm:$0xff] }
 0x3a7   :  { %v1662_v38 = vmul.f32 0.2, %v1630_v34  ;;  %v1638_v52 = vadd.f32 %v1596_v24, %v1580_v30  ;;  %2463 = vmatprep.subr.bf16.mxu0 %v1938_v49  ;;  %vm1646_vm15 = vcmp.gt.f32.partialorder %v1630_v34, 0.0  ;;  %v1746_v24 = vld [vmem:[#allocation16 + $0x168] sm:$0xff]  ;;  %v1973_v28 = vunpack.c.h.s8.bf16 %v1739_v17  ;;  %v1767_v49 = vld [vmem:[#allocation16 + $0x210] sm:$0xff] }
 0x3a8   :  { %vm1653_vm14 = vcmp.gt.f32.partialorder %v1637_v36, 0.0  ;;  %v1669_v45 = vmul.f32 0.2, %v1637_v36  ;;  %v1677_v51 = vsel %vm1645_vm13, %v1629_v32, %v1661_v35  ;;  %v1980_v27 = vunpack.c.l.s8.bf16 %v1746_v24 }
 0x3a9   :  { %v1670_v54 = vmul.f32 0.2, %v1638_v52  ;;  %vm1654_vm0 = vcmp.gt.f32.partialorder %v1638_v52, 0.0  ;;  %v1678_v55 = vsel %vm1646_vm15, %v1630_v34, %v1662_v38  ;;  %v2026_v31 = vunpack.c.l.s8.bf16 %v1768_v26  ;;  %v1752_v34 = vld [vmem:[#allocation16 + $0x198] sm:$0xff]  ;;  %v1751_v38 = vld [vmem:[#allocation16 + $0x190] sm:$0xff] }
 0x3aa   :  { %2464 = vmatpush1.bf16.msra.mxu0 %v1937_v37  ;;  %v1685_v53 = vsel %vm1653_vm14, %v1637_v36, %v1669_v45  ;;  %v1979_v32 = vunpack.c.l.s8.bf16 %v1745_v29  ;;  %v1986_v9 = vunpack.c.h.s8.bf16 %v1746_v24  ;;  %v2025_v33 = vunpack.c.l.s8.bf16 %v1767_v49  ;;  %v1774_v36 = vld [vmem:[#allocation16 + $0x248] sm:$0xff] }
 0x3ab   :  { %2465 = vmatprep.subr.bf16.mxu0 %v1944_v42  ;;  %v1686_v56 = vsel %vm1654_vm0, %v1638_v52, %v1670_v54  ;;  %v3830_v57 = vpack.c.bf16 %v1685_v53, %v1677_v51  ;;  %v2032_v30 = vunpack.c.h.s8.bf16 %v1768_v26  ;;  %v1985_v35 = vunpack.c.h.s8.bf16 %v1745_v29  ;;  %v1769_v26 = vld [vmem:[#allocation16 + $0x220] sm:$0xff] }
 0x3ac   :  { %v3832_v58 = vpack.c.bf16 %v1686_v56, %v1678_v55  ;;  %v1992_v37 = vunpack.c.l.s8.bf16 %v1752_v34  ;;  %v2031_v52 = vunpack.c.h.s8.bf16 %v1767_v49  ;;  %v2038_v42 = vunpack.c.l.s8.bf16 %v1774_v36  ;;  %v1780_v55 = vld [vmem:[#allocation16 + $0x278] sm:$0xff] }
 0x3ad   :  { %v1991_v45 = vunpack.c.l.s8.bf16 %v1751_v38  ;;  %v1998_v54 = vunpack.c.h.s8.bf16 %v1752_v34  ;;  %v2044_v51 = vunpack.c.h.s8.bf16 %v1774_v36  ;;  %v1997_v53 = vunpack.c.h.s8.bf16 %v1751_v38 }
 0x3ae   :  { %2466 = vmatpush1.bf16.msra.mxu0 %v1943_v48  ;;  %2309 = vmatprep.mubr.bf16.mxu1 %v3832_v58  ;;  %v1758_v48 = vld [vmem:[#allocation16 + $0x1c8] sm:$0xff]  ;;  %v2050_v60 = vunpack.c.l.s8.bf16 %v1780_v55  ;;  %v2062_v39 = vunpack.c.l.s8.bf16 %v1786_v4  ;;  %v2022_v15 = vunpack.c.h.s8.bf16 %v1764_v1  ;;  %v2068_v20 = vunpack.c.h.s8.bf16 %v1786_v4 }
 0x3af   :  { %2481 = vmatprep.mubr.bf16.mxu0 %v3832_v58  ;;  %2310 = vmatmul.mubr.bf16.vlgmr.msra.gmra.mrb[8].mxu1 %v3830_v57  ;;  %v2004_v56 = vunpack.c.l.s8.bf16 %v1758_v48  ;;  %v2010_v63 = vunpack.c.h.s8.bf16 %v1758_v48 }
 0x3b0   :  { %2321 = vmatpush1.bf16.msra.mxu1 %v1989_v7  ;;  %2467 = vmatprep.subr.bf16.mxu0 %v1950_v59  ;;  %v1757_v7 = vld [vmem:[#allocation16 + $0x1c0] sm:$0xff]  ;;  %v2043_v59 = vunpack.c.h.s8.bf16 %v1773_v44 }
 0x3b1   :  { %2322 = vmatprep.subr.bf16.mxu1 %v1996_v61  ;;  %v1779_v61 = vld [vmem:[#allocation16 + $0x270] sm:$0xff] }
 0x3b2   :  { %2468 = vmatpush1.bf16.msra.mxu0 %v1949_v62  ;;  %v2003_v62 = vunpack.c.l.s8.bf16 %v1757_v7 }
 0x3b3   :  { %2469 = vmatprep.subr.bf16.mxu0 %v1956_v0  ;;  %v2049_v0 = vunpack.c.l.s8.bf16 %v1779_v61 }
 0x3b4   :  { %2323 = vmatpush1.bf16.msra.mxu1 %v1995_v2  ;;  %v2056_v2 = vunpack.c.h.s8.bf16 %v1780_v55  ;;  %v1798_v55 = vld [vmem:[#allocation16 + $0x308] sm:$0xff] }
 0x3b5   :  { %2324 = vmatprep.subr.bf16.mxu1 %v2002_v3  ;;  %v2009_v3 = vunpack.c.h.s8.bf16 %v1757_v7 }
 0x3b6   :  { %2470 = vmatpush1.bf16.msra.mxu0 %v1955_v5  ;;  %v2016_v5 = vunpack.c.l.s8.bf16 %v1764_v1 }
 0x3b7   :  { %2471 = vmatprep.subr.bf16.mxu0 %v1962_v50  ;;  %v1763_v50 = vld [vmem:[#allocation16 + $0x1f0] sm:$0xff] }
 0x3b8   :  { %2325 = vmatpush1.bf16.msra.mxu1 %v2001_v6  ;;  %v2055_v6 = vunpack.c.h.s8.bf16 %v1779_v61 }
 0x3b9   :  { %2326 = vmatprep.subr.bf16.mxu1 %v2008_v12  ;;  %v1785_v12 = vld [vmem:[#allocation16 + $0x2a0] sm:$0xff] }
 0x3ba   :  { %2472 = vmatpush1.bf16.msra.mxu0 %v1961_v14  ;;  %v2015_v14 = vunpack.c.l.s8.bf16 %v1763_v50  ;;  %v2061_v17 = vunpack.c.l.s8.bf16 %v1785_v12 }
 0x3bb   :  { %2473 = vmatprep.subr.bf16.mxu0 %v1968_v16  ;;  %v1542_v16 = vrot.slane %v3814_v10, %v3776_v8 }
 0x3bc   :  { %2327 = vmatpush1.bf16.msra.mxu1 %v2007_v18  ;;  %v1770_v18 = vld [vmem:[#allocation16 + $0x228] sm:$0xff] }
 0x3bd   :  { %2328 = vmatprep.subr.bf16.mxu1 %v2014_v19  ;;  %v1546_v19 = vrot.slane %v3814_v10, %v3779_v11  ;;  %v2034_v38 = vunpack.c.h.s8.bf16 %v1770_v18 }
 0x3be   :  { %2474 = vmatpush1.bf16.msra.mxu0 %v1967_v21  ;;  %v1600_v21 = vrot.slane %v3816_v13, %v3776_v8 }
 0x3bf   :  { %2475 = vmatprep.subr.bf16.mxu0 %v1974_v22  ;;  %v2021_v22 = vunpack.c.h.s8.bf16 %v1763_v50 }
 0x3c0   :  { %2329 = vmatpush1.bf16.msra.mxu1 %v2013_v23  ;;  %v1792_v23 = vld [vmem:[#allocation16 + $0x2d8] sm:$0xff] }
 0x3c1   :  { %2330 = vmatprep.subr.bf16.mxu1 %v2020_v25  ;;  %v1604_v25 = vrot.slane %v3816_v13, %v3779_v11  ;;  %v2080_v48 = vunpack.c.h.s8.bf16 %v1792_v23 }
 0x3c2   :  { %2476 = vmatpush1.bf16.msra.mxu0 %v1973_v28  ;;  %v2028_v28 = vunpack.c.l.s8.bf16 %v1770_v18 }
 0x3c3   :  { %2477 = vmatprep.subr.bf16.mxu0 %v1980_v27 }
 0x3c4   :  { %2331 = vmatpush1.bf16.msra.mxu1 %v2019_v46  ;;  %v2067_v46 = vunpack.c.h.s8.bf16 %v1785_v12  ;;  %v2092_v12 = vunpack.c.h.s8.bf16 %v1798_v55 }
 0x3c5   :  { %2332 = vmatprep.subr.bf16.mxu1 %v2026_v31 }
 0x3c6   :  { %2478 = vmatpush1.bf16.msra.mxu0 %v1979_v32  ;;  %v2074_v32 = vunpack.c.l.s8.bf16 %v1792_v23 }
 0x3c7   :  { %2479 = vmatprep.subr.bf16.mxu0 %v1986_v9  ;;  %v1791_v9 = vld [vmem:[#allocation16 + $0x2d0] sm:$0xff] }
 0x3c8   :  { %2333 = vmatpush1.bf16.msra.mxu1 %v2025_v33  ;;  %v2073_v44 = vunpack.c.l.s8.bf16 %v1791_v9 }
 0x3c9   :  { %2334 = vmatprep.subr.bf16.mxu1 %v2032_v30 }
 0x3ca   :  { %2480 = vmatpush1.bf16.msra.mxu0 %v1985_v35  ;;  %v2027_v35 = vunpack.c.l.s8.bf16 %v1769_v26 }
 0x3cb   :  { %2492 = vmatprep.subr.bf16.mxu0 %v1992_v37 }
 0x3cc   :  { %2335 = vmatpush1.bf16.msra.mxu1 %v2031_v52 }
 0x3cd   :  { %2482 = vmatmul.mubr.bf16.vlgmr.msra.gmra.mrb[24].mxu0 %v3830_v57  ;;  %2336 = vmatprep.subr.bf16.mxu1 %v2038_v42 }
 0x3ce   :  { %2493 = vmatpush1.bf16.msra.mxu0 %v1991_v45  ;;  %v1776_v45 = vld [vmem:[#allocation16 + $0x258] sm:$0xff] }
 0x3cf   :  { %2494 = vmatprep.subr.bf16.mxu0 %v1998_v54  ;;  %v2040_v7 = vunpack.c.l.s8.bf16 %v1776_v45  ;;  %v2046_v50 = vunpack.c.h.s8.bf16 %v1776_v45 }
 0x3d0   :  { %2337 = vmatpush1.bf16.msra.mxu1 %v2037_v47 }
 0x3d1   :  { %2338 = vmatprep.subr.bf16.mxu1 %v2044_v51 }
 0x3d2   :  { %2495 = vmatpush1.bf16.msra.mxu0 %v1997_v53  ;;  %v2033_v53 = vunpack.c.h.s8.bf16 %v1769_v26  ;;  %v1810_v26 = vld [vmem:[#allocation16 + $0x368] sm:$0xff] }
 0x3d3   :  { %2496 = vmatprep.subr.bf16.mxu0 %v2004_v56 }
 0x3d4   :  { %2339 = vmatpush1.bf16.msra.mxu1 %v2043_v59  ;;  %v1775_v59 = vld [vmem:[#allocation16 + $0x250] sm:$0xff] }
 0x3d5   :  { %2340 = vmatprep.subr.bf16.mxu1 %v2050_v60 }
 0x3d6   :  { %2497 = vmatpush1.bf16.msra.mxu0 %v2003_v62  ;;  %v2079_v62 = vunpack.c.h.s8.bf16 %v1791_v9 }
 0x3d7   :  { %2498 = vmatprep.subr.bf16.mxu0 %v2010_v63 }
 0x3d8   :  { %2341 = vmatpush1.bf16.msra.mxu1 %v2049_v0 }
 0x3d9   :  { %2342 = vmatprep.subr.bf16.mxu1 %v2056_v2  ;;  %v2086_v2 = vunpack.c.l.s8.bf16 %v1798_v55  ;;  %v1822_v55 = vld [vmem:[#allocation16 + $0x3c8] sm:$0xff] }
 0x3da   :  { %2499 = vmatpush1.bf16.msra.mxu0 %v2009_v3  ;;  %v1797_v3 = vld [vmem:[#allocation16 + $0x300] sm:$0xff] }
 0x3db   :  { %2500 = vmatprep.subr.bf16.mxu0 %v2016_v5  ;;  %v2039_v5 = vunpack.c.l.s8.bf16 %v1775_v59  ;;  %v2091_v18 = vunpack.c.h.s8.bf16 %v1797_v3 }
 0x3dc   :  { %2343 = vmatpush1.bf16.msra.mxu1 %v2055_v6  ;;  %v2085_v6 = vunpack.c.l.s8.bf16 %v1797_v3  ;;  %v2140_v3 = vunpack.c.h.s8.bf16 %v1822_v55 }
 0x3dd   :  { %2344 = vmatprep.subr.bf16.mxu1 %v2062_v39  ;;  %v1782_v39 = vld [vmem:[#allocation16 + $0x288] sm:$0xff] }
 0x3de   :  { %2501 = vmatpush1.bf16.msra.mxu0 %v2015_v14  ;;  %v2045_v14 = vunpack.c.h.s8.bf16 %v1775_v59 }
 0x3df   :  { %v1348_v24 = vpop.f32.mrb[16].mxu0  ;;  %2502 = vmatprep.subr.bf16.mxu0 %v2022_v15  ;;  %v1804_v15 = vld [vmem:[#allocation16 + $0x338] sm:$0xff] }
 0x3e0   :  { %v1573_v27 = vmul.f32 %v1542_v16, %v1348_v24  ;;  %2345 = vmatpush1.bf16.msra.mxu1 %v2061_v17  ;;  %v1350_v29 = vpop.f32.mrb[17].mxu0  ;;  %v1781_v17 = vld [vmem:[#allocation16 + $0x280] sm:$0xff]  ;;  %v1788_v24 = vld [vmem:[#allocation16 + $0x2b8] sm:$0xff] }
 0x3e1   :  { %v1574_v31 = vmul.f32 %v1546_v19, %v1350_v29  ;;  %v1352_v49 = vpop.f32.mrb[18].mxu0  ;;  %2346 = vmatprep.subr.bf16.mxu1 %v2068_v20  ;;  %v1803_v20 = vld [vmem:[#allocation16 + $0x330] sm:$0xff]  ;;  %v2070_v9 = vunpack.c.h.s8.bf16 %v1788_v24 }
 0x3e2   :  { %v1631_v33 = vadd.f32 %v1600_v21, %v1573_v27  ;;  %v1581_v34 = vmul.f32 %v1542_v16, %v1352_v49  ;;  %2503 = vmatpush1.bf16.msra.mxu0 %v2021_v22  ;;  %v1354_v30 = vpop.f32.mrb[19].mxu0  ;;  %v2052_v16 = vunpack.c.l.s8.bf16 %v1782_v39  ;;  %v2058_v22 = vunpack.c.h.s8.bf16 %v1782_v39  ;;  %v1787_v29 = vld [vmem:[#allocation16 + $0x2b0] sm:$0xff]  ;;  %v1809_v49 = vld [vmem:[#allocation16 + $0x360] sm:$0xff] }
 0x3e3   :  { %v1632_v36 = vadd.f32 %v1604_v25, %v1574_v31  ;;  %v1582_v37 = vmul.f32 %v1546_v19, %v1354_v30  ;;  %2504 = vmatprep.subr.bf16.mxu0 %v2028_v28  ;;  %v2098_v19 = vunpack.c.l.s8.bf16 %v1804_v15  ;;  %v2097_v23 = vunpack.c.l.s8.bf16 %v1803_v20  ;;  %v1805_v39 = vld [vmem:[#allocation16 + $0x340] sm:$0xff] }
 0x3e4   :  { %v1663_v52 = vmul.f32 0.2, %v1631_v33  ;;  %v1639_v42 = vadd.f32 %v1600_v21, %v1581_v34  ;;  %2347 = vmatpush1.bf16.msra.mxu1 %v2067_v46  ;;  %vm1647_vm1 = vcmp.gt.f32.partialorder %v1631_v33, 0.0  ;;  %v2051_v21 = vunpack.c.l.s8.bf16 %v1781_v17  ;;  %v1794_v34 = vld [vmem:[#allocation16 + $0x2e8] sm:$0xff] }
 0x3e5   :  { %v1664_v54 = vmul.f32 0.2, %v1632_v36  ;;  %v1640_v47 = vadd.f32 %v1604_v25, %v1582_v37  ;;  %2348 = vmatprep.subr.bf16.mxu1 %v2074_v32  ;;  %vm1648_vm2 = vcmp.gt.f32.partialorder %v1632_v36, 0.0  ;;  %v2104_v25 = vunpack.c.h.s8.bf16 %v1804_v15  ;;  %v1827_v15 = vld [vmem:[#allocation16 + $0x3f0] sm:$0xff] }
 0x3e6   :  { %vm1655_vm3 = vcmp.gt.f32.partialorder %v1639_v42, 0.0  ;;  %v1671_v51 = vmul.f32 0.2, %v1639_v42  ;;  %2505 = vmatpush1.bf16.msra.mxu0 %v2027_v35  ;;  %v1679_v60 = vsel %vm1647_vm1, %v1631_v33, %v1663_v52  ;;  %v2057_v28 = vunpack.c.h.s8.bf16 %v1781_v17 }
 0x3e7   :  { %vm1656_vm4 = vcmp.gt.f32.partialorder %v1640_v47, 0.0  ;;  %v1672_v56 = vmul.f32 0.2, %v1640_v47  ;;  %2506 = vmatprep.subr.bf16.mxu0 %v2034_v38  ;;  %v1680_v63 = vsel %vm1648_vm2, %v1632_v36, %v1664_v54  ;;  %v2064_v27 = vunpack.c.l.s8.bf16 %v1788_v24  ;;  %v1816_v36 = vld [vmem:[#allocation16 + $0x398] sm:$0xff]  ;;  %v1793_v38 = vld [vmem:[#allocation16 + $0x2e0] sm:$0xff]  ;;  %v1811_v24 = vld [vmem:[#allocation16 + $0x370] sm:$0xff] }
 0x3e8   :  { %v1687_v61 = vsel %vm1655_vm3, %v1639_v42, %v1671_v51  ;;  %2349 = vmatpush1.bf16.msra.mxu1 %v2073_v44  ;;  %v2103_v46 = vunpack.c.h.s8.bf16 %v1803_v20  ;;  %v2110_v31 = vunpack.c.l.s8.bf16 %v1810_v26  ;;  %v2063_v32 = vunpack.c.l.s8.bf16 %v1787_v29  ;;  %v1815_v44 = vld [vmem:[#allocation16 + $0x390] sm:$0xff] }
 0x3e9   :  { %2350 = vmatprep.subr.bf16.mxu1 %v2080_v48  ;;  %v1688_v0 = vsel %vm1656_vm4, %v1640_v47, %v1672_v56  ;;  %v3849_v1 = vpack.c.bf16 %v1687_v61, %v1679_v60  ;;  %v2109_v33 = vunpack.c.l.s8.bf16 %v1809_v49  ;;  %v2116_v30 = vunpack.c.h.s8.bf16 %v1810_v26  ;;  %v1800_v48 = vld [vmem:[#allocation16 + $0x318] sm:$0xff]  ;;  %v1821_v61 = vld [vmem:[#allocation16 + $0x3c0] sm:$0xff] }
 0x3ea   :  { %2507 = vmatpush1.bf16.msra.mxu0 %v2033_v53  ;;  %v3851_v4 = vpack.c.bf16 %v1688_v0, %v1680_v63  ;;  %v2069_v35 = vunpack.c.h.s8.bf16 %v1787_v29  ;;  %v2076_v37 = vunpack.c.l.s8.bf16 %v1794_v34  ;;  %v2115_v52 = vunpack.c.h.s8.bf16 %v1809_v49  ;;  %v1833_v29 = vld [vmem:[#allocation16 + $0x420] sm:$0xff] }
 0x3eb   :  { %2508 = vmatprep.subr.bf16.mxu0 %v2040_v7  ;;  %v2122_v42 = vunpack.c.l.s8.bf16 %v1816_v36  ;;  %v2075_v45 = vunpack.c.l.s8.bf16 %v1793_v38  ;;  %v2082_v54 = vunpack.c.h.s8.bf16 %v1794_v34  ;;  %v2121_v47 = vunpack.c.l.s8.bf16 %v1815_v44  ;;  %v1799_v7 = vld [vmem:[#allocation16 + $0x310] sm:$0xff] }
 0x3ec   :  { %2351 = vmatpush1.bf16.msra.mxu1 %v2079_v62  ;;  %2352 = vmatprep.mubr.bf16.mxu1 %v3851_v4  ;;  %v2128_v51 = vunpack.c.h.s8.bf16 %v1816_v36  ;;  %v2081_v53 = vunpack.c.h.s8.bf16 %v1793_v38  ;;  %v2088_v56 = vunpack.c.l.s8.bf16 %v1800_v48  ;;  %v2127_v59 = vunpack.c.h.s8.bf16 %v1815_v44  ;;  %v1840_v36 = vld [vmem:[#allocation16 + $0x458] sm:$0xff] }
 0x3ed   :  { %2524 = vmatprep.mubr.bf16.mxu0 %v3851_v4  ;;  %2363 = vmatprep.subr.bf16.mxu1 %v2086_v2  ;;  %v2134_v60 = vunpack.c.l.s8.bf16 %v1822_v55  ;;  %v2087_v62 = vunpack.c.l.s8.bf16 %v1799_v7  ;;  %v2094_v63 = vunpack.c.h.s8.bf16 %v1800_v48  ;;  %v2133_v0 = vunpack.c.l.s8.bf16 %v1821_v61  ;;  %v1806_v2 = vld [vmem:[#allocation16 + $0x348] sm:$0xff] }
 0x3ee   :  { %2509 = vmatpush1.bf16.msra.mxu0 %v2039_v5  ;;  %v2093_v5 = vunpack.c.h.s8.bf16 %v1799_v7  ;;  %v2106_v17 = vunpack.c.h.s8.bf16 %v1806_v2  ;;  %v2170_v48 = vunpack.c.l.s8.bf16 %v1840_v36 }
 0x3ef   :  { %2353 = vmatmul.mubr.bf16.vlgmr.msra.gmra.mrb[8].mxu1 %v3849_v1  ;;  %2510 = vmatprep.subr.bf16.mxu0 %v2046_v50  ;;  %v1828_v50 = vld [vmem:[#allocation16 + $0x3f8] sm:$0xff] }
 0x3f0   :  { %2364 = vmatpush1.bf16.msra.mxu1 %v2085_v6  ;;  %v2100_v6 = vunpack.c.l.s8.bf16 %v1806_v2  ;;  %v2152_v20 = vunpack.c.h.s8.bf16 %v1828_v50 }
 0x3f1   :  { %2365 = vmatprep.subr.bf16.mxu1 %v2092_v12  ;;  %v2139_v12 = vunpack.c.h.s8.bf16 %v1821_v61 }
 0x3f2   :  { %2511 = vmatpush1.bf16.msra.mxu0 %v2045_v14  ;;  %v2146_v14 = vunpack.c.l.s8.bf16 %v1828_v50 }
 0x3f3   :  { %2512 = vmatprep.subr.bf16.mxu0 %v2052_v16  ;;  %v2099_v16 = vunpack.c.l.s8.bf16 %v1805_v39 }
 0x3f4   :  { %2366 = vmatpush1.bf16.msra.mxu1 %v2091_v18  ;;  %v2145_v18 = vunpack.c.l.s8.bf16 %v1827_v15 }
 0x3f5   :  { %2367 = vmatprep.subr.bf16.mxu1 %v2098_v19  ;;  %v1812_v19 = vld [vmem:[#allocation16 + $0x378] sm:$0xff] }
 0x3f6   :  { %2513 = vmatpush1.bf16.msra.mxu0 %v2051_v21  ;;  %v2105_v21 = vunpack.c.h.s8.bf16 %v1805_v39  ;;  %v1846_v39 = vld [vmem:[#allocation16 + $0x488] sm:$0xff] }
 0x3f7   :  { %2514 = vmatprep.subr.bf16.mxu0 %v2058_v22  ;;  %v1834_v22 = vld [vmem:[#allocation16 + $0x428] sm:$0xff] }
 0x3f8   :  { %2368 = vmatpush1.bf16.msra.mxu1 %v2097_v23  ;;  %v2112_v23 = vunpack.c.l.s8.bf16 %v1812_v19  ;;  %v2158_v26 = vunpack.c.l.s8.bf16 %v1834_v22  ;;  %v2164_v34 = vunpack.c.h.s8.bf16 %v1834_v22  ;;  %v2182_v22 = vunpack.c.l.s8.bf16 %v1846_v39 }
 0x3f9   :  { %2369 = vmatprep.subr.bf16.mxu1 %v2104_v25  ;;  %v2151_v25 = vunpack.c.h.s8.bf16 %v1827_v15  ;;  %v1823_v15 = vld [vmem:[#allocation16 + $0x3d0] sm:$0xff] }
 0x3fa   :  { %2515 = vmatpush1.bf16.msra.mxu0 %v2057_v28  ;;  %v3858_v28 = vsub.s32 4, %v3741_v40 }
 0x3fb   :  { %2516 = vmatprep.subr.bf16.mxu0 %v2064_v27  ;;  %v3861_v27 = vsub.s32 5, %v3741_v40 }
 0x3fc   :  { %2370 = vmatpush1.bf16.msra.mxu1 %v2103_v46  ;;  %v2111_v46 = vunpack.c.l.s8.bf16 %v1811_v24  ;;  %v1550_v49 = vrot.slane %v3814_v10, %v3858_v28 }
 0x3fd   :  { %2371 = vmatprep.subr.bf16.mxu1 %v2110_v31  ;;  %v2118_v31 = vunpack.c.h.s8.bf16 %v1812_v19  ;;  %v1612_v38 = vrot.slane %v3816_v13, %v3861_v27 }
 0x3fe   :  { %2517 = vmatpush1.bf16.msra.mxu0 %v2063_v32  ;;  %v2157_v32 = vunpack.c.l.s8.bf16 %v1833_v29 }
 0x3ff   :  { %2518 = vmatprep.subr.bf16.mxu0 %v2070_v9  ;;  %v1818_v9 = vld [vmem:[#allocation16 + $0x3a8] sm:$0xff] }
 0x400   :  { %2372 = vmatpush1.bf16.msra.mxu1 %v2109_v33  ;;  %v1554_v33 = vrot.slane %v3814_v10, %v3861_v27 }
 0x401   :  { %2373 = vmatprep.subr.bf16.mxu1 %v2116_v30  ;;  %v1608_v30 = vrot.slane %v3816_v13, %v3858_v28  ;;  %v2130_v13 = vunpack.c.h.s8.bf16 %v1818_v9 }
 0x402   :  { %2519 = vmatpush1.bf16.msra.mxu0 %v2069_v35  ;;  %v2117_v35 = vunpack.c.h.s8.bf16 %v1811_v24 }
 0x403   :  { %2520 = vmatprep.subr.bf16.mxu0 %v2076_v37 }
 0x404   :  { %2374 = vmatpush1.bf16.msra.mxu1 %v2115_v52  ;;  %v2124_v52 = vunpack.c.l.s8.bf16 %v1818_v9 }
 0x405   :  { %2375 = vmatprep.subr.bf16.mxu1 %v2122_v42  ;;  %v1817_v42 = vld [vmem:[#allocation16 + $0x3a0] sm:$0xff] }
 0x406   :  { %2521 = vmatpush1.bf16.msra.mxu0 %v2075_v45  ;;  %v2123_v7 = vunpack.c.l.s8.bf16 %v1817_v42 }
 0x407   :  { %2522 = vmatprep.subr.bf16.mxu0 %v2082_v54  ;;  %v2163_v54 = vunpack.c.h.s8.bf16 %v1833_v29 }
 0x408   :  { %2376 = vmatpush1.bf16.msra.mxu1 %v2121_v47 }
 0x409   :  { %2377 = vmatprep.subr.bf16.mxu1 %v2128_v51  ;;  %v1839_v51 = vld [vmem:[#allocation16 + $0x450] sm:$0xff] }
 0x40a   :  { %2523 = vmatpush1.bf16.msra.mxu0 %v2081_v53 }
 0x40b   :  { %2535 = vmatprep.subr.bf16.mxu0 %v2088_v56 }
 0x40c   :  { %2378 = vmatpush1.bf16.msra.mxu1 %v2127_v59 }
 0x40d   :  { %2525 = vmatmul.mubr.bf16.vlgmr.msra.gmra.mrb[24].mxu0 %v3849_v1  ;;  %2379 = vmatprep.subr.bf16.mxu1 %v2134_v60 }
 0x40e   :  { %2536 = vmatpush1.bf16.msra.mxu0 %v2087_v62 }
 0x40f   :  { %2537 = vmatprep.subr.bf16.mxu0 %v2094_v63  ;;  %v2169_v63 = vunpack.c.l.s8.bf16 %v1839_v51 }
 0x410   :  { %2380 = vmatpush1.bf16.msra.mxu1 %v2133_v0  ;;  %v1824_v0 = vld [vmem:[#allocation16 + $0x3d8] sm:$0xff] }
 0x411   :  { %2381 = vmatprep.subr.bf16.mxu1 %v2140_v3 }
 0x412   :  { %2538 = vmatpush1.bf16.msra.mxu0 %v2093_v5  ;;  %v2176_v5 = vunpack.c.h.s8.bf16 %v1840_v36 }
 0x413   :  { %2539 = vmatprep.subr.bf16.mxu0 %v2100_v6  ;;  %v2129_v6 = vunpack.c.h.s8.bf16 %v1817_v42 }
 0x414   :  { %2382 = vmatpush1.bf16.msra.mxu1 %v2139_v12 }
 0x415   :  { %2383 = vmatprep.subr.bf16.mxu1 %v2146_v14  ;;  %v2136_v14 = vunpack.c.l.s8.bf16 %v1824_v0 }
 0x416   :  { %2540 = vmatpush1.bf16.msra.mxu0 %v2099_v16 }
 0x417   :  { %2541 = vmatprep.subr.bf16.mxu0 %v2106_v17 }
 0x418   :  { %2384 = vmatpush1.bf16.msra.mxu1 %v2145_v18  ;;  %v2175_v18 = vunpack.c.h.s8.bf16 %v1839_v51  ;;  %v1857_v51 = vld [vmem:[#allocation16 + $0x4e0] sm:$0xff] }
 0x419   :  { %2385 = vmatprep.subr.bf16.mxu1 %v2152_v20 }
 0x41a   :  { %2542 = vmatpush1.bf16.msra.mxu0 %v2105_v21 }
 0x41b   :  { %2543 = vmatprep.subr.bf16.mxu0 %v2112_v23  ;;  %v1845_v23 = vld [vmem:[#allocation16 + $0x480] sm:$0xff] }
 0x41c   :  { %2386 = vmatpush1.bf16.msra.mxu1 %v2151_v25  ;;  %v2135_v25 = vunpack.c.l.s8.bf16 %v1823_v15  ;;  %v2181_v29 = vunpack.c.l.s8.bf16 %v1845_v23 }
 0x41d   :  { %2387 = vmatprep.subr.bf16.mxu1 %v2158_v26  ;;  %v2142_v26 = vunpack.c.h.s8.bf16 %v1824_v0 }
 0x41e   :  { %2544 = vmatpush1.bf16.msra.mxu0 %v2111_v46  ;;  %v1830_v46 = vld [vmem:[#allocation16 + $0x408] sm:$0xff] }
 0x41f   :  { %v1434_v37 = vpop.f32.mrb[4].mxu1  ;;  %2545 = vmatprep.subr.bf16.mxu0 %v2118_v31  ;;  %v2188_v31 = vunpack.c.h.s8.bf16 %v1846_v39  ;;  %v2148_v9 = vunpack.c.l.s8.bf16 %v1830_v46 }
 0x420   :  { %v1575_v44 = vmul.f32 %v1550_v49, %v1434_v37  ;;  %v1436_v45 = vpop.f32.mrb[5].mxu1  ;;  %2388 = vmatpush1.bf16.msra.mxu1 %v2157_v32  ;;  %v1852_v32 = vld [vmem:[#allocation16 + $0x4b8] sm:$0xff]  ;;  %v2154_v37 = vunpack.c.h.s8.bf16 %v1830_v46 }
 0x421   :  { %v1576_v47 = vmul.f32 %v1554_v33, %v1436_v45  ;;  %v1438_v10 = vpop.f32.mrb[6].mxu1  ;;  %2389 = vmatprep.subr.bf16.mxu1 %v2164_v34  ;;  %v2187_v34 = vunpack.c.h.s8.bf16 %v1845_v23  ;;  %v2200_v42 = vunpack.c.h.s8.bf16 %v1852_v32  ;;  %v1858_v45 = vld [vmem:[#allocation16 + $0x4e8] sm:$0xff]  ;;  %v1876_v46 = vld [vmem:[#allocation16 + $0x578] sm:$0xff] }
 0x422   :  { %v1633_v53 = vadd.f32 %v1608_v30, %v1575_v44  ;;  %v1583_v55 = vmul.f32 %v1550_v49, %v1438_v10  ;;  %v1440_v56 = vpop.f32.mrb[7].mxu1  ;;  %2546 = vmatpush1.bf16.msra.mxu0 %v2117_v35  ;;  %v2141_v49 = vunpack.c.h.s8.bf16 %v1823_v15  ;;  %v1851_v35 = vld [vmem:[#allocation16 + $0x4b0] sm:$0xff] }
 0x423   :  { %v1634_v59 = vadd.f32 %v1612_v38, %v1576_v47  ;;  %v1584_v60 = vmul.f32 %v1554_v33, %v1440_v56  ;;  %2547 = vmatprep.subr.bf16.mxu0 %v2124_v52  ;;  %v1829_v33 = vld [vmem:[#allocation16 + $0x400] sm:$0xff]  ;;  %v1836_v52 = vld [vmem:[#allocation16 + $0x438] sm:$0xff]  ;;  %v1835_v47 = vld [vmem:[#allocation16 + $0x430] sm:$0xff]  ;;  %v2199_v10 = vunpack.c.h.s8.bf16 %v1851_v35  ;;  %v2205_v56 = vunpack.c.l.s8.bf16 %v1857_v51 }
 0x424   :  { %v1665_v61 = vmul.f32 0.2, %v1633_v53  ;;  %v1641_v62 = vadd.f32 %v1608_v30, %v1583_v55  ;;  %2390 = vmatpush1.bf16.msra.mxu1 %v2163_v54  ;;  %vm1649_vm5 = vcmp.gt.f32.partialorder %v1633_v53, 0.0  ;;  %v2194_v30 = vunpack.c.l.s8.bf16 %v1852_v32 }
 0x425   :  { %v1666_v2 = vmul.f32 0.2, %v1634_v59  ;;  %v1642_v3 = vadd.f32 %v1612_v38, %v1584_v60  ;;  %2391 = vmatprep.subr.bf16.mxu1 %v2170_v48  ;;  %vm1650_vm6 = vcmp.gt.f32.partialorder %v1634_v59, 0.0  ;;  %v2147_v36 = vunpack.c.l.s8.bf16 %v1829_v33 }
 0x426   :  { %vm1657_vm7 = vcmp.gt.f32.partialorder %v1641_v62, 0.0  ;;  %v1673_v50 = vmul.f32 0.2, %v1641_v62  ;;  %2548 = vmatpush1.bf16.msra.mxu0 %v2123_v7  ;;  %v1681_v16 = vsel %vm1649_vm5, %v1633_v53, %v1665_v61  ;;  %v2193_v38 = vunpack.c.l.s8.bf16 %v1851_v35  ;;  %v1842_v7 = vld [vmem:[#allocation16 + $0x468] sm:$0xff] }
 0x427   :  { %vm1658_vm8 = vcmp.gt.f32.partialorder %v1642_v3, 0.0  ;;  %v1674_v12 = vmul.f32 0.2, %v1642_v3  ;;  %2549 = vmatprep.subr.bf16.mxu0 %v2130_v13  ;;  %v1682_v19 = vsel %vm1650_vm6, %v1634_v59, %v1666_v2  ;;  %v2153_v44 = vunpack.c.h.s8.bf16 %v1829_v33  ;;  %v1864_v13 = vld [vmem:[#allocation16 + $0x518] sm:$0xff]  ;;  %v1863_v2 = vld [vmem:[#allocation16 + $0x510] sm:$0xff] }
 0x428   :  { %v1689_v17 = vsel %vm1657_vm7, %v1641_v62, %v1673_v50  ;;  %2392 = vmatpush1.bf16.msra.mxu1 %v2169_v63  ;;  %v2160_v54 = vunpack.c.l.s8.bf16 %v1836_v52  ;;  %v2206_v48 = vunpack.c.l.s8.bf16 %v1858_v45  ;;  %v2159_v53 = vunpack.c.l.s8.bf16 %v1835_v47  ;;  %v1841_v62 = vld [vmem:[#allocation16 + $0x460] sm:$0xff]  ;;  %v1875_v33 = vld [vmem:[#allocation16 + $0x570] sm:$0xff] }
 0x429   :  { %2393 = vmatprep.subr.bf16.mxu1 %v2176_v5  ;;  %v1690_v20 = vsel %vm1658_vm8, %v1642_v3, %v1674_v12  ;;  %v3873_v21 = vpack.c.bf16 %v1689_v17, %v1681_v16  ;;  %v2166_v55 = vunpack.c.h.s8.bf16 %v1836_v52  ;;  %v2212_v59 = vunpack.c.h.s8.bf16 %v1858_v45  ;;  %v1847_v16 = vld [vmem:[#allocation16 + $0x490] sm:$0xff]  ;;  %v1882_v52 = vld [vmem:[#allocation16 + $0x5a8] sm:$0xff] }
 0x42a   :  { %2550 = vmatpush1.bf16.msra.mxu0 %v2129_v6  ;;  %v3875_v24 = vpack.c.bf16 %v1690_v20, %v1682_v19  ;;  %v2165_v60 = vunpack.c.h.s8.bf16 %v1835_v47  ;;  %v2172_v61 = vunpack.c.l.s8.bf16 %v1842_v7  ;;  %v2211_v63 = vunpack.c.h.s8.bf16 %v1857_v51  ;;  %v1848_v6 = vld [vmem:[#allocation16 + $0x498] sm:$0xff]  ;;  %v1869_v19 = vld [vmem:[#allocation16 + $0x540] sm:$0xff] }
 0x42b   :  { %2551 = vmatprep.subr.bf16.mxu0 %v2136_v14  ;;  %v2218_v0 = vunpack.c.l.s8.bf16 %v1864_v13  ;;  %v2171_v3 = vunpack.c.l.s8.bf16 %v1841_v62  ;;  %v2178_v5 = vunpack.c.h.s8.bf16 %v1842_v7  ;;  %v2217_v50 = vunpack.c.l.s8.bf16 %v1863_v2  ;;  %v1870_v14 = vld [vmem:[#allocation16 + $0x548] sm:$0xff]  ;;  %v3242_v7 = vld [vmem:[#allocation13] sm:$0xff] }
 0x42c   :  { %2394 = vmatpush1.bf16.msra.mxu1 %v2175_v18  ;;  %2395 = vmatprep.mubr.bf16.mxu1 %v3875_v24  ;;  %v2224_v39 = vunpack.c.h.s8.bf16 %v1864_v13  ;;  %v2177_v12 = vunpack.c.h.s8.bf16 %v1841_v62  ;;  %v2184_v15 = vunpack.c.l.s8.bf16 %v1848_v6  ;;  %v2223_v17 = vunpack.c.h.s8.bf16 %v1863_v2  ;;  %v1888_v62 = vld [vmem:[#allocation16 + $0x5d8] sm:$0xff] }
 0x42d   :  { %2567 = vmatprep.mubr.bf16.mxu0 %v3875_v24  ;;  %2406 = vmatprep.subr.bf16.mxu1 %v2182_v22  ;;  %v2230_v18 = vunpack.c.l.s8.bf16 %v1870_v14  ;;  %v2183_v20 = vunpack.c.l.s8.bf16 %v1847_v16  ;;  %v2190_v22 = vunpack.c.h.s8.bf16 %v1848_v6  ;;  %v2229_v23 = vunpack.c.l.s8.bf16 %v1869_v19 }
 0x42e   :  { %2552 = vmatpush1.bf16.msra.mxu0 %v2135_v25  ;;  %v1854_v25 = vld [vmem:[#allocation16 + $0x4c8] sm:$0xff]  ;;  %v2235_v32 = vunpack.c.h.s8.bf16 %v1869_v19  ;;  %v2241_v35 = vunpack.c.l.s8.bf16 %v1875_v33  ;;  %v2247_v45 = vunpack.c.h.s8.bf16 %v1875_v33  ;;  %v1557_v47 = vsub.s32 6, %v3741_v40 }
 0x42f   :  { %2396 = vmatmul.mubr.bf16.vlgmr.msra.gmra.mrb[8].mxu1 %v3873_v21  ;;  %2553 = vmatprep.subr.bf16.mxu0 %v2142_v26  ;;  %v2236_v26 = vunpack.c.h.s8.bf16 %v1870_v14  ;;  %v1561_v51 = vsub.s32 7, %v3741_v40  ;;  %v1887_v14 = vld [vmem:[#allocation16 + $0x5d0] sm:$0xff] }
 0x430   :  { %2407 = vmatpush1.bf16.msra.mxu1 %v2181_v29  ;;  %v2189_v29 = vunpack.c.h.s8.bf16 %v1847_v16 }
 0x431   :  { %2408 = vmatprep.subr.bf16.mxu1 %v2188_v31  ;;  %v2196_v31 = vunpack.c.l.s8.bf16 %v1854_v25  ;;  %v1562_v13 = vrot.slane %v3242_v7, %v1561_v51 }
 0x432   :  { %2554 = vmatpush1.bf16.msra.mxu0 %v2141_v49  ;;  %v1853_v49 = vld [vmem:[#allocation16 + $0x4c0] sm:$0xff] }
 0x433   :  { %2555 = vmatprep.subr.bf16.mxu0 %v2148_v9  ;;  %v2242_v9 = vunpack.c.l.s8.bf16 %v1876_v46 }
 0x434   :  { %2409 = vmatpush1.bf16.msra.mxu1 %v2187_v34  ;;  %v2195_v34 = vunpack.c.l.s8.bf16 %v1853_v49 }
 0x435   :  { %2410 = vmatprep.subr.bf16.mxu1 %v2194_v30  ;;  %v2202_v30 = vunpack.c.h.s8.bf16 %v1854_v25 }
 0x436   :  { %2556 = vmatpush1.bf16.msra.mxu0 %v2147_v36  ;;  %v1860_v36 = vld [vmem:[#allocation16 + $0x4f8] sm:$0xff] }
 0x437   :  { %2557 = vmatprep.subr.bf16.mxu0 %v2154_v37  ;;  %v2248_v37 = vunpack.c.h.s8.bf16 %v1876_v46 }
 0x438   :  { %2411 = vmatpush1.bf16.msra.mxu1 %v2193_v38  ;;  %v2201_v38 = vunpack.c.h.s8.bf16 %v1853_v49  ;;  %v2272_v49 = vunpack.c.h.s8.bf16 %v1888_v62 }
 0x439   :  { %2412 = vmatprep.subr.bf16.mxu1 %v2200_v42  ;;  %v2208_v42 = vunpack.c.l.s8.bf16 %v1860_v36 }
 0x43a   :  { %2558 = vmatpush1.bf16.msra.mxu0 %v2153_v44  ;;  %v1859_v44 = vld [vmem:[#allocation16 + $0x4f0] sm:$0xff] }
 0x43b   :  { %2559 = vmatprep.subr.bf16.mxu0 %v2160_v54  ;;  %v2254_v54 = vunpack.c.l.s8.bf16 %v1882_v52 }
 0x43c   :  { %2413 = vmatpush1.bf16.msra.mxu1 %v2199_v10  ;;  %v1881_v10 = vld [vmem:[#allocation16 + $0x5a0] sm:$0xff] }
 0x43d   :  { %2414 = vmatprep.subr.bf16.mxu1 %v2206_v48  ;;  %v2207_v48 = vunpack.c.l.s8.bf16 %v1859_v44 }
 0x43e   :  { %2560 = vmatpush1.bf16.msra.mxu0 %v2159_v53  ;;  %v2214_v53 = vunpack.c.h.s8.bf16 %v1860_v36  ;;  %v1706_v36 = vld [vmem:[#allocation16 + $0x28] sm:$0xff] }
 0x43f   :  { %2561 = vmatprep.subr.bf16.mxu0 %v2166_v55  ;;  %v2253_v55 = vunpack.c.l.s8.bf16 %v1881_v10 }
 0x440   :  { %2415 = vmatpush1.bf16.msra.mxu1 %v2205_v56  ;;  %v1866_v56 = vld [vmem:[#allocation16 + $0x528] sm:$0xff] }
 0x441   :  { %2416 = vmatprep.subr.bf16.mxu1 %v2212_v59  ;;  %v1558_v59 = vrot.slane %v3242_v7, %v1557_v47  ;;  %v2220_v2 = vunpack.c.l.s8.bf16 %v1866_v56  ;;  %v1904_v7 = vunpack.c.h.s8.bf16 %v1706_v36 }
 0x442   :  { %2562 = vmatpush1.bf16.msra.mxu0 %v2165_v60  ;;  %v2260_v60 = vunpack.c.h.s8.bf16 %v1882_v52 }
 0x443   :  { %2563 = vmatprep.subr.bf16.mxu0 %v2172_v61  ;;  %v2213_v61 = vunpack.c.h.s8.bf16 %v1859_v44 }
 0x444   :  { %2417 = vmatpush1.bf16.msra.mxu1 %v2211_v63  ;;  %v3243_v63 = vld [vmem:[#allocation14] sm:$0xff] }
 0x445   :  { %2418 = vmatprep.subr.bf16.mxu1 %v2218_v0  ;;  %v1616_v0 = vrot.slane %v3243_v63, %v1557_v47  ;;  %v1620_v40 = vrot.slane %v3243_v63, %v1561_v51 }
 0x446   :  { %2564 = vmatpush1.bf16.msra.mxu0 %v2171_v3  ;;  %v1865_v3 = vld [vmem:[#allocation16 + $0x520] sm:$0xff] }
 0x447   :  { %2565 = vmatprep.subr.bf16.mxu0 %v2178_v5  ;;  %v2225_v33 = vunpack.c.h.s8.bf16 %v1865_v3 }
 0x448   :  { %2419 = vmatpush1.bf16.msra.mxu1 %v2217_v50  ;;  %v2259_v50 = vunpack.c.h.s8.bf16 %v1881_v10 }
 0x449   :  { %2420 = vmatprep.subr.bf16.mxu1 %v2224_v39 }
 0x44a   :  { %2566 = vmatpush1.bf16.msra.mxu0 %v2177_v12  ;;  %v2266_v12 = vunpack.c.l.s8.bf16 %v1888_v62 }
 0x44b   :  { %2578 = vmatprep.subr.bf16.mxu0 %v2184_v15 }
 0x44c   :  { %2421 = vmatpush1.bf16.msra.mxu1 %v2223_v17  ;;  %v2219_v17 = vunpack.c.l.s8.bf16 %v1865_v3 }
 0x44d   :  { %2568 = vmatmul.mubr.bf16.vlgmr.msra.gmra.mrb[24].mxu0 %v3873_v21  ;;  %2422 = vmatprep.subr.bf16.mxu1 %v2230_v18 }
 0x44e   :  { %2579 = vmatpush1.bf16.msra.mxu0 %v2183_v20 }
 0x44f   :  { %2580 = vmatprep.subr.bf16.mxu0 %v2190_v22  ;;  %v2226_v22 = vunpack.c.h.s8.bf16 %v1866_v56  ;;  %v1878_v56 = vld [vmem:[#allocation16 + $0x588] sm:$0xff] }
 0x450   :  { %2423 = vmatpush1.bf16.msra.mxu1 %v2229_v23  ;;  %v2250_v3 = vunpack.c.h.s8.bf16 %v1878_v56 }
 0x451   :  { %2424 = vmatprep.subr.bf16.mxu1 %v2236_v26  ;;  %v2265_v26 = vunpack.c.l.s8.bf16 %v1887_v14 }
 0x452   :  { %2581 = vmatpush1.bf16.msra.mxu0 %v2189_v29  ;;  %v1872_v29 = vld [vmem:[#allocation16 + $0x558] sm:$0xff] }
 0x453   :  { %2582 = vmatprep.subr.bf16.mxu0 %v2196_v31 }
 0x454   :  { %2425 = vmatpush1.bf16.msra.mxu1 %v2235_v32 }
 0x455   :  { %2426 = vmatprep.subr.bf16.mxu1 %v2242_v9 }
 0x456   :  { %2583 = vmatpush1.bf16.msra.mxu0 %v2195_v34  ;;  %v1871_v34 = vld [vmem:[#allocation16 + $0x550] sm:$0xff] }
 0x457   :  { %2584 = vmatprep.subr.bf16.mxu0 %v2202_v30  ;;  %v2231_v44 = vunpack.c.l.s8.bf16 %v1871_v34 }
 0x458   :  { %2427 = vmatpush1.bf16.msra.mxu1 %v2241_v35  ;;  %v2232_v35 = vunpack.c.l.s8.bf16 %v1872_v29 }
 0x459   :  { %2428 = vmatprep.subr.bf16.mxu1 %v2248_v37 }
 0x45a   :  { %2585 = vmatpush1.bf16.msra.mxu0 %v2201_v38  ;;  %v2271_v38 = vunpack.c.h.s8.bf16 %v1887_v14  ;;  %v1883_v14 = vld [vmem:[#allocation16 + $0x5b0] sm:$0xff] }
 0x45b   :  { %2586 = vmatprep.subr.bf16.mxu0 %v2208_v42 }
 0x45c   :  { %2429 = vmatpush1.bf16.msra.mxu1 %v2247_v45  ;;  %v1705_v45 = vld [vmem:[#allocation16 + $0x20] sm:$0xff] }
 0x45d   :  { %2430 = vmatprep.subr.bf16.mxu1 %v2254_v54  ;;  %v1903_v62 = vunpack.c.h.s8.bf16 %v1705_v45 }
 0x45e   :  { %2587 = vmatpush1.bf16.msra.mxu0 %v2207_v48  ;;  %v1898_v48 = vunpack.c.l.s8.bf16 %v1706_v36 }
 0x45f   :  { %2588 = vmatprep.subr.bf16.mxu0 %v2214_v53  ;;  %v2238_v53 = vunpack.c.h.s8.bf16 %v1872_v29  ;;  %v1889_v29 = vld [vmem:[#allocation16 + $0x5e0] sm:$0xff] }
 0x460   :  { %v1520_v5 = vpop.f32.mrb[20].mxu0  ;;  %2431 = vmatpush1.bf16.msra.mxu1 %v2253_v55  ;;  %v1897_v55 = vunpack.c.l.s8.bf16 %v1705_v45 }
 0x461   :  { %v1577_v6 = vmul.f32 %v1558_v59, %v1520_v5  ;;  %v1522_v39 = vpop.f32.mrb[21].mxu0  ;;  %2432 = vmatprep.subr.bf16.mxu1 %v2260_v60  ;;  %v1712_v60 = vld [vmem:[#allocation16 + $0x58] sm:$0xff] }
 0x462   :  { %v1578_v15 = vmul.f32 %v1562_v13, %v1522_v39  ;;  %v1524_v16 = vpop.f32.mrb[22].mxu0  ;;  %2589 = vmatpush1.bf16.msra.mxu0 %v2213_v61  ;;  %v1877_v61 = vld [vmem:[#allocation16 + $0x580] sm:$0xff]  ;;  %v1910_v63 = vunpack.c.l.s8.bf16 %v1712_v60  ;;  %v1718_v39 = vld [vmem:[#allocation16 + $0x88] sm:$0xff] }
 0x463   :  { %v1635_v18 = vadd.f32 %v1616_v0, %v1577_v6  ;;  %v1585_v19 = vmul.f32 %v1558_v59, %v1524_v16  ;;  %v1526_v20 = vpop.f32.mrb[23].mxu0  ;;  %2590 = vmatprep.subr.bf16.mxu0 %v2220_v2  ;;  %v2237_v59 = vunpack.c.h.s8.bf16 %v1871_v34  ;;  %v2243_v2 = vunpack.c.l.s8.bf16 %v1877_v61  ;;  %v1717_v16 = vld [vmem:[#allocation16 + $0x80] sm:$0xff] }
 0x464   :  { %v1636_v23 = vadd.f32 %v1620_v40, %v1578_v15  ;;  %v1586_v25 = vmul.f32 %v1562_v13, %v1526_v20  ;;  %2433 = vmatpush1.bf16.msra.mxu1 %v2259_v50  ;;  %v2244_v13 = vunpack.c.l.s8.bf16 %v1878_v56  ;;  %v1916_v50 = vunpack.c.h.s8.bf16 %v1712_v60  ;;  %v1890_v20 = vld [vmem:[#allocation16 + $0x5e8] sm:$0xff] }
 0x465   :  { %v1667_v46 = vmul.f32 0.2, %v1635_v18  ;;  %v1643_v31 = vadd.f32 %v1616_v0, %v1585_v19  ;;  %2434 = vmatprep.subr.bf16.mxu1 %v2266_v12  ;;  %vm1651_vm9 = vcmp.gt.f32.partialorder %v1635_v18, 0.0  ;;  %v1711_v0 = vld [vmem:[#allocation16 + $0x50] sm:$0xff]  ;;  %v2249_v6 = vunpack.c.h.s8.bf16 %v1877_v61  ;;  %v1748_v61 = vld [vmem:[#allocation16 + $0x178] sm:$0xff] }
 0x466   :  { %v1668_v32 = vmul.f32 0.2, %v1636_v23  ;;  %v1644_v9 = vadd.f32 %v1620_v40, %v1586_v25  ;;  %2591 = vmatpush1.bf16.msra.mxu0 %v2219_v17  ;;  %vm1652_vm10 = vcmp.gt.f32.partialorder %v1636_v23, 0.0  ;;  %v1909_v5 = vunpack.c.l.s8.bf16 %v1711_v0  ;;  %v1884_v40 = vld [vmem:[#allocation16 + $0x5b8] sm:$0xff] }
 0x467   :  { %vm1659_vm11 = vcmp.gt.f32.partialorder %v1643_v31, 0.0  ;;  %v1675_v30 = vmul.f32 0.2, %v1643_v31  ;;  %2592 = vmatprep.subr.bf16.mxu0 %v2226_v22  ;;  %v1683_v52 = vsel %vm1651_vm9, %v1635_v18, %v1667_v46  ;;  %v2256_v12 = vunpack.c.l.s8.bf16 %v1884_v40  ;;  %v1724_v25 = vld [vmem:[#allocation16 + $0xb8] sm:$0xff] }
 0x468   :  { %vm1660_vm12 = vcmp.gt.f32.partialorder %v1644_v9, 0.0  ;;  %v1676_v37 = vmul.f32 0.2, %v1644_v9  ;;  %2435 = vmatpush1.bf16.msra.mxu1 %v2265_v26  ;;  %v1684_v54 = vsel %vm1652_vm10, %v1636_v23, %v1668_v32  ;;  %v1922_v15 = vunpack.c.l.s8.bf16 %v1718_v39 }
 0x469   :  { %v1691_v42 = vsel %vm1659_vm11, %v1643_v31, %v1675_v30  ;;  %2436 = vmatprep.subr.bf16.mxu1 %v2272_v49  ;;  %v2255_v17 = vunpack.c.l.s8.bf16 %v1883_v14  ;;  %v2262_v18 = vunpack.c.h.s8.bf16 %v1884_v40  ;;  %v1921_v19 = vunpack.c.l.s8.bf16 %v1717_v16  ;;  %v1723_v49 = vld [vmem:[#allocation16 + $0xb0] sm:$0xff] }
 0x46a   :  { %2593 = vmatpush1.bf16.msra.mxu0 %v2225_v33  ;;  %v1692_v47 = vsel %vm1660_vm12, %v1644_v9, %v1676_v37  ;;  %v3885_v10 = vpack.c.bf16 %v1691_v42, %v1683_v52  ;;  %v1928_v22 = vunpack.c.h.s8.bf16 %v1718_v39  ;;  %v2261_v23 = vunpack.c.h.s8.bf16 %v1883_v14  ;;  %v1760_v14 = vld [vmem:[#allocation16 + $0x1d8] sm:$0xff] }
 0x46b   :  { %v3887_v51 = vpack.c.bf16 %v1692_v47, %v1684_v54  ;;  %2594 = vmatprep.subr.bf16.mxu0 %v2232_v35  ;;  %v2268_v26 = vunpack.c.l.s8.bf16 %v1890_v20  ;;  %v1927_v46 = vunpack.c.h.s8.bf16 %v1717_v16  ;;  %v1934_v31 = vunpack.c.l.s8.bf16 %v1724_v25  ;;  %v1730_v35 = vld [vmem:[#allocation16 + $0xe8] sm:$0xff]  ;;  %v1735_v47 = vld [vmem:[#allocation16 + $0x110] sm:$0xff] }
 0x46c   :  { %2437 = vmatpush1.bf16.msra.mxu1 %v2271_v38  ;;  %v2267_v32 = vunpack.c.l.s8.bf16 %v1889_v29  ;;  %v2274_v9 = vunpack.c.h.s8.bf16 %v1890_v20  ;;  %v1933_v33 = vunpack.c.l.s8.bf16 %v1723_v49  ;;  %v1940_v34 = vunpack.c.h.s8.bf16 %v1724_v25  ;;  %v1729_v38 = vld [vmem:[#allocation16 + $0xe0] sm:$0xff]  ;;  %v1759_v16 = vld [vmem:[#allocation16 + $0x1d0] sm:$0xff] }
 0x46d   :  { %2438 = vmatprep.mubr.bf16.mxu1 %v3887_v51  ;;  %2610 = vmatprep.mubr.bf16.mxu0 %v3887_v51  ;;  %v2273_v30 = vunpack.c.h.s8.bf16 %v1889_v29  ;;  %v1939_v36 = vunpack.c.h.s8.bf16 %v1723_v49  ;;  %v1946_v37 = vunpack.c.l.s8.bf16 %v1730_v35  ;;  %v1945_v52 = vunpack.c.l.s8.bf16 %v1729_v38 }
 0x46e   :  { %2595 = vmatpush1.bf16.msra.mxu0 %v2231_v44  ;;  %2621 = vmatprep.subr.bf16.mxu1 %v1898_v48  ;;  %v1952_v42 = vunpack.c.h.s8.bf16 %v1730_v35  ;;  %v1736_v44 = vld [vmem:[#allocation16 + $0x118] sm:$0xff]  ;;  %v1951_v45 = vunpack.c.h.s8.bf16 %v1729_v38  ;;  %v1957_v48 = vunpack.c.l.s8.bf16 %v1735_v47  ;;  %v1963_v56 = vunpack.c.h.s8.bf16 %v1735_v47 }
 0x46f   :  { %2439 = vmatmul.mubr.bf16.vlgmr.msra.gmra.mrb[8].mxu1 %v3885_v10  ;;  %2596 = vmatprep.subr.bf16.mxu0 %v2238_v53  ;;  %v1958_v54 = vunpack.c.l.s8.bf16 %v1736_v44  ;;  %v1964_v53 = vunpack.c.h.s8.bf16 %v1736_v44  ;;  %v2011_v20 = vunpack.c.h.s8.bf16 %v1759_v16 }
 0x470   :  { %2622 = vmatpush1.bf16.msra.mxu1 %v1897_v55  ;;  %2653 = vmatprep.mubr.bf16.mxu1 %v3832_v58  ;;  %v1915_v58 = vunpack.c.h.s8.bf16 %v1711_v0  ;;  %v1742_v55 = vld [vmem:[#allocation16 + $0x148] sm:$0xff]  ;;  %v1747_v0 = vld [vmem:[#allocation16 + $0x170] sm:$0xff] }
 0x471   :  { %2623 = vmatprep.subr.bf16.mxu1 %v1904_v7  ;;  %v1970_v7 = vunpack.c.l.s8.bf16 %v1742_v55  ;;  %v1987_v40 = vunpack.c.h.s8.bf16 %v1747_v0 }
 0x472   :  { %2597 = vmatpush1.bf16.msra.mxu0 %v2237_v59  ;;  %v1741_v59 = vld [vmem:[#allocation16 + $0x140] sm:$0xff] }
 0x473   :  { %2598 = vmatprep.subr.bf16.mxu0 %v2244_v13  ;;  %v1969_v60 = vunpack.c.l.s8.bf16 %v1741_v59  ;;  %v1976_v13 = vunpack.c.h.s8.bf16 %v1742_v55 }
 0x474   :  { %2624 = vmatpush1.bf16.msra.mxu1 %v1903_v62  ;;  %v1975_v62 = vunpack.c.h.s8.bf16 %v1741_v59 }
 0x475   :  { %2625 = vmatprep.subr.bf16.mxu1 %v1910_v63  ;;  %v1982_v63 = vunpack.c.l.s8.bf16 %v1748_v61 }
 0x476   :  { %2599 = vmatpush1.bf16.msra.mxu0 %v2243_v2  ;;  %v1981_v2 = vunpack.c.l.s8.bf16 %v1747_v0 }
 0x477   :  { %2600 = vmatprep.subr.bf16.mxu0 %v2250_v3  ;;  %v1988_v3 = vunpack.c.h.s8.bf16 %v1748_v61 }
 0x478   :  { %2626 = vmatpush1.bf16.msra.mxu1 %v1909_v5  ;;  %v1754_v5 = vld [vmem:[#allocation16 + $0x1a8] sm:$0xff] }
 0x479   :  { %2627 = vmatprep.subr.bf16.mxu1 %v1916_v50  ;;  %v1994_v50 = vunpack.c.l.s8.bf16 %v1754_v5 }
 0x47a   :  { %2601 = vmatpush1.bf16.msra.mxu0 %v2249_v6  ;;  %v1753_v6 = vld [vmem:[#allocation16 + $0x1a0] sm:$0xff] }
 0x47b   :  { %2602 = vmatprep.subr.bf16.mxu0 %v2256_v12  ;;  %v1993_v39 = vunpack.c.l.s8.bf16 %v1753_v6  ;;  %v2000_v12 = vunpack.c.h.s8.bf16 %v1754_v5 }
 0x47c   :  { %2628 = vmatpush1.bf16.msra.mxu1 %v1915_v58  ;;  %v1999_v58 = vunpack.c.h.s8.bf16 %v1753_v6 }
 0x47d   :  { %2629 = vmatprep.subr.bf16.mxu1 %v1922_v15  ;;  %v2006_v15 = vunpack.c.l.s8.bf16 %v1760_v14 }
 0x47e   :  { %2603 = vmatpush1.bf16.msra.mxu0 %v2255_v17  ;;  %v2005_v17 = vunpack.c.l.s8.bf16 %v1759_v16 }
 0x47f   :  { %2604 = vmatprep.subr.bf16.mxu0 %v2262_v18  ;;  %v2012_v18 = vunpack.c.h.s8.bf16 %v1760_v14 }
 0x480   :  { %2630 = vmatpush1.bf16.msra.mxu1 %v1921_v19  ;;  %v1766_v19 = vld [vmem:[#allocation16 + $0x208] sm:$0xff] }
 0x481   :  { %2631 = vmatprep.subr.bf16.mxu1 %v1928_v22  ;;  %v2018_v22 = vunpack.c.l.s8.bf16 %v1766_v19 }
 0x482   :  { %2605 = vmatpush1.bf16.msra.mxu0 %v2261_v23  ;;  %v1765_v23 = vld [vmem:[#allocation16 + $0x200] sm:$0xff] }
 0x483   :  { %2606 = vmatprep.subr.bf16.mxu0 %v2268_v26  ;;  %v2017_v25 = vunpack.c.l.s8.bf16 %v1765_v23  ;;  %v1772_v26 = vld [vmem:[#allocation16 + $0x238] sm:$0xff] }
 0x484   :  { %2632 = vmatpush1.bf16.msra.mxu1 %v1927_v46  ;;  %v2030_v29 = vunpack.c.l.s8.bf16 %v1772_v26  ;;  %v1771_v46 = vld [vmem:[#allocation16 + $0x230] sm:$0xff]  ;;  %v2036_v49 = vunpack.c.h.s8.bf16 %v1772_v26 }
 0x485   :  { %2633 = vmatprep.subr.bf16.mxu1 %v1934_v31  ;;  %v2029_v31 = vunpack.c.l.s8.bf16 %v1771_v46 }
 0x486   :  { %2607 = vmatpush1.bf16.msra.mxu0 %v2267_v32  ;;  %v1778_v32 = vld [vmem:[#allocation16 + $0x268] sm:$0xff] }
 0x487   :  { %2608 = vmatprep.subr.bf16.mxu0 %v2274_v9  ;;  %v2035_v9 = vunpack.c.h.s8.bf16 %v1771_v46  ;;  %v2048_v35 = vunpack.c.h.s8.bf16 %v1778_v32 }
 0x488   :  { %2634 = vmatpush1.bf16.msra.mxu1 %v1933_v33  ;;  %v2042_v33 = vunpack.c.l.s8.bf16 %v1778_v32 }
 0x489   :  { %2635 = vmatprep.subr.bf16.mxu1 %v1940_v34  ;;  %v1777_v34 = vld [vmem:[#allocation16 + $0x260] sm:$0xff] }
 0x48a   :  { %2609 = vmatpush1.bf16.msra.mxu0 %v2273_v30  ;;  %v2041_v30 = vunpack.c.l.s8.bf16 %v1777_v34 }
 0x48c   :  { %2636 = vmatpush1.bf16.msra.mxu1 %v1939_v36  ;;  %v1784_v36 = vld [vmem:[#allocation16 + $0x298] sm:$0xff] }
 0x48d   :  { %2611 = vmatmul.mubr.bf16.vlgmr.msra.gmra.mrb[24].mxu0 %v3885_v10  ;;  %2637 = vmatprep.subr.bf16.mxu1 %v1946_v37  ;;  %v2047_v37 = vunpack.c.h.s8.bf16 %v1777_v34  ;;  %v2054_v38 = vunpack.c.l.s8.bf16 %v1784_v36  ;;  %v2060_v44 = vunpack.c.h.s8.bf16 %v1784_v36 }
 0x490   :  { %2638 = vmatpush1.bf16.msra.mxu1 %v1945_v52  ;;  %v1783_v52 = vld [vmem:[#allocation16 + $0x290] sm:$0xff] }
 0x491   :  { %2639 = vmatprep.subr.bf16.mxu1 %v1952_v42  ;;  %v2053_v42 = vunpack.c.l.s8.bf16 %v1783_v52 }
 0x494   :  { %2640 = vmatpush1.bf16.msra.mxu1 %v1951_v45  ;;  %v1790_v45 = vld [vmem:[#allocation16 + $0x2c8] sm:$0xff] }
 0x495   :  { %2641 = vmatprep.subr.bf16.mxu1 %v1958_v54  ;;  %v2059_v54 = vunpack.c.h.s8.bf16 %v1783_v52  ;;  %v2066_v47 = vunpack.c.l.s8.bf16 %v1790_v45  ;;  %v2072_v55 = vunpack.c.h.s8.bf16 %v1790_v45 }
 0x498   :  { %2642 = vmatpush1.bf16.msra.mxu1 %v1957_v48  ;;  %v1789_v48 = vld [vmem:[#allocation16 + $0x2c0] sm:$0xff] }
 0x499   :  { %2643 = vmatprep.subr.bf16.mxu1 %v1964_v53  ;;  %v2065_v53 = vunpack.c.l.s8.bf16 %v1789_v48 }
 0x49c   :  { %2644 = vmatpush1.bf16.msra.mxu1 %v1963_v56  ;;  %v1796_v56 = vld [vmem:[#allocation16 + $0x2f8] sm:$0xff] }
 0x49d   :  { %2645 = vmatprep.subr.bf16.mxu1 %v1970_v7  ;;  %v2071_v7 = vunpack.c.h.s8.bf16 %v1789_v48  ;;  %v2078_v59 = vunpack.c.l.s8.bf16 %v1796_v56  ;;  %v2084_v61 = vunpack.c.h.s8.bf16 %v1796_v56 }
 0x4a0   :  { %2646 = vmatpush1.bf16.msra.mxu1 %v1969_v60  ;;  %v1795_v60 = vld [vmem:[#allocation16 + $0x2f0] sm:$0xff] }
 0x4a1   :  { %2647 = vmatprep.subr.bf16.mxu1 %v1976_v13  ;;  %v2077_v13 = vunpack.c.l.s8.bf16 %v1795_v60 }
 0x4a4   :  { %2648 = vmatpush1.bf16.msra.mxu1 %v1975_v62  ;;  %v1802_v62 = vld [vmem:[#allocation16 + $0x328] sm:$0xff] }
 0x4a5   :  { %2649 = vmatprep.subr.bf16.mxu1 %v1982_v63  ;;  %v2083_v63 = vunpack.c.h.s8.bf16 %v1795_v60  ;;  %v2090_v0 = vunpack.c.l.s8.bf16 %v1802_v62  ;;  %v2096_v5 = vunpack.c.h.s8.bf16 %v1802_v62 }
 0x4a8   :  { %2650 = vmatpush1.bf16.msra.mxu1 %v1981_v2  ;;  %v1801_v2 = vld [vmem:[#allocation16 + $0x320] sm:$0xff] }
 0x4a9   :  { %2651 = vmatprep.subr.bf16.mxu1 %v1988_v3  ;;  %v2089_v3 = vunpack.c.l.s8.bf16 %v1801_v2 }
 0x4ac   :  { %2652 = vmatpush1.bf16.msra.mxu1 %v1987_v40  ;;  %v1808_v40 = vld [vmem:[#allocation16 + $0x358] sm:$0xff] }
 0x4ad   :  { %2664 = vmatprep.subr.bf16.mxu1 %v1994_v50  ;;  %v2095_v50 = vunpack.c.h.s8.bf16 %v1801_v2  ;;  %v2102_v6 = vunpack.c.l.s8.bf16 %v1808_v40  ;;  %v2108_v14 = vunpack.c.h.s8.bf16 %v1808_v40 }
 0x4af   :  { %2654 = vmatmul.mubr.bf16.vlgmr.msra.gmra.mrb[12].mxu1 %v3830_v57  ;;  %v2024_v57 = vunpack.c.h.s8.bf16 %v1766_v19  ;;  %v1820_v19 = vld [vmem:[#allocation16 + $0x3b8] sm:$0xff] }
 0x4b0   :  { %2665 = vmatpush1.bf16.msra.mxu1 %v1993_v39  ;;  %2696 = vmatprep.mubr.bf16.mxu1 %v3851_v4  ;;  %v2023_v4 = vunpack.c.h.s8.bf16 %v1765_v23  ;;  %v1807_v39 = vld [vmem:[#allocation16 + $0x350] sm:$0xff] }
 0x4b1   :  { %2666 = vmatprep.subr.bf16.mxu1 %v2000_v12  ;;  %v2101_v12 = vunpack.c.l.s8.bf16 %v1807_v39 }
 0x4b4   :  { %2667 = vmatpush1.bf16.msra.mxu1 %v1999_v58  ;;  %v1814_v58 = vld [vmem:[#allocation16 + $0x388] sm:$0xff] }
 0x4b5   :  { %2668 = vmatprep.subr.bf16.mxu1 %v2006_v15  ;;  %v2107_v15 = vunpack.c.h.s8.bf16 %v1807_v39  ;;  %v2114_v16 = vunpack.c.l.s8.bf16 %v1814_v58 }
 0x4b8   :  { %2669 = vmatpush1.bf16.msra.mxu1 %v2005_v17  ;;  %v1813_v17 = vld [vmem:[#allocation16 + $0x380] sm:$0xff] }
 0x4b9   :  { %2670 = vmatprep.subr.bf16.mxu1 %v2012_v18  ;;  %v2113_v18 = vunpack.c.l.s8.bf16 %v1813_v17 }
 0x4bc   :  { %2671 = vmatpush1.bf16.msra.mxu1 %v2011_v20  ;;  %v2126_v20 = vunpack.c.l.s8.bf16 %v1820_v19 }
 0x4bd   :  { %2672 = vmatprep.subr.bf16.mxu1 %v2018_v22  ;;  %v1819_v22 = vld [vmem:[#allocation16 + $0x3b0] sm:$0xff] }
 0x4be   :  { %v2125_v23 = vunpack.c.l.s8.bf16 %v1819_v22  ;;  %v2131_v26 = vunpack.c.h.s8.bf16 %v1819_v22 }
 0x4c0   :  { %2673 = vmatpush1.bf16.msra.mxu1 %v2017_v25  ;;  %v2132_v25 = vunpack.c.h.s8.bf16 %v1820_v19 }
 0x4c1   :  { %2674 = vmatprep.subr.bf16.mxu1 %v2024_v57  ;;  %v1826_v57 = vld [vmem:[#allocation16 + $0x3e8] sm:$0xff] }
 0x4c4   :  { %2675 = vmatpush1.bf16.msra.mxu1 %v2023_v4  ;;  %v2138_v4 = vunpack.c.l.s8.bf16 %v1826_v57 }
 0x4c5   :  { %2676 = vmatprep.subr.bf16.mxu1 %v2030_v29  ;;  %v1825_v29 = vld [vmem:[#allocation16 + $0x3e0] sm:$0xff] }
 0x4c6   :  { %v2137_v46 = vunpack.c.l.s8.bf16 %v1825_v29  ;;  %v2143_v32 = vunpack.c.h.s8.bf16 %v1825_v29 }
 0x4c8   :  { %2677 = vmatpush1.bf16.msra.mxu1 %v2029_v31  ;;  %v2144_v31 = vunpack.c.h.s8.bf16 %v1826_v57 }
 0x4c9   :  { %2678 = vmatprep.subr.bf16.mxu1 %v2036_v49  ;;  %v1832_v49 = vld [vmem:[#allocation16 + $0x418] sm:$0xff] }
 0x4cc   :  { %2679 = vmatpush1.bf16.msra.mxu1 %v2035_v9  ;;  %v2150_v9 = vunpack.c.l.s8.bf16 %v1832_v49 }
 0x4cd   :  { %2680 = vmatprep.subr.bf16.mxu1 %v2042_v33  ;;  %v1831_v33 = vld [vmem:[#allocation16 + $0x410] sm:$0xff] }
 0x4ce   :  { %v2149_v34 = vunpack.c.l.s8.bf16 %v1831_v33  ;;  %v2155_v36 = vunpack.c.h.s8.bf16 %v1831_v33 }
 0x4d0   :  { %2681 = vmatpush1.bf16.msra.mxu1 %v2041_v30  ;;  %v2156_v30 = vunpack.c.h.s8.bf16 %v1832_v49  ;;  %v1874_v49 = vld [vmem:[#allocation16 + $0x568] sm:$0xff] }
 0x4d1   :  { %2682 = vmatprep.subr.bf16.mxu1 %v2048_v35  ;;  %v1838_v35 = vld [vmem:[#allocation16 + $0x448] sm:$0xff]  ;;  %v2234_v33 = vunpack.c.l.s8.bf16 %v1874_v49 }
 0x4d4   :  { %2683 = vmatpush1.bf16.msra.mxu1 %v2047_v37  ;;  %v2162_v37 = vunpack.c.l.s8.bf16 %v1838_v35 }
 0x4d5   :  { %2684 = vmatprep.subr.bf16.mxu1 %v2054_v38  ;;  %v1837_v38 = vld [vmem:[#allocation16 + $0x440] sm:$0xff] }
 0x4d6   :  { %v2161_v52 = vunpack.c.l.s8.bf16 %v1837_v38  ;;  %v2167_v45 = vunpack.c.h.s8.bf16 %v1837_v38 }
 0x4d8   :  { %2685 = vmatpush1.bf16.msra.mxu1 %v2053_v42  ;;  %v2168_v42 = vunpack.c.h.s8.bf16 %v1838_v35  ;;  %v2240_v35 = vunpack.c.h.s8.bf16 %v1874_v49 }
 0x4d9   :  { %2686 = vmatprep.subr.bf16.mxu1 %v2060_v44  ;;  %v1844_v44 = vld [vmem:[#allocation16 + $0x478] sm:$0xff] }
 0x4dc   :  { %2687 = vmatpush1.bf16.msra.mxu1 %v2059_v54  ;;  %v2174_v54 = vunpack.c.l.s8.bf16 %v1844_v44 }
 0x4dd   :  { %2688 = vmatprep.subr.bf16.mxu1 %v2066_v47  ;;  %v1843_v47 = vld [vmem:[#allocation16 + $0x470] sm:$0xff] }
 0x4de   :  { %v2173_v48 = vunpack.c.l.s8.bf16 %v1843_v47  ;;  %v2179_v56 = vunpack.c.h.s8.bf16 %v1843_v47 }
 0x4e0   :  { %2689 = vmatpush1.bf16.msra.mxu1 %v2065_v53  ;;  %v2180_v53 = vunpack.c.h.s8.bf16 %v1844_v44 }
 0x4e1   :  { %2690 = vmatprep.subr.bf16.mxu1 %v2072_v55  ;;  %v1850_v55 = vld [vmem:[#allocation16 + $0x4a8] sm:$0xff] }
 0x4e4   :  { %2691 = vmatpush1.bf16.msra.mxu1 %v2071_v7  ;;  %v2186_v7 = vunpack.c.l.s8.bf16 %v1850_v55 }
 0x4e5   :  { %2692 = vmatprep.subr.bf16.mxu1 %v2078_v59  ;;  %v1849_v59 = vld [vmem:[#allocation16 + $0x4a0] sm:$0xff] }
 0x4e6   :  { %v2185_v60 = vunpack.c.l.s8.bf16 %v1849_v59  ;;  %v2191_v62 = vunpack.c.h.s8.bf16 %v1849_v59 }
 0x4e8   :  { %2693 = vmatpush1.bf16.msra.mxu1 %v2077_v13  ;;  %v2192_v13 = vunpack.c.h.s8.bf16 %v1850_v55 }
 0x4e9   :  { %2694 = vmatprep.subr.bf16.mxu1 %v2084_v61  ;;  %v1856_v61 = vld [vmem:[#allocation16 + $0x4d8] sm:$0xff] }
 0x4ec   :  { %2695 = vmatpush1.bf16.msra.mxu1 %v2083_v63  ;;  %v2198_v63 = vunpack.c.l.s8.bf16 %v1856_v61 }
 0x4ed   :  { %2707 = vmatprep.subr.bf16.mxu1 %v2090_v0  ;;  %v1855_v0 = vld [vmem:[#allocation16 + $0x4d0] sm:$0xff] }
 0x4ee   :  { %v2197_v2 = vunpack.c.l.s8.bf16 %v1855_v0  ;;  %v2203_v40 = vunpack.c.h.s8.bf16 %v1855_v0  ;;  %v1892_v0 = vld [vmem:[#allocation16 + $0x5f8] sm:$0xff] }
 0x4ef   :  { %2697 = vmatmul.mubr.bf16.vlgmr.msra.gmra.mrb[12].mxu1 %v3849_v1  ;;  %v2120_v1 = vunpack.c.h.s8.bf16 %v1814_v58 }
 0x4f0   :  { %2708 = vmatpush1.bf16.msra.mxu1 %v2089_v3  ;;  %2739 = vmatprep.mubr.bf16.mxu1 %v3875_v24  ;;  %v2119_v24 = vunpack.c.h.s8.bf16 %v1813_v17  ;;  %v2204_v3 = vunpack.c.h.s8.bf16 %v1856_v61 }
 0x4f1   :  { %2709 = vmatprep.subr.bf16.mxu1 %v2096_v5  ;;  %v1862_v5 = vld [vmem:[#allocation16 + $0x508] sm:$0xff] }
 0x4f4   :  { %2710 = vmatpush1.bf16.msra.mxu1 %v2095_v50  ;;  %v2210_v50 = vunpack.c.l.s8.bf16 %v1862_v5 }
 0x4f5   :  { %2711 = vmatprep.subr.bf16.mxu1 %v2102_v6  ;;  %v1861_v6 = vld [vmem:[#allocation16 + $0x500] sm:$0xff] }
 0x4f6   :  { %v2209_v39 = vunpack.c.l.s8.bf16 %v1861_v6 }
 0x4f8   :  { %2712 = vmatpush1.bf16.msra.mxu1 %v2101_v12  ;;  %v3902_v12 = vld [vmem:[#allocation19] sm:$0x3f] }
 0x4f9   :  { %2713 = vmatprep.subr.bf16.mxu1 %v2108_v14  ;;  %v1868_v14 = vld [vmem:[#allocation16 + $0x538] sm:$0xff]  ;;  %v2842_v17 = vrot.slane %v3902_v12, %v3744_v41 }
 0x4fc   :  { %2714 = vmatpush1.bf16.msra.mxu1 %v2107_v15 }
 0x4fd   :  { %2715 = vmatprep.subr.bf16.mxu1 %v2114_v16  ;;  %v2215_v16 = vunpack.c.h.s8.bf16 %v1861_v6 }
 0x500   :  { %2716 = vmatpush1.bf16.msra.mxu1 %v2113_v18  ;;  %v2222_v18 = vunpack.c.l.s8.bf16 %v1868_v14 }
 0x501   :  { %2717 = vmatprep.subr.bf16.mxu1 %v2120_v1  ;;  %v1867_v1 = vld [vmem:[#allocation16 + $0x530] sm:$0xff] }
 0x502   :  { %v2221_v57 = vunpack.c.l.s8.bf16 %v1867_v1 }
 0x504   :  { %2718 = vmatpush1.bf16.msra.mxu1 %v2119_v24  ;;  %v2846_v24 = vrot.slane %v3902_v12, %v3747_v43 }
 0x505   :  { %2719 = vmatprep.subr.bf16.mxu1 %v2126_v20 }
 0x508   :  { %2720 = vmatpush1.bf16.msra.mxu1 %v2125_v23 }
 0x509   :  { %2721 = vmatprep.subr.bf16.mxu1 %v2132_v25 }
 0x50c   :  { %2722 = vmatpush1.bf16.msra.mxu1 %v2131_v26 }
 0x50d   :  { %2723 = vmatprep.subr.bf16.mxu1 %v2138_v4 }
 0x510   :  { %2724 = vmatpush1.bf16.msra.mxu1 %v2137_v46  ;;  %v2228_v46 = vunpack.c.h.s8.bf16 %v1868_v14 }
 0x511   :  { %2725 = vmatprep.subr.bf16.mxu1 %v2144_v31 }
 0x514   :  { %2726 = vmatpush1.bf16.msra.mxu1 %v2143_v32 }
 0x515   :  { %2727 = vmatprep.subr.bf16.mxu1 %v2150_v9 }
 0x518   :  { %2728 = vmatpush1.bf16.msra.mxu1 %v2149_v34  ;;  %v1873_v34 = vld [vmem:[#allocation16 + $0x560] sm:$0xff] }
 0x519   :  { %2729 = vmatprep.subr.bf16.mxu1 %v2156_v30  ;;  %v2233_v30 = vunpack.c.l.s8.bf16 %v1873_v34 }
 0x51c   :  { %2730 = vmatpush1.bf16.msra.mxu1 %v2155_v36  ;;  %v1880_v36 = vld [vmem:[#allocation16 + $0x598] sm:$0xff] }
 0x51d   :  { %2731 = vmatprep.subr.bf16.mxu1 %v2162_v37  ;;  %v2239_v37 = vunpack.c.h.s8.bf16 %v1873_v34  ;;  %v2252_v55 = vunpack.c.h.s8.bf16 %v1880_v36 }
 0x520   :  { %2732 = vmatpush1.bf16.msra.mxu1 %v2161_v52  ;;  %v2246_v52 = vunpack.c.l.s8.bf16 %v1880_v36 }
 0x521   :  { %2733 = vmatprep.subr.bf16.mxu1 %v2168_v42  ;;  %v1879_v42 = vld [vmem:[#allocation16 + $0x590] sm:$0xff] }
 0x524   :  { %2734 = vmatpush1.bf16.msra.mxu1 %v2167_v45 }
 0x525   :  { %2735 = vmatprep.subr.bf16.mxu1 %v2174_v54 }
 0x528   :  { %2736 = vmatpush1.bf16.msra.mxu1 %v2173_v48  ;;  %v2245_v48 = vunpack.c.l.s8.bf16 %v1879_v42 }
 0x529   :  { %2737 = vmatprep.subr.bf16.mxu1 %v2180_v53 }
 0x52c   :  { %2738 = vmatpush1.bf16.msra.mxu1 %v2179_v56  ;;  %v1886_v56 = vld [vmem:[#allocation16 + $0x5c8] sm:$0xff] }
 0x52d   :  { %2750 = vmatprep.subr.bf16.mxu1 %v2186_v7  ;;  %v2251_v7 = vunpack.c.h.s8.bf16 %v1879_v42  ;;  %v2258_v59 = vunpack.c.l.s8.bf16 %v1886_v56 }
 0x52f   :  { %2740 = vmatmul.mubr.bf16.vlgmr.msra.gmra.mrb[12].mxu1 %v3873_v21  ;;  %v3900_v21 = vld [vmem:[#allocation17] sm:$0x3f] }
 0x530   :  { %2751 = vmatpush1.bf16.msra.mxu1 %v2185_v60  ;;  %2782 = vmatprep.mubr.bf16.mxu1 %v3887_v51  ;;  %v2216_v51 = vunpack.c.h.s8.bf16 %v1862_v5  ;;  %v2798_v58 = vrot.slane %v3900_v21, %v3744_v41  ;;  %v2802_v15 = vrot.slane %v3900_v21, %v3747_v43  ;;  %v2227_v43 = vunpack.c.h.s8.bf16 %v1867_v1  ;;  %v1885_v60 = vld [vmem:[#allocation16 + $0x5c0] sm:$0xff] }
 0x531   :  { %2752 = vmatprep.subr.bf16.mxu1 %v2192_v13  ;;  %v2257_v13 = vunpack.c.l.s8.bf16 %v1885_v60  ;;  %v2806_v61 = vrot.slane %v3900_v21, %v3776_v8  ;;  %v2854_v5 = vrot.slane %v3902_v12, %v3779_v11 }
 0x534   :  { %2753 = vmatpush1.bf16.msra.mxu1 %v2191_v62  ;;  %v2264_v62 = vunpack.c.h.s8.bf16 %v1886_v56 }
 0x535   :  { %2754 = vmatprep.subr.bf16.mxu1 %v2198_v63  ;;  %v2810_v63 = vrot.slane %v3900_v21, %v3779_v11 }
 0x538   :  { %2755 = vmatpush1.bf16.msra.mxu1 %v2197_v2  ;;  %v2850_v2 = vrot.slane %v3902_v12, %v3776_v8 }
 0x539   :  { %2756 = vmatprep.subr.bf16.mxu1 %v2204_v3 }
 0x53c   :  { %2757 = vmatpush1.bf16.msra.mxu1 %v2203_v40  ;;  %v2263_v40 = vunpack.c.h.s8.bf16 %v1885_v60 }
 0x53d   :  { %2758 = vmatprep.subr.bf16.mxu1 %v2210_v50 }
 0x540   :  { %2759 = vmatpush1.bf16.msra.mxu1 %v2209_v39  ;;  %v2270_v39 = vunpack.c.l.s8.bf16 %v1892_v0 }
 0x541   :  { %2760 = vmatprep.subr.bf16.mxu1 %v2216_v51  ;;  %v1891_v51 = vld [vmem:[#allocation16 + $0x5f0] sm:$0xff] }
 0x542   :  { %v2440_v19 = vpop.f32.mrb[8].mxu1  ;;  %v2269_v8 = vunpack.c.l.s8.bf16 %v1891_v51 }
 0x543   :  { %v2825_v20 = vmul.f32 %v2798_v58, %v2440_v19  ;;  %v2442_v22 = vpop.f32.mrb[9].mxu1 }
 0x544   :  { %v2826_v23 = vmul.f32 %v2802_v15, %v2442_v22  ;;  %v2444_v25 = vpop.f32.mrb[10].mxu1  ;;  %2761 = vmatpush1.bf16.msra.mxu1 %v2215_v16 }
 0x545   :  { %v2869_v26 = vadd.f32 %v2842_v17, %v2825_v20  ;;  %v2831_v4 = vmul.f32 %v2798_v58, %v2444_v25  ;;  %v2446_v29 = vpop.f32.mrb[11].mxu1  ;;  %2762 = vmatprep.subr.bf16.mxu1 %v2222_v18  ;;  %v2275_v20 = vunpack.c.h.s8.bf16 %v1891_v51 }
 0x546   :  { %v2870_v31 = vadd.f32 %v2846_v24, %v2826_v23  ;;  %v2832_v41 = vmul.f32 %v2802_v15, %v2446_v29  ;;  %v2814_v29 = vrot.slane %v3900_v21, %v3858_v28 }
 0x547   :  { %3218 = vtanh.f32 %v2869_v26  ;;  %v2875_v32 = vadd.f32 %v2842_v17, %v2831_v4 }
 0x548   :  { %3220 = vtanh.f32 %v2870_v31  ;;  %v2876_v9 = vadd.f32 %v2846_v24, %v2832_v41  ;;  %2763 = vmatpush1.bf16.msra.mxu1 %v2221_v57  ;;  %v2276_v24 = vunpack.c.h.s8.bf16 %v1892_v0  ;;  %v2858_v31 = vrot.slane %v3902_v12, %v3858_v28 }
 0x549   :  { %3222 = vtanh.f32 %v2875_v32  ;;  %2764 = vmatprep.subr.bf16.mxu1 %v2228_v46  ;;  %v2818_v46 = vrot.slane %v3900_v21, %v3861_v27 }
 0x54a   :  { %3224 = vtanh.f32 %v2876_v9 }
 0x54c   :  { %2765 = vmatpush1.bf16.msra.mxu1 %v2227_v43 }
 0x54d   :  { %2766 = vmatprep.subr.bf16.mxu1 %v2234_v33 }
 0x550   :  { %2767 = vmatpush1.bf16.msra.mxu1 %v2233_v30 }
 0x551   :  { %v3219_v38 = vpop.eup %3218  ;;  %2768 = vmatprep.subr.bf16.mxu1 %v2240_v35 }
 0x552   :  { %v3221_v44 = vpop.eup %3220 }
 0x553   :  { %v3223_v45 = vpop.eup %3222  ;;  %v3033_v54 = vpack.c.bf16 %v3221_v44, %v3219_v38 }
 0x554   :  { %v3225_v47 = vpop.eup %3224  ;;  %2769 = vmatpush1.bf16.msra.mxu1 %v2239_v37 }
 0x555   :  { %2929 = vst [vmem:[#allocation20] sm:$0xff] %v3033_v54  ;;  %v3036_v53 = vpack.c.bf16 %v3225_v47, %v3223_v45  ;;  %2770 = vmatprep.subr.bf16.mxu1 %v2246_v52 }
 0x557   :  { %2932 = vst [vmem:[#allocation20 + $0x18] sm:$0xff] %v3036_v53 }
 0x558   :  { %2771 = vmatpush1.bf16.msra.mxu1 %v2245_v48 }
 0x559   :  { %2772 = vmatprep.subr.bf16.mxu1 %v2252_v55 }
 0x55c   :  { %2773 = vmatpush1.bf16.msra.mxu1 %v2251_v7 }
 0x55d   :  { %2774 = vmatprep.subr.bf16.mxu1 %v2258_v59 }
 0x560   :  { %v2612_v3 = vpop.f32.mrb[24].mxu0  ;;  %2775 = vmatpush1.bf16.msra.mxu1 %v2257_v13 }
 0x561   :  { %v2827_v50 = vmul.f32 %v2806_v61, %v2612_v3  ;;  %v2614_v6 = vpop.f32.mrb[25].mxu0  ;;  %2776 = vmatprep.subr.bf16.mxu1 %v2264_v62 }
 0x562   :  { %v2828_v14 = vmul.f32 %v2810_v63, %v2614_v6  ;;  %v2616_v58 = vpop.f32.mrb[26].mxu0 }
 0x563   :  { %v2871_v15 = vadd.f32 %v2850_v2, %v2827_v50  ;;  %v2833_v16 = vmul.f32 %v2806_v61, %v2616_v58  ;;  %v2618_v17 = vpop.f32.mrb[27].mxu0 }
 0x564   :  { %v2872_v18 = vadd.f32 %v2854_v5, %v2828_v14  ;;  %v2834_v1 = vmul.f32 %v2810_v63, %v2618_v17  ;;  %2777 = vmatpush1.bf16.msra.mxu1 %v2263_v40 }
 0x565   :  { %3226 = vtanh.f32 %v2871_v15  ;;  %v2877_v19 = vadd.f32 %v2850_v2, %v2833_v16  ;;  %2778 = vmatprep.subr.bf16.mxu1 %v2270_v39 }
 0x566   :  { %3228 = vtanh.f32 %v2872_v18  ;;  %v2878_v11 = vadd.f32 %v2854_v5, %v2834_v1 }
 0x567   :  { %3230 = vtanh.f32 %v2877_v19 }
 0x568   :  { %3232 = vtanh.f32 %v2878_v11  ;;  %2779 = vmatpush1.bf16.msra.mxu1 %v2269_v8 }
 0x569   :  { %2780 = vmatprep.subr.bf16.mxu1 %v2276_v24 }
 0x56c   :  { %2781 = vmatpush1.bf16.msra.mxu1 %v2275_v20 }
 0x56f   :  { %v3227_v22 = vpop.eup %3226  ;;  %2783 = vmatmul.mubr.bf16.vlgmr.msra.gmra.mrb[12].mxu1 %v3885_v10  ;;  %v2862_v10 = vrot.slane %v3902_v12, %v3861_v27 }
 0x570   :  { %v3229_v23 = vpop.eup %3228 }
 0x571   :  { %v3231_v25 = vpop.eup %3230  ;;  %v3034_v57 = vpack.c.bf16 %v3229_v23, %v3227_v22 }
 0x572   :  { %v3233_v26 = vpop.eup %3232 }
 0x573   :  { %2930 = vst [vmem:[#allocation20 + $0x8] sm:$0xff] %v3034_v57  ;;  %v3037_v4 = vpack.c.bf16 %v3233_v26, %v3231_v25 }
 0x575   :  { %2933 = vst [vmem:[#allocation20 + $0x20] sm:$0xff] %v3037_v4 }
 0x642   :  { %v2784_v41 = vpop.f32.mrb[12].mxu1 }
 0x643   :  { %v2829_v49 = vmul.f32 %v2814_v29, %v2784_v41  ;;  %v2786_v32 = vpop.f32.mrb[13].mxu1 }
 0x644   :  { %v2830_v9 = vmul.f32 %v2818_v46, %v2786_v32  ;;  %v2788_v43 = vpop.f32.mrb[14].mxu1 }
 0x645   :  { %v2873_v33 = vadd.f32 %v2858_v31, %v2829_v49  ;;  %v2835_v34 = vmul.f32 %v2814_v29, %v2788_v43  ;;  %v2790_v30 = vpop.f32.mrb[15].mxu1 }
 0x646   :  { %v2874_v35 = vadd.f32 %v2862_v10, %v2830_v9  ;;  %v2836_v36 = vmul.f32 %v2818_v46, %v2790_v30 }
 0x647   :  { %3234 = vtanh.f32 %v2873_v33  ;;  %v2879_v37 = vadd.f32 %v2858_v31, %v2835_v34 }
 0x648   :  { %3236 = vtanh.f32 %v2874_v35  ;;  %v2880_v21 = vadd.f32 %v2862_v10, %v2836_v36 }
 0x649   :  { %3238 = vtanh.f32 %v2879_v37 }
 0x64a   :  { %3240 = vtanh.f32 %v2880_v21 }
 0x651   :  { %v3235_v28 = vpop.eup %3234 }
 0x652   :  { %v3237_v38 = vpop.eup %3236 }
 0x653   :  { %v3239_v27 = vpop.eup %3238  ;;  %v3035_v12 = vpack.c.bf16 %v3237_v38, %v3235_v28 }
 0x654   :  { %v3241_v52 = vpop.eup %3240 }
 0x655   :  { %2931 = vst [vmem:[#allocation20 + $0x10] sm:$0xff] %v3035_v12  ;;  %v3038_v42 = vpack.c.bf16 %v3241_v52, %v3239_v27 }
 0x657   :  { %2934 = vst [vmem:[#allocation20 + $0x28] sm:$0xff] %v3038_v42 }
 0x658   :  { %3497 = shalt.err (!%p3494_p8)
}
 0x659   :  { %s3498_s22 = scalar_lea.hbm %s3952_s11, 768 }
 0x65a   :  { %p3499_p9 = scmp.ne.s32.totalorder %s3952_s11, %s3498_s22  ;;  %p3502_p10 = scmp.lt.u32.totalorder %s3498_s22, %s3952_s11 }
 0x65c   :  { %p3504_p11 = pnand %p3502_p10, %p3499_p9 }
 0x65e   :  { %3507 = shalt.err (!%p3504_p11)
}
 0x65f   :  { %s3544_s24 = smov 384   ;;  %s3545_s25 = smov 24  }
 0x660   :  { %2946 = dma.vmem_to_hbm [thread:$0]  %s2941_s7, 768, %s3952_s11, [#allocation4], %s3544_s24, %s3544_s24, %s3545_s25  }
 0x661   :  { %3520 = dma.done.wait [#allocation4], 768  }
 0x662   :  { %3521 = vsyncadd [#allocation4], 4294966528 }
 0x663   :  { %2950 = vsyncpa [#allocation3], 1 }
 0x664   :  { %2951 = vsyncpa [#allocation6], 1 }
 0x665   :  { %2952 = vsyncpa [#allocation9], 1 }
 0x666   :  { %2953 = vsyncpa [#allocation12], 1 }
 0x667   :  { %2954 = vsyncpa [#allocation15], 1 }
 0x668   :  { %2955 = vsyncpa [#allocation18], 1 }
 0x669   :  { %2956 = vsyncpa [#allocation4], 1 }

</bundles_post_ra>
